<compile_context>
chip_gen: v7x
topology: tpu7x:2x2x1
jax: 0.10.0
libtpu: 0.0.40
codegen_flags: <defaults>
</compile_context>

<pallas_src>
import functools

import jax
import jax.numpy as jnp
from jax.experimental import pallas as pl
from jax.experimental.pallas import tpu as pltpu


def mlp_sin_kernel(x_ref, w_in_ref, b_in_ref, w_h_ref, b_h_ref,
                   w_out_ref, b_out_ref, o_ref, *, n_hidden_minus_1):
    """Transposed (features, batch_tile) layout; every layer is an MXU matmul.

    x_ref     : (in_dim, TB)
    w_in_ref  : (neurons, in_dim)         b_in_ref : (neurons, 1)
    w_h_ref   : (n_hid, neurons, neurons) b_h_ref  : (n_hid, neurons, 1)
    w_out_ref : (out_dim, neurons)        b_out_ref: (out_dim, 1)
    o_ref     : (out_dim, TB)
    """
    # ---- input layer: K=in_dim matmul on the MXU, bias add + sin on VPU/EUP ----
    h = jnp.sin(
        jnp.dot(w_in_ref[...], x_ref[...], preferred_element_type=jnp.float32)
        + b_in_ref[...]
    )

    # ---- hidden layers: 32x32 MXU matmuls, lane-dense batch free dimension ----
    for k in range(n_hidden_minus_1):                    # static unroll (small, fixed)
        wk = w_h_ref[k]
        h = jnp.sin(
            jnp.dot(wk, h.astype(wk.dtype), preferred_element_type=jnp.float32)
            + b_h_ref[k]
        )

    # ---- output layer: M=out_dim matmul on the MXU (no XLU sublane reduce) ----
    o_ref[...] = (
        jnp.dot(w_out_ref[...], h.astype(w_out_ref.dtype),
                preferred_element_type=jnp.float32)
        + b_out_ref[...]
    )


def neural_net_forward(x, params, *, batch_tile=2048, hidden_dtype=jnp.float32):
    """x: (B, input_dim) float32. params in PyTorch-like layout (W as (in, out)).

    hidden_dtype=jnp.bfloat16 is an optional v6e/v7x throughput mode for the
    hidden matmuls (f32 accumulation); keep f32 on v5e and re-validate accuracy.
    """
    B, in_dim = x.shape
    neurons = params["w_in"].shape[1]
    out_dim = params["w_out"].shape[1]
    n_hid = int(params["w_h"].shape[0])

    tb = int(min(batch_tile, B)) if B % 128 == 0 else int(batch_tile)
    assert tb % 128 == 0, "batch tile must be a multiple of 128 (lane width)"
    n_tiles = pl.cdiv(B, tb)
    b_pad = n_tiles * tb

    # ---- layout plumbing (batch-on-lanes). No padded copy when tb divides B. ----
    x_t = x.T                                                   # free reshape at in_dim=1
    if b_pad != B:
        # TODO(synk): handle the ragged last tile with an in-kernel masked store
        # instead of this host-side pad when collocation counts aren't 128-aligned.
        x_t = jnp.zeros((in_dim, b_pad), jnp.float32).at[:, :B].set(x_t)

    w_in_t = params["w_in"].T                                   # (neurons, in_dim)
    b_in_t = params["b_in"].reshape(1, neurons).T               # (neurons, 1)
    if n_hid > 0:
        w_h_t = jnp.transpose(params["w_h"], (0, 2, 1)).astype(hidden_dtype)
        b_h_t = jnp.transpose(params["b_h"], (0, 2, 1))         # (n_hid, neurons, 1)
    else:
        # Dummy (never read: the kernel loop is statically skipped).
        w_h_t = jnp.zeros((1, neurons, neurons), hidden_dtype)
        b_h_t = jnp.zeros((1, neurons, 1), jnp.float32)
    w_out_t = params["w_out"].T.astype(hidden_dtype)            # (out_dim, neurons)
    b_out_t = params["b_out"].reshape(1, out_dim).T             # (out_dim, 1)

    const2 = lambda i: (0, 0)
    const3 = lambda i: (0, 0, 0)

    # Advisory cost hint for the XLA scheduler around the custom call.
    flops = 2 * B * (in_dim * neurons + n_hid * neurons * neurons + neurons * out_dim)
    transcendentals = B * neurons * (n_hid + 1)
    weight_bytes = 4 * (in_dim * neurons + n_hid * neurons * neurons
                        + neurons * out_dim + (n_hid + 1) * neurons + out_dim)
    cost = pl.CostEstimate(flops=flops, transcendentals=transcendentals,
                           bytes_accessed=4 * B * (in_dim + out_dim) + weight_bytes)

    out_t = pl.pallas_call(
        functools.partial(mlp_sin_kernel, n_hidden_minus_1=n_hid),
        out_shape=jax.ShapeDtypeStruct((out_dim, b_pad), jnp.float32),
        grid=(n_tiles,),
        in_specs=[
            pl.BlockSpec((in_dim, tb), lambda i: (0, i)),           # x tile (pipelined)
            pl.BlockSpec((neurons, in_dim), const2),                # weights: VMEM-resident
            pl.BlockSpec((neurons, 1), const2),
            pl.BlockSpec((w_h_t.shape[0], neurons, neurons), const3),
            pl.BlockSpec((b_h_t.shape[0], neurons, 1), const3),
            pl.BlockSpec((out_dim, neurons), const2),
            pl.BlockSpec((out_dim, 1), const2),
        ],
        out_specs=pl.BlockSpec((out_dim, tb), lambda i: (0, i)),    # lane-dense output tile
        compiler_params=pltpu.CompilerParams(
            dimension_semantics=("parallel",)),
        cost_estimate=cost,
    )(x_t, w_in_t, b_in_t, w_h_t, b_h_t, w_out_t, b_out_t)

    if b_pad != B:
        out_t = out_t[:, :B]
    return out_t.T                                              # back to (B, out_dim)


def xavier_uniform(key, fan_in, fan_out, gain):
    limit = gain * (6.0 / (fan_in + fan_out)) ** 0.5
    return jax.random.uniform(key, (fan_in, fan_out), jnp.float32, -limit, limit)


def init_params(key, input_dim, output_dim, n_hidden_layers, neurons):
    """Xavier-uniform init (gain = tanh gain = 5/3), biases = 0, matching
    NeuralNet.init_xavier semantics (synthetic weights, not a torch checkpoint)."""
    gain = 5.0 / 3.0  # nn.init.calculate_gain('tanh')
    keys = jax.random.split(key, n_hidden_layers + 1)
    w_in = xavier_uniform(keys[0], input_dim, neurons, gain)
    b_in = jnp.zeros((1, neurons), jnp.float32)
    n_hid = n_hidden_layers - 1
    if n_hid > 0:
        w_h = jnp.stack(
            [xavier_uniform(keys[1 + i], neurons, neurons, gain) for i in range(n_hid)]
        )
        b_h = jnp.zeros((n_hid, 1, neurons), jnp.float32)
    else:
        w_h = jnp.zeros((0, neurons, neurons), jnp.float32)
        b_h = jnp.zeros((0, 1, neurons), jnp.float32)
    w_out = xavier_uniform(keys[-1], neurons, output_dim, gain)
    b_out = jnp.zeros((1, output_dim), jnp.float32)
    return {"w_in": w_in, "b_in": b_in, "w_h": w_h, "b_h": b_h,
            "w_out": w_out, "b_out": b_out}


def reference_forward(x, params):
    """Pure-JAX reference (original (batch, features) layout) for correctness."""
    h = jnp.sin(x @ params["w_in"] + params["b_in"])
    for k in range(params["w_h"].shape[0]):
        h = jnp.sin(h @ params["w_h"][k] + params["b_h"][k])
    return h @ params["w_out"] + params["b_out"]


if __name__ == "__main__":
    # Oscillator PINN sizes: input_dimension=1 (time), output_dimension=1,
    # n_hidden_layers=4, neurons=32. Batch = collocation points.
    input_dim, output_dim = 1, 1
    n_hidden_layers, neurons = 4, 32
    batch = 1024
    # TB=512 -> 2 equal tiles: no host-side pad copy, and an EVEN tile count so the
    # "parallel" batch axis splits across both v7x TensorCores. For large collocation
    # sets leave the default (2048) or sweep 2048-8192.
    batch_tile = 512

    key = jax.random.PRNGKey(0)
    k_param, k_x = jax.random.split(key)
    params = init_params(k_param, input_dim, output_dim, n_hidden_layers, neurons)
    x = jax.random.normal(k_x, (batch, input_dim), jnp.float32)

    out = neural_net_forward(x, params, batch_tile=batch_tile)
    out = jax.block_until_ready(out)

    ref = reference_forward(x, params)
    assert out.shape == (batch, output_dim)
    assert jnp.allclose(out, ref, atol=1e-4, rtol=1e-4)

    # TODO(synk): regularization() (weight-norm penalty) and bit-exact torch RNG
    # init are training-time / host-side concerns, not part of the forward kernel.
    print("KERNEL_OK")
</pallas_src>

<mosaic_0001>
module attributes {stable_mosaic.version = 11 : i64} {
  func.func @mlp_sin_kernel(%arg0: i32, %arg1: memref<1x512xf32, #tpu.memory_space<vmem>>, %arg2: memref<32x1xf32, #tpu.memory_space<vmem>>, %arg3: memref<32x1xf32, #tpu.memory_space<vmem>>, %arg4: memref<3x32x32xf32, #tpu.memory_space<vmem>>, %arg5: memref<3x32x1xf32, #tpu.memory_space<vmem>>, %arg6: memref<1x32xf32, #tpu.memory_space<vmem>>, %arg7: memref<1x1xf32, #tpu.memory_space<vmem>>, %arg8: memref<1x512xf32, #tpu.memory_space<vmem>>) attributes {dimension_semantics = [#tpu.dimension_semantics<parallel>], iteration_bounds = array<i64: 2>, scalar_prefetch = 0 : i64, scratch_operands = 0 : i64, tpu.core_type = #tpu.core_type<tc>, window_params = [{transform_indices = @transform_0, window_bounds = array<i64: 1, 512>}, {pipeline_mode = #tpu.pipeline_mode<synchronous>, transform_indices = @transform_1, window_bounds = array<i64: 32, 1>}, {pipeline_mode = #tpu.pipeline_mode<synchronous>, transform_indices = @transform_2, window_bounds = array<i64: 32, 1>}, {pipeline_mode = #tpu.pipeline_mode<synchronous>, transform_indices = @transform_3, window_bounds = array<i64: 3, 32, 32>}, {pipeline_mode = #tpu.pipeline_mode<synchronous>, transform_indices = @transform_4, window_bounds = array<i64: 3, 32, 1>}, {pipeline_mode = #tpu.pipeline_mode<synchronous>, transform_indices = @transform_5, window_bounds = array<i64: 1, 32>}, {pipeline_mode = #tpu.pipeline_mode<synchronous>, transform_indices = @transform_6, window_bounds = array<i64: 1, 1>}, {transform_indices = @transform_7, window_bounds = array<i64: 1, 512>}]} {
    %c0 = arith.constant 0 : index
    %c0_0 = arith.constant 0 : index
    %0 = vector.load %arg2[%c0, %c0_0] : memref<32x1xf32, #tpu.memory_space<vmem>>, vector<32x1xf32>
    %c0_1 = arith.constant 0 : index
    %c0_2 = arith.constant 0 : index
    %1 = vector.load %arg1[%c0_1, %c0_2] : memref<1x512xf32, #tpu.memory_space<vmem>>, vector<1x512xf32>
    %cst = arith.constant dense<0.000000e+00> : vector<32x512xf32>
    %2 = tpu.matmul %0, %1, %cst {dimension_numbers = #tpu.dot_dimension_numbers<[1], [0], [0], [1], [0, 0, 1, 1], [], []>} : vector<32x1xf32>, vector<1x512xf32>, vector<32x512xf32> -> vector<32x512xf32>
    %c0_3 = arith.constant 0 : index
    %c0_4 = arith.constant 0 : index
    %3 = vector.load %arg3[%c0_3, %c0_4] : memref<32x1xf32, #tpu.memory_space<vmem>>, vector<32x1xf32>
    %4 = vector.broadcast %3 : vector<32x1xf32> to vector<32x512xf32>
    %5 = arith.addf %2, %4 : vector<32x512xf32>
    %6 = math.sin %5 : vector<32x512xf32>
    %c0_5 = arith.constant 0 : index
    %c0_6 = arith.constant 0 : index
    %c0_7 = arith.constant 0 : index
    %7 = vector.load %arg4[%c0_5, %c0_6, %c0_7] : memref<3x32x32xf32, #tpu.memory_space<vmem>>, vector<1x32x32xf32>
    %8 = vector.shape_cast %7 : vector<1x32x32xf32> to vector<32x32xf32>
    %cst_8 = arith.constant dense<0.000000e+00> : vector<32x512xf32>
    %9 = tpu.matmul %8, %6, %cst_8 {dimension_numbers = #tpu.dot_dimension_numbers<[1], [0], [0], [1], [0, 0, 1, 1], [], []>} : vector<32x32xf32>, vector<32x512xf32>, vector<32x512xf32> -> vector<32x512xf32>
    %c0_9 = arith.constant 0 : index
    %c0_10 = arith.constant 0 : index
    %c0_11 = arith.constant 0 : index
    %10 = vector.load %arg5[%c0_9, %c0_10, %c0_11] : memref<3x32x1xf32, #tpu.memory_space<vmem>>, vector<1x32x1xf32>
    %11 = vector.shape_cast %10 : vector<1x32x1xf32> to vector<32x1xf32>
    %12 = vector.broadcast %11 : vector<32x1xf32> to vector<32x512xf32>
    %13 = arith.addf %9, %12 : vector<32x512xf32>
    %14 = math.sin %13 : vector<32x512xf32>
    %c1 = arith.constant 1 : index
    %c0_12 = arith.constant 0 : index
    %c0_13 = arith.constant 0 : index
    %15 = vector.load %arg4[%c1, %c0_12, %c0_13] : memref<3x32x32xf32, #tpu.memory_space<vmem>>, vector<1x32x32xf32>
    %16 = vector.shape_cast %15 : vector<1x32x32xf32> to vector<32x32xf32>
    %cst_14 = arith.constant dense<0.000000e+00> : vector<32x512xf32>
    %17 = tpu.matmul %16, %14, %cst_14 {dimension_numbers = #tpu.dot_dimension_numbers<[1], [0], [0], [1], [0, 0, 1, 1], [], []>} : vector<32x32xf32>, vector<32x512xf32>, vector<32x512xf32> -> vector<32x512xf32>
    %c1_15 = arith.constant 1 : index
    %c0_16 = arith.constant 0 : index
    %c0_17 = arith.constant 0 : index
    %18 = vector.load %arg5[%c1_15, %c0_16, %c0_17] : memref<3x32x1xf32, #tpu.memory_space<vmem>>, vector<1x32x1xf32>
    %19 = vector.shape_cast %18 : vector<1x32x1xf32> to vector<32x1xf32>
    %20 = vector.broadcast %19 : vector<32x1xf32> to vector<32x512xf32>
    %21 = arith.addf %17, %20 : vector<32x512xf32>
    %22 = math.sin %21 : vector<32x512xf32>
    %c2 = arith.constant 2 : index
    %c0_18 = arith.constant 0 : index
    %c0_19 = arith.constant 0 : index
    %23 = vector.load %arg4[%c2, %c0_18, %c0_19] : memref<3x32x32xf32, #tpu.memory_space<vmem>>, vector<1x32x32xf32>
    %24 = vector.shape_cast %23 : vector<1x32x32xf32> to vector<32x32xf32>
    %cst_20 = arith.constant dense<0.000000e+00> : vector<32x512xf32>
    %25 = tpu.matmul %24, %22, %cst_20 {dimension_numbers = #tpu.dot_dimension_numbers<[1], [0], [0], [1], [0, 0, 1, 1], [], []>} : vector<32x32xf32>, vector<32x512xf32>, vector<32x512xf32> -> vector<32x512xf32>
    %c2_21 = arith.constant 2 : index
    %c0_22 = arith.constant 0 : index
    %c0_23 = arith.constant 0 : index
    %26 = vector.load %arg5[%c2_21, %c0_22, %c0_23] : memref<3x32x1xf32, #tpu.memory_space<vmem>>, vector<1x32x1xf32>
    %27 = vector.shape_cast %26 : vector<1x32x1xf32> to vector<32x1xf32>
    %28 = vector.broadcast %27 : vector<32x1xf32> to vector<32x512xf32>
    %29 = arith.addf %25, %28 : vector<32x512xf32>
    %30 = math.sin %29 : vector<32x512xf32>
    %c0_24 = arith.constant 0 : index
    %c0_25 = arith.constant 0 : index
    %31 = vector.load %arg6[%c0_24, %c0_25] : memref<1x32xf32, #tpu.memory_space<vmem>>, vector<1x32xf32>
    %cst_26 = arith.constant dense<0.000000e+00> : vector<1x512xf32>
    %32 = tpu.matmul %31, %30, %cst_26 {dimension_numbers = #tpu.dot_dimension_numbers<[1], [0], [0], [1], [0, 0, 1, 1], [], []>} : vector<1x32xf32>, vector<32x512xf32>, vector<1x512xf32> -> vector<1x512xf32>
    %c0_27 = arith.constant 0 : index
    %c0_28 = arith.constant 0 : index
    %33 = vector.load %arg7[%c0_27, %c0_28] : memref<1x1xf32, #tpu.memory_space<vmem>>, vector<1x1xf32>
    %34 = vector.broadcast %33 : vector<1x1xf32> to vector<1x512xf32>
    %35 = arith.addf %32, %34 : vector<1x512xf32>
    %c0_29 = arith.constant 0 : index
    %c0_30 = arith.constant 0 : index
    %36 = vector.load %arg8[%c0_29, %c0_30] : memref<1x512xf32, #tpu.memory_space<vmem>>, vector<1x512xf32>
    tpu.vector_store %arg8[%c0_29, %c0_30], %35 {strides = array<i32>} : memref<1x512xf32, #tpu.memory_space<vmem>>, vector<1x512xf32>,
    return
  }
  func.func @transform_0(%arg0: i32) -> (i32, i32) {
    %c0_i32 = arith.constant 0 : i32
    %c0_i32_0 = arith.constant 0 : i32
    return %c0_i32, %arg0 : i32, i32
  }
  func.func @transform_1(%arg0: i32) -> (i32, i32) {
    %c0_i32 = arith.constant 0 : i32
    %c0_i32_0 = arith.constant 0 : i32
    %c0_i32_1 = arith.constant 0 : i32
    return %c0_i32, %c0_i32_0 : i32, i32
  }
  func.func @transform_2(%arg0: i32) -> (i32, i32) {
    %c0_i32 = arith.constant 0 : i32
    %c0_i32_0 = arith.constant 0 : i32
    %c0_i32_1 = arith.constant 0 : i32
    return %c0_i32, %c0_i32_0 : i32, i32
  }
  func.func @transform_3(%arg0: i32) -> (i32, i32, i32) {
    %c0_i32 = arith.constant 0 : i32
    %c0_i32_0 = arith.constant 0 : i32
    %c0_i32_1 = arith.constant 0 : i32
    %c0_i32_2 = arith.constant 0 : i32
    return %c0_i32, %c0_i32_0, %c0_i32_1 : i32, i32, i32
  }
  func.func @transform_4(%arg0: i32) -> (i32, i32, i32) {
    %c0_i32 = arith.constant 0 : i32
    %c0_i32_0 = arith.constant 0 : i32
    %c0_i32_1 = arith.constant 0 : i32
    %c0_i32_2 = arith.constant 0 : i32
    return %c0_i32, %c0_i32_0, %c0_i32_1 : i32, i32, i32
  }
  func.func @transform_5(%arg0: i32) -> (i32, i32) {
    %c0_i32 = arith.constant 0 : i32
    %c0_i32_0 = arith.constant 0 : i32
    %c0_i32_1 = arith.constant 0 : i32
    return %c0_i32, %c0_i32_0 : i32, i32
  }
  func.func @transform_6(%arg0: i32) -> (i32, i32) {
    %c0_i32 = arith.constant 0 : i32
    %c0_i32_0 = arith.constant 0 : i32
    %c0_i32_1 = arith.constant 0 : i32
    return %c0_i32, %c0_i32_0 : i32, i32
  }
  func.func @transform_7(%arg0: i32) -> (i32, i32) {
    %c0_i32 = arith.constant 0 : i32
    %c0_i32_0 = arith.constant 0 : i32
    return %c0_i32, %arg0 : i32, i32
  }
}

</mosaic_0001>

<bundles_post_ra>
// kernel: tpu_custom_call.1
= control target key start
LH: loop header
LB: loop body
LE: loop exit
PB: predicated region body
PF: predicated region fallthrough
CT: control target
= control target key end

     0   :  { %s15348_s0 = inlined_call_operand.vmem [shape: f32[1,1024], index: 0, kind: input, shape index: {}]   ;;  %s15349_s1 = inlined_call_operand.vmem [shape: f32[32,1], index: 1, kind: input, shape index: {}]   ;;  %s15350_s2 = inlined_call_operand.vmem [shape: f32[32,1], index: 2, kind: input, shape index: {}]   ;;  %s15351_s3 = inlined_call_operand.vmem [shape: f32[3,32,32], index: 3, kind: input, shape index: {}]   ;;  %s15352_s4 = inlined_call_operand.vmem [shape: f32[3,32,1], index: 4, kind: input, shape index: {}]   ;;  %s15353_s5 = inlined_call_operand.vmem [shape: f32[1,32], index: 5, kind: input, shape index: {}]   ;;  %s15354_s6 = inlined_call_operand.<no memory space> [shape: f32[1,1], index: 6, kind: input, shape index: {}]   ;;  %s15355_s7 = inlined_call_operand.hbm [shape: f32[1,1024], index: 7, kind: output, shape index: {}]  }
   0x1   :  { %v12_v0 = vstv %s15354_s6 }
   0x2   :  { %13 = vst [vmem:[#allocation2] sm:$0x1] %v12_v0 }
   0x3   :  { %14 = vsyncpa [#allocation4], 0 }
   0x4   :  { %16 = vsyncpa [#allocation4 + $0x1], 0  ;;  %s9166_s26 = smov 0   ;;  %s9168_s27 = smov 0  }
   0x5   :  { %s9170_s28 = smov 0   ;;  %s9172_s29 = smov 0  }
   0x6 LB: > { %s9187_s6 = sadd.s32 4294967295, %s9111_s29   ;;  %s8101_s30 = sadd.s32 4294967294, %s9111_s29   ;;  %s9111_s29 = sphi %s9172_s29, %s16137_s29   ;;  %s9107_s28 = sphi %s9170_s28, %s16136_s28   ;;  %s9103_s27 = sphi %s9168_s27, %s16135_s27   ;;  %s9099_s26 = sphi %s9166_s26, %s16134_s26  }
   0x7   : > { %s9191_s8 = sadd.s32 1, %s9111_s29   ;;  %s181_s9 = sadd.s32 1, %s9107_s28 }
   0x8   : > { %s178_s10 = ssub.s32 %s9111_s29, %s9191_s8  ;;  %p191_p0 = scmp.ne.s32.totalorder %s9107_s28, %s9103_s27 }
   0x9   : > { %p179_p1 = scmp.eq.s32.totalorder %s178_s10, 0  ;;  %p192_p2 = scmp.eq.s32.totalorder %s9187_s6, 1 }
   0xa   : > { %p197_p3 = scmp.ne.s32.totalorder %s9103_s27, %s9099_s26  ;;  %p198_p4 = scmp.eq.s32.totalorder %s8101_s30, 1 }
   0xb   : > { %s9202_s11 = scalar_select %p179_p1, %s9107_s28, %s181_s9  }
   0xc   : > { %p9204_p5 = por %p192_p2, %p191_p0  ;;  %p9208_p6 = por %p198_p4, %p197_p3 }
   0xd   : > { %p8104_p7 = scmp.ge.s32.totalorder %s9111_s29, 1  ;;  %p242_p8 = scmp.lt.s32.totalorder %s9111_s29, 3 }
   0xf   : > { %p243_p9 = pnand %p8104_p7, %p242_p8 }
  0x11   : > { %246 = sbr.rel (%p243_p9) target bundleno = 2763 (0xacb), region = 48 }
  0x18   : > { %s8106_s14 = sshll.u32 %s9187_s6, 2  ;;  %v15356_v1 = vlaneseq  ;;  %v15358_v2 = vmov 0.0   ;;  %v284_v3 = vld [vmem:[%s15350_s2] sm:$0xff]  ;;  %v9114_v5 = vmov 0   ;;  %v286_v6 = vld [vmem:[%s15350_s2 + $0x10] sm:$0xff]  ;;  %v285_v11 = vld [vmem:[%s15350_s2 + $0x8] sm:$0xff] }
  0x19   : > { %p274_p10 = scmp.lt.s32.totalorder %s8106_s14, 7  ;;  %411 = vmatprep.mubr.f32.mxu0 %v15358_v2  ;;  %500 = vmatprep.mubr.f32.mxu1 %v15358_v2  ;;  %v287_v12 = vld [vmem:[%s15350_s2 + $0x18] sm:$0xff]  ;;  %vm338_vm0 = vcmask 1040384   ;;  %v279_v18 = vld [vmem:[%s15349_s1] sm:$0xff]  ;;  %vm325_vm1 = vcmask 7168   ;;  %v2194_v20 = vld [vmem:[%s15352_s4 + $0x8] sm:$0xff] }
  0x1a   : > { %v9221_v4 = vshrl.u32 %v15356_v1, 7  ;;  %8791 = vset.pattern.permute.xlu0 %v9114_v5  ;;  %8792 = vset.pattern.permute.xlu1 %v9114_v5  ;;  %v2193_v19 = vld [vmem:[%s15352_s4] sm:$0xff]  ;;  %v280_v21 = vld [vmem:[%s15349_s1 + $0x8] sm:$0xff]  ;;  %v2195_v22 = vld [vmem:[%s15352_s4 + $0x10] sm:$0xff]  ;;  %s270_s24 = sand.u32 1, %s9103_s27   ;;  %s8422_s30 = sshll.u32 %s9187_s6, 6 }
  0x1b   : > { %s16139_s14 = smov (!%p274_p10, %s8106_s14), 7  ;;  %290 = vperm.xlu0 %8791, %v284_v3   ;;  %300 = vperm.xlu1 %8792, %v286_v6   ;;  %v2196_v23 = vld [vmem:[%s15352_s4 + $0x18] sm:$0xff]  ;;  %v281_v24 = vld [vmem:[%s15349_s1 + $0x10] sm:$0xff]  ;;  %v8259_v25 = vld [vmem:[%s15352_s4 + $0x20] sm:$0xff]  ;;  %s8105_s25 = sshll.u32 %s270_s24, 2 }
  0x1c   : > { %15580 = vst [vmem:[#allocation6_spill] sm:$0xff] %v9221_v4  ;;  %v315_v7 = vsub.s32 1, %v9221_v4  ;;  %v323_v8 = vsub.s32 3, %v9221_v4  ;;  %v15357_v9 = vsub.s32 0, %v9221_v4  ;;  %v319_v10 = vsub.s32 2, %v9221_v4  ;;  %s276_s23 = scalar_lea.vmem %s15348_s0, %s16139_s14  ;;  %v8260_v26 = vld [vmem:[%s15352_s4 + $0x28] sm:$0xff]  ;;  %s15306_s16 = scalar_lea.hbm %s15355_s7, %s8422_s30 }
  0x1d   : > { %v283_v13 = vld [vmem:[%s276_s23] sm:$0xf]  ;;  %v282_v27 = vld [vmem:[%s15349_s1 + $0x18] sm:$0xff]  ;;  %v8261_v28 = vld [vmem:[%s15352_s4 + $0x30] sm:$0xff]  ;;  %v15607_v4 = vmov 683565275  }
  0x1e   : > { %v316_v14 = vrot.slane %v283_v13, %v315_v7  ;;  %v324_v15 = vrot.slane %v283_v13, %v323_v8  ;;  %v312_v16 = vrot.slane %v283_v13, %v15357_v9  ;;  %v320_v17 = vrot.slane %v283_v13, %v319_v10  ;;  %v8262_v29 = vld [vmem:[%s15352_s4 + $0x38] sm:$0xff]  ;;  %v8339_v30 = vld [vmem:[%s15352_s4 + $0x40] sm:$0xff]  ;;  %v8340_v31 = vld [vmem:[%s15352_s4 + $0x48] sm:$0xff]  ;;  %s272_s9 = scalar_lea.vmem [#allocation3], %s8105_s25  ;;  %s8031_s17 = scalar_lea.sflag [#allocation4], %s270_s24 }
  0x1f   : > { %295 = vperm.xlu0 %8791, %v285_v11   ;;  %305 = vperm.xlu1 %8792, %v287_v12   ;;  %v8341_v32 = vld [vmem:[%s15352_s4 + $0x50] sm:$0xff]  ;;  %v8342_v33 = vld [vmem:[%s15352_s4 + $0x58] sm:$0xff]  ;;  %v7841_v34 = vld [vmem:[#allocation2] sm:$0x1]  ;;  %s8045_s10 = sshll.u32 %s272_s9, 4  ;;  %s9122_s6 = smov [#allocation3]   ;;  %s15308_s10 = int_to_ptr.vmem [resolvable:$true] %s8045_s10 }
  0x20   : > { %8107 = vmatprep.subr.msk.mxu0 %vm338_vm0, %v316_v14  ;;  %8113 = vmatprep.subr.msk.mxu1 %vm338_vm0, %v324_v15  ;;  %v15374_v15 = vmov 683565275   ;;  %s9049_s18 = scalar_lea.vmem %s15308_s10, 64  ;;  %s9053_s19 = sshll.u32 %s9122_s6, 4  ;;  %s9054_s19 = int_to_ptr.vmem [resolvable:$false] %s9053_s19 }
  0x21   : > { %8108 = vmatpush1.msk.msra.mxu0 %vm338_vm0, %v312_v16  ;;  %8114 = vmatpush1.msk.msra.mxu1 %vm338_vm0, %v320_v17  ;;  %p9050_p11 = scmp.ne.s32.totalorder %s15308_s10, %s9049_s18  ;;  %s9055_s20 = scalar_lea.vmem %s9054_s19, 128 }
  0x22   : > { %8109 = vmatmul.mubr.msk.f32.vlgmr.msra.gmra.mrb[0].mxu0 %vm325_vm1, %v279_v18  ;;  %8115 = vmatmul.mubr.msk.f32.vlgmr.msra.gmra.mrb[0].mxu1 %vm325_vm1, %v279_v18  ;;  %p9056_p0 = scmp.lt.s32.totalorder %s15308_s10, %s9054_s19  ;;  %p9057_p1 = scmp.lt.s32.totalorder %s9055_s20, %s9049_s18 }
  0x23   : > { %417 = vmatprep.mubr.f32.mxu0 %v15358_v2  ;;  %506 = vmatprep.mubr.f32.mxu1 %v15358_v2  ;;  %p9051_p12 = pnand %p9050_p11, %p9204_p5 }
  0x24   : > { %2199 = vperm.xlu0 %8791, %v2193_v19   ;;  %2204 = vperm.xlu1 %8792, %v2194_v20   ;;  %v15372_v19 = vmov 2475754826   ;;  %p9058_p2 = por %p9057_p1, %p9056_p0 }
  0x25   : > { %p9052_p13 = pneg %p9051_p12 }
  0x26   : > { %8110 = vmatmul.mubr.msk.f32.gmra.mrb[2].mxu0 %vm325_vm1, %v280_v21  ;;  %8116 = vmatmul.mubr.msk.f32.gmra.mrb[2].mxu1 %vm325_vm1, %v280_v21  ;;  %v15369_v21 = vmov 2131351028  }
  0x27   : > { %423 = vmatprep.mubr.f32.mxu0 %v15358_v2  ;;  %512 = vmatprep.mubr.f32.mxu1 %v15358_v2  ;;  %p9059_p3 = pnand %p9058_p2, %p9052_p13 }
  0x28   : > { %2209 = vperm.xlu0 %8791, %v2195_v22   ;;  %2214 = vperm.xlu1 %8792, %v2196_v23   ;;  %v15362_v23 = vmov 2102212464  }
  0x2a   : > { %8111 = vmatmul.mubr.msk.f32.gmra.mrb[4].mxu0 %vm325_vm1, %v281_v24  ;;  %8117 = vmatmul.mubr.msk.f32.gmra.mrb[4].mxu1 %vm325_vm1, %v281_v24 }
  0x2b   : > { %429 = vmatprep.mubr.f32.mxu0 %v15358_v2  ;;  %518 = vmatprep.mubr.f32.mxu1 %v15358_v2 }
  0x2c   : > { %4084 = vperm.xlu0 %8791, %v8259_v25   ;;  %4089 = vperm.xlu1 %8792, %v8260_v26   ;;  %v15367_v25 = vmov 920167782  }
  0x2e   : > { %8112 = vmatmul.mubr.msk.f32.gmra.mrb[6].mxu0 %vm325_vm1, %v282_v27  ;;  %8118 = vmatmul.mubr.msk.f32.gmra.mrb[6].mxu1 %vm325_vm1, %v282_v27 }
  0x2f   : > { %2294 = vmatprep.mubr.f32.mxu0 %v15358_v2  ;;  %2383 = vmatprep.mubr.f32.mxu1 %v15358_v2 }
  0x30   : > { %4094 = vperm.xlu0 %8791, %v8261_v28   ;;  %4099 = vperm.xlu1 %8792, %v8262_v29  }
  0x34   : > { %5968 = vperm.xlu0 %8791, %v8339_v30   ;;  %5973 = vperm.xlu1 %8792, %v8340_v31  }
  0x38   : > { %5978 = vperm.xlu0 %8791, %v8341_v32   ;;  %5983 = vperm.xlu1 %8792, %v8342_v33   ;;  %v15365_v33 = vmov 1326507024  }
  0x3c   : > { %7844 = vperm.xlu0 %8791, %v7841_v34  }
  0x9a   : > { %v291_v35 = vpop.permute.xlu0 %290 }
  0xf5   : > { %v413_v36 = vpop.f32.mrb[0].mxu0  ;;  %v502_v37 = vpop.f32.mrb[0].mxu1 }
  0xf6   : > { %v9305_v38 = vadd.f32 %v413_v36, %v291_v35  ;;  %v9307_v39 = vadd.f32 %v502_v37, %v291_v35  ;;  %v415_v40 = vpop.f32.mrb[1].mxu0  ;;  %v504_v41 = vpop.f32.mrb[1].mxu1 }
  0xf7   : > { %v9309_v42 = vadd.f32 %v415_v40, %v291_v35  ;;  %v9328_v0 = vadd.f32 %v504_v41, %v291_v35 }
  0xf8   : > { %15581 = vst [vmem:[#allocation7_spill] sm:$0xff] %v9305_v38  ;;  %15582 = vst [vmem:[#allocation8_spill] sm:$0xff] %v9307_v39  ;;  %v525_v43 = vand.u32 2147483647, %v9305_v38  ;;  %v528_v44 = vand.u32 2139095040, %v9305_v38  ;;  %v736_v46 = vand.u32 2139095040, %v9307_v39 }
  0xf9   : > { %v733_v45 = vand.u32 2147483647, %v9307_v39  ;;  %v9315_v47 = vpop.f32.mrb[2].mxu0  ;;  %v632_v49 = vand.u32 2139095040, %v9309_v42  ;;  %v9322_v55 = vpop.f32.mrb[2].mxu1  ;;  %15583 = vst [vmem:[#allocation9_spill] sm:$0xff] %v9328_v0 }
  0xfa   : > { %v529_v48 = vshrl.u32 %v528_v44, 23  ;;  %v532_v50 = vand.u32 8388607, %v525_v43  ;;  %v737_v51 = vshrl.u32 %v736_v46, 23  ;;  %v9324_v59 = vpop.f32.mrb[3].mxu0  ;;  %v9326_v60 = vpop.f32.mrb[3].mxu1 }
  0xfb   : > { %v740_v52 = vand.u32 8388607, %v733_v45  ;;  %v633_v54 = vshrl.u32 %v632_v49, 23  ;;  %v629_v12 = vand.u32 2147483647, %v9309_v42  ;;  %v840_v13 = vand.u32 2139095040, %v9328_v0 }
  0xfc   : > { %v8119_v53 = vadd.s32 4294967169, %v529_v48  ;;  %v8127_v56 = vadd.s32 4294967169, %v737_v51  ;;  %v533_v61 = vor.u32 8388608, %v532_v50 }
  0xfd   : > { %v8123_v58 = vadd.s32 4294967169, %v633_v54  ;;  %v741_v62 = vor.u32 8388608, %v740_v52  ;;  %v9346_v27 = vpop.f32.mrb[4].mxu0 }
  0xfe   : > { %v535_v57 = vadd.s32 1, %v8119_v53  ;;  %v743_v63 = vadd.s32 1, %v8127_v56  ;;  %v9332_v10 = vshll.u32 %v533_v61, 8 }
  0xff   : > { %v9330_v5 = vadd.s32 1, %v8123_v58  ;;  %v9334_v11 = vshll.u32 %v741_v62, 8 }
 0x100   : > { %vm536_vm2 = vcmp.gt.s32.totalorder %v535_v57, 0  ;;  %vm744_vm3 = vcmp.gt.s32.totalorder %v743_v63, 0 }
 0x101   : > { %v537_v3 = vsel %vm536_vm2, %v535_v57, 0  ;;  %v745_v8 = vsel %vm744_vm3, %v743_v63, 0  ;;  %vm640_vm4 = vcmp.gt.s32.totalorder %v9330_v5, 0 }
 0x102   : > { %v538_v6 = vshrl.u32 %v537_v3, 5  ;;  %v539_v7 = vand.u32 31, %v537_v3  ;;  %v9339_v17 = vshrl.u32 %v745_v8, 5  ;;  %v747_v18 = vand.u32 31, %v745_v8 }
 0x104   : > { %v540_v14 = vsub.s32 32, %v539_v7  ;;  %v542_v16 = vshll.u32 %v15374_v15, %v539_v7  ;;  %v545_v20 = vshll.u32 %v15372_v19, %v539_v7  ;;  %v548_v22 = vshll.u32 %v15369_v21, %v539_v7 }
 0x105   : > { %v551_v24 = vshll.u32 %v15362_v23, %v539_v7  ;;  %v554_v26 = vshll.u32 %v15367_v25, %v539_v7  ;;  %vm557_vm5 = vcmp.lt.s32.totalorder %v538_v6, 1  ;;  %vm558_vm6 = vcmp.lt.s32.totalorder %v538_v6, 2 }
 0x106   : > { %v543_v28 = vshrl.u32 %v15372_v19, %v540_v14  ;;  %v546_v29 = vshrl.u32 %v15369_v21, %v540_v14  ;;  %v549_v30 = vshrl.u32 %v15362_v23, %v540_v14  ;;  %v541_v31 = vshrl.u32 %v15374_v15, %v540_v14 }
 0x107   : > { %v552_v32 = vshrl.u32 %v15367_v25, %v540_v14  ;;  %v555_v34 = vshrl.u32 %v15365_v33, %v540_v14  ;;  %v748_v40 = vsub.s32 32, %v747_v18  ;;  %vm559_vm7 = vcmp.lt.s32.totalorder %v538_v6, 3 }
 0x108   : > { %v544_v35 = vor.u32 %v543_v28, %v542_v16  ;;  %v547_v36 = vor.u32 %v546_v29, %v545_v20  ;;  %v550_v37 = vor.u32 %v549_v30, %v548_v22  ;;  %vm560_vm8 = vcmp.lt.s32.totalorder %v538_v6, 4 }
 0x109   : > { %v553_v41 = vor.u32 %v552_v32, %v551_v24  ;;  %v556_v44 = vor.u32 %v555_v34, %v554_v26  ;;  %v750_v54 = vshll.u32 %v15374_v15, %v747_v18  ;;  %v751_v58 = vshrl.u32 %v15372_v19, %v748_v40 }
 0x10a   : > { %v561_v46 = vsel %vm557_vm5, %v541_v31, %v544_v35  ;;  %v562_v48 = vsel %vm560_vm8, %v550_v37, 2102212464  ;;  %v565_v49 = vsel %vm557_vm5, %v544_v35, %v547_v36  ;;  %v569_v50 = vsel %vm557_vm5, %v547_v36, %v550_v37 }
 0x10b   : > { %v563_v51 = vsel %vm559_vm7, %v547_v36, %v562_v48  ;;  %v566_v52 = vsel %vm560_vm8, %v553_v41, 920167782  ;;  %v570_v53 = vsel %vm560_vm8, %v556_v44, 1326507024  ;;  %v753_v61 = vshll.u32 %v15372_v19, %v747_v18 }
 0x10c   : > { %v567_v56 = vsel %vm559_vm7, %v550_v37, %v566_v52  ;;  %v571_v57 = vsel %vm559_vm7, %v553_v41, %v570_v53  ;;  %v564_v62 = vsel %vm558_vm6, %v561_v46, %v563_v51  ;;  %v754_v7 = vshrl.u32 %v15369_v21, %v748_v40 }
 0x10d   : > { %v568_v63 = vsel %vm558_vm6, %v565_v49, %v567_v56  ;;  %v572_v3 = vsel %vm558_vm6, %v569_v50, %v571_v57  ;;  %v752_v22 = vor.u32 %v751_v58, %v750_v54  ;;  %v756_v26 = vshll.u32 %v15369_v21, %v747_v18 }
 0x10e   : > { %v9365_v8 = vmul.u32.u64.low %v9332_v10, %v572_v3  ;;  %v9366_v14 = vmul.u32.u64.high %v9332_v10, %v572_v3, %v9365_v8  ;;  %v9369_v16 = vmul.u32.u64.low %v9332_v10, %v568_v63  ;;  %v9370_v20 = vmul.u32.u64.high %v9332_v10, %v568_v63, %v9369_v16 }
 0x10f   : > { %v755_v24 = vor.u32 %v754_v7, %v753_v61  ;;  %v757_v28 = vshrl.u32 %v15362_v23, %v748_v40  ;;  %v759_v6 = vshll.u32 %v15362_v23, %v747_v18  ;;  %v760_v29 = vshrl.u32 %v15367_v25, %v748_v40  ;;  %v9403_v8 = vpop.f32.mrb[4].mxu1 }
 0x110   : > { %v763_v30 = vshrl.u32 %v15365_v33, %v748_v40  ;;  %v641_v31 = vsel %vm640_vm4, %v9330_v5, 0  ;;  %v580_v32 = vmul.u32 %v9332_v10, %v564_v62  ;;  %v749_v34 = vshrl.u32 %v15374_v15, %v748_v40 }
 0x111   : > { %v758_v35 = vor.u32 %v757_v28, %v756_v26  ;;  %v762_v36 = vshll.u32 %v15367_v25, %v747_v18  ;;  %vm582_vm9 = vc.u32 %v9366_v14, %v9369_v16  ;;  %v583_v37 = vadd.s32 1, %v9370_v20 }
 0x112   : > { %v761_v41 = vor.u32 %v760_v29, %v759_v6  ;;  %vm765_vm10 = vcmp.lt.s32.totalorder %v9339_v17, 1  ;;  %vm767_vm11 = vcmp.lt.s32.totalorder %v9339_v17, 3  ;;  %vm768_vm12 = vcmp.lt.s32.totalorder %v9339_v17, 4 }
 0x113   : > { %v764_v44 = vor.u32 %v763_v30, %v762_v36  ;;  %v773_v5 = vsel %vm765_vm10, %v752_v22, %v755_v24  ;;  %v584_v10 = vsel %vm582_vm9, %v583_v37, %v9370_v20  ;;  %v770_v40 = vsel %vm768_vm12, %v758_v35, 2102212464 }
 0x114   : > { %v774_v46 = vsel %vm768_vm12, %v761_v41, 920167782  ;;  %v777_v48 = vsel %vm765_vm10, %v755_v24, %v758_v35  ;;  %v585_v18 = vadd.s32 %v584_v10, %v580_v32  ;;  %vm766_vm13 = vcmp.lt.s32.totalorder %v9339_v17, 2 }
 0x115   : > { %v775_v49 = vsel %vm767_vm11, %v758_v35, %v774_v46  ;;  %v778_v50 = vsel %vm768_vm12, %v764_v44, 1326507024  ;;  %v769_v51 = vsel %vm765_vm10, %v749_v34, %v752_v22  ;;  %v771_v52 = vsel %vm767_vm11, %v755_v24, %v770_v40 }
 0x116   : > { %v776_v53 = vsel %vm766_vm13, %v773_v5, %v775_v49  ;;  %v779_v54 = vsel %vm767_vm11, %v761_v41, %v778_v50  ;;  %v586_v56 = vadd.s32 536870912, %v585_v18  ;;  %v643_v3 = vand.u32 31, %v641_v31 }
 0x117   : > { %v780_v57 = vsel %vm766_vm13, %v777_v48, %v779_v54  ;;  %v9393_v58 = vmul.u32.u64.low %v9334_v11, %v776_v53  ;;  %v9394_v61 = vmul.u32.u64.high %v9334_v11, %v776_v53, %v9393_v58  ;;  %v772_v17 = vsel %vm766_vm13, %v769_v51, %v771_v52 }
 0x118   : > { %v9398_v62 = vmul.u32.u64.low %v9334_v11, %v780_v57  ;;  %v9399_v63 = vmul.u32.u64.high %v9334_v11, %v780_v57, %v9398_v62  ;;  %v9401_v7 = vshrl.u32 %v586_v56, 30  ;;  %v644_v20 = vsub.s32 32, %v643_v3 }
 0x119   : > { %v791_v24 = vadd.s32 1, %v9394_v61  ;;  %v636_v26 = vand.u32 8388607, %v629_v12  ;;  %v841_v28 = vshrl.u32 %v840_v13, 23  ;;  %v788_v6 = vmul.u32 %v9334_v11, %v772_v17 }
 0x11a   : > { %v588_v22 = vshll.u32 %v9401_v7, 30  ;;  %vm790_vm14 = vc.u32 %v9399_v63, %v9393_v58  ;;  %v9414_v29 = vshrl.u32 %v641_v31, 5  ;;  %v649_v30 = vshll.u32 %v15372_v19, %v643_v3 }
 0x11b   : > { %v792_v34 = vsel %vm790_vm14, %v791_v24, %v9394_v61  ;;  %v647_v35 = vshrl.u32 %v15372_v19, %v644_v20  ;;  %v650_v36 = vshrl.u32 %v15369_v21, %v644_v20  ;;  %v646_v13 = vshll.u32 %v15374_v15, %v643_v3 }
 0x11c   : > { %v9417_v32 = vsub.s32 %v585_v18, %v588_v22  ;;  %v793_v37 = vadd.s32 %v792_v34, %v788_v6  ;;  %v652_v11 = vshll.u32 %v15369_v21, %v643_v3  ;;  %v653_v41 = vshrl.u32 %v15362_v23, %v644_v20 }
 0x11d   : > { %v651_v44 = vor.u32 %v650_v36, %v649_v30  ;;  %v655_v5 = vshll.u32 %v15362_v23, %v643_v3  ;;  %v656_v10 = vshrl.u32 %v15367_v25, %v644_v20  ;;  %v658_v48 = vshll.u32 %v15367_v25, %v643_v3 }
 0x11e   : > { %v591_v31 = vsub.s32 0, %v9417_v32  ;;  %v794_v40 = vadd.s32 536870912, %v793_v37  ;;  %v654_v46 = vor.u32 %v653_v41, %v652_v11  ;;  %v659_v18 = vshrl.u32 %v15365_v33, %v644_v20 }
 0x11f   : > { %v648_v50 = vor.u32 %v647_v35, %v646_v13  ;;  %v657_v51 = vor.u32 %v656_v10, %v655_v5  ;;  %vm664_vm15 = vcmp.lt.s32.totalorder %v9414_v29, 4  ;;  %vm661_vm0 = vcmp.lt.s32.totalorder %v9414_v29, 1 }
 0x120   : > { %v8120_v49 = vmin.u32 %v591_v31, %v9417_v32  ;;  %v9431_v52 = vshrl.u32 %v794_v40, 30  ;;  %v660_v53 = vor.u32 %v659_v18, %v658_v48  ;;  %v8131_v57 = vadd.s32 4294967169, %v841_v28 }
 0x121   : > { %v670_v56 = vsel %vm664_vm15, %v657_v51, 920167782  ;;  %v637_v62 = vor.u32 8388608, %v636_v26  ;;  %vm663_vm1 = vcmp.lt.s32.totalorder %v9414_v29, 3  ;;  %v673_v3 = vsel %vm661_vm0, %v651_v44, %v654_v46 }
 0x122   : > { %v593_v54 = vclz %v8120_v49  ;;  %v796_v61 = vshll.u32 %v9431_v52, 30  ;;  %v669_v22 = vsel %vm661_vm0, %v648_v50, %v651_v44  ;;  %v671_v24 = vsel %vm663_vm1, %v654_v46, %v670_v56  ;;  %v9467_v56 = vpop.f32.mrb[5].mxu0 }
 0x123   : > { %v674_v6 = vsel %vm664_vm15, %v660_v53, 1326507024  ;;  %vm662_vm2 = vcmp.lt.s32.totalorder %v9414_v29, 2  ;;  %v666_v28 = vsel %vm664_vm15, %v654_v46, 2102212464  ;;  %v645_v34 = vshrl.u32 %v15374_v15, %v644_v20 }
 0x124   : > { %v8121_v17 = vadd.s32 4294967294, %v593_v54  ;;  %v9443_v30 = vsub.s32 %v793_v37, %v796_v61  ;;  %v675_v26 = vsel %vm663_vm1, %v657_v51, %v674_v6  ;;  %v847_v36 = vadd.s32 1, %v8131_v57  ;;  %v9478_v6 = vpop.permute.xlu0 %295 }
 0x125   : > { %v676_v35 = vsel %vm662_vm2, %v673_v3, %v675_v26  ;;  %v672_v37 = vsel %vm662_vm2, %v669_v22, %v671_v24  ;;  %v677_v41 = vshll.u32 %v637_v62, 8  ;;  %v665_v31 = vsel %vm661_vm0, %v645_v34, %v648_v50 }
 0x126   : > { %vm8122_vm3 = vcmp.lt.s32.totalorder %v8121_v17, 0  ;;  %v799_v11 = vsub.s32 0, %v9443_v30  ;;  %v667_v5 = vsel %vm663_vm1, %v651_v44, %v666_v28  ;;  %v15360_v10 = vand.u32 2147483647, %v9328_v0 }
 0x127   : > { %v596_v13 = vsel %vm8122_vm3, 0, %v8121_v17  ;;  %vm848_vm4 = vcmp.gt.s32.totalorder %v847_v36, 0  ;;  %v9460_v40 = vmul.u32.u64.low %v677_v41, %v676_v35  ;;  %v9461_v46 = vmul.u32.u64.high %v677_v41, %v676_v35, %v9460_v40 }
 0x128   : > { %v8128_v20 = vmin.u32 %v799_v11, %v9443_v30  ;;  %v849_v48 = vsel %vm848_vm4, %v847_v36, 0  ;;  %v597_v18 = vsub.s32 32, %v596_v13  ;;  %v601_v49 = vsub.s32 4294967266, %v596_v13 }
 0x129   : > { %v9463_v51 = vmul.u32.u64.low %v677_v41, %v672_v37  ;;  %v9464_v53 = vmul.u32.u64.high %v677_v41, %v672_v37, %v9463_v51  ;;  %v851_v50 = vand.u32 31, %v849_v48  ;;  %v581_v44 = vadd.s32 %v9369_v16, %v9366_v14 }
 0x12a   : > { %v801_v54 = vclz %v8128_v20  ;;  %v668_v57 = vsel %vm662_vm2, %v665_v31, %v667_v5  ;;  %v602_v17 = vadd.s32 127, %v601_v49  ;;  %v844_v24 = vand.u32 8388607, %v15360_v10 }
 0x12b   : > { %vm686_vm5 = vc.u32 %v9461_v46, %v9463_v51  ;;  %v852_v62 = vsub.s32 32, %v851_v50  ;;  %v599_v3 = vshrl.u32 %v581_v44, %v597_v18  ;;  %v687_v22 = vadd.s32 1, %v9464_v53 }
 0x12c   : > { %v8129_v61 = vadd.s32 4294967294, %v801_v54  ;;  %v684_v28 = vmul.u32 %v677_v41, %v668_v57  ;;  %v598_v14 = vshll.u32 %v9417_v32, %v596_v13  ;;  %v9484_v29 = vadd.f32 %v9315_v47, %v9478_v6 }
 0x12d   : > { %v688_v16 = vsel %vm686_vm5, %v687_v22, %v9464_v53  ;;  %v855_v35 = vshrl.u32 %v15372_v19, %v852_v62  ;;  %v858_v36 = vshrl.u32 %v15369_v21, %v852_v62  ;;  %v603_v37 = vshll.u32 %v602_v17, 23 }
 0x12e   : > { %vm8130_vm6 = vcmp.lt.s32.totalorder %v8129_v61, 0  ;;  %15584 = vst [vmem:[#allocation10_spill] sm:$0xff] %v9484_v29  ;;  %v689_v34 = vadd.s32 %v688_v16, %v684_v28  ;;  %v600_v11 = vor.u32 %v599_v3, %v598_v14  ;;  %v789_v41 = vadd.s32 %v9393_v58, %v9399_v63 }
 0x12f   : > { %v9486_v26 = vsel %vm8130_vm6, 0, %v8129_v61  ;;  %v845_v31 = vor.u32 8388608, %v844_v24  ;;  %v854_v13 = vshll.u32 %v15374_v15, %v851_v50  ;;  %v857_v5 = vshll.u32 %v15372_v19, %v851_v50 }
 0x130   : > { %v690_v32 = vadd.s32 536870912, %v689_v34  ;;  %v861_v47 = vshrl.u32 %v15362_v23, %v852_v62  ;;  %v809_v20 = vsub.s32 4294967266, %v9486_v26  ;;  %v860_v40 = vshll.u32 %v15369_v21, %v851_v50 }
 0x131   : > { %v863_v18 = vshll.u32 %v15362_v23, %v851_v50  ;;  %v864_v49 = vshrl.u32 %v15367_v25, %v852_v62  ;;  %v850_v54 = vshrl.u32 %v849_v48, 5  ;;  %v856_v58 = vor.u32 %v855_v35, %v854_v13 }
 0x132   : > { %v9499_v53 = vshrl.u32 %v690_v32, 30  ;;  %v859_v63 = vor.u32 %v858_v36, %v857_v5  ;;  %v862_v44 = vor.u32 %v861_v47, %v860_v40  ;;  %v866_v61 = vshll.u32 %v15367_v25, %v851_v50 }
 0x133   : > { %v865_v57 = vor.u32 %v864_v49, %v863_v18  ;;  %v867_v3 = vshrl.u32 %v15365_v33, %v852_v62  ;;  %v604_v17 = vor.u32 4788187, %v603_v37  ;;  %v885_v24 = vshll.u32 %v845_v31, 8 }
 0x134   : > { %v692_v22 = vshll.u32 %v9499_v53, 30  ;;  %v944_v28 = vand.u32 2139095040, %v9484_v29  ;;  %v607_v14 = vcvt.s32.f32 %v600_v11  ;;  %v810_v16 = vadd.s32 127, %v809_v20 }
 0x135   : > { %v853_v32 = vshrl.u32 %v15374_v15, %v852_v62  ;;  %v868_v1 = vor.u32 %v867_v3, %v866_v61  ;;  %v805_v48 = vsub.s32 32, %v9486_v26  ;;  %vm869_vm7 = vcmp.lt.s32.totalorder %v850_v54, 1 }
 0x136   : > { %v9507_v35 = vsub.s32 %v689_v34, %v692_v22  ;;  %vm872_vm8 = vcmp.lt.s32.totalorder %v850_v54, 4  ;;  %vm871_vm9 = vcmp.lt.s32.totalorder %v850_v54, 3  ;;  %v877_v36 = vsel %vm869_vm7, %v856_v58, %v859_v63 }
 0x137   : > { %v874_v50 = vsel %vm872_vm8, %v862_v44, 2102212464  ;;  %v878_v37 = vsel %vm872_vm8, %v865_v57, 920167782  ;;  %v605_v13 = vand.u32 2147483647, %v604_v17  ;;  %v881_v62 = vsel %vm869_vm7, %v859_v63, %v862_v44 }
 0x138   : > { %v695_v31 = vsub.s32 0, %v9507_v35  ;;  %vm870_vm10 = vcmp.lt.s32.totalorder %v850_v54, 2  ;;  %v879_v5 = vsel %vm871_vm9, %v862_v44, %v878_v37  ;;  %v811_v11 = vshll.u32 %v810_v16, 23 }
 0x139   : > { %v880_v47 = vsel %vm870_vm10, %v877_v36, %v879_v5  ;;  %v882_v20 = vsel %vm872_vm8, %v868_v1, 1326507024  ;;  %v873_v34 = vsel %vm869_vm7, %v853_v32, %v856_v58  ;;  %v875_v18 = vsel %vm871_vm9, %v859_v63, %v874_v50 }
 0x13a   : > { %v8124_v40 = vmin.u32 %v695_v31, %v9507_v35  ;;  %v883_v49 = vsel %vm871_vm9, %v865_v57, %v882_v20  ;;  %v807_v61 = vshrl.u32 %v789_v41, %v805_v48  ;;  %v608_v17 = vmul.f32 %v607_v14, %v605_v13 }
 0x13b   : > { %v884_v3 = vsel %vm870_vm10, %v881_v62, %v883_v49  ;;  %v9513_v22 = vmul.u32.u64.low %v885_v24, %v880_v47  ;;  %v9514_v9 = vmul.u32.u64.high %v885_v24, %v880_v47, %v9513_v22  ;;  %v806_v1 = vshll.u32 %v9443_v30, %v9486_v26 }
 0x13c   : > { %v697_v2 = vclz %v8124_v40  ;;  %v9517_v37 = vmul.u32.u64.low %v885_v24, %v884_v3  ;;  %v9518_v16 = vmul.u32.u64.high %v885_v24, %v884_v3, %v9517_v37  ;;  %v812_v44 = vor.u32 4788187, %v811_v11 }
 0x13d   : > { %v876_v58 = vsel %vm870_vm10, %v873_v34, %v875_v18  ;;  %v945_v63 = vshrl.u32 %v944_v28, 23  ;;  %v611_v41 = vsub.s32 4, %v9401_v7  ;;  %v941_v32 = vand.u32 2147483647, %v9484_v29 }
 0x13e   : > { %v8125_v57 = vadd.s32 4294967294, %v697_v2  ;;  %vm527_vm11 = vcmp.lt.s32.totalorder %v9305_v38, 0  ;;  %v808_v48 = vor.u32 %v807_v61, %v806_v1  ;;  %v895_v14 = vadd.s32 1, %v9514_v9  ;;  %v9530_v2 = vpop.f32.mrb[5].mxu1 }
 0x13f   : > { %v8135_v50 = vadd.s32 4294967169, %v945_v63  ;;  %v609_v36 = vxor.u32 2147483648, %v608_v17  ;;  %v892_v13 = vmul.u32 %v885_v24, %v876_v58  ;;  %vm894_vm13 = vc.u32 %v9518_v16, %v9513_v22 }
 0x140   : > { %vm8126_vm12 = vcmp.lt.s32.totalorder %v8125_v57, 0  ;;  %v813_v30 = vand.u32 2147483647, %v812_v44  ;;  %v896_v54 = vsel %vm894_vm13, %v895_v14, %v9514_v9  ;;  %v9535_v31 = vsel %vm527_vm11, %v611_v41, %v9401_v7 }
 0x141   : > { %v700_v26 = vsel %vm8126_vm12, 0, %v8125_v57  ;;  %v951_v28 = vadd.s32 1, %v8135_v50  ;;  %v897_v11 = vadd.s32 %v896_v54, %v892_v13  ;;  %v948_v24 = vand.u32 8388607, %v941_v32 }
 0x142   : > { %v705_v5 = vsub.s32 4294967266, %v700_v26  ;;  %v815_v47 = vcvt.s32.f32 %v808_v48  ;;  %v701_v62 = vsub.s32 32, %v700_v26  ;;  %v9541_v20 = vadd.f32 %v9322_v55, %v9478_v6 }
 0x143   : > { %vm952_vm14 = vcmp.gt.s32.totalorder %v951_v28, 0  ;;  %v819_v9 = vsub.s32 4, %v9431_v52  ;;  %v898_v34 = vadd.s32 536870912, %v897_v11  ;;  %v610_v7 = vsel %vm527_vm11, %v609_v36, %v608_v17 }
 0x144   : > { %15585 = vst [vmem:[#allocation11_spill] sm:$0xff] %v9541_v20  ;;  %v706_v40 = vadd.s32 127, %v705_v5  ;;  %v953_v18 = vsel %vm952_vm14, %v951_v28, 0  ;;  %v9546_v49 = vmul.f32 %v815_v47, %v813_v30  ;;  %v685_v61 = vadd.s32 %v9463_v51, %v9461_v46 }
 0x145   : > { %v955_v3 = vand.u32 31, %v953_v18  ;;  %v702_v37 = vshll.u32 %v9507_v35, %v700_v26  ;;  %v9551_v44 = vshrl.u32 %v898_v34, 30  ;;  %v949_v55 = vor.u32 8388608, %v948_v24 }
 0x146   : > { %v707_v1 = vshll.u32 %v706_v40, 23  ;;  %v703_v58 = vshrl.u32 %v685_v61, %v701_v62  ;;  %v954_v63 = vshrl.u32 %v953_v18, 5  ;;  %v1152_v57 = vand.u32 2139095040, %v9541_v20 }
 0x147   : > { %v956_v41 = vsub.s32 32, %v955_v3  ;;  %v900_v48 = vshll.u32 %v9551_v44, 30  ;;  %v958_v17 = vshll.u32 %v15374_v15, %v955_v3  ;;  %v961_v14 = vshll.u32 %v15372_v19, %v955_v3 }
 0x148   : > { %v964_v46 = vshll.u32 %v15369_v21, %v955_v3  ;;  %v708_v51 = vor.u32 4788187, %v707_v1  ;;  %vm9563_vm15 = vcmp.le.f32.partialorder %v525_v43, 0.7853982  ;;  %v967_v26 = vshll.u32 %v15362_v23, %v955_v3 }
 0x149   : > { %v959_v35 = vshrl.u32 %v15372_v19, %v956_v41  ;;  %v962_v50 = vshrl.u32 %v15369_v21, %v956_v41  ;;  %v965_v36 = vshrl.u32 %v15362_v23, %v956_v41  ;;  %v9567_v30 = vsub.s32 %v897_v11, %v900_v48 }
 0x14a   : > { %v968_v54 = vshrl.u32 %v15367_v25, %v956_v41  ;;  %v970_v28 = vshll.u32 %v15367_v25, %v955_v3  ;;  %v971_v62 = vshrl.u32 %v15365_v33, %v956_v41  ;;  %vm735_vm0 = vcmp.lt.s32.totalorder %v9307_v39, 0 }
 0x14b   : > { %v960_v5 = vor.u32 %v959_v35, %v958_v17  ;;  %v963_v24 = vor.u32 %v962_v50, %v961_v14  ;;  %v966_v47 = vor.u32 %v965_v36, %v964_v46  ;;  %v817_v43 = vxor.u32 2147483648, %v9546_v49 }
 0x14c   : > { %v903_v40 = vsub.s32 0, %v9567_v30  ;;  %v969_v34 = vor.u32 %v968_v54, %v967_v26  ;;  %v989_v11 = vshll.u32 %v949_v55, 8  ;;  %v704_v18 = vor.u32 %v703_v58, %v702_v37 }
 0x14d   : > { %v957_v61 = vshrl.u32 %v15374_v15, %v956_v41  ;;  %v972_v1 = vor.u32 %v971_v62, %v970_v28  ;;  %v1153_v48 = vshrl.u32 %v1152_v57, 23  ;;  %v709_v10 = vand.u32 2147483647, %v708_v51 }
 0x14e   : > { %v8132_v3 = vmin.u32 %v903_v40, %v9567_v30  ;;  %vm973_vm1 = vcmp.lt.s32.totalorder %v954_v63, 1  ;;  %vm976_vm2 = vcmp.lt.s32.totalorder %v954_v63, 4  ;;  %vm975_vm3 = vcmp.lt.s32.totalorder %v954_v63, 3 }
 0x14f   : > { %v978_v17 = vsel %vm976_vm2, %v966_v47, 2102212464  ;;  %v981_v14 = vsel %vm973_vm1, %v960_v5, %v963_v24  ;;  %v982_v46 = vsel %vm976_vm2, %v969_v34, 920167782  ;;  %vm974_vm4 = vcmp.lt.s32.totalorder %v954_v63, 2 }
 0x150   : > { %v905_v35 = vclz %v8132_v3  ;;  %v983_v50 = vsel %vm975_vm3, %v966_v47, %v982_v46  ;;  %v985_v36 = vsel %vm973_vm1, %v963_v24, %v966_v47  ;;  %v711_v26 = vcvt.s32.f32 %v704_v18 }
 0x151   : > { %v977_v55 = vsel %vm973_vm1, %v957_v61, %v960_v5  ;;  %v984_v37 = vsel %vm974_vm4, %v981_v14, %v983_v50  ;;  %v986_v58 = vsel %vm976_vm2, %v972_v1, 1326507024  ;;  %v979_v57 = vsel %vm975_vm3, %v963_v24, %v978_v17  ;;  %v9629_v14 = vpop.f32.mrb[6].mxu0 }
 0x152   : > { %v8133_v41 = vadd.s32 4294967294, %v905_v35  ;;  %v987_v51 = vsel %vm975_vm3, %v969_v34, %v986_v58  ;;  %v8143_v54 = vadd.s32 4294967169, %v1153_v48  ;;  %v613_v28 = vsel %vm9563_vm15, %v9305_v38, %v610_v7 }
 0x153   : > { %v988_v62 = vsel %vm974_vm4, %v985_v36, %v987_v51  ;;  %v9583_v40 = vmul.u32.u64.low %v989_v11, %v984_v37  ;;  %v9584_v3 = vmul.u32.u64.high %v989_v11, %v984_v37, %v9583_v40  ;;  %v712_v47 = vmul.f32 %v711_v26, %v709_v10 }
 0x154   : > { %vm8134_vm5 = vcmp.lt.s32.totalorder %v8133_v41, 0  ;;  %v9587_v5 = vmul.u32.u64.low %v989_v11, %v988_v62  ;;  %v9588_v18 = vmul.u32.u64.high %v989_v11, %v988_v62, %v9587_v5  ;;  %v818_v24 = vsel %vm735_vm0, %v817_v43, %v9546_v49 }
 0x155   : > { %v980_v34 = vsel %vm974_vm4, %v977_v55, %v979_v57  ;;  %v15361_v61 = vand.u32 2147483647, %v9541_v20  ;;  %v1159_v7 = vadd.s32 1, %v8143_v54  ;;  %v614_v1 = vsel %vm9563_vm15, 0, %v9535_v31 }
 0x156   : > { %vm9600_vm6 = vcmp.le.f32.partialorder %v733_v45, 0.7853982  ;;  %v9604_v48 = vsel %vm8134_vm5, 0, %v8133_v41  ;;  %v9608_v49 = vadd.f32 %v9324_v59, %v9478_v6  ;;  %8793 = vcosq.f32 %v613_v28 }
 0x157   : > { %v9615_v63 = vsel %vm735_vm0, %v819_v9, %v9431_v52  ;;  %v999_v31 = vadd.s32 1, %v9584_v3  ;;  %vm1160_vm7 = vcmp.gt.s32.totalorder %v1159_v7, 0  ;;  %v9621_v45 = vsel %vm9600_vm6, %v9307_v39, %v818_v24 }
 0x158   : > { %v713_v13 = vxor.u32 2147483648, %v712_v47  ;;  %v996_v43 = vmul.u32 %v989_v11, %v980_v34  ;;  %vm998_vm8 = vc.u32 %v9588_v18, %v9583_v40  ;;  %v913_v59 = vsub.s32 4294967266, %v9604_v48 }
 0x159   : > { %v1000_v17 = vsel %vm998_vm8, %v999_v31, %v9584_v3  ;;  %v1156_v52 = vand.u32 8388607, %v15361_v61  ;;  %v1161_v9 = vsel %vm1160_vm7, %v1159_v7, 0  ;;  %8795 = vsinq.f32 %v613_v28 }
 0x15a   : > { %vm631_vm9 = vcmp.lt.s32.totalorder %v9309_v42, 0  ;;  %v1001_v46 = vadd.s32 %v1000_v17, %v996_v43  ;;  %v1048_v35 = vand.u32 2139095040, %v9608_v49  ;;  %v9633_v11 = vadd.s32 3, %v614_v1 }
 0x15b   : > { %8797 = vcosq.f32 %v9621_v45  ;;  %v1163_v36 = vand.u32 31, %v1161_v9  ;;  %v9641_v26 = vsel %vm631_vm9, %v713_v13, %v712_v47  ;;  %v893_v55 = vadd.s32 %v9513_v22, %v9518_v16 }
 0x15c   : > { %15590 = vst [vmem:[#allocation12_spill] sm:$0xff] %v9633_v11  ;;  %v1002_v37 = vadd.s32 536870912, %v1001_v46  ;;  %v15364_v58 = vand.u32 2147483647, %v9608_v49  ;;  %v909_v41 = vsub.s32 32, %v9604_v48  ;;  %v914_v57 = vadd.s32 127, %v913_v59 }
 0x15d   : > { %v1157_v51 = vor.u32 8388608, %v1156_v52  ;;  %v1164_v54 = vsub.s32 32, %v1163_v36  ;;  %v1166_v62 = vshll.u32 %v15374_v15, %v1163_v36  ;;  %v1169_v3 = vshll.u32 %v15372_v19, %v1163_v36 }
 0x15e   : > { %v9647_v28 = vshrl.u32 %v1002_v37, 30  ;;  %v1049_v5 = vshrl.u32 %v1048_v35, 23  ;;  %v1172_v22 = vshll.u32 %v15369_v21, %v1163_v36  ;;  %v1162_v7 = vshrl.u32 %v1161_v9, 5 }
 0x15f   : > { %v1167_v47 = vshrl.u32 %v15372_v19, %v1164_v54  ;;  %v1170_v24 = vshrl.u32 %v15369_v21, %v1164_v54  ;;  %v1173_v16 = vshrl.u32 %v15362_v23, %v1164_v54  ;;  %v1175_v1 = vshll.u32 %v15362_v23, %v1163_v36 }
 0x160   : > { %v1004_v34 = vshll.u32 %v9647_v28, 30  ;;  %v1176_v31 = vshrl.u32 %v15367_v25, %v1164_v54  ;;  %v9658_v13 = vpop.eup %8793  ;;  %v1179_v52 = vshrl.u32 %v15365_v33, %v1164_v54  ;;  %vm9663_vm10 = vcmp.le.f32.partialorder %v629_v12, 0.7853982 }
 0x161   : > { %15591 = vst [vmem:[#allocation13_spill] sm:$0xff] %v9658_v13  ;;  %v1168_v43 = vor.u32 %v1167_v47, %v1166_v62  ;;  %v1171_v59 = vor.u32 %v1170_v24, %v1169_v3  ;;  %v1174_v17 = vor.u32 %v1173_v16, %v1172_v22  ;;  %v915_v37 = vshll.u32 %v914_v57, 23 }
 0x162   : > { %v9667_v61 = vsub.s32 %v1001_v46, %v1004_v34  ;;  %v1177_v9 = vor.u32 %v1176_v31, %v1175_v1  ;;  %v1178_v50 = vshll.u32 %v15367_v25, %v1163_v36  ;;  %v910_v23 = vshll.u32 %v9567_v30, %v9604_v48 }
 0x163   : > { %v911_v62 = vshrl.u32 %v893_v55, %v909_v41  ;;  %v1197_v3 = vshll.u32 %v1157_v51, 8  ;;  %v1052_v47 = vand.u32 8388607, %v15364_v58  ;;  %v9674_v24 = vpop.eup %8795  ;;  %vm1181_vm11 = vcmp.lt.s32.totalorder %v1162_v7, 1  ;;  %v9685_v58 = vpop.f32.mrb[6].mxu1 }
 0x164   : > { %15594 = vst [vmem:[#allocation14_spill] sm:$0xff] %v9674_v24  ;;  %v1007_v12 = vsub.s32 0, %v9667_v61  ;;  %v1180_v22 = vor.u32 %v1179_v52, %v1178_v50  ;;  %vm1184_vm12 = vcmp.lt.s32.totalorder %v1162_v7, 4  ;;  %v1165_v57 = vshrl.u32 %v15374_v15, %v1164_v54 }
 0x165   : > { %v9677_v46 = vpop.eup %8797  ;;  %v1186_v36 = vsel %vm1184_vm12, %v1174_v17, 2102212464  ;;  %v1189_v16 = vsel %vm1181_vm11, %v1168_v43, %v1171_v59  ;;  %v8139_v30 = vadd.s32 4294967169, %v1049_v5  ;;  %v916_v48 = vor.u32 4788187, %v915_v37 }
 0x166   : > { %15595 = vst [vmem:[#allocation15_spill] sm:$0xff] %v9677_v46  ;;  %v8136_v55 = vmin.u32 %v1007_v12, %v9667_v61  ;;  %vm1183_vm13 = vcmp.lt.s32.totalorder %v1162_v7, 3  ;;  %v1190_v41 = vsel %vm1184_vm12, %v1177_v9, 920167782  ;;  %vm1182_vm14 = vcmp.lt.s32.totalorder %v1162_v7, 2 }
 0x167   : > { %v1185_v51 = vsel %vm1181_vm11, %v1165_v57, %v1168_v43  ;;  %v1191_v34 = vsel %vm1183_vm13, %v1174_v17, %v1190_v41  ;;  %v1193_v50 = vsel %vm1181_vm11, %v1171_v59, %v1174_v17  ;;  %v1187_v31 = vsel %vm1183_vm13, %v1171_v59, %v1186_v36 }
 0x168   : > { %v1009_v1 = vclz %v8136_v55  ;;  %v1192_v52 = vsel %vm1182_vm14, %v1189_v16, %v1191_v34  ;;  %v1194_v54 = vsel %vm1184_vm12, %v1180_v22, 1326507024  ;;  %v1055_v12 = vadd.s32 1, %v8139_v30 }
 0x169   : > { %v1195_v33 = vsel %vm1183_vm13, %v1177_v9, %v1194_v54  ;;  %v9687_v5 = vmul.u32.u64.low %v1197_v3, %v1192_v52  ;;  %v9688_v37 = vmul.u32.u64.high %v1197_v3, %v1192_v52, %v9687_v5  ;;  %v912_v25 = vor.u32 %v911_v62, %v910_v23 }
 0x16a   : > { %vm943_vm15 = vcmp.lt.s32.totalorder %v9484_v29, 0  ;;  %v8137_v43 = vadd.s32 4294967294, %v1009_v1  ;;  %v1196_v17 = vsel %vm1182_vm14, %v1193_v50, %v1195_v33  ;;  %v9695_v59 = vadd.f32 %v9326_v60, %v9478_v6 }
 0x16b   : > { %v9701_v9 = vsel %vm9663_vm10, %v9309_v42, %v9641_v26  ;;  %v9703_v22 = vmul.u32.u64.low %v1197_v3, %v1196_v17  ;;  %v9704_v57 = vmul.u32.u64.high %v1197_v3, %v1196_v17, %v9703_v22  ;;  %vm1056_vm0 = vcmp.gt.s32.totalorder %v1055_v12, 0 }
 0x16c   : > { %15596 = vst [vmem:[#allocation16_spill] sm:$0xff] %v9695_v59  ;;  %vm8138_vm1 = vcmp.lt.s32.totalorder %v8137_v43, 0  ;;  %v1188_v23 = vsel %vm1182_vm14, %v1185_v51, %v1187_v31  ;;  %v1053_v62 = vor.u32 8388608, %v1052_v47  ;;  %v1057_v36 = vsel %vm1056_vm0, %v1055_v12, 0 }
 0x16d   : > { %8799 = vsinq.f32 %v9621_v45  ;;  %v917_v33 = vand.u32 2147483647, %v916_v48  ;;  %v1207_v60 = vadd.s32 1, %v9688_v37  ;;  %v1059_v6 = vand.u32 31, %v1057_v36 }
 0x16e   : > { %8801 = vcosq.f32 %v9701_v9  ;;  %v919_v16 = vcvt.s32.f32 %v912_v25  ;;  %vm9712_vm2 = vcmp.le.f32.partialorder %v941_v32, 0.7853982  ;;  %v1027_v7 = vsub.s32 4, %v9647_v28 }
 0x16f   : > { %v9717_v30 = vsel %vm8138_vm1, 0, %v8137_v43  ;;  %v1204_v47 = vmul.u32 %v1197_v3, %v1188_v23  ;;  %vm1206_vm3 = vc.u32 %v9704_v57, %v9687_v5  ;;  %v1060_v45 = vsub.s32 32, %v1059_v6 }
 0x170   : > { %v997_v48 = vadd.s32 %v9583_v40, %v9588_v18  ;;  %v1208_v25 = vsel %vm1206_vm3, %v1207_v60, %v9688_v37  ;;  %v9724_v55 = vshll.u32 %v1053_v62, 8  ;;  %v15371_v32 = vand.u32 2147483647, %v9695_v59 }
 0x171   : > { %v920_v41 = vmul.f32 %v919_v16, %v917_v33  ;;  %v1209_v51 = vadd.s32 %v1208_v25, %v1204_v47  ;;  %v1063_v34 = vshrl.u32 %v15372_v19, %v1060_v45  ;;  %v1066_v50 = vshrl.u32 %v15369_v21, %v1060_v45 }
 0x172   : > { %v1017_v3 = vsub.s32 4294967266, %v9717_v30  ;;  %v1062_v1 = vshll.u32 %v15374_v15, %v1059_v6  ;;  %v1065_v31 = vshll.u32 %v15372_v19, %v1059_v6  ;;  %v15599_v52 = vmov 2102212464  }
 0x173   : > { %v1069_v40 = vshrl.u32 %v15599_v52, %v1060_v45  ;;  %v1028_v18 = vsel %vm943_vm15, %v1027_v7, %v9647_v28  ;;  %v1210_v54 = vadd.s32 536870912, %v1209_v51  ;;  %v1058_v37 = vshrl.u32 %v1057_v36, 5 }
 0x174   : > { %v1068_v12 = vshll.u32 %v15369_v21, %v1059_v6  ;;  %v1064_v43 = vor.u32 %v1063_v34, %v1062_v1  ;;  %v1067_v17 = vor.u32 %v1066_v50, %v1065_v31  ;;  %v1071_v22 = vshll.u32 %v15599_v52, %v1059_v6 }
 0x175   : > { %v15600_v23 = vmov 920167782   ;;  %v921_v33 = vxor.u32 2147483648, %v920_v41  ;;  %v9739_v60 = vshrl.u32 %v1210_v54, 30  ;;  %v15601_v16 = vmov 1326507024  }
 0x176   : > { %v1072_v62 = vshrl.u32 %v15600_v23, %v1060_v45  ;;  %v1075_v47 = vshrl.u32 %v15601_v16, %v1060_v45  ;;  %v1256_v25 = vand.u32 2139095040, %v9695_v59  ;;  %vm839_vm4 = vcmp.lt.s32.totalorder %v9328_v0, 0 }
 0x177   : > { %v1018_v28 = vadd.s32 127, %v1017_v3  ;;  %v1070_v7 = vor.u32 %v1069_v40, %v1068_v12  ;;  %v1074_v21 = vshll.u32 %v15600_v23, %v1059_v6  ;;  %v9745_v34 = vpop.eup %8799  ;;  %v1030_v50 = vsel %vm9712_vm2, 0, %v1028_v18 }
 0x178   : > { %v1073_v36 = vor.u32 %v1072_v62, %v1071_v22  ;;  %15602 = vst [vmem:[#allocation17_spill] sm:$0xff] %v9745_v34  ;;  %v1212_v1 = vshll.u32 %v9739_v60, 30  ;;  %vm1077_vm5 = vcmp.lt.s32.totalorder %v1058_v37, 1  ;;  %v9752_v31 = vand.u32 8388607, %v15371_v32  ;;  %v9754_v54 = vpop.eup %8801 }
 0x179   : > { %v1013_v3 = vsub.s32 32, %v9717_v30  ;;  %v1076_v40 = vor.u32 %v1075_v47, %v1074_v21  ;;  %vm1080_vm7 = vcmp.lt.s32.totalorder %v1058_v37, 4  ;;  %v1085_v6 = vsel %vm1077_vm5, %v1064_v43, %v1067_v17 }
 0x17a   : > { %v15603_v12 = vand.u32 2147483647, %v9328_v0  ;;  %v15604_v22 = vmov 0  ;;  %v9764_v18 = vsub.s32 %v1209_v51, %v1212_v1  ;;  %vm1079_vm11 = vcmp.lt.s32.totalorder %v1058_v37, 3 }
 0x17b   : > { %v1086_v62 = vsel %vm1080_vm7, %v1073_v36, 920167782  ;;  %v1257_v32 = vshrl.u32 %v1256_v25, 23  ;;  %v1019_v19 = vshll.u32 %v1018_v28, 23  ;;  %vm1078_vm12 = vcmp.lt.s32.totalorder %v1058_v37, 2 }
 0x17c   : > { %vm9760_vm8 = vcmp.le.f32.partialorder %v15603_v12, 0.7853982  ;;  %v1082_v15 = vsel %vm1080_vm7, %v1070_v7, 2102212464  ;;  %v1087_v21 = vsel %vm1079_vm11, %v1070_v7, %v1086_v62  ;;  %v1215_v47 = vsub.s32 0, %v9764_v18 }
 0x17d   : > { %v15605_v22 = vsel %vm9760_vm8, 4294967295, %v15604_v22  ;;  %v1061_v39 = vshrl.u32 %v15607_v4, %v1060_v45  ;;  %v1088_v12 = vsel %vm1078_vm12, %v1085_v6, %v1087_v21  ;;  %v1089_v46 = vsel %vm1077_vm5, %v1067_v17, %v1070_v7 }
 0x17e   : > { %15606 = vst [vmem:[#allocation18_spill] sm:$0xff] %v15605_v22  ;;  %v1015_v51 = vshrl.u32 %v997_v48, %v1013_v3  ;;  %v1090_v1 = vsel %vm1080_vm7, %v1076_v40, 1326507024  ;;  %v9775_v34 = vmul.u32.u64.low %v9724_v55, %v1088_v12  ;;  %v9776_v25 = vmul.u32.u64.high %v9724_v55, %v1088_v12, %v9775_v34 }
 0x17f   : > { %v8144_v28 = vmin.u32 %v1215_v47, %v9764_v18  ;;  %v1081_v62 = vsel %vm1077_vm5, %v1061_v39, %v1064_v43  ;;  %v1083_v13 = vsel %vm1079_vm11, %v1067_v17, %v1082_v15  ;;  %v1091_v45 = vsel %vm1079_vm11, %v1073_v36, %v1090_v1  ;;  %v9794_v36 = vpop.f32.mrb[7].mxu0 }
 0x180   : > { %v1014_v6 = vshll.u32 %v9667_v61, %v9717_v30  ;;  %v1020_v7 = vor.u32 4788187, %v1019_v19  ;;  %v1092_v48 = vsel %vm1078_vm12, %v1089_v46, %v1091_v45  ;;  %v8147_v3 = vadd.s32 4294967169, %v1257_v32 }
 0x181   : > { %v922_v40 = vsel %vm839_vm4, %v921_v33, %v920_v41  ;;  %v1217_v21 = vclz %v8144_v28  ;;  %v9789_v12 = vmul.u32.u64.low %v9724_v55, %v1092_v48  ;;  %v9790_v47 = vmul.u32.u64.high %v9724_v55, %v1092_v48, %v9789_v12 }
 0x182   : > { %v1016_v39 = vor.u32 %v1015_v51, %v1014_v6  ;;  %v1084_v15 = vsel %vm1078_vm12, %v1081_v62, %v1083_v13  ;;  %v1103_v43 = vadd.s32 1, %v9776_v25  ;;  %v1263_v17 = vadd.s32 1, %v8147_v3 }
 0x183   : > { %v15608_v19 = vsel %vm9600_vm6, 0, %v9615_v63  ;;  %8803 = vsinq.f32 %v9701_v9  ;;  %v9803_v46 = vadd.s32 3, %v1030_v50  ;;  %v8145_v30 = vadd.s32 4294967294, %v1217_v21  ;;  %v9814_v9 = vpop.permute.xlu1 %300 }
 0x184   : > { %v9800_v61 = vadd.s32 3, %v15608_v19  ;;  %v9808_v13 = vsel %vm9760_vm8, %v9328_v0, %v922_v40  ;;  %v1021_v32 = vand.u32 2147483647, %v1020_v7  ;;  %v1261_v41 = vor.u32 8388608, %v9752_v31 }
 0x185   : > { %15610 = vst [vmem:[#allocation20_spill] sm:$0xff] %v9803_v46  ;;  %vm1264_vm13 = vcmp.gt.s32.totalorder %v1263_v17, 0  ;;  %vm8146_vm14 = vcmp.lt.s32.totalorder %v8145_v30, 0  ;;  %v1100_v10 = vmul.u32 %v9724_v55, %v1084_v15  ;;  %vm1102_vm6 = vc.u32 %v9790_v47, %v9775_v34 }
 0x186   : > { %15609 = vst [vmem:[#allocation19_spill] sm:$0xff] %v9800_v61  ;;  %v1265_v63 = vsel %vm1264_vm13, %v1263_v17, 0  ;;  %v1023_v37 = vcvt.s32.f32 %v1016_v39  ;;  %v9816_v33 = vsel %vm8146_vm14, 0, %v8145_v30  ;;  %v1104_v50 = vsel %vm1102_vm6, %v1103_v43, %v9776_v25 }
 0x187   : > { %v1267_v51 = vand.u32 31, %v1265_v63  ;;  %v1205_v1 = vadd.s32 %v9687_v5, %v9704_v57  ;;  %v1105_v28 = vadd.s32 %v1104_v50, %v1100_v10  ;;  %v9824_v55 = vadd.f32 %v9346_v27, %v9814_v9 }
 0x188   : > { %v9826_v62 = vmul.f32 %v1023_v37, %v1021_v32  ;;  %v1221_v45 = vsub.s32 32, %v9816_v33  ;;  %v9829_v7 = vshll.u32 %v1261_v41, 8  ;;  %v1225_v25 = vsub.s32 4294967266, %v9816_v33 }
 0x189   : > { %15611 = vst [vmem:[#allocation21_spill] sm:$0xff] %v9824_v55  ;;  %v1268_v6 = vsub.s32 32, %v1267_v51  ;;  %v1106_v48 = vadd.s32 536870912, %v1105_v28  ;;  %v1270_v3 = vshll.u32 %v15607_v4, %v1267_v51  ;;  %v15612_v5 = vmov 2475754826  }
 0x18a   : > { %v1273_v57 = vshll.u32 %v15612_v5, %v1267_v51  ;;  %v15613_v21 = vmov 2131351028   ;;  %v1266_v43 = vshrl.u32 %v1265_v63, 5  ;;  %v1279_v17 = vshll.u32 %v15599_v52, %v1267_v51 }
 0x18b   : > { %v1271_v40 = vshrl.u32 %v15612_v5, %v1268_v6  ;;  %v1274_v12 = vshrl.u32 %v15613_v21, %v1268_v6  ;;  %v1276_v27 = vshll.u32 %v15613_v21, %v1267_v51  ;;  %v1277_v39 = vshrl.u32 %v15599_v52, %v1268_v6 }
 0x18c   : > { %v9838_v15 = vshrl.u32 %v1106_v48, 30  ;;  %v1280_v19 = vshrl.u32 %v15600_v23, %v1268_v6  ;;  %v1360_v61 = vand.u32 2139095040, %v9824_v55  ;;  %v9849_v48 = vadd.f32 %v9403_v8, %v9814_v9 }
 0x18d   : > { %v1272_v30 = vor.u32 %v1271_v40, %v1270_v3  ;;  %v1275_v32 = vor.u32 %v1274_v12, %v1273_v57  ;;  %v1278_v41 = vor.u32 %v1277_v39, %v1276_v27  ;;  %v9843_v37 = vpop.eup %8803  ;;  %vm1151_vm0 = vcmp.lt.s32.totalorder %v9541_v20, 0 }
 0x18e   : > { %v1108_v50 = vshll.u32 %v9838_v15, 30  ;;  %v1281_v31 = vor.u32 %v1280_v19, %v1279_v17  ;;  %15614 = vst [vmem:[#allocation22_spill] sm:$0xff] %v9849_v48  ;;  %v1223_v63 = vshrl.u32 %v1205_v1, %v1221_v45  ;;  %v1226_v46 = vadd.s32 127, %v1225_v25 }
 0x18f   : > { %v1282_v3 = vshll.u32 %v15600_v23, %v1267_v51  ;;  %v1283_v57 = vshrl.u32 %v15601_v16, %v1268_v6  ;;  %vm1285_vm1 = vcmp.lt.s32.totalorder %v1266_v43, 1  ;;  %vm1287_vm3 = vcmp.lt.s32.totalorder %v1266_v43, 3 }
 0x190   : > { %v9854_v40 = vsub.s32 %v1105_v28, %v1108_v50  ;;  %vm1288_vm5 = vcmp.lt.s32.totalorder %v1266_v43, 4  ;;  %v1293_v39 = vsel %vm1285_vm1, %v1272_v30, %v1275_v32  ;;  %v1269_v19 = vshrl.u32 %v15607_v4, %v1268_v6 }
 0x191   : > { %v1284_v12 = vor.u32 %v1283_v57, %v1282_v3  ;;  %v1290_v27 = vsel %vm1288_vm5, %v1278_v41, 2102212464  ;;  %v1294_v17 = vsel %vm1288_vm5, %v1281_v31, 920167782  ;;  %vm1286_vm7 = vcmp.lt.s32.totalorder %v1266_v43, 2 }
 0x192   : > { %v1111_v8 = vsub.s32 0, %v9854_v40  ;;  %v1295_v1 = vsel %vm1287_vm3, %v1278_v41, %v1294_v17  ;;  %v1227_v51 = vshll.u32 %v1226_v46, 23  ;;  %v1297_v28 = vsel %vm1285_vm1, %v1275_v32, %v1278_v41 }
 0x193   : > { %v1296_v45 = vsel %vm1286_vm7, %v1293_v39, %v1295_v1  ;;  %v1298_v25 = vsel %vm1288_vm5, %v1284_v12, 1326507024  ;;  %v1289_v3 = vsel %vm1285_vm1, %v1269_v19, %v1272_v30  ;;  %v1291_v57 = vsel %vm1287_vm3, %v1275_v32, %v1290_v27 }
 0x194   : > { %v8140_v50 = vmin.u32 %v1111_v8, %v9854_v40  ;;  %v1299_v10 = vsel %vm1287_vm3, %v1281_v31, %v1298_v25  ;;  %v15615_v24 = vand.u32 2147483647, %v9541_v20  ;;  %v1361_v12 = vshrl.u32 %v1360_v61, 23 }
 0x195   : > { %v1300_v46 = vsel %vm1286_vm7, %v1297_v28, %v1299_v10  ;;  %v9874_v39 = vmul.u32.u64.low %v9829_v7, %v1296_v45  ;;  %v9875_v41 = vmul.u32.u64.high %v9829_v7, %v1296_v45, %v9874_v39  ;;  %v1025_v30 = vxor.u32 2147483648, %v9826_v62 }
 0x196   : > { %vm9868_vm11 = vcmp.le.f32.partialorder %v15615_v24, 0.7853982  ;;  %v1113_v17 = vclz %v8140_v50  ;;  %v9880_v32 = vmul.u32.u64.low %v9829_v7, %v1300_v46  ;;  %v9881_v31 = vmul.u32.u64.high %v9829_v7, %v1300_v46, %v9880_v32 }
 0x197   : > { %v1222_v24 = vshll.u32 %v9764_v18, %v9816_v33  ;;  %v1228_v27 = vor.u32 4788187, %v1227_v51  ;;  %v1292_v8 = vsel %vm1286_vm7, %v1289_v3, %v1291_v57  ;;  %v8151_v10 = vadd.s32 4294967169, %v1361_v12 }
 0x198   : > { %8805 = vcosq.f32 %v9808_v13  ;;  %v15618_v19 = vsub.s32 4, %v9739_v60  ;;  %v8141_v1 = vadd.s32 4294967294, %v1113_v17  ;;  %v15619_v45 = vand.u32 2147483647, %v9824_v55 }
 0x199   : > { %v1224_v25 = vor.u32 %v1223_v63, %v1222_v24  ;;  %v1311_v18 = vadd.s32 1, %v9875_v41  ;;  %v1367_v33 = vadd.s32 1, %v8151_v10  ;;  %v1568_v43 = vand.u32 2139095040, %v9849_v48 }
 0x19a   : > { %v9892_v61 = vsel %vm1151_vm0, %v15618_v19, %v9739_v60  ;;  %v1364_v28 = vand.u32 8388607, %v15619_v45  ;;  %v1026_v51 = vsel %vm943_vm15, %v1025_v30, %v9826_v62  ;;  %vm8142_vm12 = vcmp.lt.s32.totalorder %v8141_v1, 0  ;;  %v9904_v60 = vpop.f32.mrb[7].mxu1 }
 0x19b   : > { %v1308_v50 = vmul.u32 %v9829_v7, %v1292_v8  ;;  %vm1310_vm13 = vc.u32 %v9881_v31, %v9874_v39  ;;  %v1229_v3 = vand.u32 2147483647, %v1228_v27  ;;  %v1116_v57 = vsel %vm8142_vm12, 0, %v8141_v1 }
 0x19c   : > { %v1312_v63 = vsel %vm1310_vm13, %v1311_v18, %v9875_v41  ;;  %vm1368_vm14 = vcmp.gt.s32.totalorder %v1367_v33, 0  ;;  %8807 = vsinq.f32 %v9808_v13  ;;  %v1121_v46 = vsub.s32 4294967266, %v1116_v57 }
 0x19d   : > { %v1313_v12 = vadd.s32 %v1312_v63, %v1308_v50  ;;  %v1365_v17 = vor.u32 8388608, %v1364_v28  ;;  %v1231_v32 = vcvt.s32.f32 %v1224_v25  ;;  %v1117_v62 = vsub.s32 32, %v1116_v57 }
 0x19e   : > { %v1369_v30 = vsel %vm1368_vm14, %v1367_v33, 0  ;;  %v1569_v24 = vshrl.u32 %v1568_v43, 23  ;;  %v9911_v7 = vsel %vm9712_vm2, %v9484_v29, %v1026_v51  ;;  %v1122_v41 = vadd.s32 127, %v1121_v46 }
 0x19f   : > { %v1314_v8 = vadd.s32 536870912, %v1313_v12  ;;  %v9916_v10 = vmul.f32 %v1231_v32, %v1229_v3  ;;  %v1101_v13 = vadd.s32 %v9775_v34, %v9790_v47  ;;  %v1371_v19 = vand.u32 31, %v1369_v30 }
 0x1a0   : > { %v1118_v45 = vshll.u32 %v9854_v40, %v1116_v57  ;;  %v1123_v28 = vshll.u32 %v1122_v41, 23  ;;  %v9924_v25 = vshll.u32 %v1365_v17, 8  ;;  %v1370_v33 = vshrl.u32 %v1369_v30, 5 }
 0x1a1   : > { %v9922_v26 = vshrl.u32 %v1314_v8, 30  ;;  %v1119_v18 = vshrl.u32 %v1101_v13, %v1117_v62  ;;  %v1372_v43 = vsub.s32 32, %v1371_v19  ;;  %v8159_v51 = vadd.s32 4294967169, %v1569_v24 }
 0x1a2   : > { %v9926_v50 = vpop.eup %8805  ;;  %v1374_v34 = vshll.u32 %v15607_v4, %v1371_v19  ;;  %v1377_v47 = vshll.u32 %v15612_v5, %v1371_v19  ;;  %v1380_v63 = vshll.u32 %v15613_v21, %v1371_v19  ;;  %v1124_v40 = vor.u32 4788187, %v1123_v28 }
 0x1a3   : > { %15620 = vst [vmem:[#allocation23_spill] sm:$0xff] %v9922_v26  ;;  %15621 = vst [vmem:[#allocation24_spill] sm:$0xff] %v9926_v50  ;;  %v1316_v3 = vshll.u32 %v9922_v26, 30  ;;  %v1375_v57 = vshrl.u32 %v15612_v5, %v1372_v43  ;;  %v1378_v46 = vshrl.u32 %v15613_v21, %v1372_v43  ;;  %v1381_v17 = vshrl.u32 %v15599_v52, %v1372_v43 }
 0x1a4   : > { %v1383_v62 = vshll.u32 %v15599_v52, %v1371_v19  ;;  %v1384_v30 = vshrl.u32 %v15600_v23, %v1372_v43  ;;  %v1386_v24 = vshll.u32 %v15600_v23, %v1371_v19  ;;  %v1387_v27 = vshrl.u32 %v15601_v16, %v1372_v43 }
 0x1a5   : > { %v9935_v32 = vsub.s32 %v1313_v12, %v1316_v3  ;;  %v1376_v41 = vor.u32 %v1375_v57, %v1374_v34  ;;  %v1379_v8 = vor.u32 %v1378_v46, %v1377_v47  ;;  %v1382_v13 = vor.u32 %v1381_v17, %v1380_v63 }
 0x1a6   : > { %v9941_v28 = vpop.eup %8807  ;;  %v1120_v1 = vor.u32 %v1119_v18, %v1118_v45  ;;  %v1385_v11 = vor.u32 %v1384_v30, %v1383_v62  ;;  %v1575_v38 = vadd.s32 1, %v8159_v51  ;;  %v1125_v12 = vand.u32 2147483647, %v1124_v40 }
 0x1a7   : > { %15622 = vst [vmem:[#allocation25_spill] sm:$0xff] %v9941_v28  ;;  %v1319_v29 = vsub.s32 0, %v9935_v32  ;;  %v1373_v3 = vshrl.u32 %v15607_v4, %v1372_v43  ;;  %v1388_v50 = vor.u32 %v1387_v27, %v1386_v24  ;;  %vm1389_vm15 = vcmp.lt.s32.totalorder %v1370_v33, 1 }
 0x1a8   : > { %vm1391_vm2 = vcmp.lt.s32.totalorder %v1370_v33, 3  ;;  %vm1392_vm6 = vcmp.lt.s32.totalorder %v1370_v33, 4  ;;  %v1397_v19 = vsel %vm1389_vm15, %v1376_v41, %v1379_v8  ;;  %v1401_v63 = vsel %vm1389_vm15, %v1379_v8, %v1382_v13 }
 0x1a9   : > { %v8148_v22 = vmin.u32 %v1319_v29, %v9935_v32  ;;  %v1394_v34 = vsel %vm1392_vm6, %v1382_v13, 2102212464  ;;  %v1398_v47 = vsel %vm1392_vm6, %v1385_v11, 920167782  ;;  %v1402_v57 = vsel %vm1392_vm6, %v1388_v50, 1326507024 }
 0x1aa   : > { %vm1390_vm1 = vcmp.lt.s32.totalorder %v1370_v33, 2  ;;  %v1399_v45 = vsel %vm1391_vm2, %v1382_v13, %v1398_v47  ;;  %v15623_v18 = vand.u32 2147483647, %v9849_v48  ;;  %v1127_v43 = vcvt.s32.f32 %v1120_v1 }
 0x1ab   : > { %v1321_v46 = vclz %v8148_v22  ;;  %v1393_v27 = vsel %vm1389_vm15, %v1373_v3, %v1376_v41  ;;  %v1400_v40 = vsel %vm1390_vm1, %v1397_v19, %v1399_v45  ;;  %v1403_v29 = vsel %vm1391_vm2, %v1385_v11, %v1402_v57 }
 0x1ac   : > { %v9949_v51 = vand.u32 8388607, %v15623_v18  ;;  %v1395_v62 = vsel %vm1391_vm2, %v1379_v8, %v1394_v34  ;;  %v1404_v30 = vsel %vm1390_vm1, %v1401_v63, %v1403_v29  ;;  %vm1576_vm3 = vcmp.gt.s32.totalorder %v1575_v38, 0 }
 0x1ad   : > { %v8149_v17 = vadd.s32 4294967294, %v1321_v46  ;;  %v1128_v22 = vmul.f32 %v1127_v43, %v1125_v12  ;;  %v9956_v50 = vmul.u32.u64.low %v9924_v25, %v1404_v30  ;;  %v9957_v24 = vmul.u32.u64.high %v9924_v25, %v1404_v30, %v9956_v50 }
 0x1ae   : > { %v1577_v13 = vsel %vm1576_vm3, %v1575_v38, 0  ;;  %8809 = vcosq.f32 %v9911_v7  ;;  %v9961_v1 = vmul.u32.u64.low %v9924_v25, %v1400_v40  ;;  %v9962_v41 = vmul.u32.u64.high %v9924_v25, %v1400_v40, %v9961_v1 }
 0x1af   : > { %vm8150_vm5 = vcmp.lt.s32.totalorder %v8149_v17, 0  ;;  %8811 = vsinq.f32 %v9911_v7  ;;  %v1396_v8 = vsel %vm1390_vm1, %v1393_v27, %v1395_v62  ;;  %v1579_v3 = vand.u32 31, %v1577_v13 }
 0x1b0   : > { %v1324_v11 = vsel %vm8150_vm5, 0, %v8149_v17  ;;  %v1233_v12 = vxor.u32 2147483648, %v9916_v10  ;;  %vm1047_vm7 = vcmp.lt.s32.totalorder %v9608_v49, 0  ;;  %v1309_v38 = vadd.s32 %v9874_v39, %v9881_v31 }
 0x1b1   : > { %v1325_v19 = vsub.s32 32, %v1324_v11  ;;  %v1329_v34 = vsub.s32 4294967266, %v1324_v11  ;;  %v1129_v47 = vxor.u32 2147483648, %v1128_v22  ;;  %vm1414_vm12 = vc.u32 %v9957_v24, %v9961_v1 }
 0x1b2   : > { %v1573_v63 = vor.u32 8388608, %v9949_v51  ;;  %v1580_v7 = vsub.s32 32, %v1579_v3  ;;  %v1412_v33 = vmul.u32 %v9924_v25, %v1396_v8  ;;  %v1415_v46 = vadd.s32 1, %v9962_v41 }
 0x1b3   : > { %v1330_v57 = vadd.s32 127, %v1329_v34  ;;  %v9976_v45 = vshrl.u32 %v1577_v13, 5  ;;  %v1327_v18 = vshrl.u32 %v1309_v38, %v1325_v19  ;;  %v1582_v43 = vshll.u32 %v15607_v4, %v1579_v3 }
 0x1b4   : > { %v1583_v39 = vshrl.u32 %v15612_v5, %v1580_v7  ;;  %v1586_v31 = vshrl.u32 %v15613_v21, %v1580_v7  ;;  %v1416_v40 = vsel %vm1414_vm12, %v1415_v46, %v9962_v41  ;;  %v1585_v51 = vshll.u32 %v15612_v5, %v1579_v3 }
 0x1b5   : > { %v1331_v27 = vshll.u32 %v1330_v57, 23  ;;  %v1589_v29 = vshrl.u32 %v15599_v52, %v1580_v7  ;;  %v1326_v25 = vshll.u32 %v9935_v32, %v1324_v11  ;;  %v1417_v17 = vadd.s32 %v1416_v40, %v1412_v33 }
 0x1b6   : > { %v1584_v62 = vor.u32 %v1583_v39, %v1582_v43  ;;  %v1588_v30 = vshll.u32 %v15613_v21, %v1579_v3  ;;  %v1587_v13 = vor.u32 %v1586_v31, %v1585_v51  ;;  %v1591_v8 = vshll.u32 %v15599_v52, %v1579_v3 }
 0x1b7   : > { %v1332_v50 = vor.u32 4788187, %v1331_v27  ;;  %v1592_v38 = vshrl.u32 %v15600_v23, %v1580_v7  ;;  %v1418_v19 = vadd.s32 536870912, %v1417_v17  ;;  %v1594_v41 = vshll.u32 %v15600_v23, %v1579_v3 }
 0x1b8   : > { %v1590_v34 = vor.u32 %v1589_v29, %v1588_v30  ;;  %v1595_v57 = vshrl.u32 %v15601_v16, %v1580_v7  ;;  %v9990_v46 = vpop.eup %8809  ;;  %v1234_v32 = vsel %vm1151_vm0, %v1233_v12, %v9916_v10  ;;  %v1328_v11 = vor.u32 %v1327_v18, %v1326_v25 }
 0x1b9   : > { %15624 = vst [vmem:[#allocation26_spill] sm:$0xff] %v9990_v46  ;;  %v1593_v33 = vor.u32 %v1592_v38, %v1591_v8  ;;  %v9997_v43 = vadd.f32 %v9467_v56, %v9814_v9  ;;  %v9999_v39 = vpop.eup %8811  ;;  %v15626_v31 = vand.u32 2147483647, %v9608_v49  ;;  %v1130_v27 = vsel %vm1047_vm7, %v1129_v47, %v1128_v22 }
 0x1ba   : > { %15625 = vst [vmem:[#allocation27_spill] sm:$0xff] %v9999_v39  ;;  %v1419_v40 = vshrl.u32 %v1418_v19, 30  ;;  %v1596_v51 = vor.u32 %v1595_v57, %v1594_v41  ;;  %vm1600_vm0 = vcmp.lt.s32.totalorder %v9976_v45, 4  ;;  %v1333_v10 = vand.u32 2147483647, %v1332_v50 }
 0x1bb   : > { %vm10003_vm13 = vcmp.le.f32.partialorder %v15626_v31, 0.7853982  ;;  %vm1359_vm14 = vcmp.lt.s32.totalorder %v9824_v55, 0  ;;  %vm1597_vm15 = vcmp.lt.s32.totalorder %v9976_v45, 1  ;;  %vm1599_vm2 = vcmp.lt.s32.totalorder %v9976_v45, 3 }
 0x1bc   : > { %v1606_v56 = vsel %vm1600_vm0, %v1593_v33, 920167782  ;;  %v1420_v12 = vshll.u32 %v1419_v40, 30  ;;  %v1605_v18 = vsel %vm1597_vm15, %v1584_v62, %v1587_v13  ;;  %v1613_v22 = vshll.u32 %v1573_v63, 8 }
 0x1bd   : > { %v1607_v29 = vsel %vm1599_vm2, %v1590_v34, %v1606_v56  ;;  %v1335_v47 = vcvt.s32.f32 %v1328_v11  ;;  %v1602_v25 = vsel %vm1600_vm0, %v1590_v34, 2102212464  ;;  %v1609_v30 = vsel %vm1597_vm15, %v1587_v13, %v1590_v34 }
 0x1be   : > { %v1610_v50 = vsel %vm1600_vm0, %v1596_v51, 1326507024  ;;  %vm15410_vm6 = vcmp.lt.s32.totalorder %v9695_v59, 0  ;;  %v10020_v8 = vsub.s32 %v1417_v17, %v1420_v12  ;;  %v1581_v38 = vshrl.u32 %v15607_v4, %v1580_v7 }
 0x1bf   : > { %vm1598_vm1 = vcmp.lt.s32.totalorder %v9976_v45, 2  ;;  %v1611_v19 = vsel %vm1599_vm2, %v1593_v33, %v1610_v50  ;;  %v1336_v41 = vmul.f32 %v1335_v47, %v1333_v10  ;;  %v1464_v34 = vand.u32 2139095040, %v9997_v43 }
 0x1c0   : > { %v1608_v63 = vsel %vm1598_vm1, %v1605_v18, %v1607_v29  ;;  %v1612_v57 = vsel %vm1598_vm1, %v1609_v30, %v1611_v19  ;;  %v1423_v11 = vsub.s32 0, %v10020_v8  ;;  %v1443_v17 = vsub.s32 4, %v1419_v40 }
 0x1c1   : > { %v1601_v7 = vsel %vm1597_vm15, %v1581_v38, %v1584_v62  ;;  %v1603_v31 = vsel %vm1599_vm2, %v1587_v13, %v1602_v25  ;;  %v1237_v33 = vsel %vm9868_vm11, %v9541_v20, %v1234_v32  ;;  %v15629_v51 = vand.u32 2147483647, %v9695_v59 }
 0x1c2   : > { %v15630_v10 = vmov 0  ;;  %v10045_v56 = vmul.u32.u64.low %v1613_v22, %v1612_v57  ;;  %v10046_v12 = vmul.u32.u64.high %v1613_v22, %v1612_v57, %v10045_v56  ;;  %v1465_v18 = vshrl.u32 %v1464_v34, 23 }
 0x1c3   : > { %vm10041_vm3 = vcmp.le.f32.partialorder %v15629_v51, 0.7853982  ;;  %v8152_v29 = vmin.u32 %v1423_v11, %v10020_v8  ;;  %v10049_v62 = vmul.u32.u64.low %v1613_v22, %v1608_v63  ;;  %v10050_v47 = vmul.u32.u64.high %v1613_v22, %v1608_v63, %v10049_v62 }
 0x1c4   : > { %v15631_v10 = vsel %vm10041_vm3, 4294967295, %v15630_v10  ;;  %v15389_v13 = vand.u32 2147483647, %v9997_v43  ;;  %v1133_v32 = vsel %vm10003_vm13, %v9608_v49, %v1130_v27  ;;  %v1337_v25 = vxor.u32 2147483648, %v1336_v41 }
 0x1c5   : > { %15632 = vst [vmem:[#allocation28_spill] sm:$0xff] %v15631_v10  ;;  %v1604_v30 = vsel %vm1598_vm1, %v1601_v7, %v1603_v31  ;;  %v8155_v50 = vadd.s32 4294967169, %v1465_v18  ;;  %8813 = vcosq.f32 %v1237_v33  ;;  %v15633_v38 = vsel %vm9868_vm11, 0, %v9892_v61 }
 0x1c6   : > { %v10063_v19 = vadd.s32 3, %v15633_v38  ;;  %v1425_v63 = vclz %v8152_v29  ;;  %v1444_v57 = vsel %vm1359_vm14, %v1443_v17, %v1419_v40  ;;  %8815 = vsinq.f32 %v1237_v33 }
 0x1c7   : > { %v15635_v34 = vand.u32 2147483647, %v9824_v55  ;;  %vm1622_vm12 = vc.u32 %v10046_v12, %v10049_v62  ;;  %v1471_v45 = vadd.s32 1, %v8155_v50  ;;  %8817 = vcosq.f32 %v1133_v32 }
 0x1c8   : > { %15634 = vst [vmem:[#allocation29_spill] sm:$0xff] %v10063_v19  ;;  %v8153_v6 = vadd.s32 4294967294, %v1425_v63  ;;  %v1620_v61 = vmul.u32 %v1613_v22, %v1604_v30  ;;  %v1623_v11 = vadd.s32 1, %v10050_v47  ;;  %v1338_v7 = vsel %vm15410_vm6, %v1337_v25, %v1336_v41 }
 0x1c9   : > { %vm10069_vm5 = vcmp.le.f32.partialorder %v15635_v34, 0.7853982  ;;  %v1468_v17 = vand.u32 8388607, %v15389_v13  ;;  %vm1472_vm11 = vcmp.gt.s32.totalorder %v1471_v45, 0  ;;  %v10085_v51 = vadd.f32 %v9530_v2, %v9814_v9 }
 0x1ca   : > { %v1446_v40 = vsel %vm10069_vm5, 0, %v1444_v57  ;;  %vm8154_vm0 = vcmp.lt.s32.totalorder %v8153_v6, 0  ;;  %v1624_v31 = vsel %vm1622_vm12, %v1623_v11, %v10050_v47  ;;  %v1473_v33 = vsel %vm1472_vm11, %v1471_v45, 0 }
 0x1cb   : > { %8819 = vsinq.f32 %v1133_v32  ;;  %v1428_v22 = vsel %vm8154_vm0, 0, %v8153_v6  ;;  %v1625_v56 = vadd.s32 %v1624_v31, %v1620_v61  ;;  %v1475_v18 = vand.u32 31, %v1473_v33 }
 0x1cc   : > { %v10090_v41 = vsel %vm10041_vm3, %v9695_v59, %v1338_v7  ;;  %v1413_v29 = vadd.s32 %v9961_v1, %v9957_v24  ;;  %v1429_v25 = vsub.s32 32, %v1428_v22  ;;  %v1433_v30 = vsub.s32 4294967266, %v1428_v22 }
 0x1cd   : > { %v10094_v47 = vadd.s32 3, %v1446_v40  ;;  %v1626_v50 = vadd.s32 536870912, %v1625_v56  ;;  %v1469_v38 = vor.u32 8388608, %v1468_v17  ;;  %v1476_v2 = vsub.s32 32, %v1475_v18 }
 0x1ce   : > { %v1434_v9 = vadd.s32 127, %v1433_v30  ;;  %v1478_v32 = vshll.u32 %v15607_v4, %v1475_v18  ;;  %v1481_v63 = vshll.u32 %v15612_v5, %v1475_v18  ;;  %v1672_v57 = vand.u32 2139095040, %v10085_v51 }
 0x1cf   : > { %15638 = vst [vmem:[#allocation30_spill] sm:$0xff] %v10094_v47  ;;  %v1431_v34 = vshrl.u32 %v1413_v29, %v1429_v25  ;;  %v10099_v45 = vshrl.u32 %v1626_v50, 30  ;;  %v1479_v6 = vshrl.u32 %v15612_v5, %v1476_v2  ;;  %v1482_v24 = vshrl.u32 %v15613_v21, %v1476_v2  ;;  %v10103_v1 = vpop.eup %8813 }
 0x1d0   : > { %15639 = vst [vmem:[#allocation31_spill] sm:$0xff] %v10103_v1  ;;  %v1435_v61 = vshll.u32 %v1434_v9, 23  ;;  %v1484_v11 = vshll.u32 %v15613_v21, %v1475_v18  ;;  %v1485_v7 = vshrl.u32 %v15599_v52, %v1476_v2  ;;  %v1488_v40 = vshrl.u32 %v15600_v23, %v1476_v2  ;;  %v10108_v17 = vpop.eup %8815 }
 0x1d1   : > { %15640 = vst [vmem:[#allocation32_spill] sm:$0xff] %v10108_v17  ;;  %v1430_v31 = vshll.u32 %v10020_v8, %v1428_v22  ;;  %v1628_v29 = vshll.u32 %v10099_v45, 30  ;;  %v1474_v25 = vshrl.u32 %v1473_v33, 5  ;;  %v1487_v30 = vshll.u32 %v15599_v52, %v1475_v18  ;;  %v10113_v50 = vpop.eup %8817 }
 0x1d2   : > { %v1436_v13 = vor.u32 4788187, %v1435_v61  ;;  %v1480_v47 = vor.u32 %v1479_v6, %v1478_v32  ;;  %v1483_v9 = vor.u32 %v1482_v24, %v1481_v63  ;;  %v1486_v20 = vor.u32 %v1485_v7, %v1484_v11 }
 0x1d3   : > { %v10115_v1 = vsub.s32 %v1625_v56, %v1628_v29  ;;  %v1489_v19 = vor.u32 %v1488_v40, %v1487_v30  ;;  %v1490_v46 = vshll.u32 %v15600_v23, %v1475_v18  ;;  %v1491_v17 = vshrl.u32 %v15601_v16, %v1476_v2 }
 0x1d4   : > { %v1432_v39 = vor.u32 %v1431_v34, %v1430_v31  ;;  %v1509_v8 = vshll.u32 %v1469_v38, 8  ;;  %v15398_v22 = vand.u32 2147483647, %v10085_v51  ;;  %v1673_v33 = vshrl.u32 %v1672_v57, 23 }
 0x1d5   : > { %v10120_v10 = vpop.eup %8819  ;;  %v1631_v59 = vsub.s32 0, %v10115_v1  ;;  %v1477_v32 = vshrl.u32 %v15607_v4, %v1476_v2  ;;  %v1492_v63 = vor.u32 %v1491_v17, %v1490_v46  ;;  %vm1493_vm15 = vcmp.lt.s32.totalorder %v1474_v25, 1 }
 0x1d6   : > { %v1437_v56 = vand.u32 2147483647, %v1436_v13  ;;  %vm1495_vm2 = vcmp.lt.s32.totalorder %v1474_v25, 3  ;;  %vm1496_vm1 = vcmp.lt.s32.totalorder %v1474_v25, 4  ;;  %v1501_v6 = vsel %vm1493_vm15, %v1480_v47, %v1483_v9 }
 0x1d7   : > { %v8160_v18 = vmin.u32 %v1631_v59, %v10115_v1  ;;  %v1498_v24 = vsel %vm1496_vm1, %v1486_v20, 2102212464  ;;  %v1502_v34 = vsel %vm1496_vm1, %v1489_v19, 920167782  ;;  %v1505_v38 = vsel %vm1493_vm15, %v1483_v9, %v1486_v20 }
 0x1d8   : > { %v1439_v61 = vcvt.s32.f32 %v1432_v39  ;;  %vm1494_vm12 = vcmp.lt.s32.totalorder %v1474_v25, 2  ;;  %v1503_v57 = vsel %vm1495_vm2, %v1486_v20, %v1502_v34  ;;  %v1506_v11 = vsel %vm1496_vm1, %v1492_v63, 1326507024  ;;  %v10135_v39 = vpop.permute.xlu1 %305 }
 0x1d9   : > { %vm1567_vm11 = vcmp.lt.s32.totalorder %v9849_v48, 0  ;;  %v1633_v7 = vclz %v8160_v18  ;;  %v1497_v2 = vsel %vm1493_vm15, %v1477_v32, %v1480_v47  ;;  %v1504_v46 = vsel %vm1494_vm12, %v1501_v6, %v1503_v57 }
 0x1da   : > { %v1507_v13 = vsel %vm1495_vm2, %v1489_v19, %v1506_v11  ;;  %v1499_v40 = vsel %vm1495_vm2, %v1483_v9, %v1498_v24  ;;  %v10131_v17 = vmul.u32.u64.low %v1509_v8, %v1504_v46  ;;  %v10132_v31 = vmul.u32.u64.high %v1509_v8, %v1504_v46, %v10131_v17 }
 0x1db   : > { %v1508_v59 = vsel %vm1494_vm12, %v1505_v38, %v1507_v13  ;;  %v1440_v20 = vmul.f32 %v1439_v61, %v1437_v56  ;;  %v8161_v29 = vadd.s32 4294967294, %v1633_v7  ;;  %8821 = vcosq.f32 %v10090_v41 }
 0x1dc   : > { %v10137_v30 = vmul.u32.u64.low %v1509_v8, %v1508_v59  ;;  %v10138_v63 = vmul.u32.u64.high %v1509_v8, %v1508_v59, %v10137_v30  ;;  %v8163_v47 = vadd.s32 4294967169, %v1673_v33  ;;  %v1676_v19 = vand.u32 8388607, %v15398_v22 }
 0x1dd   : > { %v10145_v9 = vadd.f32 %v9629_v14, %v10135_v39  ;;  %v1621_v32 = vadd.s32 %v10049_v62, %v10046_v12  ;;  %vm8162_vm0 = vcmp.lt.s32.totalorder %v8161_v29, 0  ;;  %v1500_v56 = vsel %vm1494_vm12, %v1497_v2, %v1499_v40 }
 0x1de   : > { %v10152_v6 = vadd.f32 %v9685_v58, %v10135_v39  ;;  %v1636_v18 = vsel %vm8162_vm0, 0, %v8161_v29  ;;  %v1651_v33 = vsub.s32 4, %v10099_v45  ;;  %v1519_v24 = vadd.s32 1, %v10132_v31 }
 0x1df   : > { %v1679_v34 = vadd.s32 1, %v8163_v47  ;;  %v1441_v38 = vxor.u32 2147483648, %v1440_v20  ;;  %v1637_v61 = vsub.s32 32, %v1636_v18  ;;  %v1641_v14 = vsub.s32 4294967266, %v1636_v18 }
 0x1e0   : > { %v1677_v57 = vor.u32 8388608, %v1676_v19  ;;  %v1516_v11 = vmul.u32 %v1509_v8, %v1500_v56  ;;  %vm1518_vm15 = vc.u32 %v10138_v63, %v10131_v17  ;;  %v1776_v12 = vand.u32 2139095040, %v10145_v9 }
 0x1e1   : > { %vm1680_vm2 = vcmp.gt.s32.totalorder %v1679_v34, 0  ;;  %v1639_v62 = vshrl.u32 %v1621_v32, %v1637_v61  ;;  %v1642_v58 = vadd.s32 127, %v1641_v14  ;;  %v1520_v25 = vsel %vm1518_vm15, %v1519_v24, %v10132_v31 }
 0x1e2   : > { %v1681_v7 = vsel %vm1680_vm2, %v1679_v34, 0  ;;  %v10163_v2 = vsel %vm1567_vm11, %v1651_v33, %v10099_v45  ;;  %v1521_v46 = vadd.s32 %v1520_v25, %v1516_v11  ;;  %v1773_v8 = vand.u32 2147483647, %v10145_v9 }
 0x1e3   : > { %v1683_v13 = vand.u32 31, %v1681_v7  ;;  %v1442_v40 = vsel %vm1359_vm14, %v1441_v38, %v1440_v20  ;;  %v1638_v59 = vshll.u32 %v10115_v1, %v1636_v18  ;;  %v1643_v29 = vshll.u32 %v1642_v58, 23 }
 0x1e4   : > { %v10169_v30 = vshll.u32 %v1677_v57, 8  ;;  %v1522_v47 = vadd.s32 536870912, %v1521_v46  ;;  %v1682_v31 = vshrl.u32 %v1681_v7, 5  ;;  %v1777_v32 = vshrl.u32 %v1776_v12, 23 }
 0x1e5   : > { %v1684_v19 = vsub.s32 32, %v1683_v13  ;;  %v1640_v56 = vor.u32 %v1639_v62, %v1638_v59  ;;  %v1644_v24 = vor.u32 4788187, %v1643_v29  ;;  %v1686_v45 = vshll.u32 %v15607_v4, %v1683_v13  ;;  %v10173_v34 = vpop.eup %8821 }
 0x1e6   : > { %v1689_v33 = vshll.u32 %v15612_v5, %v1683_v13  ;;  %15641 = vst [vmem:[#allocation33_spill] sm:$0xff] %v10173_v34  ;;  %v10175_v61 = vshrl.u32 %v1522_v47, 30  ;;  %v1692_v18 = vshll.u32 %v15613_v21, %v1683_v13  ;;  %v1695_v14 = vshll.u32 %v15599_v52, %v1683_v13 }
 0x1e7   : > { %v1687_v20 = vshrl.u32 %v15612_v5, %v1684_v19  ;;  %v1690_v1 = vshrl.u32 %v15613_v21, %v1684_v19  ;;  %v1693_v38 = vshrl.u32 %v15599_v52, %v1684_v19  ;;  %v1696_v57 = vshrl.u32 %v15600_v23, %v1684_v19 }
 0x1e8   : > { %15642 = vst [vmem:[#allocation34_spill] sm:$0xff] %v10175_v61  ;;  %v1698_v11 = vshll.u32 %v15600_v23, %v1683_v13  ;;  %v15643_v12 = vand.u32 2147483647, %v9849_v48  ;;  %v1524_v58 = vshll.u32 %v10175_v61, 30  ;;  %v1699_v59 = vshrl.u32 %v15601_v16, %v1684_v19 }
 0x1e9   : > { %v1688_v25 = vor.u32 %v1687_v20, %v1686_v45  ;;  %v1691_v7 = vor.u32 %v1690_v1, %v1689_v33  ;;  %v1694_v29 = vor.u32 %v1693_v38, %v1692_v18  ;;  %v1697_v47 = vor.u32 %v1696_v57, %v1695_v14 }
 0x1ea   : > { %vm10186_vm14 = vcmp.le.f32.partialorder %v15643_v12, 0.7853982  ;;  %v8167_v22 = vadd.s32 4294967169, %v1777_v32  ;;  %v1780_v34 = vand.u32 8388607, %v1773_v8  ;;  %v10194_v13 = vsub.s32 %v1521_v46, %v1524_v58 }
 0x1eb   : > { %v1645_v28 = vand.u32 2147483647, %v1644_v24  ;;  %v1700_v26 = vor.u32 %v1699_v59, %v1698_v11  ;;  %vm1701_vm1 = vcmp.lt.s32.totalorder %v1682_v31, 1  ;;  %v1647_v12 = vcvt.s32.f32 %v1640_v56 }
 0x1ec   : > { %v1685_v0 = vshrl.u32 %v15607_v4, %v1684_v19  ;;  %vm1704_vm12 = vcmp.lt.s32.totalorder %v1682_v31, 4  ;;  %v1709_v61 = vsel %vm1701_vm1, %v1688_v25, %v1691_v7  ;;  %v1527_v45 = vsub.s32 0, %v10194_v13 }
 0x1ed   : > { %vm1703_vm0 = vcmp.lt.s32.totalorder %v1682_v31, 3  ;;  %v1706_v33 = vsel %vm1704_vm12, %v1694_v29, 2102212464  ;;  %v1710_v20 = vsel %vm1704_vm12, %v1697_v47, 920167782  ;;  %vm1702_vm15 = vcmp.lt.s32.totalorder %v1682_v31, 2 }
 0x1ee   : > { %v1711_v32 = vsel %vm1703_vm0, %v1694_v29, %v1710_v20  ;;  %v1713_v1 = vsel %vm1701_vm1, %v1691_v7, %v1694_v29  ;;  %v1714_v18 = vsel %vm1704_vm12, %v1700_v26, 1326507024  ;;  %v1648_v38 = vmul.f32 %v1647_v12, %v1645_v28 }
 0x1ef   : > { %v8156_v46 = vmin.u32 %v1527_v45, %v10194_v13  ;;  %v1705_v24 = vsel %vm1701_vm1, %v1685_v0, %v1688_v25  ;;  %v1712_v14 = vsel %vm1702_vm15, %v1709_v61, %v1711_v32  ;;  %v1707_v56 = vsel %vm1703_vm0, %v1691_v7, %v1706_v33 }
 0x1f0   : > { %v1715_v57 = vsel %vm1703_vm0, %v1697_v47, %v1714_v18  ;;  %v10201_v19 = vmul.u32.u64.low %v10169_v30, %v1712_v14  ;;  %v10202_v11 = vmul.u32.u64.high %v10169_v30, %v1712_v14, %v10201_v19  ;;  %8823 = vsinq.f32 %v10090_v41 }
 0x1f1   : > { %v1529_v58 = vclz %v8156_v46  ;;  %v1716_v59 = vsel %vm1702_vm15, %v1713_v1, %v1715_v57  ;;  %v10209_v26 = vadd.f32 %v9794_v36, %v10135_v39  ;;  %v1654_v0 = vsel %vm10186_vm14, 0, %v10163_v2 }
 0x1f2   : > { %v10215_v28 = vmul.u32.u64.low %v10169_v30, %v1716_v59  ;;  %v10216_v61 = vmul.u32.u64.high %v10169_v30, %v1716_v59, %v10215_v28  ;;  %v1783_v25 = vadd.s32 1, %v8167_v22  ;;  %v10221_v41 = vsel %vm10069_vm5, %v9824_v55, %v1442_v40 }
 0x1f3   : > { %v1649_v7 = vxor.u32 2147483648, %v1648_v38  ;;  %v8157_v29 = vadd.s32 4294967294, %v1529_v58  ;;  %v1708_v47 = vsel %vm1702_vm15, %v1705_v24, %v1707_v56  ;;  %v1727_v36 = vadd.s32 1, %v10202_v11 }
 0x1f4   : > { %v1781_v12 = vor.u32 8388608, %v1780_v34  ;;  %vm1784_vm2 = vcmp.gt.s32.totalorder %v1783_v25, 0  ;;  %v1984_v45 = vand.u32 2139095040, %v10152_v6  ;;  %v1517_v33 = vadd.s32 %v10131_v17, %v10138_v63 }
 0x1f5   : > { %vm8158_vm1 = vcmp.lt.s32.totalorder %v8157_v29, 0  ;;  %v1785_v22 = vsel %vm1784_vm2, %v1783_v25, 0  ;;  %v15407_v20 = vand.u32 2147483647, %v10152_v6  ;;  %v1724_v40 = vmul.u32 %v10169_v30, %v1708_v47 }
 0x1f6   : > { %v1532_v27 = vsel %vm8158_vm1, 0, %v8157_v29  ;;  %vm1726_vm5 = vc.u32 %v10216_v61, %v10201_v19  ;;  %v10232_v31 = vshrl.u32 %v1785_v22, 5  ;;  %v1650_v34 = vsel %vm1567_vm11, %v1649_v7, %v1648_v38 }
 0x1f7   : > { %v1533_v32 = vsub.s32 32, %v1532_v27  ;;  %v1537_v1 = vsub.s32 4294967266, %v1532_v27  ;;  %v1728_v18 = vsel %vm1726_vm5, %v1727_v36, %v10202_v11  ;;  %v1787_v63 = vand.u32 31, %v1785_v22 }
 0x1f8   : > { %v1729_v17 = vadd.s32 %v1728_v18, %v1724_v40  ;;  %v10237_v46 = vshll.u32 %v1781_v12, 8  ;;  %v1985_v24 = vshrl.u32 %v1984_v45, 23  ;;  %v1534_v14 = vshll.u32 %v10194_v13, %v1532_v27 }
 0x1f9   : > { %v1535_v30 = vshrl.u32 %v1517_v33, %v1533_v32  ;;  %v1538_v56 = vadd.s32 127, %v1537_v1  ;;  %vm1805_vm12 = vcmp.lt.s32.totalorder %v10232_v31, 1  ;;  %v1788_v58 = vsub.s32 32, %v1787_v63 }
 0x1fa   : > { %v1730_v57 = vadd.s32 536870912, %v1729_v17  ;;  %v1790_v59 = vshll.u32 %v15607_v4, %v1787_v63  ;;  %vm1806_vm11 = vcmp.lt.s32.totalorder %v10232_v31, 2  ;;  %vm1807_vm0 = vcmp.lt.s32.totalorder %v10232_v31, 3  ;;  %v10244_v38 = vpop.eup %8823 }
 0x1fb   : > { %v1536_v11 = vor.u32 %v1535_v30, %v1534_v14  ;;  %v1539_v28 = vshll.u32 %v1538_v56, 23  ;;  %v1793_v25 = vshll.u32 %v15612_v5, %v1787_v63  ;;  %v1796_v13 = vshll.u32 %v15613_v21, %v1787_v63 }
 0x1fc   : > { %v10248_v7 = vshrl.u32 %v1730_v57, 30  ;;  %v1791_v29 = vshrl.u32 %v15612_v5, %v1788_v58  ;;  %v1794_v47 = vshrl.u32 %v15613_v21, %v1788_v58  ;;  %v1799_v36 = vshll.u32 %v15599_v52, %v1787_v63 }
 0x1fd   : > { %v1540_v12 = vor.u32 4788187, %v1539_v28  ;;  %v1543_v45 = vcvt.s32.f32 %v1536_v11  ;;  %v1797_v33 = vshrl.u32 %v15599_v52, %v1788_v58  ;;  %v1800_v22 = vshrl.u32 %v15600_v23, %v1788_v58 }
 0x1fe   : > { %v1732_v27 = vshll.u32 %v10248_v7, 30  ;;  %v1792_v40 = vor.u32 %v1791_v29, %v1790_v59  ;;  %v1795_v32 = vor.u32 %v1794_v47, %v1793_v25  ;;  %v1802_v1 = vshll.u32 %v15600_v23, %v1787_v63 }
 0x1ff   : > { %v1541_v18 = vand.u32 2147483647, %v1540_v12  ;;  %v1798_v14 = vor.u32 %v1797_v33, %v1796_v13  ;;  %v1801_v30 = vor.u32 %v1800_v22, %v1799_v36  ;;  %v1803_v56 = vshrl.u32 %v15601_v16, %v1788_v58 }
 0x200   : > { %vm15409_vm15 = vcmp.lt.s32.totalorder %v9997_v43, 0  ;;  %v10259_v57 = vsub.s32 %v1729_v17, %v1732_v27  ;;  %v1789_v11 = vshrl.u32 %v15607_v4, %v1788_v58  ;;  %vm1808_vm2 = vcmp.lt.s32.totalorder %v10232_v31, 4 }
 0x201   : > { %v1813_v28 = vsel %vm1805_vm12, %v1792_v40, %v1795_v32  ;;  %v1544_v59 = vmul.f32 %v1543_v45, %v1541_v18  ;;  %v1804_v25 = vor.u32 %v1803_v56, %v1802_v1  ;;  %v1810_v29 = vsel %vm1808_vm2, %v1798_v14, 2102212464 }
 0x202   : > { %v1814_v63 = vsel %vm1808_vm2, %v1801_v30, 920167782  ;;  %v1735_v13 = vsub.s32 0, %v10259_v57  ;;  %v1809_v47 = vsel %vm1805_vm12, %v1789_v11, %v1792_v40  ;;  %v1817_v58 = vsel %vm1805_vm12, %v1795_v32, %v1798_v14 }
 0x203   : > { %v1815_v17 = vsel %vm1807_vm0, %v1798_v14, %v1814_v63  ;;  %v15646_v36 = vand.u32 2147483647, %v9997_v43  ;;  %v1811_v45 = vsel %vm1807_vm0, %v1795_v32, %v1810_v29  ;;  %v1818_v22 = vsel %vm1808_vm2, %v1804_v25, 1326507024 }
 0x204   : > { %v1816_v33 = vsel %vm1806_vm11, %v1813_v28, %v1815_v17  ;;  %v8175_v27 = vadd.s32 4294967169, %v1985_v24  ;;  %v8164_v40 = vmin.u32 %v1735_v13, %v10259_v57  ;;  %v1819_v1 = vsel %vm1807_vm0, %v1801_v30, %v1818_v22 }
 0x205   : > { %vm10274_vm1 = vcmp.le.f32.partialorder %v15646_v36, 0.7853982  ;;  %v10286_v18 = vmul.u32.u64.low %v10237_v46, %v1816_v33  ;;  %v10287_v14 = vmul.u32.u64.high %v10237_v46, %v1816_v33, %v10286_v18  ;;  %v1653_v56 = vsel %vm10186_vm14, %v9849_v48, %v1650_v34 }
 0x206   : > { %v1545_v32 = vxor.u32 2147483648, %v1544_v59  ;;  %v1820_v11 = vsel %vm1806_vm11, %v1817_v58, %v1819_v1  ;;  %v1988_v24 = vand.u32 8388607, %v15407_v20  ;;  %8825 = vcosq.f32 %v10221_v41 }
 0x207   : > { %v1737_v28 = vclz %v8164_v40  ;;  %v10299_v30 = vmul.u32.u64.low %v10237_v46, %v1820_v11  ;;  %v10300_v25 = vmul.u32.u64.high %v10237_v46, %v1820_v11, %v10299_v30  ;;  %8827 = vsinq.f32 %v10221_v41 }
 0x208   : > { %v1812_v29 = vsel %vm1806_vm11, %v1809_v47, %v1811_v45  ;;  %v1991_v34 = vadd.s32 1, %v8175_v27  ;;  %v10307_v63 = vadd.f32 %v9904_v60, %v10135_v39  ;;  %8829 = vcosq.f32 %v1653_v56 }
 0x209   : > { %v10313_v13 = vadd.s32 3, %v1654_v0  ;;  %v8165_v17 = vadd.s32 4294967294, %v1737_v28  ;;  %v1831_v58 = vadd.s32 1, %v10287_v14  ;;  %8831 = vsinq.f32 %v1653_v56 }
 0x20a   : > { %v1546_v41 = vsel %vm15409_vm15, %v1545_v32, %v1544_v59  ;;  %v1989_v31 = vor.u32 8388608, %v1988_v24  ;;  %vm1992_vm5 = vcmp.gt.s32.totalorder %v1991_v34, 0  ;;  %v1828_v60 = vmul.u32 %v10237_v46, %v1812_v29 }
 0x20b   : > { %15649 = vst [vmem:[#allocation35_spill] sm:$0xff] %v10313_v13  ;;  %vm8166_vm12 = vcmp.lt.s32.totalorder %v8165_v17, 0  ;;  %vm1830_vm11 = vc.u32 %v10300_v25, %v10286_v18  ;;  %v1993_v39 = vsel %vm1992_vm5, %v1991_v34, 0  ;;  %v1725_v2 = vadd.s32 %v10201_v19, %v10216_v61 }
 0x20c   : > { %v1740_v62 = vsel %vm8166_vm12, 0, %v8165_v17  ;;  %v1832_v0 = vsel %vm1830_vm11, %v1831_v58, %v10287_v14  ;;  %v1995_v47 = vand.u32 31, %v1993_v39  ;;  %v10327_v59 = vsel %vm10274_vm1, %v9997_v43, %v1546_v41 }
 0x20d   : > { %v1741_v36 = vsub.s32 32, %v1740_v62  ;;  %v1745_v45 = vsub.s32 4294967266, %v1740_v62  ;;  %v1833_v33 = vadd.s32 %v1832_v0, %v1828_v60  ;;  %v1742_v46 = vshll.u32 %v10259_v57, %v1740_v62 }
 0x20e   : > { %vm1775_vm14 = vcmp.lt.s32.totalorder %v10145_v9, 0  ;;  %v1996_v22 = vsub.s32 32, %v1995_v47  ;;  %v10331_v27 = vshll.u32 %v1989_v31, 8  ;;  %v1880_v19 = vand.u32 2139095040, %v10209_v26 }
 0x20f   : > { %v1743_v61 = vshrl.u32 %v1725_v2, %v1741_v36  ;;  %v1746_v40 = vadd.s32 127, %v1745_v45  ;;  %v1834_v1 = vadd.s32 536870912, %v1833_v33  ;;  %v1998_v14 = vshll.u32 %v15607_v4, %v1995_v47 }
 0x210   : > { %v1999_v56 = vshrl.u32 %v15612_v5, %v1996_v22  ;;  %v2002_v32 = vshrl.u32 %v15613_v21, %v1996_v22  ;;  %v2004_v11 = vshll.u32 %v15613_v21, %v1995_v47  ;;  %v2005_v57 = vshrl.u32 %v15599_v52, %v1996_v22  ;;  %v10339_v24 = vpop.eup %8825 }
 0x211   : > { %15650 = vst [vmem:[#allocation36_spill] sm:$0xff] %v10339_v24  ;;  %v1744_v28 = vor.u32 %v1743_v61, %v1742_v46  ;;  %v1747_v30 = vshll.u32 %v1746_v40, 23  ;;  %v1835_v29 = vshrl.u32 %v1834_v1, 30  ;;  %v2008_v34 = vshrl.u32 %v15600_v23, %v1996_v22  ;;  %v10342_v17 = vpop.eup %8827 }
 0x212   : > { %v1994_v58 = vshrl.u32 %v1993_v39, 5  ;;  %v2000_v41 = vor.u32 %v1999_v56, %v1998_v14  ;;  %v2001_v31 = vshll.u32 %v15612_v5, %v1995_v47  ;;  %v2007_v60 = vshll.u32 %v15599_v52, %v1995_v47  ;;  %v10346_v2 = vpop.eup %8829 }
 0x213   : > { %15651 = vst [vmem:[#allocation37_spill] sm:$0xff] %v10346_v2  ;;  %v1748_v62 = vor.u32 4788187, %v1747_v30  ;;  %vm10350_vm0 = vcmp.le.f32.partialorder %v1773_v8, 0.7853982  ;;  %v1836_v36 = vshll.u32 %v1835_v29, 30  ;;  %v2006_v46 = vor.u32 %v2005_v57, %v2004_v11  ;;  %v10354_v61 = vpop.eup %8831 }
 0x214   : > { %v1859_v45 = vsub.s32 4, %v1835_v29  ;;  %15654 = vst [vmem:[#allocation38_spill] sm:$0xff] %v10354_v61  ;;  %v2003_v39 = vor.u32 %v2002_v32, %v2001_v31  ;;  %v2009_v40 = vor.u32 %v2008_v34, %v2007_v60  ;;  %v2010_v1 = vshll.u32 %v15600_v23, %v1995_v47 }
 0x215   : > { %v2011_v14 = vshrl.u32 %v15601_v16, %v1996_v22  ;;  %vm15417_vm2 = vcmp.lt.s32.totalorder %v10085_v51, 0  ;;  %v1749_v56 = vand.u32 2147483647, %v1748_v62  ;;  %v1751_v30 = vcvt.s32.f32 %v1744_v28 }
 0x216   : > { %v10359_v20 = vsub.s32 %v1833_v33, %v1836_v36  ;;  %v1997_v8 = vshrl.u32 %v15607_v4, %v1996_v22  ;;  %vm2013_vm5 = vcmp.lt.s32.totalorder %v1994_v58, 1  ;;  %vm2014_vm12 = vcmp.lt.s32.totalorder %v1994_v58, 2 }
 0x217   : > { %v2012_v48 = vor.u32 %v2011_v14, %v2010_v1  ;;  %vm2016_vm11 = vcmp.lt.s32.totalorder %v1994_v58, 4  ;;  %v1752_v11 = vmul.f32 %v1751_v30, %v1749_v56  ;;  %v1860_v47 = vsel %vm1775_vm14, %v1859_v45, %v1835_v29 }
 0x218   : > { %v1839_v32 = vsub.s32 0, %v10359_v20  ;;  %v2018_v57 = vsel %vm2016_vm11, %v2006_v46, 2102212464  ;;  %v15655_v34 = vand.u32 2147483647, %v10085_v51  ;;  %vm2015_vm6 = vcmp.lt.s32.totalorder %v1994_v58, 3 }
 0x219   : > { %v2017_v33 = vsel %vm2013_vm5, %v1997_v8, %v2000_v41  ;;  %v2021_v22 = vsel %vm2013_vm5, %v2000_v41, %v2003_v39  ;;  %v2022_v31 = vsel %vm2016_vm11, %v2009_v40, 920167782  ;;  %v2019_v62 = vsel %vm2015_vm6, %v2003_v39, %v2018_v57 }
 0x21a   : > { %vm10368_vm15 = vcmp.le.f32.partialorder %v15655_v34, 0.7853982  ;;  %v8168_v60 = vmin.u32 %v1839_v32, %v10359_v20  ;;  %v2023_v36 = vsel %vm2015_vm6, %v2006_v46, %v2022_v31  ;;  %v2025_v1 = vsel %vm2013_vm5, %v2003_v39, %v2006_v46 }
 0x21b   : > { %v1753_v14 = vxor.u32 2147483648, %v1752_v11  ;;  %v2024_v29 = vsel %vm2014_vm12, %v2021_v22, %v2023_v36  ;;  %v2026_v45 = vsel %vm2016_vm11, %v2012_v48, 1326507024  ;;  %v1881_v56 = vshrl.u32 %v1880_v19, 23 }
 0x21c   : > { %8833 = vcosq.f32 %v10327_v59  ;;  %v1841_v30 = vclz %v8168_v60  ;;  %v2027_v34 = vsel %vm2015_vm6, %v2009_v40, %v2026_v45  ;;  %v15411_v8 = vand.u32 2147483647, %v10209_v26 }
 0x21d   : > { %v1862_v41 = vsel %vm10350_vm0, 0, %v1860_v47  ;;  %v2028_v32 = vsel %vm2014_vm12, %v2025_v1, %v2027_v34  ;;  %v10382_v57 = vmul.u32.u64.low %v10331_v27, %v2024_v29  ;;  %v10383_v46 = vmul.u32.u64.high %v10331_v27, %v2024_v29, %v10382_v57 }
 0x21e   : > { %v8169_v39 = vadd.s32 4294967294, %v1841_v30  ;;  %v2020_v48 = vsel %vm2014_vm12, %v2017_v33, %v2019_v62  ;;  %v10388_v19 = vmul.u32.u64.low %v10331_v27, %v2028_v32  ;;  %v10389_v22 = vmul.u32.u64.high %v10331_v27, %v2028_v32, %v10388_v19 }
 0x21f   : > { %8835 = vsinq.f32 %v10327_v59  ;;  %v1754_v40 = vsel %vm15417_vm2, %v1753_v14, %v1752_v11  ;;  %v8171_v47 = vadd.s32 4294967169, %v1881_v56  ;;  %v15413_v31 = vand.u32 2147483647, %v10307_v63 }
 0x220   : > { %v1829_v60 = vadd.s32 %v10286_v18, %v10300_v25  ;;  %vm8170_vm6 = vcmp.lt.s32.totalorder %v8169_v39, 0  ;;  %v10397_v36 = vadd.s32 3, %v1862_v41  ;;  %v1884_v58 = vand.u32 8388607, %v15411_v8 }
 0x221   : > { %v1844_v33 = vsel %vm8170_vm6, 0, %v8169_v39  ;;  %v2036_v62 = vmul.u32 %v10331_v27, %v2020_v48  ;;  %v2039_v59 = vadd.s32 1, %v10383_v46  ;;  %v1887_v1 = vadd.s32 1, %v8171_v47 }
 0x222   : > { %15658 = vst [vmem:[#allocation39_spill] sm:$0xff] %v10397_v36  ;;  %v1757_v11 = vsel %vm10368_vm15, %v10085_v51, %v1754_v40  ;;  %v1845_v14 = vsub.s32 32, %v1844_v33  ;;  %v1849_v29 = vsub.s32 4294967266, %v1844_v33  ;;  %v2088_v18 = vand.u32 2139095040, %v10307_v63 }
 0x223   : > { %v1846_v25 = vshll.u32 %v10359_v20, %v1844_v33  ;;  %vm2038_vm5 = vc.u32 %v10389_v22, %v10382_v57  ;;  %vm1888_vm12 = vcmp.gt.s32.totalorder %v1887_v1, 0  ;;  %v2092_v27 = vand.u32 8388607, %v15413_v31 }
 0x224   : > { %v1847_v45 = vshrl.u32 %v1829_v60, %v1845_v14  ;;  %v1850_v56 = vadd.s32 127, %v1849_v29  ;;  %v2040_v30 = vsel %vm2038_vm5, %v2039_v59, %v10383_v46  ;;  %v1889_v34 = vsel %vm1888_vm12, %v1887_v1, 0 }
 0x225   : > { %8837 = vcosq.f32 %v1757_v11  ;;  %v2041_v41 = vadd.s32 %v2040_v30, %v2036_v62  ;;  %v1885_v32 = vor.u32 8388608, %v1884_v58  ;;  %v1891_v39 = vand.u32 31, %v1889_v34 }
 0x226   : > { %v10413_v48 = vpop.eup %8833  ;;  %8839 = vsinq.f32 %v1757_v11  ;;  %v1848_v20 = vor.u32 %v1847_v45, %v1846_v25  ;;  %v1851_v19 = vshll.u32 %v1850_v56, 23  ;;  %v2089_v40 = vshrl.u32 %v2088_v18, 23 }
 0x227   : > { %v2042_v47 = vadd.s32 536870912, %v2041_v41  ;;  %v1890_v33 = vshrl.u32 %v1889_v34, 5  ;;  %v1892_v8 = vsub.s32 32, %v1891_v39  ;;  %v2093_v2 = vor.u32 8388608, %v2092_v27 }
 0x228   : > { %v1852_v31 = vor.u32 4788187, %v1851_v19  ;;  %v1855_v60 = vcvt.s32.f32 %v1848_v20  ;;  %v1894_v14 = vshll.u32 %v15607_v4, %v1891_v39  ;;  %v1897_v46 = vshll.u32 %v15612_v5, %v1891_v39 }
 0x229   : > { %v10417_v59 = vpop.eup %8835  ;;  %v2043_v58 = vshrl.u32 %v2042_v47, 30  ;;  %v1895_v62 = vshrl.u32 %v15612_v5, %v1892_v8  ;;  %v1898_v1 = vshrl.u32 %v15613_v21, %v1892_v8  ;;  %v1900_v11 = vshll.u32 %v15613_v21, %v1891_v39 }
 0x22a   : > { %v1853_v29 = vand.u32 2147483647, %v1852_v31  ;;  %v1901_v18 = vshrl.u32 %v15599_v52, %v1892_v8  ;;  %v1903_v25 = vshll.u32 %v15599_v52, %v1891_v39  ;;  %v1904_v27 = vshrl.u32 %v15600_v23, %v1892_v8 }
 0x22b   : > { %v2044_v45 = vshll.u32 %v2043_v58, 30  ;;  %v1896_v56 = vor.u32 %v1895_v62, %v1894_v14  ;;  %v1899_v30 = vor.u32 %v1898_v1, %v1897_v46  ;;  %v10425_v34 = vshll.u32 %v1885_v32, 8 }
 0x22c   : > { %v1856_v20 = vmul.f32 %v1855_v60, %v1853_v29  ;;  %v1902_v19 = vor.u32 %v1901_v18, %v1900_v11  ;;  %v1905_v47 = vor.u32 %v1904_v27, %v1903_v25  ;;  %v1907_v61 = vshrl.u32 %v15601_v16, %v1892_v8 }
 0x22d   : > { %v2037_v13 = vadd.s32 %v10382_v57, %v10389_v22  ;;  %v10430_v31 = vsub.s32 %v2041_v41, %v2044_v45  ;;  %v1906_v55 = vshll.u32 %v15600_v23, %v1891_v39  ;;  %v715_v36 = vsub.s32 4, %v9499_v53 }
 0x22e   : > { %vm1983_vm11 = vcmp.lt.s32.totalorder %v10152_v6, 0  ;;  %v1893_v14 = vshrl.u32 %v15607_v4, %v1892_v8  ;;  %vm1909_vm6 = vcmp.lt.s32.totalorder %v1890_v33, 1  ;;  %v8179_v32 = vadd.s32 4294967169, %v2089_v40 }
 0x22f   : > { %v10436_v60 = vshll.u32 %v2093_v2, 8  ;;  %v10438_v46 = vpop.eup %8837  ;;  %v1857_v62 = vxor.u32 2147483648, %v1856_v20  ;;  %v2047_v1 = vsub.s32 0, %v10430_v31  ;;  %v1908_v57 = vor.u32 %v1907_v61, %v1906_v55 }
 0x230   : > { %vm1912_vm5 = vcmp.lt.s32.totalorder %v1890_v33, 4  ;;  %v10441_v22 = vpop.eup %8839  ;;  %vm1911_vm12 = vcmp.lt.s32.totalorder %v1890_v33, 3  ;;  %v1917_v39 = vsel %vm1909_vm6, %v1896_v56, %v1899_v30  ;;  %vm1910_vm2 = vcmp.lt.s32.totalorder %v1890_v33, 2 }
 0x231   : > { %v1914_v41 = vsel %vm1912_vm5, %v1902_v19, 2102212464  ;;  %v1918_v8 = vsel %vm1912_vm5, %v1905_v47, 920167782  ;;  %v8176_v40 = vmin.u32 %v2047_v1, %v10430_v31  ;;  %v716_v11 = vsel %vm631_vm9, %v715_v36, %v9499_v53 }
 0x232   : > { %v1919_v2 = vsel %vm1911_vm12, %v1902_v19, %v1918_v8  ;;  %v1913_v55 = vsel %vm1909_vm6, %v1893_v14, %v1896_v56  ;;  %v1915_v61 = vsel %vm1911_vm12, %v1899_v30, %v1914_v41  ;;  %v1921_v18 = vsel %vm1909_vm6, %v1899_v30, %v1902_v19 }
 0x233   : > { %v1920_v29 = vsel %vm1910_vm2, %v1917_v39, %v1919_v2  ;;  %v1858_v25 = vsel %vm1775_vm14, %v1857_v62, %v1856_v20  ;;  %v2049_v27 = vclz %v8176_v40  ;;  %v2067_v45 = vsub.s32 4, %v2043_v58 }
 0x234   : > { %v1922_v1 = vsel %vm1912_vm5, %v1908_v57, 1326507024  ;;  %v10460_v24 = vmul.u32.u64.low %v10425_v34, %v1920_v29  ;;  %v10461_v53 = vmul.u32.u64.high %v10425_v34, %v1920_v29, %v10460_v24  ;;  %v2095_v36 = vadd.s32 1, %v8179_v32 }
 0x235   : > { %v1923_v8 = vsel %vm1911_vm12, %v1905_v47, %v1922_v1  ;;  %v8177_v56 = vadd.s32 4294967294, %v2049_v27  ;;  %v1916_v14 = vsel %vm1910_vm2, %v1913_v55, %v1915_v61  ;;  %v718_v20 = vsel %vm9663_vm10, 0, %v716_v11 }
 0x236   : > { %v1924_v30 = vsel %vm1910_vm2, %v1921_v18, %v1923_v8  ;;  %vm2096_vm9 = vcmp.gt.s32.totalorder %v2095_v36, 0  ;;  %v722_v47 = vadd.s32 3, %v718_v20  ;;  %v10475_v57 = vsel %vm10350_vm0, %v10145_v9, %v1858_v25 }
 0x237   : > { %v10469_v19 = vmul.u32.u64.low %v10425_v34, %v1924_v30  ;;  %v10470_v62 = vmul.u32.u64.high %v10425_v34, %v1924_v30, %v10469_v19  ;;  %vm8178_vm14 = vcmp.lt.s32.totalorder %v8177_v56, 0  ;;  %v10479_v32 = vsel %vm1983_vm11, %v2067_v45, %v2043_v58 }
 0x238   : > { %v2097_v33 = vsel %vm2096_vm9, %v2095_v36, 0  ;;  %v2052_v41 = vsel %vm8178_vm14, 0, %v8177_v56  ;;  %v1932_v35 = vmul.u32 %v10425_v34, %v1916_v14  ;;  %v1935_v39 = vadd.s32 1, %v10461_v53 }
 0x239   : > { %v2099_v40 = vand.u32 31, %v2097_v33  ;;  %v2053_v2 = vsub.s32 32, %v2052_v41  ;;  %v2057_v11 = vsub.s32 4294967266, %v2052_v41  ;;  %v10483_v55 = vshrl.u32 %v2097_v33, 5 }
 0x23a   : > { %v2054_v61 = vshll.u32 %v10430_v31, %v2052_v41  ;;  %vm1934_vm10 = vc.u32 %v10470_v62, %v10460_v24  ;;  %v10489_v29 = vand.u32 3, %v722_v47  ;;  %8841 = vcosq.f32 %v10475_v57 }
 0x23b   : > { %v2100_v58 = vsub.s32 32, %v2099_v40  ;;  %v2055_v18 = vshrl.u32 %v2037_v13, %v2053_v2  ;;  %v2058_v25 = vadd.s32 127, %v2057_v11  ;;  %v1936_v34 = vsel %vm1934_vm10, %v1935_v39, %v10461_v53 }
 0x23c   : > { %v2102_v27 = vshll.u32 %v15607_v4, %v2099_v40  ;;  %v1937_v45 = vadd.s32 %v1936_v34, %v1932_v35  ;;  %v2105_v8 = vshll.u32 %v15612_v5, %v2099_v40  ;;  %v2108_v14 = vshll.u32 %v15613_v21, %v2099_v40 }
 0x23d   : > { %v2103_v1 = vshrl.u32 %v15612_v5, %v2100_v58  ;;  %v2106_v36 = vshrl.u32 %v15613_v21, %v2100_v58  ;;  %v2056_v31 = vor.u32 %v2055_v18, %v2054_v61  ;;  %v2059_v56 = vshll.u32 %v2058_v25, 23 }
 0x23e   : > { %v2109_v30 = vshrl.u32 %v15599_v52, %v2100_v58  ;;  %v15659_v13 = vand.u32 2147483647, %v10152_v6  ;;  %v1938_v53 = vadd.s32 536870912, %v1937_v45  ;;  %v2101_v19 = vshrl.u32 %v15607_v4, %v2100_v58 }
 0x23f   : > { %v2104_v47 = vor.u32 %v2103_v1, %v2102_v27  ;;  %v2107_v33 = vor.u32 %v2106_v36, %v2105_v8  ;;  %v2060_v41 = vor.u32 4788187, %v2059_v56  ;;  %v2111_v39 = vshll.u32 %v15599_v52, %v2099_v40 }
 0x240   : > { %vm10500_vm0 = vcmp.le.f32.partialorder %v15659_v13, 0.7853982  ;;  %v2110_v35 = vor.u32 %v2109_v30, %v2108_v14  ;;  %v2112_v2 = vshrl.u32 %v15600_v23, %v2100_v58  ;;  %v2063_v11 = vcvt.s32.f32 %v2056_v31 }
 0x241   : > { %v10507_v61 = vshrl.u32 %v1938_v53, 30  ;;  %v2114_v18 = vshll.u32 %v15600_v23, %v2099_v40  ;;  %v2115_v25 = vshrl.u32 %v15601_v16, %v2100_v58  ;;  %v2061_v34 = vand.u32 2147483647, %v2060_v41 }
 0x242   : > { %v2113_v13 = vor.u32 %v2112_v2, %v2111_v39  ;;  %vm2117_vm2 = vcmp.lt.s32.totalorder %v10483_v55, 1  ;;  %vm2118_vm6 = vcmp.lt.s32.totalorder %v10483_v55, 2  ;;  %vm2119_vm5 = vcmp.lt.s32.totalorder %v10483_v55, 3 }
 0x243   : > { %v1940_v27 = vshll.u32 %v10507_v61, 30  ;;  %v2116_v1 = vor.u32 %v2115_v25, %v2114_v18  ;;  %vm2120_vm12 = vcmp.lt.s32.totalorder %v10483_v55, 4  ;;  %v2064_v8 = vmul.f32 %v2063_v11, %v2061_v34 }
 0x244   : > { %v2122_v36 = vsel %vm2120_vm12, %v2110_v35, 2102212464  ;;  %v2125_v31 = vsel %vm2117_vm2, %v2104_v47, %v2107_v33  ;;  %v2126_v56 = vsel %vm2120_vm12, %v2113_v13, 920167782  ;;  %v2121_v58 = vsel %vm2117_vm2, %v2101_v19, %v2104_v47 }
 0x245   : > { %v10516_v40 = vsub.s32 %v1937_v45, %v1940_v27  ;;  %v2127_v14 = vsel %vm2119_vm5, %v2110_v35, %v2126_v56  ;;  %v2129_v30 = vsel %vm2117_vm2, %v2107_v33, %v2110_v35  ;;  %v2065_v53 = vxor.u32 2147483648, %v2064_v8 }
 0x246   : > { %v2123_v41 = vsel %vm2119_vm5, %v2107_v33, %v2122_v36  ;;  %v2128_v39 = vsel %vm2118_vm6, %v2125_v31, %v2127_v14  ;;  %v2130_v2 = vsel %vm2120_vm12, %v2116_v1, 1326507024  ;;  %v2070_v45 = vsel %vm10500_vm0, 0, %v10479_v32 }
 0x247   : > { %v1943_v18 = vsub.s32 0, %v10516_v40  ;;  %v2131_v25 = vsel %vm2119_vm5, %v2113_v13, %v2130_v2  ;;  %v10522_v0 = vmul.u32.u64.low %v10436_v60, %v2128_v39  ;;  %v10523_v11 = vmul.u32.u64.high %v10436_v60, %v2128_v39, %v10522_v0 }
 0x248   : > { %v2132_v19 = vsel %vm2118_vm6, %v2129_v30, %v2131_v25  ;;  %v729_v47 = vxor.u32 2147483648, %v9754_v54  ;;  %8843 = vsinq.f32 %v10475_v57  ;;  %v2066_v13 = vsel %vm1983_vm11, %v2065_v53, %v2064_v8 }
 0x249   : > { %v8172_v33 = vmin.u32 %v1943_v18, %v10516_v40  ;;  %v10535_v35 = vmul.u32.u64.low %v10436_v60, %v2132_v19  ;;  %v10536_v34 = vmul.u32.u64.high %v10436_v60, %v2132_v19, %v10535_v35  ;;  %v2124_v27 = vsel %vm2118_vm6, %v2121_v58, %v2123_v41  ;;  %v10576_v19 = vpop.eup %8841 }
 0x24a   : > { %vm725_vm9 = vcmp.eq.s32.totalorder %v10489_v29, 0  ;;  %v1131_v1 = vsub.s32 4, %v9838_v15  ;;  %v2143_v31 = vadd.s32 1, %v10523_v11  ;;  %v15662_v57 = vxor.u32 2147483648, %v9843_v37  ;;  %v15663_v35 = vld [vmem:[#allocation9_spill] sm:$0xff] }
 0x24b   : > { %v1945_v36 = vclz %v8172_v33  ;;  %vm728_vm14 = vcmp.eq.s32.totalorder %v10489_v29, 2  ;;  %vm721_vm10 = vweird.f32 %v9309_v42  ;;  %vm724_vm11 = vcmp.lt.s32.totalorder %v10489_v29, 2 }
 0x24c   : > { %v727_v56 = vsel %vm725_vm9, %v9754_v54, %v15662_v57  ;;  %v730_v55 = vsel %vm728_vm14, %v729_v47, %v9843_v37  ;;  %v1132_v8 = vsel %vm1047_vm7, %v1131_v1, %v9838_v15  ;;  %v2140_v14 = vmul.u32 %v10436_v60, %v2124_v27 }
 0x24d   : > { %v8173_v58 = vadd.s32 4294967294, %v1945_v36  ;;  %vm2142_vm2 = vc.u32 %v10536_v34, %v10522_v0  ;;  %v731_v30 = vsel %vm724_vm11, %v727_v56, %v730_v55  ;;  %v10560_v54 = vsel %vm10500_vm0, %v10152_v6, %v2066_v13 }
 0x24e   : > { %v1933_v29 = vadd.s32 %v10460_v24, %v10470_v62  ;;  %v2144_v37 = vsel %vm2142_vm2, %v2143_v31, %v10523_v11  ;;  %v1134_v53 = vsel %vm10003_vm13, 0, %v1132_v8  ;;  %vm1137_vm6 = vweird.f32 %v9608_v49 }
 0x24f   : > { %vm8174_vm7 = vcmp.lt.s32.totalorder %v8173_v58, 0  ;;  %v2145_v15 = vadd.s32 %v2144_v37, %v2140_v14  ;;  %v1138_v60 = vadd.s32 3, %v1134_v53  ;;  %v923_v41 = vsub.s32 4, %v9551_v44  ;;  %v15667_v37 = vld [vmem:[#allocation24_spill] sm:$0xff] }
 0x250   : > { %v1948_v39 = vsel %vm8174_vm7, 0, %v8173_v58  ;;  %v10570_v2 = vadd.s32 %v10522_v0, %v10536_v34  ;;  %v732_v18 = vsel %vm721_vm10, nan, %v731_v30  ;;  %v1142_v24 = vxor.u32 2147483648, %v10120_v10  ;;  %v15664_v34 = vld [vmem:[#allocation23_spill] sm:$0xff] }
 0x251   : > { %v1949_v62 = vsub.s32 32, %v1948_v39  ;;  %v1953_v25 = vsub.s32 4294967266, %v1948_v39  ;;  %v2146_v3 = vadd.s32 536870912, %v2145_v15  ;;  %v1145_v11 = vxor.u32 2147483648, %v10113_v50 }
 0x252   : > { %v1950_v47 = vshll.u32 %v10516_v40, %v1948_v39  ;;  %v1139_v33 = vand.u32 3, %v1138_v60  ;;  %v924_v0 = vsel %vm839_vm4, %v923_v41, %v9551_v44  ;;  %v1339_v13 = vsub.s32 4, %v15664_v34  ;;  %v10583_v42 = vpop.eup %8843  ;;  %v15666_v40 = vld [vmem:[#allocation25_spill] sm:$0xff] }
 0x253   : > { %v1951_v27 = vshrl.u32 %v1933_v29, %v1949_v62  ;;  %v1954_v1 = vadd.s32 127, %v1953_v25  ;;  %v10585_v36 = vshrl.u32 %v2146_v3, 30  ;;  %v926_v57 = vsel %vm9760_vm8, 0, %v924_v0 }
 0x254   : > { %vm1141_vm13 = vcmp.eq.s32.totalorder %v1139_v33, 0  ;;  %vm1144_vm5 = vcmp.eq.s32.totalorder %v1139_v33, 2  ;;  %v930_v56 = vadd.s32 3, %v926_v57  ;;  %v934_v55 = vxor.u32 2147483648, %v15666_v40 }
 0x255   : > { %v1952_v8 = vor.u32 %v1951_v27, %v1950_v47  ;;  %v1955_v58 = vshll.u32 %v1954_v1, 23  ;;  %v2148_v44 = vshll.u32 %v10585_v36, 30  ;;  %v1143_v14 = vsel %vm1141_vm13, %v10113_v50, %v1142_v24  ;;  %v15671_v24 = vld [vmem:[#allocation16_spill] sm:$0xff] }
 0x256   : > { %vm929_vm4 = vweird.f32 %v15663_v35  ;;  %vm1879_vm12 = vcmp.lt.s32.totalorder %v10209_v26, 0  ;;  %vm1140_vm9 = vcmp.lt.s32.totalorder %v1139_v33, 2  ;;  %v1146_v30 = vsel %vm1144_vm5, %v1145_v11, %v10120_v10 }
 0x257   : > { %v931_v29 = vand.u32 3, %v930_v56  ;;  %v937_v53 = vxor.u32 2147483648, %v15667_v37  ;;  %v15668_v60 = vand.u32 2147483647, %v10209_v26  ;;  %v1956_v39 = vor.u32 4788187, %v1955_v58 }
 0x258   : > { %v10602_v62 = vsub.s32 %v2145_v15, %v2148_v44  ;;  %v1147_v50 = vsel %vm1140_vm9, %v1143_v14, %v1146_v30  ;;  %vm15672_vm14 = vcmp.lt.s32.totalorder %v15671_v24, 0  ;;  %v1959_v3 = vcvt.s32.f32 %v1952_v8  ;;  %v15674_v56 = vld [vmem:[#allocation33_spill] sm:$0xff]  ;;  %v15675_v8 = vld [vmem:[#allocation7_spill] sm:$0xff] }
 0x259   : > { %vm10598_vm8 = vcmp.le.f32.partialorder %v15668_v60, 0.7853982  ;;  %v1340_v25 = vsel %vm15672_vm14, %v1339_v13, %v15664_v34  ;;  %v1148_v10 = vsel %vm1137_vm6, nan, %v1147_v50  ;;  %vm933_vm10 = vcmp.eq.s32.totalorder %v931_v29, 0 }
 0x25a   : > { %vm936_vm11 = vcmp.eq.s32.totalorder %v931_v29, 2  ;;  %v1957_v11 = vand.u32 2147483647, %v1956_v39  ;;  %v2151_v47 = vsub.s32 0, %v10602_v62  ;;  %v8423_v33 = vpack.c.bf16 %v1148_v10, %v732_v18 }
 0x25b   : > { %v935_v0 = vsel %vm933_vm10, %v15667_v37, %v934_v55  ;;  %vm932_vm2 = vcmp.lt.s32.totalorder %v931_v29, 2  ;;  %v938_v15 = vsel %vm936_vm11, %v937_v53, %v15666_v40  ;;  %v1342_v1 = vsel %vm10041_vm3, 0, %v1340_v25  ;;  %v15676_v55 = vld [vmem:[#allocation12_spill] sm:$0xff]  ;;  %v15677_v40 = vld [vmem:[#allocation14_spill] sm:$0xff]  ;;  %v15678_v37 = vld [vmem:[#allocation13_spill] sm:$0xff] }
 0x25c   : > { %vm1345_vm7 = vweird.f32 %v15671_v24  ;;  %v1350_v34 = vxor.u32 2147483648, %v10244_v38  ;;  %v1960_v49 = vmul.f32 %v1959_v3, %v1957_v11  ;;  %v8180_v13 = vmin.u32 %v2151_v47, %v10602_v62  ;;  %8424 = vmatprep.subr.bf16.mxu0 %v8423_v33  ;;  %v15679_v25 = vld [vmem:[#allocation20_spill] sm:$0xff] }
 0x25d   : > { %v939_v31 = vsel %vm932_vm2, %v935_v0, %v938_v15  ;;  %v1346_v57 = vadd.s32 3, %v1342_v1  ;;  %v1353_v18 = vxor.u32 2147483648, %v15674_v56  ;;  %vm617_vm6 = vweird.f32 %v15675_v8  ;;  %v15680_v1 = vld [vmem:[#allocation10_spill] sm:$0xff]  ;;  %v15685_v8 = vld [vmem:[#allocation15_spill] sm:$0xff] }
 0x25e   : > { %v619_v58 = vand.u32 3, %v15676_v55  ;;  %v622_v44 = vxor.u32 2147483648, %v15677_v40  ;;  %v1961_v14 = vxor.u32 2147483648, %v1960_v49  ;;  %v2153_v30 = vclz %v8180_v13  ;;  %v15681_v55 = vld [vmem:[#allocation27_spill] sm:$0xff] }
 0x25f   : > { %v1347_v29 = vand.u32 3, %v1346_v57  ;;  %v625_v53 = vxor.u32 2147483648, %v15678_v37  ;;  %v940_v60 = vsel %vm929_vm4, nan, %v939_v31  ;;  %v1035_v3 = vand.u32 3, %v15679_v25 }
 0x260   : > { %vm620_vm3 = vcmp.lt.s32.totalorder %v619_v58, 2  ;;  %vm621_vm13 = vcmp.eq.s32.totalorder %v619_v58, 0  ;;  %vm624_vm5 = vcmp.eq.s32.totalorder %v619_v58, 2  ;;  %v1962_v39 = vsel %vm1879_vm12, %v1961_v14, %v1960_v49  ;;  %v15683_v14 = vld [vmem:[#allocation19_spill] sm:$0xff] }
 0x261   : > { %v8181_v50 = vadd.s32 4294967294, %v2153_v30  ;;  %vm1349_vm9 = vcmp.eq.s32.totalorder %v1347_v29, 0  ;;  %v1965_v10 = vsel %vm10598_vm8, %v10209_v26, %v1962_v39  ;;  %vm1352_vm14 = vcmp.eq.s32.totalorder %v1347_v29, 2  ;;  %v15684_v30 = vld [vmem:[#allocation17_spill] sm:$0xff] }
 0x262   : > { %v1351_v11 = vsel %vm1349_vm9, %v15674_v56, %v1350_v34  ;;  %v623_v35 = vsel %vm621_vm13, %v15678_v37, %v622_v44  ;;  %vm1348_vm10 = vcmp.lt.s32.totalorder %v1347_v29, 2  ;;  %v1354_v47 = vsel %vm1352_vm14, %v1353_v18, %v10244_v38 }
 0x263   : > { %vm8182_vm4 = vcmp.lt.s32.totalorder %v8181_v50, 0  ;;  %v626_v33 = vsel %vm624_vm5, %v625_v53, %v15677_v40  ;;  %v1355_v15 = vsel %vm1348_vm10, %v1351_v11, %v1354_v47  ;;  %vm1033_vm11 = vweird.f32 %v15680_v1  ;;  %v15682_v40 = vld [vmem:[#allocation26_spill] sm:$0xff] }
 0x264   : > { %v2156_v0 = vsel %vm8182_vm4, 0, %v8181_v50  ;;  %v627_v27 = vsel %vm620_vm3, %v623_v35, %v626_v33  ;;  %8845 = vcosq.f32 %v1965_v10  ;;  %v1356_v34 = vsel %vm1345_vm7, nan, %v1355_v15  ;;  %v15689_v33 = vld [vmem:[#allocation29_spill] sm:$0xff] }
 0x265   : > { %v2157_v49 = vsub.s32 32, %v2156_v0  ;;  %v2161_v13 = vsub.s32 4294967266, %v2156_v0  ;;  %8847 = vsinq.f32 %v1965_v10  ;;  %v2158_v31 = vshll.u32 %v10602_v62, %v2156_v0 }
 0x266   : > { %v8431_v57 = vpack.c.bf16 %v1356_v34, %v940_v60  ;;  %v628_v38 = vsel %vm617_vm6, nan, %v627_v27  ;;  %vm1037_vm2 = vcmp.eq.s32.totalorder %v1035_v3, 0  ;;  %v1038_v58 = vxor.u32 2147483648, %v15681_v55 }
 0x267   : > { %v2159_v56 = vshrl.u32 %v10570_v2, %v2157_v49  ;;  %v2162_v18 = vadd.s32 127, %v2161_v13  ;;  %vm1040_vm3 = vcmp.eq.s32.totalorder %v1035_v3, 2  ;;  %v1041_v44 = vxor.u32 2147483648, %v15682_v40  ;;  %v15690_v13 = vld [vmem:[#allocation32_spill] sm:$0xff] }
 0x268   : > { %8432 = vmatprep.subr.bf16.mxu1 %v8431_v57  ;;  %v827_v24 = vand.u32 3, %v15683_v14  ;;  %v830_v29 = vxor.u32 2147483648, %v15684_v30  ;;  %v1039_v53 = vsel %vm1037_vm2, %v15682_v40, %v1038_v58  ;;  %v833_v60 = vxor.u32 2147483648, %v15685_v8  ;;  %v15691_v57 = vld [vmem:[#allocation8_spill] sm:$0xff]  ;;  %v15693_v58 = vld [vmem:[#allocation34_spill] sm:$0xff] }
 0x269   : > { %v2160_v37 = vor.u32 %v2159_v56, %v2158_v31  ;;  %v2163_v62 = vshll.u32 %v2162_v18, 23  ;;  %vm2087_vm7 = vcmp.lt.s32.totalorder %v10307_v63, 0  ;;  %vm1036_vm6 = vcmp.lt.s32.totalorder %v1035_v3, 2  ;;  %v15692_v18 = vld [vmem:[#allocation31_spill] sm:$0xff] }
 0x26a   : > { %v1042_v2 = vsel %vm1040_vm3, %v1041_v44, %v15681_v55  ;;  %vm828_vm13 = vcmp.lt.s32.totalorder %v827_v24, 2  ;;  %vm829_vm5 = vcmp.eq.s32.totalorder %v827_v24, 0  ;;  %v15686_v39 = vand.u32 2147483647, %v10307_v63 }
 0x26b   : > { %v2164_v25 = vor.u32 4788187, %v2163_v62  ;;  %v1043_v10 = vsel %vm1036_vm6, %v1039_v53, %v1042_v2  ;;  %v831_v11 = vsel %vm829_vm5, %v15685_v8, %v830_v29  ;;  %vm832_vm14 = vcmp.eq.s32.totalorder %v827_v24, 2  ;;  %v15694_v24 = vld [vmem:[#allocation11_spill] sm:$0xff] }
 0x26c   : > { %vm10652_vm9 = vcmp.le.f32.partialorder %v15686_v39, 0.7853982  ;;  %v2167_v35 = vcvt.s32.f32 %v2160_v37  ;;  %v1044_v47 = vsel %vm1033_vm11, nan, %v1043_v10  ;;  %v834_v3 = vsel %vm832_vm14, %v833_v60, %v15684_v30 }
 0x26d   : > { %v1243_v0 = vand.u32 3, %v15689_v33  ;;  %v2165_v15 = vand.u32 2147483647, %v2164_v25  ;;  %v8425_v27 = vpack.c.bf16 %v1044_v47, %v628_v38  ;;  %v835_v49 = vsel %vm828_vm13, %v831_v11, %v834_v3 }
 0x26e   : > { %v1246_v34 = vxor.u32 2147483648, %v15690_v13  ;;  %8849 = vcosq.f32 %v10560_v54  ;;  %v10667_v31 = vadd.s32 3, %v2070_v45  ;;  %vm825_vm4 = vweird.f32 %v15691_v57  ;;  %v8846_v1 = vpop.eup %8845 }
 0x26f   : > { %vm1245_vm10 = vcmp.eq.s32.totalorder %v1243_v0, 0  ;;  %v2168_v56 = vmul.f32 %v2167_v35, %v2165_v15  ;;  %8426 = vmatpush1.bf16.msra.mxu0 %v8425_v27  ;;  %v1249_v38 = vxor.u32 2147483648, %v15692_v18  ;;  %v1547_v40 = vsub.s32 4, %v15693_v58  ;;  %v8848_v44 = vpop.eup %8847 }
 0x270   : > { %v1247_v55 = vsel %vm1245_vm10, %v15692_v18, %v1246_v34  ;;  %v836_v14 = vsel %vm825_vm4, nan, %v835_v49  ;;  %vm1241_vm11 = vweird.f32 %v15694_v24  ;;  %vm1248_vm2 = vcmp.eq.s32.totalorder %v1243_v0, 2 }
 0x271   : > { %v1963_v32 = vsub.s32 4, %v10507_v61  ;;  %v2169_v20 = vxor.u32 2147483648, %v2168_v56  ;;  %vm1244_vm0 = vcmp.lt.s32.totalorder %v1243_v0, 2  ;;  %v1250_v45 = vsel %vm1248_vm2, %v1249_v38, %v15690_v13 }
 0x272   : > { %vm15695_vm3 = vcmp.lt.s32.totalorder %v9997_v43, 0  ;;  %v1251_v29 = vsel %vm1244_vm0, %v1247_v55, %v1250_v45  ;;  %vm1553_vm6 = vweird.f32 %v9997_v43  ;;  %v1558_v62 = vxor.u32 2147483648, %v10417_v59 }
 0x273   : > { %v1548_v30 = vsel %vm15695_vm3, %v1547_v40, %v15693_v58  ;;  %v1964_v53 = vsel %vm1879_vm12, %v1963_v32, %v10507_v61  ;;  %v2170_v8 = vsel %vm2087_vm7, %v2169_v20, %v2168_v56  ;;  %v1252_v60 = vsel %vm1241_vm11, nan, %v1251_v29  ;;  %v15697_v58 = vld [vmem:[#allocation30_spill] sm:$0xff] }
 0x274   : > { %v1550_v37 = vsel %vm10274_vm1, 0, %v1548_v30  ;;  %v1966_v39 = vsel %vm10598_vm8, 0, %v1964_v53  ;;  %v2173_v12 = vsel %vm10652_vm9, %v10307_v63, %v2170_v8  ;;  %v8433_v25 = vpack.c.bf16 %v1252_v60, %v836_v14  ;;  %v15698_v30 = vld [vmem:[#allocation36_spill] sm:$0xff]  ;;  %v15699_v53 = vld [vmem:[#allocation39_spill] sm:$0xff]  ;;  %v15700_v60 = vld [vmem:[#allocation21_spill] sm:$0xff] }
 0x275   : > { %v1554_v2 = vadd.s32 3, %v1550_v37  ;;  %v1561_v10 = vxor.u32 2147483648, %v10413_v48  ;;  %v1970_v11 = vadd.s32 3, %v1966_v39  ;;  %8851 = vcosq.f32 %v2173_v12 }
 0x276   : > { %v1974_v47 = vxor.u32 2147483648, %v8848_v44  ;;  %v1755_v61 = vsub.s32 4, %v10248_v7  ;;  %8853 = vsinq.f32 %v2173_v12  ;;  %8434 = vmatpush1.bf16.msra.mxu1 %v8433_v25  ;;  %vm1969_vm1 = vweird.f32 %v10209_v26 }
 0x277   : > { %v1555_v35 = vand.u32 3, %v1554_v2  ;;  %v1971_v3 = vand.u32 3, %v1970_v11  ;;  %v1977_v41 = vxor.u32 2147483648, %v8846_v1  ;;  %vm15696_vm13 = vcmp.lt.s32.totalorder %v10085_v51, 0 }
 0x278   : > { %v1756_v33 = vsel %vm15696_vm13, %v1755_v61, %v10248_v7  ;;  %v1766_v0 = vxor.u32 2147483648, %v10441_v22  ;;  %v10700_v15 = vpop.eup %8849  ;;  %v2171_v7 = vsub.s32 4, %v10585_v36  ;;  %8855 = vsinq.f32 %v10560_v54  ;;  %v15701_v61 = vld [vmem:[#allocation35_spill] sm:$0xff] }
 0x279   : > { %vm1557_vm12 = vcmp.eq.s32.totalorder %v1555_v35, 0  ;;  %vm1560_vm8 = vcmp.eq.s32.totalorder %v1555_v35, 2  ;;  %vm1556_vm5 = vcmp.lt.s32.totalorder %v1555_v35, 2  ;;  %vm1973_vm14 = vcmp.eq.s32.totalorder %v1971_v3, 0 }
 0x27a   : > { %v1559_v27 = vsel %vm1557_vm12, %v10413_v48, %v1558_v62  ;;  %v1562_v49 = vsel %vm1560_vm8, %v1561_v10, %v10417_v59  ;;  %v1975_v34 = vsel %vm1973_vm14, %v8846_v1, %v1974_v47  ;;  %vm1976_vm4 = vcmp.eq.s32.totalorder %v1971_v3, 2 }
 0x27b   : > { %v1563_v13 = vsel %vm1556_vm5, %v1559_v27, %v1562_v49  ;;  %v1758_v57 = vsel %vm10368_vm15, 0, %v1756_v33  ;;  %vm1972_vm10 = vcmp.lt.s32.totalorder %v1971_v3, 2  ;;  %v1978_v56 = vsel %vm1976_vm4, %v1977_v41, %v8848_v44  ;;  %v15702_v41 = vld [vmem:[#allocation38_spill] sm:$0xff]  ;;  %v15703_v27 = vld [vmem:[#allocation37_spill] sm:$0xff] }
 0x27c   : > { %v1762_v18 = vadd.s32 3, %v1758_v57  ;;  %v1564_v55 = vsel %vm1553_vm6, nan, %v1563_v13  ;;  %v1979_v38 = vsel %vm1972_vm10, %v1975_v34, %v1978_v56  ;;  %v1769_v48 = vxor.u32 2147483648, %v10438_v46 }
 0x27d   : > { %v1451_v59 = vand.u32 3, %v15697_v58  ;;  %v1980_v1 = vsel %vm1969_vm1, nan, %v1979_v38  ;;  %v2172_v28 = vsel %vm2087_vm7, %v2171_v7, %v10585_v36  ;;  %v1454_v44 = vxor.u32 2147483648, %v10342_v17 }
 0x27e   : > { %v1763_v40 = vand.u32 3, %v1762_v18  ;;  %v8427_v14 = vpack.c.bf16 %v1980_v1, %v1564_v55  ;;  %vm1761_vm15 = vweird.f32 %v10085_v51  ;;  %v2174_v43 = vsel %vm10652_vm9, 0, %v2172_v28  ;;  %v2189_v55 = vld [vmem:[%s15351_s3] sm:$0xff] }
 0x27f   : > { %vm2177_vm0 = vweird.f32 %v10307_v63  ;;  %v2178_v26 = vadd.s32 3, %v2174_v43  ;;  %v8852_v24 = vpop.eup %8851  ;;  %vm1453_vm7 = vcmp.eq.s32.totalorder %v1451_v59, 0  ;;  %v1457_v50 = vxor.u32 2147483648, %v15698_v30 }
 0x280   : > { %vm1765_vm11 = vcmp.eq.s32.totalorder %v1763_v40, 0  ;;  %vm1768_vm2 = vcmp.eq.s32.totalorder %v1763_v40, 2  ;;  %8428 = vmatprep.subr.bf16.mxu0 %v8427_v14  ;;  %vm1764_vm3 = vcmp.lt.s32.totalorder %v1763_v40, 2  ;;  %v8854_v54 = vpop.eup %8853  ;;  %v2185_v45 = vxor.u32 2147483648, %v8852_v24  ;;  %v10778_v14 = vpop.permute.xlu0 %2199 }
 0x281   : > { %v1767_v36 = vsel %vm1765_vm11, %v10438_v46, %v1766_v0  ;;  %v1770_v32 = vsel %vm1768_vm2, %v1769_v48, %v10441_v22  ;;  %v2179_v20 = vand.u32 3, %v2178_v26  ;;  %v1455_v29 = vsel %vm1453_vm7, %v15698_v30, %v1454_v44  ;;  %v15704_v48 = vld [vmem:[#allocation22_spill] sm:$0xff]  ;;  %v2192_v44 = vld [vmem:[%s15351_s3 + $0x18] sm:$0xff] }
 0x282   : > { %v1771_v37 = vsel %vm1764_vm3, %v1767_v36, %v1770_v32  ;;  %v2182_v62 = vxor.u32 2147483648, %v8854_v54  ;;  %vm1456_vm9 = vcmp.eq.s32.totalorder %v1451_v59, 2  ;;  %v1867_v8 = vand.u32 3, %v15699_v53  ;;  %v8856_v51 = vpop.eup %8855 }
 0x283   : > { %vm2181_vm6 = vcmp.eq.s32.totalorder %v2179_v20, 0  ;;  %vm2184_vm1 = vcmp.eq.s32.totalorder %v2179_v20, 2  ;;  %vm1449_vm12 = vweird.f32 %v15700_v60  ;;  %v1458_v46 = vsel %vm1456_vm9, %v1457_v50, %v10342_v17 }
 0x284   : > { %vm2180_vm8 = vcmp.lt.s32.totalorder %v2179_v20, 2  ;;  %v2183_v22 = vsel %vm2181_vm6, %v8852_v24, %v2182_v62  ;;  %v2186_v2 = vsel %vm2184_vm1, %v2185_v45, %v8854_v54  ;;  %vm1452_vm13 = vcmp.lt.s32.totalorder %v1451_v59, 2 }
 0x285   : > { %v1772_v39 = vsel %vm1761_vm15, nan, %v1771_v37  ;;  %v2187_v12 = vsel %vm2180_vm8, %v2183_v22, %v2186_v2  ;;  %v1459_v25 = vsel %vm1452_vm13, %v1455_v29, %v1458_v46  ;;  %v1870_v10 = vxor.u32 2147483648, %v10583_v42 }
 0x286   : > { %v2188_v11 = vsel %vm2177_vm0, nan, %v2187_v12  ;;  %vm1869_vm5 = vcmp.eq.s32.totalorder %v1867_v8, 0  ;;  %vm1872_vm14 = vcmp.eq.s32.totalorder %v1867_v8, 2  ;;  %v1873_v35 = vxor.u32 2147483648, %v10576_v19 }
 0x287   : > { %v8435_v47 = vpack.c.bf16 %v2188_v11, %v1772_v39  ;;  %v1871_v17 = vsel %vm1869_vm5, %v10576_v19, %v1870_v10  ;;  %v1659_v3 = vand.u32 3, %v15701_v61  ;;  %v1662_v33 = vxor.u32 2147483648, %v15702_v41 }
 0x288   : > { %vm1868_vm4 = vcmp.lt.s32.totalorder %v1867_v8, 2  ;;  %v1874_v0 = vsel %vm1872_vm14, %v1873_v35, %v10583_v42  ;;  %v1665_v49 = vxor.u32 2147483648, %v15703_v27  ;;  %v2075_v63 = vand.u32 3, %v10667_v31 }
 0x289   : > { %8436 = vmatprep.subr.bf16.mxu1 %v8435_v47  ;;  %vm1865_vm10 = vweird.f32 %v10145_v9  ;;  %v1875_v13 = vsel %vm1868_vm4, %v1871_v17, %v1874_v0  ;;  %vm1661_vm15 = vcmp.eq.s32.totalorder %v1659_v3, 0  ;;  %vm1664_vm11 = vcmp.eq.s32.totalorder %v1659_v3, 2 }
 0x28a   : > { %v1460_v19 = vsel %vm1449_vm12, nan, %v1459_v25  ;;  %v1876_v34 = vsel %vm1865_vm10, nan, %v1875_v13  ;;  %v1663_v57 = vsel %vm1661_vm15, %v15703_v27, %v1662_v33  ;;  %v1666_v56 = vsel %vm1664_vm11, %v1665_v49, %v15702_v41 }
 0x28b   : > { %v8429_v18 = vpack.c.bf16 %v1876_v34, %v1460_v19  ;;  %v2078_v42 = vxor.u32 2147483648, %v8856_v51  ;;  %vm1660_vm2 = vcmp.lt.s32.totalorder %v1659_v3, 2  ;;  %vm2077_vm0 = vcmp.eq.s32.totalorder %v2075_v63, 0 }
 0x28c   : > { %v2081_v31 = vxor.u32 2147483648, %v10700_v15  ;;  %v1667_v7 = vsel %vm1660_vm2, %v1663_v57, %v1666_v56  ;;  %vm2080_vm3 = vcmp.eq.s32.totalorder %v2075_v63, 2  ;;  %vm15448_vm7 = vcmask 261120  }
 0x28d   : > { %8430 = vmatpush1.bf16.msra.mxu0 %v8429_v18  ;;  %v2079_v9 = vsel %vm2077_vm0, %v10700_v15, %v2078_v42  ;;  %vm2076_vm9 = vcmp.lt.s32.totalorder %v2075_v63, 2  ;;  %vm1657_vm6 = vweird.f32 %v15704_v48  ;;  %vm2073_vm1 = vweird.f32 %v10152_v6  ;;  %v2190_v15 = vld [vmem:[%s15351_s3 + $0x8] sm:$0xff]  ;;  %v2191_v6 = vld [vmem:[%s15351_s3 + $0x10] sm:$0xff] }
 0x28e   : > { %v2082_v38 = vsel %vm2080_vm3, %v2081_v31, %v8856_v51  ;;  %v1668_v59 = vsel %vm1657_vm6, nan, %v1667_v7  ;;  %v15705_v28 = vmov 0.0  }
 0x28f   : > { %v2083_v58 = vsel %vm2076_vm9, %v2079_v9, %v2082_v38 }
 0x290   : > { %v2084_v1 = vsel %vm2073_vm1, nan, %v2083_v58  ;;  %8183 = vmatmul.mubr.msk.f32.vlgmr.msra.gmra.mrb[8].mxu0 %vm15448_vm7, %v2189_v55 }
 0x291   : > { %v8437_v40 = vpack.c.bf16 %v2084_v1, %v1668_v59  ;;  %2300 = vmatprep.mubr.f32.mxu0 %v15705_v28 }
 0x293   : > { %8438 = vmatpush1.bf16.msra.mxu1 %v8437_v40 }
 0x294   : > { %8184 = vmatmul.mubr.msk.f32.gmra.mrb[10].mxu0 %vm15448_vm7, %v2190_v15 }
 0x295   : > { %2306 = vmatprep.mubr.f32.mxu0 %v15705_v28 }
 0x296   : > { %8187 = vmatmul.mubr.msk.f32.vlgmr.msra.gmra.mrb[8].mxu1 %vm15448_vm7, %v2189_v55 }
 0x297   : > { %2389 = vmatprep.mubr.f32.mxu1 %v15705_v28 }
 0x298   : > { %8185 = vmatmul.mubr.msk.f32.gmra.mrb[12].mxu0 %vm15448_vm7, %v2191_v6 }
 0x299   : > { %2312 = vmatprep.mubr.f32.mxu0 %v15705_v28 }
 0x29a   : > { %8188 = vmatmul.mubr.msk.f32.gmra.mrb[10].mxu1 %vm15448_vm7, %v2190_v15 }
 0x29b   : > { %2395 = vmatprep.mubr.f32.mxu1 %v15705_v28 }
 0x29c   : > { %8186 = vmatmul.mubr.msk.f32.gmra.mrb[14].mxu0 %vm15448_vm7, %v2192_v44 }
 0x29d   : > { %4178 = vmatprep.mubr.f32.mxu0 %v15705_v28 }
 0x29e   : > { %8189 = vmatmul.mubr.msk.f32.gmra.mrb[12].mxu1 %vm15448_vm7, %v2191_v6 }
 0x29f   : > { %2401 = vmatprep.mubr.f32.mxu1 %v15705_v28 }
 0x2a2   : > { %8190 = vmatmul.mubr.msk.f32.gmra.mrb[14].mxu1 %vm15448_vm7, %v2192_v44 }
 0x2a3   : > { %4267 = vmatprep.mubr.f32.mxu1 %v15705_v28 }
 0x363   : > { %v2296_v43 = vpop.f32.mrb[8].mxu0 }
 0x364   : > { %v10781_v26 = vadd.f32 %v2296_v43, %v10778_v14  ;;  %v2298_v24 = vpop.f32.mrb[9].mxu0 }
 0x365   : > { %v10784_v36 = vadd.f32 %v2298_v24, %v10778_v14 }
 0x366   : > { %15706 = vst [vmem:[#allocation9_spill] sm:$0xff] %v10781_v26  ;;  %v2408_v32 = vand.u32 2147483647, %v10781_v26  ;;  %v2411_v54 = vand.u32 2139095040, %v10781_v26 }
 0x367   : > { %v2515_v20 = vand.u32 2139095040, %v10784_v36  ;;  %v10789_v45 = vpop.f32.mrb[10].mxu0  ;;  %v15421_v25 = vand.u32 2147483647, %v10784_v36 }
 0x368   : > { %v2412_v30 = vshrl.u32 %v2411_v54, 23  ;;  %v10791_v29 = vpop.f32.mrb[11].mxu0  ;;  %v2415_v50 = vand.u32 8388607, %v2408_v32 }
 0x369   : > { %v2385_v37 = vpop.f32.mrb[8].mxu1  ;;  %v2516_v62 = vshrl.u32 %v2515_v20, 23  ;;  %v10813_v0 = vand.u32 8388607, %v15421_v25 }
 0x36a   : > { %v8191_v53 = vadd.s32 4294967169, %v2412_v30  ;;  %v10796_v8 = vadd.f32 %v2385_v37, %v10778_v14  ;;  %v10798_v60 = vpop.f32.mrb[9].mxu1  ;;  %v2416_v39 = vor.u32 8388608, %v2415_v50 }
 0x36b   : > { %v8195_v46 = vadd.s32 4294967169, %v2516_v62  ;;  %v10828_v54 = vpop.f32.mrb[12].mxu0 }
 0x36c   : > { %15707 = vst [vmem:[#allocation23_spill] sm:$0xff] %v10796_v8  ;;  %v2418_v22 = vadd.s32 1, %v8191_v53  ;;  %v2616_v2 = vand.u32 2147483647, %v10796_v8  ;;  %v2619_v12 = vand.u32 2139095040, %v10796_v8  ;;  %v10809_v51 = vshll.u32 %v2416_v39, 8 }
 0x36d   : > { %v2522_v10 = vadd.s32 1, %v8195_v46  ;;  %v10803_v11 = vpop.f32.mrb[10].mxu1 }
 0x36e   : > { %vm2419_vm12 = vcmp.gt.s32.totalorder %v2418_v22, 0  ;;  %v2623_v35 = vand.u32 8388607, %v2616_v2  ;;  %v2620_v17 = vshrl.u32 %v2619_v12, 23  ;;  %v10807_v61 = vpop.f32.mrb[11].mxu1 }
 0x36f   : > { %v2420_v47 = vsel %vm2419_vm12, %v2418_v22, 0  ;;  %vm2523_vm8 = vcmp.gt.s32.totalorder %v2522_v10, 0 }
 0x370   : > { %v2422_v3 = vand.u32 31, %v2420_v47  ;;  %v2524_v41 = vsel %vm2523_vm8, %v2522_v10, 0  ;;  %v2421_v33 = vshrl.u32 %v2420_v47, 5  ;;  %v8199_v49 = vadd.s32 4294967169, %v2620_v17 }
 0x371   : > { %v2624_v63 = vor.u32 8388608, %v2623_v35  ;;  %v10815_v13 = vand.u32 31, %v2524_v41 }
 0x372   : > { %v2423_v27 = vsub.s32 32, %v2422_v3  ;;  %v2425_v19 = vshll.u32 %v15607_v4, %v2422_v3  ;;  %v2428_v34 = vshll.u32 %v15612_v5, %v2422_v3  ;;  %v2431_v57 = vshll.u32 %v15613_v21, %v2422_v3 }
 0x373   : > { %v2434_v56 = vshll.u32 %v15599_v52, %v2422_v3  ;;  %v2437_v7 = vshll.u32 %v15600_v23, %v2422_v3  ;;  %vm2440_vm13 = vcmp.lt.s32.totalorder %v2421_v33, 1  ;;  %v2626_v1 = vadd.s32 1, %v8199_v49 }
 0x374   : > { %v2426_v18 = vshrl.u32 %v15612_v5, %v2423_v27  ;;  %v2429_v42 = vshrl.u32 %v15613_v21, %v2423_v27  ;;  %v2432_v31 = vshrl.u32 %v15599_v52, %v2423_v27  ;;  %v2424_v9 = vshrl.u32 %v15607_v4, %v2423_v27 }
 0x375   : > { %v2435_v55 = vshrl.u32 %v15600_v23, %v2423_v27  ;;  %v2438_v38 = vshrl.u32 %v15601_v16, %v2423_v27  ;;  %vm2442_vm5 = vcmp.lt.s32.totalorder %v2421_v33, 3  ;;  %vm2443_vm14 = vcmp.lt.s32.totalorder %v2421_v33, 4 }
 0x376   : > { %v2427_v48 = vor.u32 %v2426_v18, %v2425_v19  ;;  %v2430_v58 = vor.u32 %v2429_v42, %v2428_v34  ;;  %v2433_v59 = vor.u32 %v2432_v31, %v2431_v57  ;;  %vm2627_vm4 = vcmp.gt.s32.totalorder %v2626_v1, 0 }
 0x377   : > { %v2436_v40 = vor.u32 %v2435_v55, %v2434_v56  ;;  %v2439_v15 = vor.u32 %v2438_v38, %v2437_v7  ;;  %vm2441_vm10 = vcmp.lt.s32.totalorder %v2421_v33, 2  ;;  %v2628_v53 = vsel %vm2627_vm4, %v2626_v1, 0 }
 0x378   : > { %v2444_v6 = vsel %vm2440_vm13, %v2424_v9, %v2427_v48  ;;  %v2445_v44 = vsel %vm2443_vm14, %v2433_v59, 2102212464  ;;  %v2448_v43 = vsel %vm2440_vm13, %v2427_v48, %v2430_v58  ;;  %v2452_v24 = vsel %vm2440_vm13, %v2430_v58, %v2433_v59 }
 0x379   : > { %v2446_v20 = vsel %vm2442_vm5, %v2430_v58, %v2445_v44  ;;  %v2449_v30 = vsel %vm2443_vm14, %v2436_v40, 920167782  ;;  %v2453_v50 = vsel %vm2443_vm14, %v2439_v15, 1326507024  ;;  %v2629_v12 = vshrl.u32 %v2628_v53, 5 }
 0x37a   : > { %v2450_v37 = vsel %vm2442_vm5, %v2433_v59, %v2449_v30  ;;  %v2454_v62 = vsel %vm2442_vm5, %v2436_v40, %v2453_v50  ;;  %v2447_v46 = vsel %vm2441_vm10, %v2444_v6, %v2446_v20  ;;  %v2630_v3 = vand.u32 31, %v2628_v53  ;;  %v10870_v30 = vpop.f32.mrb[12].mxu1 }
 0x37b   : > { %v2451_v22 = vsel %vm2441_vm10, %v2448_v43, %v2450_v37  ;;  %v2455_v39 = vsel %vm2441_vm10, %v2452_v24, %v2454_v62  ;;  %v2520_v27 = vor.u32 8388608, %v10813_v0  ;;  %v10840_v33 = vshrl.u32 %v2524_v41, 5 }
 0x37c   : > { %v10831_v10 = vmul.u32.u64.low %v10809_v51, %v2455_v39  ;;  %v10832_v35 = vmul.u32.u64.high %v10809_v51, %v2455_v39, %v10831_v10  ;;  %v10835_v47 = vmul.u32.u64.low %v10809_v51, %v2451_v22  ;;  %v10836_v17 = vmul.u32.u64.high %v10809_v51, %v2451_v22, %v10835_v47 }
 0x37d   : > { %v10844_v49 = vadd.f32 %v10798_v60, %v10778_v14  ;;  %v2463_v19 = vmul.u32 %v10809_v51, %v2447_v46  ;;  %vm2648_vm15 = vcmp.lt.s32.totalorder %v2629_v12, 1  ;;  %v10847_v34 = vshll.u32 %v2624_v63, 8 }
 0x37e   : > { %v10850_v57 = vsub.s32 32, %v10815_v13  ;;  %v2631_v56 = vsub.s32 32, %v2630_v3  ;;  %v2633_v18 = vshll.u32 %v15607_v4, %v2630_v3  ;;  %vm2649_vm11 = vcmp.lt.s32.totalorder %v2629_v12, 2 }
 0x37f   : > { %15708 = vst [vmem:[#allocation18_spill] sm:$0xff] %v10844_v49  ;;  %vm2650_vm2 = vcmp.lt.s32.totalorder %v2629_v12, 3  ;;  %vm2465_vm0 = vc.u32 %v10832_v35, %v10835_v47  ;;  %v2466_v41 = vadd.s32 1, %v10836_v17  ;;  %v2636_v14 = vshll.u32 %v15612_v5, %v2630_v3 }
 0x380   : > { %v2639_v60 = vshll.u32 %v15613_v21, %v2630_v3  ;;  %v2634_v51 = vshrl.u32 %v15612_v5, %v2631_v56  ;;  %v2637_v63 = vshrl.u32 %v15613_v21, %v2631_v56  ;;  %v2640_v42 = vshrl.u32 %v15599_v52, %v2631_v56 }
 0x381   : > { %v2642_v31 = vshll.u32 %v15599_v52, %v2630_v3  ;;  %v2467_v7 = vsel %vm2465_vm0, %v2466_v41, %v10836_v17  ;;  %v2643_v9 = vshrl.u32 %v15600_v23, %v2631_v56  ;;  %v2645_v55 = vshll.u32 %v15600_v23, %v2630_v3 }
 0x382   : > { %v2646_v38 = vshrl.u32 %v15601_v16, %v2631_v56  ;;  %v2468_v48 = vadd.s32 %v2467_v7, %v2463_v19  ;;  %v2635_v58 = vor.u32 %v2634_v51, %v2633_v18  ;;  %v2638_v59 = vor.u32 %v2637_v63, %v2636_v14 }
 0x383   : > { %v2641_v1 = vor.u32 %v2640_v42, %v2639_v60  ;;  %v2632_v40 = vshrl.u32 %v15607_v4, %v2631_v56  ;;  %v2644_v15 = vor.u32 %v2643_v9, %v2642_v31  ;;  %vm2651_vm3 = vcmp.lt.s32.totalorder %v2629_v12, 4 }
 0x384   : > { %v2647_v6 = vor.u32 %v2646_v38, %v2645_v55  ;;  %v2469_v44 = vadd.s32 536870912, %v2468_v48  ;;  %v2656_v24 = vsel %vm2648_vm15, %v2635_v58, %v2638_v59  ;;  %v2530_v20 = vshrl.u32 %v15612_v5, %v10850_v57 }
 0x385   : > { %v2653_v43 = vsel %vm2651_vm3, %v2641_v1, 2102212464  ;;  %v2652_v50 = vsel %vm2648_vm15, %v2632_v40, %v2635_v58  ;;  %v2657_v37 = vsel %vm2651_vm3, %v2644_v15, 920167782  ;;  %v2660_v62 = vsel %vm2648_vm15, %v2638_v59, %v2641_v1 }
 0x386   : > { %v2661_v53 = vsel %vm2651_vm3, %v2647_v6, 1326507024  ;;  %v10874_v46 = vshrl.u32 %v2469_v44, 30  ;;  %v2654_v22 = vsel %vm2650_vm2, %v2638_v59, %v2653_v43  ;;  %v2658_v39 = vsel %vm2650_vm2, %v2641_v1, %v2657_v37 }
 0x387   : > { %v2662_v10 = vsel %vm2650_vm2, %v2644_v15, %v2661_v53  ;;  %v2659_v17 = vsel %vm2649_vm11, %v2656_v24, %v2658_v39  ;;  %v2529_v19 = vshll.u32 %v15607_v4, %v10815_v13  ;;  %v2533_v56 = vshrl.u32 %v15613_v21, %v10850_v57 }
 0x388   : > { %v2663_v3 = vsel %vm2649_vm11, %v2660_v62, %v2662_v10  ;;  %v2471_v18 = vshll.u32 %v10874_v46, 30  ;;  %v2532_v60 = vshll.u32 %v15612_v5, %v10815_v13  ;;  %v2655_v51 = vsel %vm2649_vm11, %v2652_v50, %v2654_v22 }
 0x389   : > { %v10887_v41 = vmul.u32.u64.low %v10847_v34, %v2663_v3  ;;  %v10888_v14 = vmul.u32.u64.high %v10847_v34, %v2663_v3, %v10887_v41  ;;  %v10894_v63 = vmul.u32.u64.low %v10847_v34, %v2659_v17  ;;  %v10895_v42 = vmul.u32.u64.high %v10847_v34, %v2659_v17, %v10894_v63 }
 0x38a   : > { %v2531_v31 = vor.u32 %v2530_v20, %v2529_v19  ;;  %v10898_v7 = vsub.s32 %v2468_v48, %v2471_v18  ;;  %v2534_v9 = vor.u32 %v2533_v56, %v2532_v60  ;;  %v2535_v55 = vshll.u32 %v15613_v21, %v10815_v13 }
 0x38b   : > { %v2536_v38 = vshrl.u32 %v15599_v52, %v10850_v57  ;;  %v2538_v58 = vshll.u32 %v15599_v52, %v10815_v13  ;;  %v2539_v12 = vshrl.u32 %v15600_v23, %v10850_v57  ;;  %v2541_v59 = vshll.u32 %v15600_v23, %v10815_v13 }
 0x38c   : > { %v2542_v48 = vshrl.u32 %v15601_v16, %v10850_v57  ;;  %v2474_v1 = vsub.s32 0, %v10898_v7  ;;  %vm2673_vm9 = vc.u32 %v10888_v14, %v10894_v63  ;;  %v2560_v40 = vshll.u32 %v2520_v27, 8 }
 0x38d   : > { %v2723_v15 = vand.u32 2139095040, %v10844_v49  ;;  %v2674_v6 = vadd.s32 1, %v10895_v42  ;;  %v2537_v44 = vor.u32 %v2536_v38, %v2535_v55  ;;  %v2540_v43 = vor.u32 %v2539_v12, %v2538_v58 }
 0x38e   : > { %v2543_v24 = vor.u32 %v2542_v48, %v2541_v59  ;;  %v8192_v13 = vmin.u32 %v2474_v1, %v10898_v7  ;;  %v2671_v20 = vmul.u32 %v10847_v34, %v2655_v51  ;;  %v2528_v50 = vshrl.u32 %v15607_v4, %v10850_v57 }
 0x38f   : > { %vm2544_vm6 = vcmp.lt.s32.totalorder %v10840_v33, 1  ;;  %v2675_v37 = vsel %vm2673_vm9, %v2674_v6, %v10895_v42  ;;  %vm2546_vm1 = vcmp.lt.s32.totalorder %v10840_v33, 3  ;;  %vm2547_vm12 = vcmp.lt.s32.totalorder %v10840_v33, 4 }
 0x390   : > { %v2552_v0 = vsel %vm2544_vm6, %v2531_v31, %v2534_v9  ;;  %v2476_v27 = vclz %v8192_v13  ;;  %v2676_v62 = vadd.s32 %v2675_v37, %v2671_v20  ;;  %v2549_v53 = vsel %vm2547_vm12, %v2537_v44, 2102212464  ;;  %v10958_v20 = vpop.f32.mrb[13].mxu0 }
 0x391   : > { %v2553_v22 = vsel %vm2547_vm12, %v2540_v43, 920167782  ;;  %vm2545_vm8 = vcmp.lt.s32.totalorder %v10840_v33, 2  ;;  %v2556_v39 = vsel %vm2544_vm6, %v2534_v9, %v2537_v44  ;;  %v2557_v57 = vsel %vm2547_vm12, %v2543_v24, 1326507024 }
 0x392   : > { %v2554_v34 = vsel %vm2546_vm1, %v2537_v44, %v2553_v22  ;;  %v8193_v10 = vadd.s32 4294967294, %v2476_v27  ;;  %v2677_v17 = vadd.s32 536870912, %v2676_v62  ;;  %v2548_v3 = vsel %vm2544_vm6, %v2528_v50, %v2531_v31 }
 0x393   : > { %v2555_v19 = vsel %vm2545_vm8, %v2552_v0, %v2554_v34  ;;  %v2550_v56 = vsel %vm2546_vm1, %v2534_v9, %v2549_v53  ;;  %v2558_v18 = vsel %vm2546_vm1, %v2540_v43, %v2557_v57  ;;  %v2724_v31 = vshrl.u32 %v2723_v15, 23 }
 0x394   : > { %v10936_v41 = vmul.u32.u64.low %v2560_v40, %v2555_v19  ;;  %v10937_v60 = vmul.u32.u64.high %v2560_v40, %v2555_v19, %v10936_v41  ;;  %vm8194_vm13 = vcmp.lt.s32.totalorder %v8193_v10, 0  ;;  %v10940_v51 = vshrl.u32 %v2677_v17, 30 }
 0x395   : > { %v2559_v42 = vsel %vm2545_vm8, %v2556_v39, %v2558_v18  ;;  %v2479_v55 = vsel %vm8194_vm13, 0, %v8193_v10  ;;  %v15419_v48 = vand.u32 2147483647, %v10844_v49  ;;  %v2551_v1 = vsel %vm2545_vm8, %v2548_v3, %v2550_v56 }
 0x396   : > { %v10944_v38 = vmul.u32.u64.low %v2560_v40, %v2559_v42  ;;  %v10945_v58 = vmul.u32.u64.high %v2560_v40, %v2559_v42, %v10944_v38  ;;  %v2480_v12 = vsub.s32 32, %v2479_v55  ;;  %v2484_v9 = vsub.s32 4294967266, %v2479_v55 }
 0x397   : > { %v2679_v59 = vshll.u32 %v10940_v51, 30  ;;  %v2570_v6 = vadd.s32 1, %v10937_v60  ;;  %v8203_v44 = vadd.s32 4294967169, %v2724_v31  ;;  %v2464_v43 = vadd.s32 %v10835_v47, %v10832_v35  ;;  %v10964_v35 = vpop.permute.xlu1 %2204 }
 0x398   : > { %v2485_v15 = vadd.s32 127, %v2484_v9  ;;  %vm2569_vm5 = vc.u32 %v10945_v58, %v10936_v41  ;;  %v2567_v33 = vmul.u32 %v2560_v40, %v2551_v1  ;;  %v2727_v0 = vand.u32 8388607, %v15419_v48 }
 0x399   : > { %v10954_v24 = vsub.s32 %v2676_v62, %v2679_v59  ;;  %v2730_v13 = vadd.s32 1, %v8203_v44  ;;  %v2482_v50 = vshrl.u32 %v2464_v43, %v2480_v12  ;;  %v2571_v27 = vsel %vm2569_vm5, %v2570_v6, %v10937_v60 }
 0x39a   : > { %v2481_v47 = vshll.u32 %v10898_v7, %v2479_v55  ;;  %v2486_v62 = vshll.u32 %v2485_v15, 23  ;;  %v2572_v22 = vadd.s32 %v2571_v27, %v2567_v33  ;;  %v10970_v39 = vadd.f32 %v10789_v45, %v10964_v35 }
 0x39b   : > { %v2682_v37 = vsub.s32 0, %v10954_v24  ;;  %vm2731_vm14 = vcmp.gt.s32.totalorder %v2730_v13, 0  ;;  %v2728_v17 = vor.u32 8388608, %v2727_v0  ;;  %v2672_v7 = vadd.s32 %v10894_v63, %v10888_v14 }
 0x39c   : > { %v2732_v34 = vsel %vm2731_vm14, %v2730_v13, 0  ;;  %15709 = vst [vmem:[#allocation25_spill] sm:$0xff] %v10970_v39  ;;  %v10972_v40 = vor.u32 %v2482_v50, %v2481_v47  ;;  %v2573_v10 = vadd.s32 536870912, %v2572_v22  ;;  %v10974_v19 = vor.u32 4788187, %v2486_v62 }
 0x39d   : > { %v8200_v53 = vmin.u32 %v2682_v37, %v10954_v24  ;;  %v2734_v3 = vand.u32 31, %v2732_v34  ;;  %v15420_v42 = vand.u32 2147483647, %v10970_v39  ;;  %v10983_v55 = vshll.u32 %v2728_v17, 8 }
 0x39e   : > { %v10976_v18 = vshrl.u32 %v2573_v10, 30  ;;  %v2490_v45 = vcvt.s32.f32 %v10972_v40  ;;  %v2827_v59 = vand.u32 2139095040, %v10970_v39  ;;  %v2488_v1 = vand.u32 2147483647, %v10974_v19 }
 0x39f   : > { %v2684_v57 = vclz %v8200_v53  ;;  %v2735_v60 = vsub.s32 32, %v2734_v3  ;;  %v2737_v6 = vshll.u32 %v15607_v4, %v2734_v3  ;;  %v2733_v43 = vshrl.u32 %v2732_v34, 5 }
 0x3a0   : > { %v2575_v31 = vshll.u32 %v10976_v18, 30  ;;  %v2740_v15 = vshll.u32 %v15612_v5, %v2734_v3  ;;  %v2743_v13 = vshll.u32 %v15613_v21, %v2734_v3  ;;  %v2746_v0 = vshll.u32 %v15599_v52, %v2734_v3 }
 0x3a1   : > { %v8201_v56 = vadd.s32 4294967294, %v2684_v57  ;;  %v2738_v12 = vshrl.u32 %v15612_v5, %v2735_v60  ;;  %v2741_v9 = vshrl.u32 %v15613_v21, %v2735_v60  ;;  %v2744_v33 = vshrl.u32 %v15599_v52, %v2735_v60 }
 0x3a2   : > { %v10990_v44 = vsub.s32 %v2572_v22, %v2575_v31  ;;  %v2747_v53 = vshrl.u32 %v15600_v23, %v2735_v60  ;;  %v2749_v22 = vshll.u32 %v15600_v23, %v2734_v3  ;;  %v2750_v34 = vshrl.u32 %v15601_v16, %v2735_v60 }
 0x3a3   : > { %vm8202_vm4 = vcmp.lt.s32.totalorder %v8201_v56, 0  ;;  %v2739_v37 = vor.u32 %v2738_v12, %v2737_v6  ;;  %v2742_v62 = vor.u32 %v2741_v9, %v2740_v15  ;;  %v2745_v40 = vor.u32 %v2744_v33, %v2743_v13 }
 0x3a4   : > { %v2687_v38 = vsel %vm8202_vm4, 0, %v8201_v56  ;;  %v2578_v47 = vsub.s32 0, %v10990_v44  ;;  %v2828_v57 = vshrl.u32 %v2827_v59, 23  ;;  %v2748_v56 = vor.u32 %v2747_v53, %v2746_v0 }
 0x3a5   : > { %v2688_v14 = vsub.s32 32, %v2687_v38  ;;  %v2692_v63 = vsub.s32 4294967266, %v2687_v38  ;;  %v2689_v10 = vshll.u32 %v10954_v24, %v2687_v38  ;;  %v2736_v31 = vshrl.u32 %v15607_v4, %v2735_v60 }
 0x3a6   : > { %v8196_v19 = vmin.u32 %v2578_v47, %v10990_v44  ;;  %vm2752_vm10 = vcmp.lt.s32.totalorder %v2733_v43, 1  ;;  %vm2755_vm15 = vcmp.lt.s32.totalorder %v2733_v43, 4  ;;  %vm2753_vm11 = vcmp.lt.s32.totalorder %v2733_v43, 2 }
 0x3a7   : > { %v2693_v50 = vadd.s32 127, %v2692_v63  ;;  %v2690_v27 = vshrl.u32 %v2672_v7, %v2688_v14  ;;  %v2751_v7 = vor.u32 %v2750_v34, %v2749_v22  ;;  %v2757_v14 = vsel %vm2755_vm15, %v2745_v40, 2102212464 }
 0x3a8   : > { %v2580_v9 = vclz %v8196_v19  ;;  %v2760_v63 = vsel %vm2752_vm10, %v2739_v37, %v2742_v62  ;;  %vm2754_vm2 = vcmp.lt.s32.totalorder %v2733_v43, 3  ;;  %v2761_v3 = vsel %vm2755_vm15, %v2748_v56, 920167782 }
 0x3a9   : > { %v2694_v17 = vshll.u32 %v2693_v50, 23  ;;  %v2691_v12 = vor.u32 %v2690_v27, %v2689_v10  ;;  %v2764_v6 = vsel %vm2752_vm10, %v2742_v62, %v2745_v40  ;;  %v2762_v24 = vsel %vm2754_vm2, %v2745_v40, %v2761_v3 }
 0x3aa   : > { %v8197_v15 = vadd.s32 4294967294, %v2580_v9  ;;  %v2765_v38 = vsel %vm2755_vm15, %v2751_v7, 1326507024  ;;  %v2756_v13 = vsel %vm2752_vm10, %v2736_v31, %v2739_v37  ;;  %v2758_v50 = vsel %vm2754_vm2, %v2742_v62, %v2757_v14  ;;  %v11024_v14 = vpop.f32.mrb[13].mxu1 }
 0x3ab   : > { %v2695_v59 = vor.u32 4788187, %v2694_v17  ;;  %v2763_v33 = vsel %vm2753_vm11, %v2760_v63, %v2762_v24  ;;  %v2766_v60 = vsel %vm2754_vm2, %v2748_v56, %v2765_v38  ;;  %v2491_v40 = vmul.f32 %v2490_v45, %v2488_v1 }
 0x3ac   : > { %vm8198_vm0 = vcmp.lt.s32.totalorder %v8197_v15, 0  ;;  %v2767_v0 = vsel %vm2753_vm11, %v2764_v6, %v2766_v60  ;;  %v11006_v27 = vmul.u32.u64.low %v10983_v55, %v2763_v33  ;;  %v11007_v47 = vmul.u32.u64.high %v10983_v55, %v2763_v33, %v11006_v27 }
 0x3ad   : > { %v11010_v53 = vsel %vm8198_vm0, 0, %v8197_v15  ;;  %v11013_v22 = vmul.u32.u64.low %v10983_v55, %v2767_v0  ;;  %v11014_v34 = vmul.u32.u64.high %v10983_v55, %v2767_v0, %v11013_v22  ;;  %v2696_v37 = vand.u32 2147483647, %v2695_v59 }
 0x3ae   : > { %v2759_v62 = vsel %vm2753_vm11, %v2756_v13, %v2758_v50  ;;  %v8207_v10 = vadd.s32 4294967169, %v2828_v57  ;;  %vm2410_vm3 = vcmp.lt.s32.totalorder %v10781_v26, 0  ;;  %v2494_v17 = vsub.s32 4, %v10874_v46 }
 0x3af   : > { %v2588_v19 = vsub.s32 4294967266, %v11010_v53  ;;  %v2698_v56 = vcvt.s32.f32 %v2691_v12  ;;  %v2702_v31 = vsub.s32 4, %v10940_v51  ;;  %v2778_v7 = vadd.s32 1, %v11007_v47 }
 0x3b0   : > { %v2831_v9 = vand.u32 8388607, %v15420_v42  ;;  %v2775_v45 = vmul.u32 %v10983_v55, %v2759_v62  ;;  %vm2777_vm9 = vc.u32 %v11014_v34, %v11006_v27  ;;  %v2834_v1 = vadd.s32 1, %v8207_v10 }
 0x3b1   : > { %v11031_v43 = vadd.f32 %v10803_v11, %v10964_v35  ;;  %v2492_v57 = vxor.u32 2147483648, %v2491_v40  ;;  %v11033_v12 = vmul.f32 %v2698_v56, %v2696_v37  ;;  %v2584_v63 = vsub.s32 32, %v11010_v53 }
 0x3b2   : > { %v2779_v3 = vsel %vm2777_vm9, %v2778_v7, %v11007_v47  ;;  %v2589_v6 = vadd.s32 127, %v2588_v19  ;;  %vm2835_vm6 = vcmp.gt.s32.totalorder %v2834_v1, 0  ;;  %v11039_v55 = vadd.f32 %v10791_v29, %v10964_v35 }
 0x3b3   : > { %15710 = vst [vmem:[#allocation24_spill] sm:$0xff] %v11031_v43  ;;  %v2780_v59 = vadd.s32 %v2779_v3, %v2775_v45  ;;  %v11044_v15 = vsel %vm2410_vm3, %v2494_v17, %v10874_v46  ;;  %vm2618_vm1 = vcmp.lt.s32.totalorder %v10796_v8, 0  ;;  %v2568_v11 = vadd.s32 %v10936_v41, %v10945_v58 }
 0x3b4   : > { %v2836_v24 = vsel %vm2835_vm6, %v2834_v1, 0  ;;  %v11052_v38 = vsel %vm2618_vm1, %v2702_v31, %v10940_v51  ;;  %v2832_v50 = vor.u32 8388608, %v2831_v9  ;;  %v2493_v33 = vsel %vm2410_vm3, %v2492_v57, %v2491_v40 }
 0x3b5   : > { %v2781_v13 = vadd.s32 536870912, %v2780_v59  ;;  %v2838_v29 = vand.u32 31, %v2836_v24  ;;  %v2700_v46 = vxor.u32 2147483648, %v11033_v12  ;;  %v2586_v60 = vshrl.u32 %v2568_v11, %v2584_v63 }
 0x3b6   : > { %v15423_v0 = vand.u32 2147483647, %v11031_v43  ;;  %v2590_v47 = vshll.u32 %v2589_v6, 23  ;;  %v3035_v58 = vand.u32 2139095040, %v11031_v43  ;;  %v2837_v37 = vshrl.u32 %v2836_v24, 5 }
 0x3b7   : > { %v11058_v22 = vshrl.u32 %v2781_v13, 30  ;;  %v2839_v41 = vsub.s32 32, %v2838_v29  ;;  %v2841_v51 = vshll.u32 %v15607_v4, %v2838_v29  ;;  %v2844_v62 = vshll.u32 %v15612_v5, %v2838_v29 }
 0x3b8   : > { %v2847_v10 = vshll.u32 %v15613_v21, %v2838_v29  ;;  %v2850_v56 = vshll.u32 %v15599_v52, %v2838_v29  ;;  %v2853_v9 = vshll.u32 %v15600_v23, %v2838_v29  ;;  %vm11074_vm12 = vcmp.le.f32.partialorder %v2408_v32, 0.7853982 }
 0x3b9   : > { %v2783_v40 = vshll.u32 %v11058_v22, 30  ;;  %v2842_v17 = vshrl.u32 %v15612_v5, %v2839_v41  ;;  %v2845_v19 = vshrl.u32 %v15613_v21, %v2839_v41  ;;  %v2848_v31 = vshrl.u32 %v15599_v52, %v2839_v41 }
 0x3ba   : > { %v2851_v7 = vshrl.u32 %v15600_v23, %v2839_v41  ;;  %v2854_v45 = vshrl.u32 %v15601_v16, %v2839_v41  ;;  %v2585_v57 = vshll.u32 %v10990_v44, %v11010_v53  ;;  %v2872_v48 = vshll.u32 %v2832_v50, 8 }
 0x3bb   : > { %v11080_v63 = vsub.s32 %v2780_v59, %v2783_v40  ;;  %v2843_v3 = vor.u32 %v2842_v17, %v2841_v51  ;;  %v2846_v6 = vor.u32 %v2845_v19, %v2844_v62  ;;  %v2849_v11 = vor.u32 %v2848_v31, %v2847_v10 }
 0x3bc   : > { %v2852_v24 = vor.u32 %v2851_v7, %v2850_v56  ;;  %v2855_v13 = vor.u32 %v2854_v45, %v2853_v9  ;;  %vm11084_vm8 = vcmp.le.f32.partialorder %v2616_v2, 0.7853982  ;;  %v2587_v32 = vor.u32 %v2586_v60, %v2585_v57 }
 0x3bd   : > { %v2591_v42 = vor.u32 4788187, %v2590_v47  ;;  %v2786_v25 = vsub.s32 0, %v11080_v63  ;;  %vm2856_vm13 = vcmp.lt.s32.totalorder %v2837_v37, 1  ;;  %v2840_v44 = vshrl.u32 %v15607_v4, %v2839_v41 }
 0x3be   : > { %vm2859_vm5 = vcmp.lt.s32.totalorder %v2837_v37, 4  ;;  %v2864_v53 = vsel %vm2856_vm13, %v2843_v3, %v2846_v6  ;;  %v3036_v59 = vshrl.u32 %v3035_v58, 23  ;;  %vm2858_vm14 = vcmp.lt.s32.totalorder %v2837_v37, 3 }
 0x3bf   : > { %v8204_v51 = vmin.u32 %v2786_v25, %v11080_v63  ;;  %v2861_v50 = vsel %vm2859_vm5, %v2849_v11, 2102212464  ;;  %v2865_v62 = vsel %vm2859_vm5, %v2852_v24, 920167782  ;;  %vm2857_vm4 = vcmp.lt.s32.totalorder %v2837_v37, 2 }
 0x3c0   : > { %v2866_v2 = vsel %vm2858_vm14, %v2849_v11, %v2865_v62  ;;  %v2868_v10 = vsel %vm2856_vm13, %v2846_v6, %v2849_v11  ;;  %v2869_v40 = vsel %vm2859_vm5, %v2855_v13, 1326507024  ;;  %v2860_v60 = vsel %vm2856_vm13, %v2840_v44, %v2843_v3 }
 0x3c1   : > { %v2788_v17 = vclz %v8204_v51  ;;  %v2867_v47 = vsel %vm2857_vm4, %v2864_v53, %v2866_v2  ;;  %v2870_v19 = vsel %vm2858_vm14, %v2852_v24, %v2869_v40  ;;  %v2862_v56 = vsel %vm2858_vm14, %v2846_v6, %v2861_v50  ;;  %v11111_v53 = vpop.f32.mrb[14].mxu0 }
 0x3c2   : > { %v2871_v41 = vsel %vm2857_vm4, %v2868_v10, %v2870_v19  ;;  %v11093_v31 = vmul.u32.u64.low %v2872_v48, %v2867_v47  ;;  %v11094_v7 = vmul.u32.u64.high %v2872_v48, %v2867_v47, %v11093_v31  ;;  %v8215_v45 = vadd.s32 4294967169, %v3036_v59 }
 0x3c3   : > { %v8205_v25 = vadd.s32 4294967294, %v2788_v17  ;;  %v11097_v58 = vmul.u32.u64.low %v2872_v48, %v2871_v41  ;;  %v11098_v9 = vmul.u32.u64.high %v2872_v48, %v2871_v41, %v11097_v58  ;;  %v2496_v57 = vsel %vm11074_vm12, %v10781_v26, %v2493_v33 }
 0x3c4   : > { %v2497_v3 = vsel %vm11074_vm12, 0, %v11044_v15  ;;  %v2701_v6 = vsel %vm2618_vm1, %v2700_v46, %v11033_v12  ;;  %v2592_v11 = vand.u32 2147483647, %v2591_v42  ;;  %v2863_v24 = vsel %vm2857_vm4, %v2860_v60, %v2862_v56 }
 0x3c5   : > { %vm8206_vm10 = vcmp.lt.s32.totalorder %v8205_v25, 0  ;;  %v3042_v13 = vadd.s32 1, %v8215_v45  ;;  %v2931_v44 = vand.u32 2139095040, %v11039_v55  ;;  %v2705_v33 = vsel %vm11084_vm8, 0, %v11052_v38 }
 0x3c6   : > { %v2594_v59 = vcvt.s32.f32 %v2587_v32  ;;  %v11116_v1 = vsel %vm8206_vm10, 0, %v8205_v25  ;;  %v2882_v15 = vadd.s32 1, %v11094_v7  ;;  %8857 = vcosq.f32 %v2496_v57 }
 0x3c7   : > { %v11122_v42 = vsel %vm11084_vm8, %v10796_v8, %v2701_v6  ;;  %v3039_v12 = vand.u32 8388607, %v15423_v0  ;;  %v15422_v46 = vand.u32 2147483647, %v11039_v55  ;;  %v2879_v51 = vmul.u32 %v2872_v48, %v2863_v24 }
 0x3c8   : > { %v2595_v37 = vmul.f32 %v2594_v59, %v2592_v11  ;;  %vm2881_vm15 = vc.u32 %v11098_v9, %v11093_v31  ;;  %vm3043_vm11 = vcmp.gt.s32.totalorder %v3042_v13, 0  ;;  %v2796_v38 = vsub.s32 4294967266, %v11116_v1 }
 0x3c9   : > { %v2883_v32 = vsel %vm2881_vm15, %v2882_v15, %v11094_v7  ;;  %v3044_v50 = vsel %vm3043_vm11, %v3042_v13, 0  ;;  %v2932_v62 = vshrl.u32 %v2931_v44, 23  ;;  %8859 = vsinq.f32 %v2496_v57 }
 0x3ca   : > { %vm2514_vm2 = vcmp.lt.s32.totalorder %v10784_v36, 0  ;;  %v2884_v29 = vadd.s32 %v2883_v32, %v2879_v51  ;;  %v3046_v2 = vand.u32 31, %v3044_v50  ;;  %v11132_v10 = vadd.s32 3, %v2497_v3 }
 0x3cb   : > { %8861 = vcosq.f32 %v11122_v42  ;;  %v11135_v48 = vadd.s32 3, %v2705_v33  ;;  %v3040_v40 = vor.u32 8388608, %v3039_v12  ;;  %v2596_v17 = vxor.u32 2147483648, %v2595_v37 }
 0x3cc   : > { %15715 = vst [vmem:[#allocation16_spill] sm:$0xff] %v11132_v10  ;;  %v2885_v60 = vadd.s32 536870912, %v2884_v29  ;;  %v3047_v47 = vsub.s32 32, %v3046_v2  ;;  %v11139_v19 = vand.u32 8388607, %v15422_v46  ;;  %v2792_v56 = vsub.s32 32, %v11116_v1 }
 0x3cd   : > { %15716 = vst [vmem:[#allocation28_spill] sm:$0xff] %v11135_v48  ;;  %v2797_v41 = vadd.s32 127, %v2796_v38  ;;  %v3049_v7 = vshll.u32 %v15607_v4, %v3046_v2  ;;  %v8211_v25 = vadd.s32 4294967169, %v2932_v62  ;;  %v3052_v57 = vshll.u32 %v15612_v5, %v3046_v2 }
 0x3ce   : > { %v11143_v58 = vshrl.u32 %v2885_v60, 30  ;;  %v3050_v45 = vshrl.u32 %v15612_v5, %v3047_v47  ;;  %v3053_v3 = vshrl.u32 %v15613_v21, %v3047_v47  ;;  %v3055_v6 = vshll.u32 %v15613_v21, %v3046_v2 }
 0x3cf   : > { %v3056_v11 = vshrl.u32 %v15599_v52, %v3047_v47  ;;  %v3058_v24 = vshll.u32 %v15599_v52, %v3046_v2  ;;  %v3059_v13 = vshrl.u32 %v15600_v23, %v3047_v47  ;;  %v2776_v44 = vadd.s32 %v11006_v27, %v11014_v34 }
 0x3d0   : > { %v2887_v33 = vshll.u32 %v11143_v58, 30  ;;  %v3045_v59 = vshrl.u32 %v3044_v50, 5  ;;  %v3051_v15 = vor.u32 %v3050_v45, %v3049_v7  ;;  %v11155_v12 = vpop.eup %8857  ;;  %v3054_v51 = vor.u32 %v3053_v3, %v3052_v57 }
 0x3d1   : > { %15717 = vst [vmem:[#allocation33_spill] sm:$0xff] %v11155_v12  ;;  %v3057_v38 = vor.u32 %v3056_v11, %v3055_v6  ;;  %v3060_v32 = vor.u32 %v3059_v13, %v3058_v24  ;;  %v3062_v62 = vshrl.u32 %v15601_v16, %v3047_v47  ;;  %v2597_v60 = vsel %vm2514_vm2, %v2596_v17, %v2595_v37 }
 0x3d2   : > { %v11160_v46 = vsub.s32 %v2884_v29, %v2887_v33  ;;  %v3061_v0 = vshll.u32 %v15600_v23, %v3046_v2  ;;  %v11163_v28 = vshll.u32 %v3040_v40, 8  ;;  %v15718_v27 = vand.u32 2147483647, %v10784_v36 }
 0x3d3   : > { %v2794_v50 = vshrl.u32 %v2776_v44, %v2792_v56  ;;  %v2798_v7 = vshll.u32 %v2797_v41, 23  ;;  %v2936_v45 = vor.u32 8388608, %v11139_v19  ;;  %v2938_v57 = vadd.s32 1, %v8211_v25  ;;  %v11172_v3 = vpop.eup %8859 }
 0x3d4   : > { %vm11167_vm0 = vcmp.le.f32.partialorder %v15718_v27, 0.7853982  ;;  %15721 = vst [vmem:[#allocation7_spill] sm:$0xff] %v11172_v3  ;;  %v2890_v37 = vsub.s32 0, %v11160_v46  ;;  %v3063_v29 = vor.u32 %v3062_v62, %v3061_v0  ;;  %vm3064_vm3 = vcmp.lt.s32.totalorder %v3045_v59, 1 }
 0x3d5   : > { %vm3067_vm9 = vcmp.lt.s32.totalorder %v3045_v59, 4  ;;  %v11175_v2 = vpop.eup %8861  ;;  %vm3066_vm6 = vcmp.lt.s32.totalorder %v3045_v59, 3  ;;  %v3072_v17 = vsel %vm3064_vm3, %v3051_v15, %v3054_v51  ;;  %v3048_v19 = vshrl.u32 %v15607_v4, %v3047_v47 }
 0x3d6   : > { %15722 = vst [vmem:[#allocation12_spill] sm:$0xff] %v11175_v2  ;;  %v3069_v40 = vsel %vm3067_vm9, %v3057_v38, 2102212464  ;;  %v3073_v56 = vsel %vm3067_vm9, %v3060_v32, 920167782  ;;  %v8208_v41 = vmin.u32 %v2890_v37, %v11160_v46  ;;  %vm3065_vm1 = vcmp.lt.s32.totalorder %v3045_v59, 2 }
 0x3d7   : > { %v3074_v25 = vsel %vm3066_vm6, %v3057_v38, %v3073_v56  ;;  %v2793_v0 = vshll.u32 %v11080_v63, %v11116_v1  ;;  %v2799_v6 = vor.u32 4788187, %v2798_v7  ;;  %v3076_v24 = vsel %vm3064_vm3, %v3054_v51, %v3057_v38  ;;  %v11196_v63 = vpop.f32.mrb[14].mxu1 }
 0x3d8   : > { %v3075_v11 = vsel %vm3065_vm1, %v3072_v17, %v3074_v25  ;;  %v2892_v13 = vclz %v8208_v41  ;;  %v3068_v44 = vsel %vm3064_vm3, %v3048_v19, %v3051_v15  ;;  %v3070_v33 = vsel %vm3066_vm6, %v3054_v51, %v3069_v40 }
 0x3d9   : > { %v3077_v62 = vsel %vm3067_vm9, %v3063_v29, 1326507024  ;;  %v11192_v27 = vmul.u32.u64.low %v11163_v28, %v3075_v11  ;;  %v11193_v37 = vmul.u32.u64.high %v11163_v28, %v3075_v11, %v11192_v27  ;;  %vm2939_vm12 = vcmp.gt.s32.totalorder %v2938_v57, 0 }
 0x3da   : > { %v3078_v47 = vsel %vm3066_vm6, %v3060_v32, %v3077_v62  ;;  %v2795_v1 = vor.u32 %v2794_v50, %v2793_v0  ;;  %v8209_v7 = vadd.s32 4294967294, %v2892_v13  ;;  %v2940_v17 = vsel %vm2939_vm12, %v2938_v57, 0 }
 0x3db   : > { %v3079_v38 = vsel %vm3065_vm1, %v3076_v24, %v3078_v47  ;;  %8863 = vsinq.f32 %v11122_v42  ;;  %v2942_v32 = vand.u32 31, %v2940_v17  ;;  %v11207_v29 = vsel %vm11167_vm0, %v10784_v36, %v2597_v60  ;;  %v11215_v42 = vpop.permute.xlu0 %2209 }
 0x3dc   : > { %v11201_v15 = vmul.u32.u64.low %v11163_v28, %v3079_v38  ;;  %v11202_v51 = vmul.u32.u64.high %v11163_v28, %v3079_v38, %v11201_v15  ;;  %vm2826_vm8 = vcmp.lt.s32.totalorder %v10970_v39, 0  ;;  %vm8210_vm13 = vcmp.lt.s32.totalorder %v8209_v7, 0 }
 0x3dd   : > { %v3071_v50 = vsel %vm3065_vm1, %v3068_v44, %v3070_v33  ;;  %v11213_v57 = vadd.f32 %v10807_v61, %v10964_v35  ;;  %v2800_v40 = vand.u32 2147483647, %v2799_v6  ;;  %v11217_v56 = vsel %vm8210_vm13, 0, %v8209_v7 }
 0x3de   : > { %v3090_v41 = vadd.s32 1, %v11193_v37  ;;  %v2943_v19 = vsub.s32 32, %v2942_v32  ;;  %v2802_v25 = vcvt.s32.f32 %v2795_v1  ;;  %v2880_v60 = vadd.s32 %v11093_v31, %v11098_v9 }
 0x3df   : > { %v11222_v0 = vshll.u32 %v2936_v45, 8  ;;  %v11226_v59 = vadd.f32 %v10828_v54, %v11215_v42  ;;  %v2910_v61 = vsub.s32 4, %v11143_v58  ;;  %v3087_v35 = vmul.u32 %v11163_v28, %v3071_v50 }
 0x3e0   : > { %vm3089_vm5 = vc.u32 %v11202_v51, %v11192_v27  ;;  %v2946_v6 = vshrl.u32 %v15612_v5, %v2943_v19  ;;  %v2900_v11 = vsub.s32 4294967266, %v11217_v56  ;;  %v2945_v31 = vshll.u32 %v15607_v4, %v2942_v32 }
 0x3e1   : > { %15723 = vst [vmem:[#allocation14_spill] sm:$0xff] %v11226_v59  ;;  %v3091_v24 = vsel %vm3089_vm5, %v3090_v41, %v11193_v37  ;;  %v2949_v9 = vshrl.u32 %v15613_v21, %v2943_v19  ;;  %v2803_v45 = vmul.f32 %v2802_v25, %v2800_v40  ;;  %v2948_v13 = vshll.u32 %v15612_v5, %v2942_v32 }
 0x3e2   : > { %v3092_v54 = vadd.s32 %v3091_v24, %v3087_v35  ;;  %v2952_v44 = vshrl.u32 %v15599_v52, %v2943_v19  ;;  %v2941_v28 = vshrl.u32 %v2940_v17, 5  ;;  %v2947_v33 = vor.u32 %v2946_v6, %v2945_v31 }
 0x3e3   : > { %v2951_v62 = vshll.u32 %v15613_v21, %v2942_v32  ;;  %v2950_v7 = vor.u32 %v2949_v9, %v2948_v13  ;;  %v2954_v37 = vshll.u32 %v15599_v52, %v2942_v32  ;;  %v2955_v38 = vshrl.u32 %v15600_v23, %v2943_v19 }
 0x3e4   : > { %v3093_v1 = vadd.s32 536870912, %v3092_v54  ;;  %v2901_v15 = vadd.s32 127, %v2900_v11  ;;  %v2957_v40 = vshll.u32 %v15600_v23, %v2942_v32  ;;  %v2958_v41 = vshrl.u32 %v15601_v16, %v2943_v19 }
 0x3e5   : > { %v2953_v50 = vor.u32 %v2952_v44, %v2951_v62  ;;  %v11245_v25 = vpop.eup %8863  ;;  %v2804_v17 = vxor.u32 2147483648, %v2803_v45  ;;  %v11250_v35 = vsel %vm2826_vm8, %v2910_v61, %v11143_v58  ;;  %v2956_v24 = vor.u32 %v2955_v38, %v2954_v37 }
 0x3e6   : > { %15724 = vst [vmem:[#allocation13_spill] sm:$0xff] %v11245_v25  ;;  %v11252_v6 = vshrl.u32 %v3093_v1, 30  ;;  %vm15463_vm14 = vcmp.lt.s32.totalorder %v10844_v49, 0  ;;  %v15725_v11 = vand.u32 2147483647, %v10970_v39  ;;  %v2896_v32 = vsub.s32 32, %v11217_v56 }
 0x3e7   : > { %v2959_v9 = vor.u32 %v2958_v41, %v2957_v40  ;;  %vm2960_vm10 = vcmp.lt.s32.totalorder %v2941_v28, 1  ;;  %v3139_v13 = vand.u32 2139095040, %v11213_v57  ;;  %v2944_v61 = vshrl.u32 %v15607_v4, %v2943_v19 }
 0x3e8   : > { %vm11257_vm4 = vcmp.le.f32.partialorder %v15725_v11, 0.7853982  ;;  %v3095_v58 = vshll.u32 %v11252_v6, 30  ;;  %vm2963_vm15 = vcmp.lt.s32.totalorder %v2941_v28, 4  ;;  %v2968_v44 = vsel %vm2960_vm10, %v2947_v33, %v2950_v7 }
 0x3e9   : > { %v2902_v62 = vshll.u32 %v2901_v15, 23  ;;  %vm2962_vm11 = vcmp.lt.s32.totalorder %v2941_v28, 3  ;;  %v2965_v1 = vsel %vm2963_vm15, %v2953_v50, 2102212464  ;;  %v2969_v37 = vsel %vm2963_vm15, %v2956_v24, 920167782 }
 0x3ea   : > { %v11266_v38 = vsub.s32 %v3092_v54, %v3095_v58  ;;  %vm2961_vm3 = vcmp.lt.s32.totalorder %v2941_v28, 2  ;;  %v2970_v11 = vsel %vm2962_vm11, %v2953_v50, %v2969_v37  ;;  %v2972_v40 = vsel %vm2960_vm10, %v2950_v7, %v2953_v50 }
 0x3eb   : > { %v15728_v41 = vand.u32 2147483647, %v10844_v49  ;;  %v15729_v47 = vmov 0  ;;  %v2897_v19 = vshll.u32 %v11160_v46, %v11217_v56  ;;  %v2898_v8 = vshrl.u32 %v2880_v60, %v2896_v32 }
 0x3ec   : > { %v2971_v15 = vsel %vm2961_vm3, %v2968_v44, %v2970_v11  ;;  %v2973_v2 = vsel %vm2963_vm15, %v2959_v9, 1326507024  ;;  %v3098_v54 = vsub.s32 0, %v11266_v38  ;;  %v2964_v58 = vsel %vm2960_vm10, %v2944_v61, %v2947_v33  ;;  %v11300_v61 = vpop.f32.mrb[15].mxu0 }
 0x3ed   : > { %vm11271_vm9 = vcmp.le.f32.partialorder %v15728_v41, 0.7853982  ;;  %v2966_v37 = vsel %vm2962_vm11, %v2950_v7, %v2965_v1  ;;  %v2974_v25 = vsel %vm2962_vm11, %v2956_v24, %v2973_v2  ;;  %v2903_v50 = vor.u32 4788187, %v2902_v62 }
 0x3ee   : > { %v15730_v47 = vsel %vm11271_vm9, 4294967295, %v15729_v47  ;;  %v2975_v48 = vsel %vm2961_vm3, %v2972_v40, %v2974_v25  ;;  %v11282_v41 = vmul.u32.u64.low %v11222_v0, %v2971_v15  ;;  %v11283_v26 = vmul.u32.u64.high %v11222_v0, %v2971_v15, %v11282_v41 }
 0x3ef   : > { %15731 = vst [vmem:[#allocation20_spill] sm:$0xff] %v15730_v47  ;;  %8865 = vcosq.f32 %v11207_v29  ;;  %v8216_v46 = vmin.u32 %v3098_v54, %v11266_v38  ;;  %v11289_v56 = vmul.u32.u64.low %v11222_v0, %v2975_v48  ;;  %v11290_v60 = vmul.u32.u64.high %v11222_v0, %v2975_v48, %v11289_v56 }
 0x3f0   : > { %8867 = vsinq.f32 %v11207_v29  ;;  %v2899_v33 = vor.u32 %v2898_v8, %v2897_v19  ;;  %v2967_v2 = vsel %vm2961_vm3, %v2964_v58, %v2966_v37  ;;  %v3140_v7 = vshrl.u32 %v3139_v13, 23 }
 0x3f1   : > { %v2805_v25 = vsel %vm15463_vm14, %v2804_v17, %v2803_v45  ;;  %v2913_v24 = vsel %vm11257_vm4, 0, %v11250_v35  ;;  %v3100_v32 = vclz %v8216_v46  ;;  %v3243_v9 = vand.u32 2139095040, %v11226_v59 }
 0x3f2   : > { %v2904_v48 = vand.u32 2147483647, %v2903_v50  ;;  %v2986_v44 = vadd.s32 1, %v11283_v26  ;;  %v8219_v29 = vadd.s32 4294967169, %v3140_v7  ;;  %v15732_v8 = vand.u32 2147483647, %v11213_v57 }
 0x3f3   : > { %v8217_v13 = vadd.s32 4294967294, %v3100_v32  ;;  %v2983_v62 = vmul.u32 %v11222_v0, %v2967_v2  ;;  %vm2985_vm6 = vc.u32 %v11290_v60, %v11282_v41  ;;  %v15429_v45 = vand.u32 2147483647, %v11226_v59 }
 0x3f4   : > { %v3143_v28 = vand.u32 8388607, %v15732_v8  ;;  %v2906_v17 = vcvt.s32.f32 %v2899_v33  ;;  %v2987_v35 = vsel %vm2985_vm6, %v2986_v44, %v11283_v26  ;;  %v3146_v1 = vadd.s32 1, %v8219_v29 }
 0x3f5   : > { %v3244_v11 = vshrl.u32 %v3243_v9, 23  ;;  %v11313_v40 = vsel %vm11271_vm9, %v10844_v49, %v2805_v25  ;;  %v3088_v19 = vadd.s32 %v11192_v27, %v11202_v51  ;;  %vm8218_vm1 = vcmp.lt.s32.totalorder %v8217_v13, 0 }
 0x3f6   : > { %v2988_v0 = vadd.s32 %v2987_v35, %v2983_v62  ;;  %v11317_v15 = vmul.f32 %v2906_v17, %v2904_v48  ;;  %v3103_v54 = vsel %vm8218_vm1, 0, %v8217_v13  ;;  %v3144_v58 = vor.u32 8388608, %v3143_v28 }
 0x3f7   : > { %vm3147_vm12 = vcmp.gt.s32.totalorder %v3146_v1, 0  ;;  %v3104_v37 = vsub.s32 32, %v3103_v54  ;;  %v3108_v50 = vsub.s32 4294967266, %v3103_v54  ;;  %v11321_v46 = vand.u32 8388607, %v15429_v45 }
 0x3f8   : > { %v2989_v26 = vadd.s32 536870912, %v2988_v0  ;;  %v11323_v56 = vadd.s32 3, %v2913_v24  ;;  %v3148_v33 = vsel %vm3147_vm12, %v3146_v1, 0  ;;  %v8223_v2 = vadd.s32 4294967169, %v3244_v11 }
 0x3f9   : > { %v11327_v27 = vadd.f32 %v10870_v30, %v11215_v42  ;;  %v11329_v51 = vpop.eup %8865  ;;  %8869 = vcosq.f32 %v11313_v40  ;;  %v3106_v7 = vshrl.u32 %v3088_v19, %v3104_v37  ;;  %v3109_v25 = vadd.s32 127, %v3108_v50 }
 0x3fa   : > { %15733 = vst [vmem:[#allocation10_spill] sm:$0xff] %v11323_v56  ;;  %v11332_v32 = vshrl.u32 %v2989_v26, 30  ;;  %v11334_v9 = vpop.eup %8867  ;;  %v3105_v24 = vshll.u32 %v11266_v38, %v3103_v54  ;;  %v3118_v44 = vsub.s32 4, %v11252_v6  ;;  %v3150_v29 = vand.u32 31, %v3148_v33 }
 0x3fb   : > { %15734 = vst [vmem:[#allocation27_spill] sm:$0xff] %v11327_v27  ;;  %v3110_v8 = vshll.u32 %v3109_v25, 23  ;;  %v11340_v28 = vshll.u32 %v3144_v58, 8  ;;  %v3149_v17 = vshrl.u32 %v3148_v33, 5  ;;  %v3250_v1 = vadd.s32 1, %v8223_v2 }
 0x3fc   : > { %v2991_v30 = vshll.u32 %v11332_v32, 30  ;;  %v3107_v62 = vor.u32 %v3106_v7, %v3105_v24  ;;  %v3151_v35 = vsub.s32 32, %v3150_v29  ;;  %v3153_v37 = vshll.u32 %v15607_v4, %v3150_v29 }
 0x3fd   : > { %v3111_v11 = vor.u32 4788187, %v3110_v8  ;;  %v3156_v38 = vshll.u32 %v15612_v5, %v3150_v29  ;;  %v3159_v58 = vshll.u32 %v15613_v21, %v3150_v29  ;;  %vm3034_vm13 = vcmp.lt.s32.totalorder %v11031_v43, 0 }
 0x3fe   : > { %v11343_v19 = vsub.s32 %v2988_v0, %v2991_v30  ;;  %v3154_v54 = vshrl.u32 %v15612_v5, %v3151_v35  ;;  %v3157_v50 = vshrl.u32 %v15613_v21, %v3151_v35  ;;  %v3160_v26 = vshrl.u32 %v15599_v52, %v3151_v35 }
 0x3ff   : > { %v3162_v2 = vshll.u32 %v15599_v52, %v3150_v29  ;;  %v3163_v0 = vshrl.u32 %v15600_v23, %v3151_v35  ;;  %v3165_v7 = vshll.u32 %v15600_v23, %v3150_v29  ;;  %v3166_v30 = vshrl.u32 %v15601_v16, %v3151_v35 }
 0x400   : > { %v2994_v33 = vsub.s32 0, %v11343_v19  ;;  %v3155_v25 = vor.u32 %v3154_v54, %v3153_v37  ;;  %v3158_v24 = vor.u32 %v3157_v50, %v3156_v38  ;;  %v3161_v8 = vor.u32 %v3160_v26, %v3159_v58 }
 0x401   : > { %v3112_v45 = vand.u32 2147483647, %v3111_v11  ;;  %v3164_v48 = vor.u32 %v3163_v0, %v3162_v2  ;;  %vm3251_vm5 = vcmp.gt.s32.totalorder %v3250_v1, 0  ;;  %v3114_v56 = vcvt.s32.f32 %v3107_v62 }
 0x402   : > { %v8212_v13 = vmin.u32 %v2994_v33, %v11343_v19  ;;  %v3167_v12 = vor.u32 %v3166_v30, %v3165_v7  ;;  %vm3168_vm10 = vcmp.lt.s32.totalorder %v3149_v17, 1  ;;  %vm3171_vm15 = vcmp.lt.s32.totalorder %v3149_v17, 4 }
 0x403   : > { %v11358_v3 = vpop.eup %8869  ;;  %v3152_v47 = vshrl.u32 %v15607_v4, %v3151_v35  ;;  %vm3170_vm11 = vcmp.lt.s32.totalorder %v3149_v17, 3  ;;  %v3173_v29 = vsel %vm3171_vm15, %v3161_v8, 2102212464  ;;  %v3176_v37 = vsel %vm3168_vm10, %v3155_v25, %v3158_v24  ;;  %v11367_v35 = vpop.f32.mrb[15].mxu1 }
 0x404   : > { %15735 = vst [vmem:[#allocation26_spill] sm:$0xff] %v11358_v3  ;;  %v2996_v10 = vclz %v8212_v13  ;;  %v3177_v38 = vsel %vm3171_vm15, %v3164_v48, 920167782  ;;  %v3180_v11 = vsel %vm3168_vm10, %v3158_v24, %v3161_v8  ;;  %v3181_v54 = vsel %vm3171_vm15, %v3167_v12, 1326507024 }
 0x405   : > { %v11363_v50 = vmul.f32 %v3114_v56, %v3112_v45  ;;  %v3178_v62 = vsel %vm3170_vm11, %v3161_v8, %v3177_v38  ;;  %v3451_v26 = vand.u32 2139095040, %v11327_v27  ;;  %vm3169_vm3 = vcmp.lt.s32.totalorder %v3149_v17, 2 }
 0x406   : > { %v8213_v58 = vadd.s32 4294967294, %v2996_v10  ;;  %v3172_v33 = vsel %vm3168_vm10, %v3152_v47, %v3155_v25  ;;  %v3174_v13 = vsel %vm3170_vm11, %v3158_v24, %v3173_v29  ;;  %v3182_v2 = vsel %vm3170_vm11, %v3164_v48, %v3181_v54 }
 0x407   : > { %v3179_v0 = vsel %vm3169_vm3, %v3176_v37, %v3178_v62  ;;  %v3183_v7 = vsel %vm3169_vm3, %v3180_v11, %v3182_v2  ;;  %v3252_v30 = vsel %vm3251_vm5, %v3250_v1, 0  ;;  %v11373_v12 = vsel %vm3034_vm13, %v3118_v44, %v11252_v6 }
 0x408   : > { %vm8214_vm6 = vcmp.lt.s32.totalorder %v8213_v58, 0  ;;  %v11376_v45 = vmul.u32.u64.low %v11340_v28, %v3183_v7  ;;  %v11377_v56 = vmul.u32.u64.high %v11340_v28, %v3183_v7, %v11376_v45  ;;  %v15736_v47 = vxor.u32 2147483648, %v11317_v15 }
 0x409   : > { %v2999_v10 = vsel %vm8214_vm6, 0, %v8213_v58  ;;  %v3175_v25 = vsel %vm3169_vm3, %v3172_v33, %v3174_v13  ;;  %v3452_v1 = vshrl.u32 %v3451_v26, 23  ;;  %v2984_v24 = vadd.s32 %v11282_v41, %v11290_v60 }
 0x40a   : > { %v11384_v48 = vsel %vm2826_vm8, %v15736_v47, %v11317_v15  ;;  %v3004_v17 = vsub.s32 4294967266, %v2999_v10  ;;  %v11389_v6 = vmul.u32.u64.low %v11340_v28, %v3179_v0  ;;  %v11390_v44 = vmul.u32.u64.high %v11340_v28, %v3179_v0, %v11389_v6 }
 0x40b   : > { %v3254_v8 = vand.u32 31, %v3252_v30  ;;  %v15737_v38 = vor.u32 8388608, %v11321_v46  ;;  %v3000_v54 = vsub.s32 32, %v2999_v10  ;;  %v3001_v58 = vshll.u32 %v11343_v19, %v2999_v10 }
 0x40c   : > { %v3005_v37 = vadd.s32 127, %v3004_v17  ;;  %v3191_v41 = vmul.u32 %v11340_v28, %v3175_v25  ;;  %vm3193_vm8 = vc.u32 %v11377_v56, %v11389_v6  ;;  %v3253_v62 = vshrl.u32 %v3252_v30, 5 }
 0x40d   : > { %v11396_v11 = vshll.u32 %v15737_v38, 8  ;;  %v3255_v60 = vsub.s32 32, %v3254_v8  ;;  %v3257_v26 = vshll.u32 %v15607_v4, %v3254_v8  ;;  %v8231_v33 = vadd.s32 4294967169, %v3452_v1 }
 0x40e   : > { %v3194_v13 = vadd.s32 1, %v11390_v44  ;;  %v3260_v2 = vshll.u32 %v15612_v5, %v3254_v8  ;;  %v3006_v7 = vshll.u32 %v3005_v37, 23  ;;  %v3263_v19 = vshll.u32 %v15613_v21, %v3254_v8 }
 0x40f   : > { %v3258_v46 = vshrl.u32 %v15612_v5, %v3255_v60  ;;  %v3261_v0 = vshrl.u32 %v15613_v21, %v3255_v60  ;;  %v3264_v28 = vshrl.u32 %v15599_v52, %v3255_v60  ;;  %v3266_v10 = vshll.u32 %v15599_v52, %v3254_v8 }
 0x410   : > { %v3195_v30 = vsel %vm3193_vm8, %v3194_v13, %v11390_v44  ;;  %v3267_v17 = vshrl.u32 %v15600_v23, %v3255_v60  ;;  %v3002_v25 = vshrl.u32 %v2984_v24, %v3000_v54  ;;  %vm3272_vm1 = vcmp.lt.s32.totalorder %v3253_v62, 1 }
 0x411   : > { %v3259_v45 = vor.u32 %v3258_v46, %v3257_v26  ;;  %v3262_v47 = vor.u32 %v3261_v0, %v3260_v2  ;;  %v3196_v1 = vadd.s32 %v3195_v30, %v3191_v41  ;;  %v3265_v38 = vor.u32 %v3264_v28, %v3263_v19 }
 0x412   : > { %v15738_v29 = vand.u32 2147483647, %v11031_v43  ;;  %v3256_v15 = vshrl.u32 %v15607_v4, %v3255_v60  ;;  %v3268_v3 = vor.u32 %v3267_v17, %v3266_v10  ;;  %v3269_v49 = vshll.u32 %v15600_v23, %v3254_v8 }
 0x413   : > { %v3270_v44 = vshrl.u32 %v15601_v16, %v3255_v60  ;;  %v3007_v26 = vor.u32 4788187, %v3006_v7  ;;  %v3197_v13 = vadd.s32 536870912, %v3196_v1  ;;  %vm3274_vm5 = vcmp.lt.s32.totalorder %v3253_v62, 3 }
 0x414   : > { %vm11415_vm12 = vcmp.le.f32.partialorder %v15738_v29, 0.7853982  ;;  %vm3275_vm10 = vcmp.lt.s32.totalorder %v3253_v62, 4  ;;  %v3280_v41 = vsel %vm3272_vm1, %v3259_v45, %v3262_v47  ;;  %v3003_v29 = vor.u32 %v3002_v25, %v3001_v58 }
 0x415   : > { %v3271_v24 = vor.u32 %v3270_v44, %v3269_v49  ;;  %v3277_v54 = vsel %vm3275_vm10, %v3265_v38, 2102212464  ;;  %v3281_v46 = vsel %vm3275_vm10, %v3268_v3, 920167782  ;;  %v11423_v2 = vshrl.u32 %v3197_v13, 30 }
 0x416   : > { %vm3273_vm15 = vcmp.lt.s32.totalorder %v3253_v62, 2  ;;  %v3282_v0 = vsel %vm3274_vm5, %v3265_v38, %v3281_v46  ;;  %v3276_v19 = vsel %vm3272_vm1, %v3256_v15, %v3259_v45  ;;  %v3284_v60 = vsel %vm3272_vm1, %v3262_v47, %v3265_v38 }
 0x417   : > { %15741 = vst [vmem:[#allocation19_spill] sm:$0xff] %v11423_v2  ;;  %v3283_v8 = vsel %vm3273_vm15, %v3280_v41, %v3282_v0  ;;  %v3285_v7 = vsel %vm3275_vm10, %v3271_v24, 1326507024  ;;  %v3199_v28 = vshll.u32 %v11423_v2, 30  ;;  %v3278_v49 = vsel %vm3274_vm5, %v3262_v47, %v3277_v54 }
 0x418   : > { %v3286_v10 = vsel %vm3274_vm5, %v3268_v3, %v3285_v7  ;;  %v3458_v30 = vadd.s32 1, %v8231_v33  ;;  %v3008_v58 = vand.u32 2147483647, %v3007_v26  ;;  %8871 = vsinq.f32 %v11313_v40 }
 0x419   : > { %v3287_v17 = vsel %vm3273_vm15, %v3284_v60, %v3286_v10  ;;  %v11434_v25 = vmul.u32.u64.low %v11396_v11, %v3283_v8  ;;  %v11435_v44 = vmul.u32.u64.high %v11396_v11, %v3283_v8, %v11434_v25  ;;  %v11439_v15 = vsub.s32 %v3196_v1, %v3199_v28 }
 0x41a   : > { %v11442_v45 = vmul.u32.u64.low %v11396_v11, %v3287_v17  ;;  %v11443_v38 = vmul.u32.u64.high %v11396_v11, %v3287_v17, %v11442_v45  ;;  %v2912_v3 = vsel %vm11257_vm4, %v10970_v39, %v11384_v48  ;;  %v3010_v33 = vcvt.s32.f32 %v3003_v29 }
 0x41b   : > { %v3279_v47 = vsel %vm3273_vm15, %v3276_v19, %v3278_v49  ;;  %vm3459_vm11 = vcmp.gt.s32.totalorder %v3458_v30, 0  ;;  %v3121_v26 = vsel %vm11415_vm12, 0, %v11373_v12  ;;  %v3202_v40 = vsub.s32 0, %v11439_v15 }
 0x41c   : > { %v15742_v1 = vand.u32 2147483647, %v11327_v27  ;;  %v3460_v24 = vsel %vm3459_vm11, %v3458_v30, 0  ;;  %v15743_v54 = vxor.u32 2147483648, %v11363_v50  ;;  %v3011_v48 = vmul.f32 %v3010_v33, %v3008_v58 }
 0x41d   : > { %v3298_v62 = vadd.s32 1, %v11435_v44  ;;  %v3462_v41 = vand.u32 31, %v3460_v24  ;;  %8873 = vcosq.f32 %v2912_v3  ;;  %vm2930_vm4 = vcmp.lt.s32.totalorder %v11039_v55, 0 }
 0x41e   : > { %v3455_v13 = vand.u32 8388607, %v15742_v1  ;;  %v3117_v31 = vsel %vm3034_vm13, %v15743_v54, %v11363_v50  ;;  %v8220_v12 = vmin.u32 %v3202_v40, %v11439_v15  ;;  %v3295_v46 = vmul.u32 %v11396_v11, %v3279_v47 }
 0x41f   : > { %vm3297_vm3 = vc.u32 %v11443_v38, %v11434_v25  ;;  %8875 = vsinq.f32 %v2912_v3  ;;  %v11467_v29 = vadd.s32 3, %v3121_v26  ;;  %v3463_v50 = vsub.s32 32, %v3462_v41 }
 0x420   : > { %v3299_v0 = vsel %vm3297_vm3, %v3298_v62, %v11435_v44  ;;  %v11473_v19 = vsel %vm11415_vm12, %v11031_v43, %v3117_v31  ;;  %v3204_v8 = vclz %v8220_v12  ;;  %v3456_v7 = vor.u32 8388608, %v3455_v13 }
 0x421   : > { %15744 = vst [vmem:[#allocation17_spill] sm:$0xff] %v11467_v29  ;;  %v3300_v60 = vadd.s32 %v3299_v0, %v3295_v46  ;;  %v3012_v28 = vxor.u32 2147483648, %v3011_v48  ;;  %v11475_v49 = vshrl.u32 %v3460_v24, 5  ;;  %v3466_v11 = vshrl.u32 %v15612_v5, %v3463_v50 }
 0x422   : > { %v3469_v10 = vshrl.u32 %v15613_v21, %v3463_v50  ;;  %v8221_v30 = vadd.s32 4294967294, %v3204_v8  ;;  %v3472_v17 = vshrl.u32 %v15599_v52, %v3463_v50  ;;  %v3475_v44 = vshrl.u32 %v15600_v23, %v3463_v50  ;;  %v11485_v47 = vpop.eup %8871 }
 0x423   : > { %v3301_v58 = vadd.s32 536870912, %v3300_v60  ;;  %v3465_v37 = vshll.u32 %v15607_v4, %v3462_v41  ;;  %v3468_v45 = vshll.u32 %v15612_v5, %v3462_v41  ;;  %v3474_v3 = vshll.u32 %v15599_v52, %v3462_v41  ;;  %15745 = vst [vmem:[#allocation15_spill] sm:$0xff] %v11485_v47 }
 0x424   : > { %v3478_v33 = vshrl.u32 %v15601_v16, %v3463_v50  ;;  %vm8222_vm13 = vcmp.lt.s32.totalorder %v8221_v30, 0  ;;  %v3471_v40 = vshll.u32 %v15613_v21, %v3462_v41  ;;  %v3477_v1 = vshll.u32 %v15600_v23, %v3462_v41 }
 0x425   : > { %v11487_v26 = vshrl.u32 %v3301_v58, 30  ;;  %v3207_v13 = vsel %vm8222_vm13, 0, %v8221_v30  ;;  %v3467_v24 = vor.u32 %v3466_v11, %v3465_v37  ;;  %v3470_v54 = vor.u32 %v3469_v10, %v3468_v45 }
 0x426   : > { %v3476_v31 = vor.u32 %v3475_v44, %v3474_v3  ;;  %8877 = vcosq.f32 %v11473_v19  ;;  %v3212_v62 = vsub.s32 4294967266, %v3207_v13  ;;  %v3473_v46 = vor.u32 %v3472_v17, %v3471_v40 }
 0x427   : > { %v3303_v12 = vshll.u32 %v11487_v26, 30  ;;  %v15746_v0 = vand.u32 2147483647, %v11039_v55  ;;  %v3013_v58 = vsel %vm2930_vm4, %v3012_v28, %v3011_v48  ;;  %v3192_v41 = vadd.s32 %v11389_v6, %v11377_v56  ;;  %v11505_v30 = vpop.eup %8873 }
 0x428   : > { %v3479_v11 = vor.u32 %v3478_v33, %v3477_v1  ;;  %v11503_v10 = vshll.u32 %v3456_v7, 8  ;;  %15749 = vst [vmem:[#allocation29_spill] sm:$0xff] %v11505_v30  ;;  %v3213_v44 = vadd.s32 127, %v3212_v62  ;;  %vm3480_vm8 = vcmp.lt.s32.totalorder %v11475_v49, 1 }
 0x429   : > { %vm11495_vm6 = vcmp.le.f32.partialorder %v15746_v0, 0.7853982  ;;  %v11507_v37 = vsub.s32 %v3300_v60, %v3303_v12  ;;  %vm3483_vm1 = vcmp.lt.s32.totalorder %v11475_v49, 4  ;;  %v11511_v17 = vpop.eup %8875  ;;  %v3208_v45 = vsub.s32 32, %v3207_v13 }
 0x42a   : > { %15750 = vst [vmem:[#allocation32_spill] sm:$0xff] %v11511_v17  ;;  %v3488_v48 = vsel %vm3480_vm8, %v3467_v24, %v3470_v54  ;;  %v3489_v28 = vsel %vm3483_vm1, %v3476_v31, 920167782  ;;  %v11517_v56 = vadd.f32 %v10958_v20, %v11215_v42  ;;  %vm3481_vm12 = vcmp.lt.s32.totalorder %v11475_v49, 2  ;;  %v15804_v17 = vld [vmem:[#allocation33_spill] sm:$0xff] }
 0x42b   : > { %v3306_v6 = vsub.s32 0, %v11507_v37  ;;  %vm3482_vm5 = vcmp.lt.s32.totalorder %v11475_v49, 3  ;;  %v3485_v60 = vsel %vm3483_vm1, %v3473_v46, 2102212464  ;;  %v3214_v7 = vshll.u32 %v3213_v44, 23 }
 0x42c   : > { %v3490_v3 = vsel %vm3482_vm5, %v3473_v46, %v3489_v28  ;;  %v3492_v33 = vsel %vm3480_vm8, %v3470_v54, %v3473_v46  ;;  %v3493_v40 = vsel %vm3483_vm1, %v3479_v11, 1326507024  ;;  %v3209_v1 = vshll.u32 %v11439_v15, %v3207_v13 }
 0x42d   : > { %v8224_v62 = vmin.u32 %v3306_v6, %v11507_v37  ;;  %v3464_v20 = vshrl.u32 %v15607_v4, %v3463_v50  ;;  %v3491_v12 = vsel %vm3481_vm12, %v3488_v48, %v3490_v3  ;;  %v3210_v0 = vshrl.u32 %v3192_v41, %v3208_v45 }
 0x42e   : > { %v3494_v43 = vsel %vm3482_vm5, %v3476_v31, %v3493_v40  ;;  %v11530_v29 = vmul.u32.u64.low %v11503_v10, %v3491_v12  ;;  %v11531_v30 = vmul.u32.u64.high %v11503_v10, %v3491_v12, %v11530_v29  ;;  %v3486_v11 = vsel %vm3482_vm5, %v3470_v54, %v3485_v60 }
 0x42f   : > { %v3308_v44 = vclz %v8224_v62  ;;  %v3484_v46 = vsel %vm3480_vm8, %v3464_v20, %v3467_v24  ;;  %v3495_v15 = vsel %vm3481_vm12, %v3492_v33, %v3494_v43  ;;  %v3215_v13 = vor.u32 4788187, %v3214_v7 }
 0x430   : > { %v11539_v50 = vmul.u32.u64.low %v11503_v10, %v3495_v15  ;;  %v11540_v28 = vmul.u32.u64.high %v11503_v10, %v3495_v15, %v11539_v50  ;;  %v3347_v31 = vand.u32 2139095040, %v11517_v56  ;;  %v11543_v41 = vpop.eup %8877  ;;  %8879 = vsinq.f32 %v11473_v19 }
 0x431   : > { %15751 = vst [vmem:[#allocation8_spill] sm:$0xff] %v11543_v41  ;;  %v3016_v45 = vsel %vm11495_vm6, %v11039_v55, %v3013_v58  ;;  %vm3242_vm10 = vcmp.lt.s32.totalorder %v11226_v59, 0  ;;  %v8225_v24 = vadd.s32 4294967294, %v3308_v44  ;;  %v3211_v54 = vor.u32 %v3210_v0, %v3209_v1 }
 0x432   : > { %v3487_v43 = vsel %vm3481_vm12, %v3484_v46, %v3486_v11  ;;  %v3506_v48 = vadd.s32 1, %v11531_v30  ;;  %v3348_v6 = vshrl.u32 %v3347_v31, 23  ;;  %v3326_v60 = vsub.s32 4, %v11487_v26 }
 0x433   : > { %vm8226_vm15 = vcmp.lt.s32.totalorder %v8225_v24, 0  ;;  %v15439_v7 = vand.u32 2147483647, %v11517_v56  ;;  %v11557_v19 = vadd.f32 %v11024_v14, %v11215_v42  ;;  %v3216_v58 = vand.u32 2147483647, %v3215_v13 }
 0x434   : > { %v3311_v3 = vsel %vm8226_vm15, 0, %v8225_v24  ;;  %vm3505_vm11 = vc.u32 %v11540_v28, %v11530_v29  ;;  %v8227_v33 = vadd.s32 4294967169, %v3348_v6  ;;  %8881 = vcosq.f32 %v3016_v45 }
 0x435   : > { %15752 = vst [vmem:[#allocation31_spill] sm:$0xff] %v11557_v19  ;;  %v3312_v49 = vsub.s32 32, %v3311_v3  ;;  %v3316_v40 = vsub.s32 4294967266, %v3311_v3  ;;  %v3503_v1 = vmul.u32 %v11503_v10, %v3487_v43  ;;  %v3218_v62 = vcvt.s32.f32 %v3211_v54 }
 0x436   : > { %v3296_v20 = vadd.s32 %v11434_v25, %v11443_v38  ;;  %v3507_v12 = vsel %vm3505_vm11, %v3506_v48, %v11531_v30  ;;  %v3354_v0 = vadd.s32 1, %v8227_v33  ;;  %vm15462_vm3 = vcmp.lt.s32.totalorder %v11213_v57, 0  ;;  %v11575_v38 = vpop.permute.xlu1 %2214 }
 0x437   : > { %v3317_v14 = vadd.s32 127, %v3316_v40  ;;  %v11569_v42 = vsel %vm3242_vm10, %v3326_v60, %v11487_v26  ;;  %v3508_v44 = vadd.s32 %v3507_v12, %v3503_v1  ;;  %v3351_v46 = vand.u32 8388607, %v15439_v7 }
 0x438   : > { %v3219_v10 = vmul.f32 %v3218_v62, %v3216_v58  ;;  %vm3355_vm13 = vcmp.gt.s32.totalorder %v3354_v0, 0  ;;  %v15438_v11 = vand.u32 2147483647, %v11557_v19  ;;  %v3555_v25 = vand.u32 2139095040, %v11557_v19 }
 0x439   : > { %v3314_v30 = vshrl.u32 %v3296_v20, %v3312_v49  ;;  %v3318_v15 = vshll.u32 %v3317_v14, 23  ;;  %v3509_v13 = vadd.s32 536870912, %v3508_v44  ;;  %v3356_v50 = vsel %vm3355_vm13, %v3354_v0, 0 }
 0x43a   : > { %8883 = vsinq.f32 %v3016_v45  ;;  %v15753_v26 = vand.u32 2147483647, %v11226_v59  ;;  %v3358_v24 = vand.u32 31, %v3356_v50  ;;  %v11585_v54 = vadd.f32 %v11111_v53, %v11575_v38  ;;  %v11587_v43 = vpop.eup %8879 }
 0x43b   : > { %15756 = vst [vmem:[#allocation34_spill] sm:$0xff] %v11587_v43  ;;  %v3313_v48 = vshll.u32 %v11507_v37, %v3311_v3  ;;  %v11593_v45 = vshrl.u32 %v3509_v13, 30  ;;  %v3352_v60 = vor.u32 8388608, %v3351_v46  ;;  %v3220_v58 = vxor.u32 2147483648, %v3219_v10 }
 0x43c   : > { %vm11579_vm8 = vcmp.le.f32.partialorder %v15753_v26, 0.7853982  ;;  %v3319_v33 = vor.u32 4788187, %v3318_v15  ;;  %v3359_v49 = vsub.s32 32, %v3358_v24  ;;  %v11601_v1 = vadd.s32 %v11530_v29, %v11540_v28 }
 0x43d   : > { %v11597_v40 = vand.u32 8388607, %v15438_v11  ;;  %v3315_v53 = vor.u32 %v3314_v30, %v3313_v48  ;;  %v3511_v37 = vshll.u32 %v11593_v45, 30  ;;  %v3556_v3 = vshrl.u32 %v3555_v25, 23 }
 0x43e   : > { %v3361_v62 = vshll.u32 %v15607_v4, %v3358_v24  ;;  %v3362_v20 = vshrl.u32 %v15612_v5, %v3359_v49  ;;  %v3365_v12 = vshrl.u32 %v15613_v21, %v3359_v49  ;;  %v3368_v0 = vshrl.u32 %v15599_v52, %v3359_v49  ;;  %v11608_v14 = vpop.eup %8881 }
 0x43f   : > { %v11610_v46 = vsub.s32 %v3508_v44, %v3511_v37  ;;  %v3364_v30 = vshll.u32 %v15612_v5, %v3358_v24  ;;  %v3367_v29 = vshll.u32 %v15613_v21, %v3358_v24  ;;  %v3371_v28 = vshrl.u32 %v15600_v23, %v3359_v49 }
 0x440   : > { %v3221_v25 = vsel %vm15462_vm3, %v3220_v58, %v3219_v10  ;;  %v3320_v15 = vand.u32 2147483647, %v3319_v33  ;;  %v3357_v13 = vshrl.u32 %v3356_v50, 5  ;;  %v3370_v26 = vshll.u32 %v15599_v52, %v3358_v24 }
 0x441   : > { %v3514_v48 = vsub.s32 0, %v11610_v46  ;;  %v3363_v11 = vor.u32 %v3362_v20, %v3361_v62  ;;  %v3366_v7 = vor.u32 %v3365_v12, %v3364_v30  ;;  %v3369_v6 = vor.u32 %v3368_v0, %v3367_v29 }
 0x442   : > { %v3372_v44 = vor.u32 %v3371_v28, %v3370_v26  ;;  %v3373_v37 = vshll.u32 %v15600_v23, %v3358_v24  ;;  %v3374_v41 = vshrl.u32 %v15601_v16, %v3359_v49  ;;  %v3392_v43 = vshll.u32 %v3352_v60, 8 }
 0x443   : > { %v15757_v39 = vand.u32 2147483647, %v11213_v57  ;;  %v3322_v10 = vcvt.s32.f32 %v3315_v53  ;;  %v8232_v50 = vmin.u32 %v3514_v48, %v11610_v46  ;;  %v8235_v58 = vadd.s32 4294967169, %v3556_v3 }
 0x444   : > { %v3560_v33 = vor.u32 8388608, %v11597_v40  ;;  %v11629_v62 = vpop.eup %8883  ;;  %v3360_v20 = vshrl.u32 %v15607_v4, %v3359_v49  ;;  %v3375_v24 = vor.u32 %v3374_v41, %v3373_v37  ;;  %vm3376_vm12 = vcmp.lt.s32.totalorder %v3357_v13, 1 }
 0x445   : > { %vm11623_vm1 = vcmp.le.f32.partialorder %v15757_v39, 0.7853982  ;;  %vm3379_vm5 = vcmp.lt.s32.totalorder %v3357_v13, 4  ;;  %v3323_v60 = vmul.f32 %v3322_v10, %v3320_v15  ;;  %v3516_v12 = vclz %v8232_v50 }
 0x446   : > { %v3381_v0 = vsel %vm3379_vm5, %v3369_v6, 2102212464  ;;  %v3384_v39 = vsel %vm3376_vm12, %v3363_v11, %v3366_v7  ;;  %vm3377_vm15 = vcmp.lt.s32.totalorder %v3357_v13, 2  ;;  %vm3378_vm11 = vcmp.lt.s32.totalorder %v3357_v13, 3 }
 0x447   : > { %v3385_v30 = vsel %vm3379_vm5, %v3372_v44, 920167782  ;;  %v3388_v53 = vsel %vm3376_vm12, %v3366_v7, %v3369_v6  ;;  %v8233_v29 = vadd.s32 4294967294, %v3516_v12  ;;  %v3380_v28 = vsel %vm3376_vm12, %v3360_v20, %v3363_v11 }
 0x448   : > { %v3386_v3 = vsel %vm3378_vm11, %v3369_v6, %v3385_v30  ;;  %v3389_v26 = vsel %vm3379_vm5, %v3375_v24, 1326507024  ;;  %v3382_v40 = vsel %vm3378_vm11, %v3366_v7, %v3381_v0  ;;  %v3562_v49 = vadd.s32 1, %v8235_v58 }
 0x449   : > { %v3387_v48 = vsel %vm3377_vm15, %v3384_v39, %v3386_v3  ;;  %v3390_v2 = vsel %vm3378_vm11, %v3372_v44, %v3389_v26  ;;  %vm8234_vm13 = vcmp.lt.s32.totalorder %v8233_v29, 0  ;;  %v3383_v7 = vsel %vm3377_vm15, %v3380_v28, %v3382_v40 }
 0x44a   : > { %v3391_v41 = vsel %vm3377_vm15, %v3388_v53, %v3390_v2  ;;  %v11634_v15 = vmul.u32.u64.low %v3392_v43, %v3387_v48  ;;  %v11635_v37 = vmul.u32.u64.high %v3392_v43, %v3387_v48, %v11634_v15  ;;  %v3519_v10 = vsel %vm8234_vm13, 0, %v8233_v29 }
 0x44b   : > { %v11638_v50 = vmul.u32.u64.low %v3392_v43, %v3391_v41  ;;  %v11639_v47 = vmul.u32.u64.high %v3392_v43, %v3391_v41, %v11638_v50  ;;  %vm3563_vm7 = vcmp.gt.s32.totalorder %v3562_v49, 0  ;;  %v3520_v11 = vsub.s32 32, %v3519_v10 }
 0x44c   : > { %v3524_v6 = vsub.s32 4294967266, %v3519_v10  ;;  %v3564_v20 = vsel %vm3563_vm7, %v3562_v49, 0  ;;  %v11645_v44 = vsel %vm11623_vm1, %v11213_v57, %v3221_v25  ;;  %v11647_v58 = vshll.u32 %v3560_v33, 8 }
 0x44d   : > { %v3566_v2 = vand.u32 31, %v3564_v20  ;;  %v15449_v24 = vand.u32 2147483647, %v11585_v54  ;;  %v3521_v12 = vshll.u32 %v11610_v46, %v3519_v10  ;;  %v3522_v0 = vshrl.u32 %v11601_v1, %v3520_v11 }
 0x44e   : > { %v3525_v39 = vadd.s32 127, %v3524_v6  ;;  %v3402_v30 = vadd.s32 1, %v11635_v37  ;;  %v3324_v13 = vxor.u32 2147483648, %v3323_v60  ;;  %v3399_v53 = vmul.u32 %v3392_v43, %v3383_v7 }
 0x44f   : > { %vm3401_vm7 = vc.u32 %v11639_v47, %v11634_v15  ;;  %v3567_v29 = vsub.s32 32, %v3566_v2  ;;  %v3523_v25 = vor.u32 %v3522_v0, %v3521_v12  ;;  %v3569_v3 = vshll.u32 %v15607_v4, %v3566_v2 }
 0x450   : > { %v3526_v28 = vshll.u32 %v3525_v39, 23  ;;  %v3403_v33 = vsel %vm3401_vm7, %v3402_v30, %v11635_v37  ;;  %v3572_v1 = vshll.u32 %v15612_v5, %v3566_v2  ;;  %v3565_v49 = vshrl.u32 %v3564_v20, 5 }
 0x451   : > { %v3404_v26 = vadd.s32 %v3403_v33, %v3399_v53  ;;  %v3570_v46 = vshrl.u32 %v15612_v5, %v3567_v29  ;;  %v3573_v40 = vshrl.u32 %v15613_v21, %v3567_v29  ;;  %v3575_v43 = vshll.u32 %v15613_v21, %v3566_v2 }
 0x452   : > { %v3527_v48 = vor.u32 4788187, %v3526_v28  ;;  %v3576_v41 = vshrl.u32 %v15599_v52, %v3567_v29  ;;  %v3530_v10 = vcvt.s32.f32 %v3523_v25  ;;  %v3578_v12 = vshll.u32 %v15599_v52, %v3566_v2 }
 0x453   : > { %v3405_v50 = vadd.s32 536870912, %v3404_v26  ;;  %v3571_v11 = vor.u32 %v3570_v46, %v3569_v3  ;;  %v3574_v6 = vor.u32 %v3573_v40, %v3572_v1  ;;  %v3579_v0 = vshrl.u32 %v15600_v23, %v3567_v29 }
 0x454   : > { %v3528_v37 = vand.u32 2147483647, %v3527_v48  ;;  %v3577_v7 = vor.u32 %v3576_v41, %v3575_v43  ;;  %v3325_v39 = vsel %vm3242_vm10, %v3324_v13, %v3323_v60  ;;  %v3581_v20 = vshll.u32 %v15600_v23, %v3566_v2 }
 0x455   : > { %v11666_v30 = vshrl.u32 %v3405_v50, 30  ;;  %v3582_v53 = vshrl.u32 %v15601_v16, %v3567_v29  ;;  %vm3450_vm12 = vcmp.lt.s32.totalorder %v11327_v27, 0  ;;  %v3568_v28 = vshrl.u32 %v15607_v4, %v3567_v29 }
 0x456   : > { %v3531_v25 = vmul.f32 %v3530_v10, %v3528_v37  ;;  %v3580_v33 = vor.u32 %v3579_v0, %v3578_v12  ;;  %v3659_v3 = vand.u32 2139095040, %v11585_v54  ;;  %vm3584_vm5 = vcmp.lt.s32.totalorder %v3565_v49, 1 }
 0x457   : > { %15760 = vst [vmem:[#allocation11_spill] sm:$0xff] %v11666_v30  ;;  %v3407_v46 = vshll.u32 %v11666_v30, 30  ;;  %v3583_v1 = vor.u32 %v3582_v53, %v3581_v20  ;;  %vm3587_vm15 = vcmp.lt.s32.totalorder %v3565_v49, 4  ;;  %vm3586_vm10 = vcmp.lt.s32.totalorder %v3565_v49, 3 }
 0x458   : > { %v3589_v60 = vsel %vm3587_vm15, %v3577_v7, 2102212464  ;;  %v3592_v13 = vsel %vm3584_vm5, %v3571_v11, %v3574_v6  ;;  %v3593_v40 = vsel %vm3587_vm15, %v3580_v33, 920167782  ;;  %vm3585_vm11 = vcmp.lt.s32.totalorder %v3565_v49, 2 }
 0x459   : > { %v11674_v2 = vsub.s32 %v3404_v26, %v3407_v46  ;;  %v3594_v48 = vsel %vm3586_vm10, %v3577_v7, %v3593_v40  ;;  %v3596_v43 = vsel %vm3584_vm5, %v3574_v6, %v3577_v7  ;;  %v15761_v41 = vand.u32 2147483647, %v11327_v27 }
 0x45a   : > { %v15762_v29 = vmov 0  ;;  %v3532_v10 = vxor.u32 2147483648, %v3531_v25  ;;  %v3588_v50 = vsel %vm3584_vm5, %v3568_v28, %v3571_v11  ;;  %v3595_v37 = vsel %vm3585_vm11, %v3592_v13, %v3594_v48 }
 0x45b   : > { %vm11678_vm13 = vcmp.le.f32.partialorder %v15761_v41, 0.7853982  ;;  %v3597_v12 = vsel %vm3587_vm15, %v3583_v1, 1326507024  ;;  %v3410_v0 = vsub.s32 0, %v11674_v2  ;;  %v3590_v20 = vsel %vm3586_vm10, %v3574_v6, %v3589_v60 }
 0x45c   : > { %v15763_v29 = vsel %vm11678_vm13, 4294967295, %v15762_v29  ;;  %v3598_v53 = vsel %vm3586_vm10, %v3580_v33, %v3597_v12  ;;  %v3660_v26 = vshrl.u32 %v3659_v3, 23  ;;  %v3663_v41 = vand.u32 8388607, %v15449_v24 }
 0x45d   : > { %15764 = vst [vmem:[#allocation30_spill] sm:$0xff] %v15763_v29  ;;  %v3599_v46 = vsel %vm3585_vm11, %v3596_v43, %v3598_v53  ;;  %v11686_v7 = vmul.u32.u64.low %v11647_v58, %v3595_v37  ;;  %v11687_v40 = vmul.u32.u64.high %v11647_v58, %v3595_v37, %v11686_v7  ;;  %v3534_v11 = vsub.s32 4, %v11593_v45 }
 0x45e   : > { %v8228_v28 = vmin.u32 %v3410_v0, %v11674_v2  ;;  %v11695_v1 = vmul.u32.u64.low %v11647_v58, %v3599_v46  ;;  %v11696_v13 = vmul.u32.u64.high %v11647_v58, %v3599_v46, %v11695_v1  ;;  %8885 = vcosq.f32 %v11645_v44 }
 0x45f   : > { %v15765_v6 = vsel %vm11579_vm8, 0, %v11569_v42  ;;  %v3591_v3 = vsel %vm3585_vm11, %v3588_v50, %v3590_v20  ;;  %v8239_v60 = vadd.s32 4294967169, %v3660_v26  ;;  %8887 = vsinq.f32 %v11645_v44 }
 0x460   : > { %v11703_v33 = vadd.s32 3, %v15765_v6  ;;  %v11710_v48 = vsel %vm11579_vm8, %v11226_v59, %v3325_v39  ;;  %v3533_v43 = vsel %vm3450_vm12, %v3532_v10, %v3531_v25  ;;  %v3412_v37 = vclz %v8228_v28 }
 0x461   : > { %v3610_v12 = vadd.s32 1, %v11687_v40  ;;  %v3664_v0 = vor.u32 8388608, %v3663_v41  ;;  %v3666_v42 = vadd.s32 1, %v8239_v60  ;;  %v11717_v49 = vadd.f32 %v11196_v63, %v11575_v38 }
 0x462   : > { %15766 = vst [vmem:[#allocation36_spill] sm:$0xff] %v11703_v33  ;;  %v11722_v44 = vsel %vm3450_vm12, %v3534_v11, %v11593_v45  ;;  %v8229_v31 = vadd.s32 4294967294, %v3412_v37  ;;  %v3607_v39 = vmul.u32 %v11647_v58, %v3591_v3  ;;  %vm3609_vm8 = vc.u32 %v11696_v13, %v11686_v7 }
 0x463   : > { %15767 = vst [vmem:[#allocation39_spill] sm:$0xff] %v11722_v44  ;;  %8889 = vcosq.f32 %v11710_v48  ;;  %v3400_v25 = vadd.s32 %v11634_v15, %v11639_v47  ;;  %v3611_v10 = vsel %vm3609_vm8, %v3610_v12, %v11687_v40  ;;  %vm3667_vm7 = vcmp.gt.s32.totalorder %v3666_v42, 0 }
 0x464   : > { %v11734_v63 = vsel %vm11678_vm13, %v11327_v27, %v3533_v43  ;;  %vm8230_vm12 = vcmp.lt.s32.totalorder %v8229_v31, 0  ;;  %v3612_v45 = vadd.s32 %v3611_v10, %v3607_v39  ;;  %v3668_v50 = vsel %vm3667_vm7, %v3666_v42, 0 }
 0x465   : > { %v3415_v58 = vsel %vm8230_vm12, 0, %v8229_v31  ;;  %v3670_v20 = vand.u32 31, %v3668_v50  ;;  %v11736_v53 = vshll.u32 %v3664_v0, 8  ;;  %v3867_v26 = vand.u32 2139095040, %v11717_v49 }
 0x466   : > { %v3416_v46 = vsub.s32 32, %v3415_v58  ;;  %v3420_v41 = vsub.s32 4294967266, %v3415_v58  ;;  %v3613_v47 = vadd.s32 536870912, %v3612_v45  ;;  %v11739_v15 = vshrl.u32 %v3668_v50, 5 }
 0x467   : > { %v3417_v40 = vshll.u32 %v11674_v2, %v3415_v58  ;;  %v3671_v11 = vsub.s32 32, %v3670_v20  ;;  %v3673_v28 = vshll.u32 %v15607_v4, %v3670_v20  ;;  %v3676_v1 = vshll.u32 %v15612_v5, %v3670_v20 }
 0x468   : > { %v3418_v6 = vshrl.u32 %v3400_v25, %v3416_v46  ;;  %v3421_v3 = vadd.s32 127, %v3420_v41  ;;  %v11744_v60 = vshrl.u32 %v3613_v47, 30  ;;  %v3679_v43 = vshll.u32 %v15613_v21, %v3670_v20  ;;  %v11747_v37 = vpop.eup %8885 }
 0x469   : > { %15768 = vst [vmem:[#allocation21_spill] sm:$0xff] %v11747_v37  ;;  %v3674_v12 = vshrl.u32 %v15612_v5, %v3671_v11  ;;  %v3677_v0 = vshrl.u32 %v15613_v21, %v3671_v11  ;;  %v3680_v42 = vshrl.u32 %v15599_v52, %v3671_v11  ;;  %v3682_v2 = vshll.u32 %v15599_v52, %v3670_v20  ;;  %v11753_v31 = vpop.eup %8887 }
 0x46a   : > { %v3419_v39 = vor.u32 %v3418_v6, %v3417_v40  ;;  %v3422_v10 = vshll.u32 %v3421_v3, 23  ;;  %v3615_v25 = vshll.u32 %v11744_v60, 30  ;;  %v3683_v50 = vshrl.u32 %v15600_v23, %v3671_v11 }
 0x46b   : > { %v3675_v58 = vor.u32 %v3674_v12, %v3673_v28  ;;  %v3678_v46 = vor.u32 %v3677_v0, %v3676_v1  ;;  %v3681_v41 = vor.u32 %v3680_v42, %v3679_v43  ;;  %v3868_v47 = vshrl.u32 %v3867_v26, 23 }
 0x46c   : > { %v3423_v24 = vor.u32 4788187, %v3422_v10  ;;  %v11757_v27 = vsub.s32 %v3612_v45, %v3615_v25  ;;  %v3672_v59 = vshrl.u32 %v15607_v4, %v3671_v11  ;;  %v3684_v33 = vor.u32 %v3683_v50, %v3682_v2 }
 0x46d   : > { %v11760_v30 = vpop.eup %8889  ;;  %v3426_v37 = vcvt.s32.f32 %v3419_v39  ;;  %v3685_v40 = vshll.u32 %v15600_v23, %v3670_v20  ;;  %v3686_v6 = vshrl.u32 %v15601_v16, %v3671_v11  ;;  %vm3688_vm5 = vcmp.lt.s32.totalorder %v11739_v15, 1 }
 0x46e   : > { %15769 = vst [vmem:[#allocation35_spill] sm:$0xff] %v11760_v30  ;;  %v3424_v3 = vand.u32 2147483647, %v3423_v24  ;;  %v3618_v28 = vsub.s32 0, %v11757_v27  ;;  %vm3690_vm15 = vcmp.lt.s32.totalorder %v11739_v15, 3  ;;  %vm3691_vm10 = vcmp.lt.s32.totalorder %v11739_v15, 4 }
 0x46f   : > { %vm15461_vm11 = vcmp.lt.s32.totalorder %v11517_v56, 0  ;;  %v3687_v45 = vor.u32 %v3686_v6, %v3685_v40  ;;  %v3693_v26 = vsel %vm3691_vm10, %v3681_v41, 2102212464  ;;  %v3696_v1 = vsel %vm3688_vm5, %v3675_v58, %v3678_v46 }
 0x470   : > { %v3697_v43 = vsel %vm3691_vm10, %v3684_v33, 920167782  ;;  %v3427_v20 = vmul.f32 %v3426_v37, %v3424_v3  ;;  %v8236_v11 = vmin.u32 %v3618_v28, %v11757_v27  ;;  %vm3689_vm8 = vcmp.lt.s32.totalorder %v11739_v15, 2 }
 0x471   : > { %v3698_v24 = vsel %vm3690_vm15, %v3681_v41, %v3697_v43  ;;  %v3700_v0 = vsel %vm3688_vm5, %v3678_v46, %v3681_v41  ;;  %v3701_v42 = vsel %vm3691_vm10, %v3687_v45, 1326507024  ;;  %v15456_v2 = vand.u32 2147483647, %v11717_v49 }
 0x472   : > { %v3699_v12 = vsel %vm3689_vm8, %v3696_v1, %v3698_v24  ;;  %v3620_v39 = vclz %v8236_v11  ;;  %v3692_v37 = vsel %vm3688_vm5, %v3672_v59, %v3675_v58  ;;  %v3694_v10 = vsel %vm3690_vm15, %v3678_v46, %v3693_v26 }
 0x473   : > { %v3702_v25 = vsel %vm3690_vm15, %v3684_v33, %v3701_v42  ;;  %v11789_v40 = vmul.u32.u64.low %v11736_v53, %v3699_v12  ;;  %v11790_v6 = vmul.u32.u64.high %v11736_v53, %v3699_v12, %v11789_v40  ;;  %v8247_v41 = vadd.s32 4294967169, %v3868_v47 }
 0x474   : > { %v3703_v50 = vsel %vm3689_vm8, %v3700_v0, %v3702_v25  ;;  %v3428_v3 = vxor.u32 2147483648, %v3427_v20  ;;  %v8237_v28 = vadd.s32 4294967294, %v3620_v39  ;;  %8891 = vsinq.f32 %v11710_v48 }
 0x475   : > { %v11794_v45 = vmul.u32.u64.low %v11736_v53, %v3703_v50  ;;  %v11795_v59 = vmul.u32.u64.high %v11736_v53, %v3703_v50, %v11794_v45  ;;  %v15770_v58 = vand.u32 2147483647, %v11517_v56  ;;  %v3874_v26 = vadd.s32 1, %v8247_v41 }
 0x476   : > { %8893 = vcosq.f32 %v11734_v63  ;;  %vm8238_vm12 = vcmp.lt.s32.totalorder %v8237_v28, 0  ;;  %v3695_v47 = vsel %vm3689_vm8, %v3692_v37, %v3694_v10  ;;  %v11812_v48 = vadd.f32 %v11300_v61, %v11575_v38 }
 0x477   : > { %vm11803_vm7 = vcmp.le.f32.partialorder %v15770_v58, 0.7853982  ;;  %v3608_v1 = vadd.s32 %v11686_v7, %v11696_v13  ;;  %v3623_v43 = vsel %vm8238_vm12, 0, %v8237_v28  ;;  %v3714_v11 = vadd.s32 1, %v11790_v6 }
 0x478   : > { %vm3875_vm5 = vcmp.gt.s32.totalorder %v3874_v26, 0  ;;  %v3429_v24 = vsel %vm15461_vm11, %v3428_v3, %v3427_v20  ;;  %v3624_v12 = vsub.s32 32, %v3623_v43  ;;  %v3628_v0 = vsub.s32 4294967266, %v3623_v43 }
 0x479   : > { %v3871_v15 = vand.u32 8388607, %v15456_v2  ;;  %8895 = vsinq.f32 %v11734_v63  ;;  %v3711_v61 = vmul.u32 %v11736_v53, %v3695_v47  ;;  %vm3713_vm15 = vc.u32 %v11795_v59, %v11789_v40 }
 0x47a   : > { %v3876_v7 = vsel %vm3875_vm5, %v3874_v26, 0  ;;  %v3625_v13 = vshll.u32 %v11757_v27, %v3623_v43  ;;  %v3626_v42 = vshrl.u32 %v3608_v1, %v3624_v12  ;;  %v3629_v39 = vadd.s32 127, %v3628_v0 }
 0x47b   : > { %v3715_v37 = vsel %vm3713_vm15, %v3714_v11, %v11790_v6  ;;  %v11830_v20 = vsel %vm11803_vm7, %v11517_v56, %v3429_v24  ;;  %v3878_v25 = vand.u32 31, %v3876_v7  ;;  %v11834_v63 = vadd.f32 %v11367_v35, %v11575_v38 }
 0x47c   : > { %v3716_v10 = vadd.s32 %v3715_v37, %v3711_v61  ;;  %v3627_v53 = vor.u32 %v3626_v42, %v3625_v13  ;;  %v3630_v50 = vshll.u32 %v3629_v39, 23  ;;  %v3872_v41 = vor.u32 8388608, %v3871_v15 }
 0x47d   : > { %v11837_v28 = vshrl.u32 %v3876_v7, 5  ;;  %v3879_v6 = vsub.s32 32, %v3878_v25  ;;  %v3763_v45 = vand.u32 2139095040, %v11812_v48  ;;  %vm15468_vm10 = vcmp.lt.s32.totalorder %v11557_v19, 0 }
 0x47e   : > { %v3717_v3 = vadd.s32 536870912, %v3716_v10  ;;  %v3631_v58 = vor.u32 4788187, %v3630_v50  ;;  %v3634_v26 = vcvt.s32.f32 %v3627_v53  ;;  %v3881_v47 = vshll.u32 %v15607_v4, %v3878_v25  ;;  %v11843_v38 = vpop.eup %8891 }
 0x47f   : > { %v3884_v35 = vshll.u32 %v15612_v5, %v3878_v25  ;;  %15773 = vst [vmem:[#allocation38_spill] sm:$0xff] %v11843_v38  ;;  %vm3658_vm8 = vcmp.lt.s32.totalorder %v11585_v54, 0  ;;  %v3882_v43 = vshrl.u32 %v15612_v5, %v3879_v6  ;;  %v3885_v11 = vshrl.u32 %v15613_v21, %v3879_v6 }
 0x480   : > { %v3718_v1 = vshrl.u32 %v3717_v3, 30  ;;  %v3887_v24 = vshll.u32 %v15613_v21, %v3878_v25  ;;  %v11849_v12 = vpop.eup %8893  ;;  %v3632_v0 = vand.u32 2147483647, %v3631_v58  ;;  %v3888_v15 = vshrl.u32 %v15599_v52, %v3879_v6 }
 0x481   : > { %15774 = vst [vmem:[#allocation37_spill] sm:$0xff] %v11849_v12  ;;  %v3890_v61 = vshll.u32 %v15599_v52, %v3878_v25  ;;  %v3891_v7 = vshrl.u32 %v15600_v23, %v3879_v6  ;;  %v15775_v13 = vand.u32 2147483647, %v11557_v19  ;;  %v15776_v42 = vmov 0 }
 0x482   : > { %v3719_v39 = vshll.u32 %v3718_v1, 30  ;;  %v3883_v37 = vor.u32 %v3882_v43, %v3881_v47  ;;  %v3886_v53 = vor.u32 %v3885_v11, %v3884_v35  ;;  %v3893_v50 = vshll.u32 %v15600_v23, %v3878_v25  ;;  %v15837_v47 = vld [vmem:[#allocation14_spill] sm:$0xff] }
 0x483   : > { %vm11856_vm12 = vcmp.le.f32.partialorder %v15775_v13, 0.7853982  ;;  %v3635_v3 = vmul.f32 %v3634_v26, %v3632_v0  ;;  %v3889_v33 = vor.u32 %v3888_v15, %v3887_v24  ;;  %v3892_v58 = vor.u32 %v3891_v7, %v3890_v61  ;;  %v11862_v27 = vpop.eup %8895 }
 0x484   : > { %v15777_v42 = vsel %vm11856_vm12, 4294967295, %v15776_v42  ;;  %v3894_v2 = vshrl.u32 %v15601_v16, %v3879_v6  ;;  %15779 = vst [vmem:[#allocation40_spill] sm:$0xff] %v11862_v27  ;;  %8897 = vcosq.f32 %v11830_v20  ;;  %v11865_v12 = vsub.s32 %v3716_v10, %v3719_v39 }
 0x485   : > { %15778 = vst [vmem:[#allocation22_spill] sm:$0xff] %v15777_v42  ;;  %v3912_v13 = vshll.u32 %v3872_v41, 8  ;;  %v3764_v30 = vshrl.u32 %v3763_v45, 23  ;;  %v3636_v38 = vxor.u32 2147483648, %v3635_v3  ;;  %v15780_v44 = vand.u32 2147483647, %v11585_v54 }
 0x486   : > { %v3742_v25 = vsub.s32 4, %v3718_v1  ;;  %v3895_v26 = vor.u32 %v3894_v2, %v3893_v50  ;;  %vm3896_vm15 = vcmp.lt.s32.totalorder %v11837_v28, 1  ;;  %v3722_v35 = vsub.s32 0, %v11865_v12 }
 0x487   : > { %vm11869_vm5 = vcmp.le.f32.partialorder %v15780_v44, 0.7853982  ;;  %vm3897_vm11 = vcmp.lt.s32.totalorder %v11837_v28, 2  ;;  %vm3899_vm3 = vcmp.lt.s32.totalorder %v11837_v28, 4  ;;  %v3904_v10 = vsel %vm3896_vm15, %v3883_v37, %v3886_v53 }
 0x488   : > { %v3880_v41 = vshrl.u32 %v15607_v4, %v3879_v6  ;;  %vm3898_vm14 = vcmp.lt.s32.totalorder %v11837_v28, 3  ;;  %v3901_v45 = vsel %vm3899_vm3, %v3889_v33, 2102212464  ;;  %v3905_v44 = vsel %vm3899_vm3, %v3892_v58, 920167782 }
 0x489   : > { %v3637_v43 = vsel %vm15468_vm10, %v3636_v38, %v3635_v3  ;;  %v8240_v2 = vmin.u32 %v3722_v35, %v11865_v12  ;;  %v3906_v11 = vsel %vm3898_vm14, %v3889_v33, %v3905_v44  ;;  %v3908_v24 = vsel %vm3896_vm15, %v3886_v53, %v3889_v33 }
 0x48a   : > { %v11884_v0 = vsel %vm3658_vm8, %v3742_v25, %v3718_v1  ;;  %v3900_v15 = vsel %vm3896_vm15, %v3880_v41, %v3883_v37  ;;  %v3907_v61 = vsel %vm3897_vm11, %v3904_v10, %v3906_v11  ;;  %v3909_v6 = vsel %vm3899_vm3, %v3895_v26, 1326507024 }
 0x48b   : > { %15783 = vst [vmem:[#allocation41_spill] sm:$0xff] %v11884_v0  ;;  %v3724_v7 = vclz %v8240_v2  ;;  %v3902_v39 = vsel %vm3898_vm14, %v3886_v53, %v3901_v45  ;;  %v3910_v50 = vsel %vm3898_vm14, %v3892_v58, %v3909_v6  ;;  %v8243_v27 = vadd.s32 4294967169, %v3764_v30 }
 0x48c   : > { %v3640_v38 = vsel %vm11856_vm12, %v11557_v19, %v3637_v43  ;;  %v3911_v33 = vsel %vm3897_vm11, %v3908_v24, %v3910_v50  ;;  %v11893_v3 = vmul.u32.u64.low %v3912_v13, %v3907_v61  ;;  %v11894_v35 = vmul.u32.u64.high %v3912_v13, %v3907_v61, %v11893_v3 }
 0x48d   : > { %v8241_v1 = vadd.s32 4294967294, %v3724_v7  ;;  %v11897_v37 = vmul.u32.u64.low %v3912_v13, %v3911_v33  ;;  %v11898_v25 = vmul.u32.u64.high %v3912_v13, %v3911_v33, %v11897_v37  ;;  %v3770_v26 = vadd.s32 1, %v8243_v27 }
 0x48e   : > { %8899 = vsinq.f32 %v11830_v20  ;;  %v3903_v30 = vsel %vm3897_vm11, %v3900_v15, %v3902_v39  ;;  %v15784_v53 = vand.u32 2147483647, %v11812_v48  ;;  %v2598_v10 = vsub.s32 4, %v10976_v18  ;;  %v11906_v41 = vpop.eup %8897 }
 0x48f   : > { %v3712_v45 = vadd.s32 %v11789_v40, %v11795_v59  ;;  %vm8242_vm14 = vcmp.lt.s32.totalorder %v8241_v1, 0  ;;  %vm3771_vm3 = vcmp.gt.s32.totalorder %v3770_v26, 0  ;;  %8901 = vcosq.f32 %v3640_v38 }
 0x490   : > { %v3767_v58 = vand.u32 8388607, %v15784_v53  ;;  %v3727_v20 = vsel %vm8242_vm14, 0, %v8241_v1  ;;  %v3922_v28 = vadd.s32 1, %v11894_v35  ;;  %v3772_v44 = vsel %vm3771_vm3, %v3770_v26, 0 }
 0x491   : > { %8903 = vsinq.f32 %v3640_v38  ;;  %v3728_v43 = vsub.s32 32, %v3727_v20  ;;  %v3732_v2 = vsub.s32 4294967266, %v3727_v20  ;;  %v3919_v11 = vmul.u32 %v3912_v13, %v3903_v30 }
 0x492   : > { %vm3921_vm11 = vc.u32 %v11898_v25, %v11893_v3  ;;  %v3768_v24 = vor.u32 8388608, %v3767_v58  ;;  %v3774_v40 = vand.u32 31, %v3772_v44  ;;  %v3729_v15 = vshll.u32 %v11865_v12, %v3727_v20 }
 0x493   : > { %v3730_v61 = vshrl.u32 %v3712_v45, %v3728_v43  ;;  %v3733_v6 = vadd.s32 127, %v3732_v2  ;;  %v3923_v7 = vsel %vm3921_vm11, %v3922_v28, %v11894_v35  ;;  %v11919_v50 = vshrl.u32 %v3772_v44, 5 }
 0x494   : > { %v3924_v39 = vadd.s32 %v3923_v7, %v3919_v11  ;;  %v3775_v38 = vsub.s32 32, %v3774_v40  ;;  %v3971_v33 = vand.u32 2139095040, %v11834_v63  ;;  %v3777_v37 = vshll.u32 %v15607_v4, %v3774_v40 }
 0x495   : > { %v3731_v13 = vor.u32 %v3730_v61, %v3729_v15  ;;  %v3734_v1 = vshll.u32 %v3733_v6, 23  ;;  %v3780_v26 = vshll.u32 %v15612_v5, %v3774_v40  ;;  %v3783_v58 = vshll.u32 %v15613_v21, %v3774_v40 }
 0x496   : > { %v3925_v30 = vadd.s32 536870912, %v3924_v39  ;;  %v3778_v53 = vshrl.u32 %v15612_v5, %v3775_v38  ;;  %v3781_v12 = vshrl.u32 %v15613_v21, %v3775_v38  ;;  %v3784_v45 = vshrl.u32 %v15599_v52, %v3775_v38 }
 0x497   : > { %v3735_v35 = vor.u32 4788187, %v3734_v1  ;;  %v3786_v20 = vshll.u32 %v15599_v52, %v3774_v40  ;;  %v3787_v28 = vshrl.u32 %v15600_v23, %v3775_v38  ;;  %v3738_v43 = vcvt.s32.f32 %v3731_v13 }
 0x498   : > { %v11930_v44 = vpop.eup %8899  ;;  %vm3866_vm15 = vcmp.lt.s32.totalorder %v11717_v49, 0  ;;  %v3926_v2 = vshrl.u32 %v3925_v30, 30  ;;  %v3779_v11 = vor.u32 %v3778_v53, %v3777_v37  ;;  %v3782_v15 = vor.u32 %v3781_v12, %v3780_v26 }
 0x499   : > { %v3736_v61 = vand.u32 2147483647, %v3735_v35  ;;  %v3785_v6 = vor.u32 %v3784_v45, %v3783_v58  ;;  %v3789_v7 = vshll.u32 %v15600_v23, %v3774_v40  ;;  %v3790_v1 = vshrl.u32 %v15601_v16, %v3775_v38  ;;  %v11935_v27 = vpop.eup %8901 }
 0x49a   : > { %15785 = vst [vmem:[#allocation42_spill] sm:$0xff] %v11935_v27  ;;  %v3927_v59 = vshll.u32 %v3926_v2, 30  ;;  %v3788_v0 = vor.u32 %v3787_v28, %v3786_v20  ;;  %v3808_v29 = vshll.u32 %v3768_v24, 8  ;;  %v2599_v13 = vsel %vm2514_vm2, %v2598_v10, %v10976_v18 }
 0x49b   : > { %v11940_v42 = vpop.eup %8903  ;;  %v3739_v30 = vmul.f32 %v3738_v43, %v3736_v61  ;;  %v15787_v37 = vand.u32 2147483647, %v11717_v49  ;;  %v3791_v40 = vor.u32 %v3790_v1, %v3789_v7  ;;  %v3972_v53 = vshrl.u32 %v3971_v33, 23 }
 0x49c   : > { %15786 = vst [vmem:[#allocation43_spill] sm:$0xff] %v11940_v42  ;;  %v15790_v12 = vand.u32 2147483647, %v11834_v63  ;;  %v11950_v35 = vsub.s32 %v3924_v39, %v3927_v59  ;;  %v3776_v24 = vshrl.u32 %v15607_v4, %v3775_v38  ;;  %vm3792_vm2 = vcmp.lt.s32.totalorder %v11919_v50, 1 }
 0x49d   : > { %vm11944_vm14 = vcmp.le.f32.partialorder %v15787_v37, 0.7853982  ;;  %vm3795_vm3 = vcmp.lt.s32.totalorder %v11919_v50, 4  ;;  %v3950_v18 = vsub.s32 4, %v3926_v2  ;;  %vm3793_vm11 = vcmp.lt.s32.totalorder %v11919_v50, 2 }
 0x49e   : > { %v3975_v58 = vand.u32 8388607, %v15790_v12  ;;  %v3797_v10 = vsel %vm3795_vm3, %v3785_v6, 2102212464  ;;  %v3800_v45 = vsel %vm3792_vm2, %v3779_v11, %v3782_v15  ;;  %v3740_v20 = vxor.u32 2147483648, %v3739_v30 }
 0x49f   : > { %v3930_v28 = vsub.s32 0, %v11950_v35  ;;  %vm3794_vm10 = vcmp.lt.s32.totalorder %v11919_v50, 3  ;;  %v3801_v33 = vsel %vm3795_vm3, %v3788_v0, 920167782  ;;  %v3796_v43 = vsel %vm3792_vm2, %v3776_v24, %v3779_v11 }
 0x4a0   : > { %v3802_v59 = vsel %vm3794_vm10, %v3785_v6, %v3801_v33  ;;  %v3804_v39 = vsel %vm3792_vm2, %v3782_v15, %v3785_v6  ;;  %v3805_v61 = vsel %vm3795_vm3, %v3791_v40, 1326507024  ;;  %v3798_v7 = vsel %vm3794_vm10, %v3782_v15, %v3797_v10 }
 0x4a1   : > { %v8248_v38 = vmin.u32 %v3930_v28, %v11950_v35  ;;  %v3803_v1 = vsel %vm3793_vm11, %v3800_v45, %v3802_v59  ;;  %v3806_v37 = vsel %vm3794_vm10, %v3788_v0, %v3805_v61  ;;  %v11963_v12 = vsel %vm3866_vm15, %v3950_v18, %v3926_v2 }
 0x4a2   : > { %v3807_v27 = vsel %vm3793_vm11, %v3804_v39, %v3806_v37  ;;  %v11967_v42 = vmul.u32.u64.low %v3808_v29, %v3803_v1  ;;  %v11968_v19 = vmul.u32.u64.high %v3808_v29, %v3803_v1, %v11967_v42  ;;  %v3741_v11 = vsel %vm3658_vm8, %v3740_v20, %v3739_v30 }
 0x4a3   : > { %v3932_v6 = vclz %v8248_v38  ;;  %v11973_v15 = vmul.u32.u64.low %v3808_v29, %v3807_v27  ;;  %v11974_v40 = vmul.u32.u64.high %v3808_v29, %v3807_v27, %v11973_v15  ;;  %v3799_v0 = vsel %vm3793_vm11, %v3796_v43, %v3798_v7 }
 0x4a4   : > { %v8251_v24 = vadd.s32 4294967169, %v3972_v53  ;;  %v2601_v2 = vsel %vm11167_vm0, 0, %v2599_v13  ;;  %v2609_v18 = vxor.u32 2147483648, %v11334_v9  ;;  %v3920_v10 = vadd.s32 %v11893_v3, %v11898_v25 }
 0x4a5   : > { %v8249_v45 = vadd.s32 4294967294, %v3932_v6  ;;  %v2605_v20 = vadd.s32 3, %v2601_v2  ;;  %v3744_v27 = vsel %vm11869_vm5, %v11585_v54, %v3741_v11  ;;  %v3818_v50 = vadd.s32 1, %v11968_v19 }
 0x4a6   : > { %v3976_v53 = vor.u32 8388608, %v3975_v58  ;;  %v3978_v34 = vadd.s32 1, %v8251_v24  ;;  %v3815_v13 = vmul.u32 %v3808_v29, %v3799_v0  ;;  %vm3817_vm10 = vc.u32 %v11974_v40, %v11967_v42 }
 0x4a7   : > { %vm8250_vm0 = vcmp.lt.s32.totalorder %v8249_v45, 0  ;;  %v3014_v3 = vsub.s32 4, %v11332_v32  ;;  %v3819_v28 = vsel %vm3817_vm10, %v3818_v50, %v11968_v19  ;;  %v11994_v33 = vand.u32 3, %v2605_v20 }
 0x4a8   : > { %v3935_v25 = vsel %vm8250_vm0, 0, %v8249_v45  ;;  %vm3979_vm8 = vcmp.gt.s32.totalorder %v3978_v34, 0  ;;  %8905 = vcosq.f32 %v3744_v27  ;;  %v3820_v39 = vadd.s32 %v3819_v28, %v3815_v13 }
 0x4a9   : > { %v3936_v43 = vsub.s32 32, %v3935_v25  ;;  %v3940_v59 = vsub.s32 4294967266, %v3935_v25  ;;  %8907 = vsinq.f32 %v3744_v27  ;;  %v3980_v58 = vsel %vm3979_vm8, %v3978_v34, 0 }
 0x4aa   : > { %v11996_v61 = vshll.u32 %v3976_v53, 8  ;;  %v2612_v29 = vxor.u32 2147483648, %v11329_v51  ;;  %v3937_v38 = vshll.u32 %v11950_v35, %v3935_v25  ;;  %v3821_v37 = vadd.s32 536870912, %v3820_v39 }
 0x4ab   : > { %v3938_v7 = vshrl.u32 %v3920_v10, %v3936_v43  ;;  %v3941_v1 = vadd.s32 127, %v3940_v59  ;;  %v3981_v11 = vshrl.u32 %v3980_v58, 5  ;;  %v3982_v19 = vand.u32 31, %v3980_v58 }
 0x4ac   : > { %vm2608_vm2 = vcmp.eq.s32.totalorder %v11994_v33, 0  ;;  %v12004_v6 = vsel %vm2930_vm4, %v3014_v3, %v11332_v32  ;;  %v12006_v24 = vshrl.u32 %v3821_v37, 30  ;;  %vm2611_vm3 = vcmp.eq.s32.totalorder %v11994_v33, 2 }
 0x4ad   : > { %v3939_v15 = vor.u32 %v3938_v7, %v3937_v38  ;;  %v3942_v0 = vshll.u32 %v3941_v1, 23  ;;  %v2610_v2 = vsel %vm2608_vm2, %v11329_v51, %v2609_v18  ;;  %v3983_v45 = vsub.s32 32, %v3982_v19 }
 0x4ae   : > { %v3985_v35 = vshll.u32 %v15607_v4, %v3982_v19  ;;  %v3988_v10 = vshll.u32 %v15612_v5, %v3982_v19  ;;  %v3991_v20 = vshll.u32 %v15613_v21, %v3982_v19  ;;  %v3823_v32 = vshll.u32 %v12006_v24, 30 }
 0x4af   : > { %v3943_v27 = vor.u32 4788187, %v3942_v0  ;;  %v3946_v50 = vcvt.s32.f32 %v3939_v15  ;;  %v3994_v53 = vshll.u32 %v15599_v52, %v3982_v19  ;;  %v3984_v34 = vshrl.u32 %v15607_v4, %v3983_v45 }
 0x4b0   : > { %v3986_v13 = vshrl.u32 %v15612_v5, %v3983_v45  ;;  %v3989_v51 = vshrl.u32 %v15613_v21, %v3983_v45  ;;  %v3992_v18 = vshrl.u32 %v15599_v52, %v3983_v45  ;;  %v12019_v25 = vsub.s32 %v3820_v39, %v3823_v32 }
 0x4b1   : > { %v3944_v3 = vand.u32 2147483647, %v3943_v27  ;;  %v3995_v28 = vshrl.u32 %v15600_v23, %v3983_v45  ;;  %v3997_v43 = vshll.u32 %v15600_v23, %v3982_v19  ;;  %v3998_v7 = vshrl.u32 %v15601_v16, %v3983_v45 }
 0x4b2   : > { %v3987_v59 = vor.u32 %v3986_v13, %v3985_v35  ;;  %v3990_v58 = vor.u32 %v3989_v51, %v3988_v10  ;;  %v3993_v38 = vor.u32 %v3992_v18, %v3991_v20  ;;  %v12024_v1 = vpop.eup %8905  ;;  %v3826_v15 = vsub.s32 0, %v12019_v25 }
 0x4b3   : > { %v3947_v37 = vmul.f32 %v3946_v50, %v3944_v3  ;;  %v3996_v0 = vor.u32 %v3995_v28, %v3994_v53  ;;  %vm4000_vm4 = vcmp.lt.s32.totalorder %v3981_v11, 1  ;;  %v12027_v30 = vpop.eup %8907  ;;  %v3999_v39 = vor.u32 %v3998_v7, %v3997_v43 }
 0x4b4   : > { %vm4002_vm11 = vcmp.lt.s32.totalorder %v3981_v11, 3  ;;  %vm4003_vm0 = vcmp.lt.s32.totalorder %v3981_v11, 4  ;;  %v4004_v27 = vsel %vm4000_vm4, %v3984_v34, %v3987_v59  ;;  %v8244_v19 = vmin.u32 %v3826_v15, %v12019_v25 }
 0x4b5   : > { %v3948_v32 = vxor.u32 2147483648, %v3947_v37  ;;  %v4005_v35 = vsel %vm4003_vm0, %v3993_v38, 2102212464  ;;  %v4008_v10 = vsel %vm4000_vm4, %v3987_v59, %v3990_v58  ;;  %vm2604_vm10 = vweird.f32 %v10784_v36 }
 0x4b6   : > { %v4006_v45 = vsel %vm4002_vm11, %v3990_v58, %v4005_v35  ;;  %v4009_v20 = vsel %vm4003_vm0, %v3996_v0, 920167782  ;;  %v4012_v50 = vsel %vm4000_vm4, %v3990_v58, %v3993_v38  ;;  %v4013_v13 = vsel %vm4003_vm0, %v3999_v39, 1326507024  ;;  %v15791_v35 = vld [vmem:[#allocation18_spill] sm:$0xff] }
 0x4b7   : > { %v3828_v53 = vclz %v8244_v19  ;;  %vm4001_vm8 = vcmp.lt.s32.totalorder %v3981_v11, 2  ;;  %v4010_v51 = vsel %vm4002_vm11, %v3993_v38, %v4009_v20  ;;  %v2613_v34 = vsel %vm2611_vm3, %v2612_v29, %v11334_v9 }
 0x4b8   : > { %v4011_v18 = vsel %vm4001_vm8, %v4008_v10, %v4010_v51  ;;  %v4014_v3 = vsel %vm4002_vm11, %v3996_v0, %v4013_v13  ;;  %vm2607_vm2 = vcmp.lt.s32.totalorder %v11994_v33, 2  ;;  %v3017_v28 = vsel %vm11495_vm6, 0, %v12004_v6 }
 0x4b9   : > { %v3949_v43 = vsel %vm3866_vm15, %v3948_v32, %v3947_v37  ;;  %v8245_v59 = vadd.s32 4294967294, %v3828_v53  ;;  %v4007_v58 = vsel %vm4001_vm8, %v4004_v27, %v4006_v45  ;;  %v4015_v7 = vsel %vm4001_vm8, %v4012_v50, %v4014_v3 }
 0x4ba   : > { %v3816_v38 = vadd.s32 %v11967_v42, %v11974_v40  ;;  %v12046_v9 = vmul.u32.u64.low %v11996_v61, %v4015_v7  ;;  %v12047_v29 = vmul.u32.u64.high %v11996_v61, %v4015_v7, %v12046_v9  ;;  %v2614_v11 = vsel %vm2607_vm2, %v2610_v2, %v2613_v34  ;;  %v15795_v7 = vld [vmem:[#allocation26_spill] sm:$0xff] }
 0x4bb   : > { %vm8246_vm3 = vcmp.lt.s32.totalorder %v8245_v59, 0  ;;  %v12050_v33 = vmul.u32.u64.low %v11996_v61, %v4011_v18  ;;  %v12051_v15 = vmul.u32.u64.high %v11996_v61, %v4011_v18, %v12050_v33  ;;  %vm3020_vm6 = vweird.f32 %v11039_v55  ;;  %v15796_v9 = vld [vmem:[#allocation19_spill] sm:$0xff] }
 0x4bc   : > { %v3021_v8 = vadd.s32 3, %v3017_v28  ;;  %v12057_v6 = vsel %vm11944_vm14, %v11717_v49, %v3949_v43  ;;  %v3831_v37 = vsel %vm8246_vm3, 0, %v8245_v59  ;;  %v4023_v42 = vmul.u32 %v11996_v61, %v4007_v58  ;;  %v15794_v28 = vld [vmem:[#allocation15_spill] sm:$0xff] }
 0x4bd   : > { %v2806_v40 = vsub.s32 4, %v11058_v22  ;;  %v3832_v0 = vsub.s32 32, %v3831_v37  ;;  %v3836_v2 = vsub.s32 4294967266, %v3831_v37  ;;  %v3025_v27 = vxor.u32 2147483648, %v11629_v62 }
 0x4be   : > { %v3022_v39 = vand.u32 3, %v3021_v8  ;;  %vm4025_vm15 = vc.u32 %v12047_v29, %v12050_v33  ;;  %v2615_v32 = vsel %vm2604_vm10, nan, %v2614_v11  ;;  %v3028_v19 = vxor.u32 2147483648, %v11608_v14 }
 0x4bf   : > { %vm15792_vm4 = vcmp.lt.s32.totalorder %v15791_v35, 0  ;;  %v3833_v61 = vshll.u32 %v12019_v25, %v3831_v37  ;;  %v3834_v45 = vshrl.u32 %v3816_v38, %v3832_v0  ;;  %v3837_v20 = vadd.s32 127, %v3836_v2 }
 0x4c0   : > { %v2807_v10 = vsel %vm15792_vm4, %v2806_v40, %v11058_v22  ;;  %v4026_v50 = vadd.s32 1, %v12051_v15  ;;  %vm3023_vm11 = vcmp.lt.s32.totalorder %v3022_v39, 2  ;;  %vm3024_vm0 = vcmp.eq.s32.totalorder %v3022_v39, 0 }
 0x4c1   : > { %vm3027_vm8 = vcmp.eq.s32.totalorder %v3022_v39, 2  ;;  %v2809_v53 = vsel %vm11271_vm9, 0, %v2807_v10  ;;  %v3835_v36 = vor.u32 %v3834_v45, %v3833_v61  ;;  %v3838_v51 = vshll.u32 %v3837_v20, 23 }
 0x4c2   : > { %v4027_v34 = vsel %vm4025_vm15, %v4026_v50, %v12051_v15  ;;  %v3026_v18 = vsel %vm3024_vm0, %v11608_v14, %v3025_v27  ;;  %vm3762_vm10 = vcmp.lt.s32.totalorder %v11812_v48, 0  ;;  %v3029_v25 = vsel %vm3027_vm8, %v3028_v19, %v11629_v62  ;;  %v15801_v50 = vld [vmem:[#allocation21_spill] sm:$0xff] }
 0x4c3   : > { %v4028_v22 = vadd.s32 %v4027_v34, %v4023_v42  ;;  %v2813_v3 = vadd.s32 3, %v2809_v53  ;;  %v2817_v43 = vxor.u32 2147483648, %v15794_v28  ;;  %v3839_v59 = vor.u32 4788187, %v3838_v51  ;;  %v15802_v53 = vld [vmem:[#allocation16_spill] sm:$0xff] }
 0x4c4   : > { %v3030_v58 = vsel %vm3023_vm11, %v3026_v18, %v3029_v25  ;;  %v2820_v38 = vxor.u32 2147483648, %v15795_v7  ;;  %v3222_v11 = vsub.s32 4, %v15796_v9  ;;  %v15797_v8 = vand.u32 2147483647, %v11812_v48  ;;  %v15803_v18 = vld [vmem:[#allocation7_spill] sm:$0xff] }
 0x4c5   : > { %v12087_v14 = vadd.s32 %v12050_v33, %v12047_v29  ;;  %v4029_v37 = vadd.s32 536870912, %v4028_v22  ;;  %v3031_v62 = vsel %vm3020_vm6, nan, %v3030_v58  ;;  %v2814_v42 = vand.u32 3, %v2813_v3 }
 0x4c6   : > { %vm12082_vm9 = vcmp.le.f32.partialorder %v15797_v8, 0.7853982  ;;  %v3840_v40 = vand.u32 2147483647, %v3839_v59  ;;  %v3842_v0 = vcvt.s32.f32 %v3835_v36  ;;  %v8439_v2 = vpack.c.bf16 %v3031_v62, %v2615_v32  ;;  %v15805_v8 = vld [vmem:[#allocation9_spill] sm:$0xff]  ;;  %v15806_v62 = vld [vmem:[#allocation10_spill] sm:$0xff] }
 0x4c7   : > { %vm15800_vm2 = vcmp.lt.s32.totalorder %v11213_v57, 0  ;;  %v12094_v27 = vshrl.u32 %v4029_v37, 30  ;;  %vm2815_vm3 = vcmp.lt.s32.totalorder %v2814_v42, 2  ;;  %vm2816_vm15 = vcmp.eq.s32.totalorder %v2814_v42, 0 }
 0x4c8   : > { %v3223_v39 = vsel %vm15800_vm2, %v3222_v11, %v15796_v9  ;;  %vm2819_vm4 = vcmp.eq.s32.totalorder %v2814_v42, 2  ;;  %v3843_v19 = vmul.f32 %v3842_v0, %v3840_v40  ;;  %8440 = vmatprep.subr.bf16.mxu0 %v8439_v2  ;;  %v2818_v29 = vsel %vm2816_vm15, %v15795_v7, %v2817_v43  ;;  %v15807_v2 = vld [vmem:[#allocation32_spill] sm:$0xff] }
 0x4c9   : > { %v2821_v55 = vsel %vm2819_vm4, %v2820_v38, %v15794_v28  ;;  %v3225_v33 = vsel %vm11623_vm1, 0, %v3223_v39  ;;  %v4031_v32 = vshll.u32 %v12094_v27, 30  ;;  %vm2812_vm6 = vweird.f32 %v15791_v35 }
 0x4ca   : > { %v2822_v10 = vsel %vm2815_vm3, %v2818_v29, %v2821_v55  ;;  %v3229_v61 = vadd.s32 3, %v3225_v33  ;;  %v3844_v45 = vxor.u32 2147483648, %v3843_v19  ;;  %v3233_v20 = vxor.u32 2147483648, %v11753_v31  ;;  %v15808_v29 = vld [vmem:[#allocation25_spill] sm:$0xff] }
 0x4cb   : > { %v3236_v13 = vxor.u32 2147483648, %v15801_v50  ;;  %v2502_v36 = vand.u32 3, %v15802_v53  ;;  %v12105_v51 = vsub.s32 %v4028_v22, %v4031_v32  ;;  %v2505_v25 = vxor.u32 2147483648, %v15803_v18  ;;  %v15809_v33 = vld [vmem:[#allocation29_spill] sm:$0xff] }
 0x4cc   : > { %v3230_v34 = vand.u32 3, %v3229_v61  ;;  %v2508_v3 = vxor.u32 2147483648, %v15804_v17  ;;  %v3845_v28 = vsel %vm3762_vm10, %v3844_v45, %v3843_v19  ;;  %v2823_v35 = vsel %vm2812_vm6, nan, %v2822_v10  ;;  %v15810_v61 = vld [vmem:[#allocation28_spill] sm:$0xff] }
 0x4cd   : > { %vm3228_vm1 = vweird.f32 %v11213_v57  ;;  %vm2503_vm11 = vcmp.lt.s32.totalorder %v2502_v36, 2  ;;  %v4034_v43 = vsub.s32 0, %v12105_v51  ;;  %vm2504_vm8 = vcmp.eq.s32.totalorder %v2502_v36, 0  ;;  %v15811_v57 = vld [vmem:[#allocation13_spill] sm:$0xff] }
 0x4ce   : > { %vm3232_vm0 = vcmp.eq.s32.totalorder %v3230_v34, 0  ;;  %vm2507_vm2 = vcmp.eq.s32.totalorder %v2502_v36, 2  ;;  %v3848_v22 = vsel %vm12082_vm9, %v11812_v48, %v3845_v28  ;;  %vm3235_vm3 = vcmp.eq.s32.totalorder %v3230_v34, 2  ;;  %v15813_v36 = vld [vmem:[#allocation17_spill] sm:$0xff] }
 0x4cf   : > { %v3234_v59 = vsel %vm3232_vm0, %v15801_v50, %v3233_v20  ;;  %v2506_v58 = vsel %vm2504_vm8, %v15804_v17, %v2505_v25  ;;  %v8252_v7 = vmin.u32 %v4034_v43, %v12105_v51  ;;  %vm3231_vm15 = vcmp.lt.s32.totalorder %v3230_v34, 2  ;;  %v15814_v17 = vld [vmem:[#allocation34_spill] sm:$0xff] }
 0x4d0   : > { %v3237_v38 = vsel %vm3235_vm3, %v3236_v13, %v11753_v31  ;;  %v2509_v9 = vsel %vm2507_vm2, %v2508_v3, %v15803_v18  ;;  %vm2500_vm4 = vweird.f32 %v15805_v8  ;;  %v2918_v42 = vand.u32 3, %v15806_v62  ;;  %v15812_v13 = vld [vmem:[#allocation12_spill] sm:$0xff] }
 0x4d1   : > { %v3238_v11 = vsel %vm3231_vm15, %v3234_v59, %v3237_v38  ;;  %v2510_v37 = vsel %vm2503_vm11, %v2506_v58, %v2509_v9  ;;  %8909 = vcosq.f32 %v3848_v22  ;;  %v4036_v40 = vclz %v8252_v7  ;;  %v15815_v8 = vld [vmem:[#allocation8_spill] sm:$0xff] }
 0x4d2   : > { %v3239_v0 = vsel %vm3228_vm1, nan, %v3238_v11  ;;  %v2921_v39 = vxor.u32 2147483648, %v15807_v2  ;;  %8911 = vsinq.f32 %v3848_v22  ;;  %vm2916_vm6 = vweird.f32 %v15808_v29 }
 0x4d3   : > { %v8447_v19 = vpack.c.bf16 %v3239_v0, %v2823_v35  ;;  %vm2920_vm0 = vcmp.eq.s32.totalorder %v2918_v42, 0  ;;  %v8253_v31 = vadd.s32 4294967294, %v4036_v40  ;;  %v2511_v55 = vsel %vm2500_vm4, nan, %v2510_v37  ;;  %v15816_v0 = vld [vmem:[#allocation11_spill] sm:$0xff] }
 0x4d4   : > { %v2922_v32 = vsel %vm2920_vm0, %v15809_v33, %v2921_v39  ;;  %v2924_v10 = vxor.u32 2147483648, %v15809_v33  ;;  %vm2919_vm11 = vcmp.lt.s32.totalorder %v2918_v42, 2  ;;  %vm2923_vm8 = vcmp.eq.s32.totalorder %v2918_v42, 2  ;;  %v15817_v39 = vld [vmem:[#allocation23_spill] sm:$0xff]  ;;  %v15821_v33 = vld [vmem:[#allocation24_spill] sm:$0xff] }
 0x4d5   : > { %8448 = vmatprep.subr.bf16.mxu1 %v8447_v19  ;;  %v2710_v45 = vand.u32 3, %v15810_v61  ;;  %v2713_v20 = vxor.u32 2147483648, %v15811_v57  ;;  %vm8254_vm1 = vcmp.lt.s32.totalorder %v8253_v31, 0  ;;  %v2716_v53 = vxor.u32 2147483648, %v15812_v13 }
 0x4d6   : > { %v2925_v50 = vsel %vm2923_vm8, %v2924_v10, %v15807_v2  ;;  %v3126_v34 = vand.u32 3, %v15813_v36  ;;  %v4039_v18 = vsel %vm8254_vm1, 0, %v8253_v31  ;;  %v3129_v3 = vxor.u32 2147483648, %v15814_v17 }
 0x4d7   : > { %v2926_v25 = vsel %vm2919_vm11, %v2922_v32, %v2925_v50  ;;  %vm2711_vm2 = vcmp.lt.s32.totalorder %v2710_v45, 2  ;;  %v4040_v28 = vsub.s32 32, %v4039_v18  ;;  %v4044_v35 = vsub.s32 4294967266, %v4039_v18 }
 0x4d8   : > { %v2927_v43 = vsel %vm2916_vm6, nan, %v2926_v25  ;;  %vm2712_vm3 = vcmp.eq.s32.totalorder %v2710_v45, 0  ;;  %v4041_v22 = vshll.u32 %v12105_v51, %v4039_v18  ;;  %vm2715_vm15 = vcmp.eq.s32.totalorder %v2710_v45, 2 }
 0x4d9   : > { %v8441_v59 = vpack.c.bf16 %v2927_v43, %v2511_v55  ;;  %v2714_v58 = vsel %vm2712_vm3, %v15812_v13, %v2713_v20  ;;  %v4042_v7 = vshrl.u32 %v12087_v14, %v4040_v28  ;;  %v4045_v38 = vadd.s32 127, %v4044_v35 }
 0x4da   : > { %v2717_v9 = vsel %vm2715_vm15, %v2716_v53, %v15811_v57  ;;  %vm3128_vm4 = vcmp.eq.s32.totalorder %v3126_v34, 0  ;;  %8913 = vcosq.f32 %v12057_v6  ;;  %v3132_v62 = vxor.u32 2147483648, %v15815_v8 }
 0x4db   : > { %8442 = vmatpush1.bf16.msra.mxu0 %v8441_v59  ;;  %v2718_v11 = vsel %vm2711_vm2, %v2714_v58, %v2717_v9  ;;  %v3130_v37 = vsel %vm3128_vm4, %v15815_v8, %v3129_v3  ;;  %v12145_v51 = vpop.eup %8909  ;;  %v4043_v42 = vor.u32 %v4042_v7, %v4041_v22  ;;  %v4046_v40 = vshll.u32 %v4045_v38, 23  ;;  %v15823_v22 = vld [vmem:[#allocation31_spill] sm:$0xff] }
 0x4dc   : > { %vm3131_vm6 = vcmp.eq.s32.totalorder %v3126_v34, 2  ;;  %v3430_v14 = vsub.s32 4, %v15816_v0  ;;  %v8912_v2 = vpop.eup %8911  ;;  %8915 = vsinq.f32 %v12057_v6  ;;  %vm3970_vm0 = vcmp.lt.s32.totalorder %v11834_v63, 0  ;;  %v15825_v7 = vld [vmem:[#allocation43_spill] sm:$0xff] }
 0x4dd   : > { %vm2708_vm11 = vweird.f32 %v15817_v39  ;;  %vm3127_vm8 = vcmp.lt.s32.totalorder %v3126_v34, 2  ;;  %v3133_v19 = vsel %vm3131_vm6, %v3132_v62, %v15814_v17  ;;  %v15818_v29 = vand.u32 2147483647, %v11834_v63 }
 0x4de   : > { %v4047_v55 = vor.u32 4788187, %v4046_v40  ;;  %vm3124_vm2 = vweird.f32 %v15821_v33  ;;  %v3134_v32 = vsel %vm3127_vm8, %v3130_v37, %v3133_v19  ;;  %vm15822_vm3 = vcmp.lt.s32.totalorder %v11517_v56, 0 }
 0x4df   : > { %vm12154_vm1 = vcmp.le.f32.partialorder %v15818_v29, 0.7853982  ;;  %v3431_v6 = vsel %vm15822_vm3, %v3430_v14, %v15816_v0  ;;  %v2719_v10 = vsel %vm2708_vm11, nan, %v2718_v11  ;;  %v3135_v61 = vsel %vm3124_vm2, nan, %v3134_v32  ;;  %v15827_v14 = vld [vmem:[#allocation42_spill] sm:$0xff] }
 0x4e0   : > { %v3433_v45 = vsel %vm11803_vm7, 0, %v3431_v6  ;;  %v3846_v57 = vsub.s32 4, %v12006_v24  ;;  %v4048_v20 = vand.u32 2147483647, %v4047_v55  ;;  %v4050_v50 = vcvt.s32.f32 %v4043_v42 }
 0x4e1   : > { %v8449_v13 = vpack.c.bf16 %v3135_v61, %v2719_v10  ;;  %v3437_v53 = vadd.s32 3, %v3433_v45  ;;  %vm3436_vm15 = vweird.f32 %v11517_v56  ;;  %v3441_v36 = vxor.u32 2147483648, %v11930_v44  ;;  %v15831_v56 = vld [vmem:[#allocation41_spill] sm:$0xff] }
 0x4e2   : > { %v3444_v34 = vxor.u32 2147483648, %v11906_v41  ;;  %v3847_v18 = vsel %vm3762_vm10, %v3846_v57, %v12006_v24  ;;  %v3638_v25 = vsub.s32 4, %v11744_v60  ;;  %v4051_v46 = vmul.f32 %v4050_v50, %v4048_v20 }
 0x4e3   : > { %8450 = vmatpush1.bf16.msra.mxu1 %v8449_v13  ;;  %v3438_v17 = vand.u32 3, %v3437_v53  ;;  %v3849_v3 = vsel %vm12082_vm9, 0, %v3847_v18  ;;  %vm3852_vm7 = vweird.f32 %v11812_v48  ;;  %v3857_v28 = vxor.u32 2147483648, %v8912_v2  ;;  %v15833_v53 = vld [vmem:[#allocation36_spill] sm:$0xff] }
 0x4e4   : > { %v3853_v35 = vadd.s32 3, %v3849_v3  ;;  %v3860_v43 = vxor.u32 2147483648, %v12145_v51  ;;  %vm15824_vm4 = vcmp.lt.s32.totalorder %v15823_v22, 0  ;;  %v4054_v24 = vsub.s32 4, %v12094_v27  ;;  %v12181_v9 = vpop.eup %8913 }
 0x4e5   : > { %v3639_v59 = vsel %vm15824_vm4, %v3638_v25, %v11744_v60  ;;  %v4052_v58 = vxor.u32 2147483648, %v4051_v46  ;;  %vm3440_vm10 = vcmp.eq.s32.totalorder %v3438_v17, 0  ;;  %vm3443_vm6 = vcmp.eq.s32.totalorder %v3438_v17, 2  ;;  %v15835_v25 = vld [vmem:[#allocation35_spill] sm:$0xff] }
 0x4e6   : > { %v3649_v38 = vxor.u32 2147483648, %v15825_v7  ;;  %v3442_v15 = vsel %vm3440_vm10, %v11906_v41, %v3441_v36  ;;  %v3445_v11 = vsel %vm3443_vm6, %v3444_v34, %v11930_v44  ;;  %v3854_v8 = vand.u32 3, %v3853_v35  ;;  %v12192_v0 = vpop.eup %8915  ;;  %v15834_v34 = vld [vmem:[#allocation38_spill] sm:$0xff] }
 0x4e7   : > { %v3641_v62 = vsel %vm11856_vm12, 0, %v3639_v59  ;;  %v4053_v60 = vsel %vm3970_vm0, %v4052_v58, %v4051_v46  ;;  %vm3439_vm9 = vcmp.lt.s32.totalorder %v3438_v17, 2  ;;  %v4055_v40 = vsel %vm3970_vm0, %v4054_v24, %v12094_v27 }
 0x4e8   : > { %v3645_v42 = vadd.s32 3, %v3641_v62  ;;  %v4056_v41 = vsel %vm12154_vm1, %v11834_v63, %v4053_v60  ;;  %v3446_v44 = vsel %vm3439_vm9, %v3442_v15, %v3445_v11  ;;  %vm3856_vm11 = vcmp.eq.s32.totalorder %v3854_v8, 0 }
 0x4e9   : > { %v3652_v39 = vxor.u32 2147483648, %v15827_v14  ;;  %8917 = vcosq.f32 %v4056_v41  ;;  %v3858_v19 = vsel %vm3856_vm11, %v12145_v51, %v3857_v28  ;;  %vm3859_vm12 = vcmp.eq.s32.totalorder %v3854_v8, 2 }
 0x4ea   : > { %v3646_v29 = vand.u32 3, %v3645_v42  ;;  %8919 = vsinq.f32 %v4056_v41  ;;  %vm3855_vm8 = vcmp.lt.s32.totalorder %v3854_v8, 2  ;;  %v3861_v55 = vsel %vm3859_vm12, %v3860_v43, %v8912_v2  ;;  %v15829_v2 = vld [vmem:[#allocation39_spill] sm:$0xff] }
 0x4eb   : > { %v4057_v27 = vsel %vm12154_vm1, 0, %v4055_v40  ;;  %v3447_v33 = vsel %vm3436_vm15, nan, %v3446_v44  ;;  %v3862_v32 = vsel %vm3855_vm8, %v3858_v19, %v3861_v55  ;;  %v15830_v57 = vsel %vm11678_vm13, 0, %v15829_v2 }
 0x4ec   : > { %vm3648_vm0 = vcmp.eq.s32.totalorder %v3646_v29, 0  ;;  %vm3651_vm2 = vcmp.eq.s32.totalorder %v3646_v29, 2  ;;  %v3863_v6 = vsel %vm3852_vm7, nan, %v3862_v32  ;;  %v4061_v61 = vadd.s32 3, %v4057_v27 }
 0x4ed   : > { %v3650_v10 = vsel %vm3648_vm0, %v15827_v14, %v3649_v38  ;;  %v3653_v51 = vsel %vm3651_vm2, %v3652_v39, %v15825_v7  ;;  %v3541_v31 = vadd.s32 3, %v15830_v57  ;;  %v15832_v20 = vsel %vm11869_vm5, 0, %v15831_v56  ;;  %v15838_v38 = vld [vmem:[#allocation40_spill] sm:$0xff]  ;;  %v15839_v14 = vld [vmem:[#allocation37_spill] sm:$0xff] }
 0x4ee   : > { %v3749_v50 = vadd.s32 3, %v15832_v20  ;;  %v8443_v13 = vpack.c.bf16 %v3863_v6, %v3447_v33  ;;  %v3334_v36 = vand.u32 3, %v15833_v53  ;;  %vm3647_vm1 = vcmp.lt.s32.totalorder %v3646_v29, 2 }
 0x4ef   : > { %v4062_v48 = vand.u32 3, %v4061_v61  ;;  %v3337_v18 = vxor.u32 2147483648, %v15834_v34  ;;  %v3340_v46 = vxor.u32 2147483648, %v15835_v25  ;;  %v15836_v17 = vsel %vm11944_vm14, 0, %v11963_v12 }
 0x4f0   : > { %v3957_v3 = vadd.s32 3, %v15836_v17  ;;  %8444 = vmatprep.subr.bf16.mxu0 %v8443_v13  ;;  %v3654_v28 = vsel %vm3647_vm1, %v3650_v10, %v3653_v51  ;;  %vm3332_vm13 = vweird.f32 %v15837_v47  ;;  %vm3336_vm5 = vcmp.eq.s32.totalorder %v3334_v36, 0  ;;  %v8255_v10 = vld [vmem:[%s15351_s3 + $0x20] sm:$0xff] }
 0x4f1   : > { %vm3644_vm3 = vweird.f32 %v15823_v22  ;;  %vm4060_vm15 = vweird.f32 %v11834_v63  ;;  %vm3335_vm7 = vcmp.lt.s32.totalorder %v3334_v36, 2  ;;  %v3338_v35 = vsel %vm3336_vm5, %v15835_v25, %v3337_v18  ;;  %v15840_v22 = vld [vmem:[#allocation27_spill] sm:$0xff] }
 0x4f2   : > { %vm3339_vm4 = vcmp.eq.s32.totalorder %v3334_v36, 2  ;;  %vm3748_vm10 = vweird.f32 %v11585_v54  ;;  %v3750_v43 = vand.u32 3, %v3749_v50  ;;  %v3753_v12 = vxor.u32 2147483648, %v12027_v30  ;;  %v12280_v50 = vpop.permute.xlu0 %4084 }
 0x4f3   : > { %v3341_v26 = vsel %vm3339_vm4, %v3340_v46, %v15834_v34  ;;  %v3756_v59 = vxor.u32 2147483648, %v12024_v1  ;;  %vm4063_vm14 = vcmp.lt.s32.totalorder %v4062_v48, 2  ;;  %vm4064_vm6 = vcmp.eq.s32.totalorder %v4062_v48, 0  ;;  %v8918_v7 = vpop.eup %8917 }
 0x4f4   : > { %v3342_v24 = vsel %vm3335_vm7, %v3338_v35, %v3341_v26  ;;  %v3542_v58 = vand.u32 3, %v3541_v31  ;;  %vm4067_vm9 = vcmp.eq.s32.totalorder %v4062_v48, 2  ;;  %vm3752_vm11 = vcmp.eq.s32.totalorder %v3750_v43, 0  ;;  %v8920_v11 = vpop.eup %8919 }
 0x4f5   : > { %vm3755_vm12 = vcmp.eq.s32.totalorder %v3750_v43, 2  ;;  %v3545_v15 = vxor.u32 2147483648, %v15838_v38  ;;  %v4068_v8 = vxor.u32 2147483648, %v8918_v7  ;;  %vm3751_vm8 = vcmp.lt.s32.totalorder %v3750_v43, 2 }
 0x4f6   : > { %v3754_v37 = vsel %vm3752_vm11, %v12024_v1, %v3753_v12  ;;  %v3757_v62 = vsel %vm3755_vm12, %v3756_v59, %v12027_v30  ;;  %v4065_v60 = vxor.u32 2147483648, %v8920_v11  ;;  %v3343_v42 = vsel %vm3332_vm13, nan, %v3342_v24 }
 0x4f7   : > { %v3758_v40 = vsel %vm3751_vm8, %v3754_v37, %v3757_v62  ;;  %vm3544_vm0 = vcmp.eq.s32.totalorder %v3542_v58, 0  ;;  %v4069_v41 = vsel %vm4067_vm9, %v4068_v8, %v8920_v11  ;;  %vm3547_vm2 = vcmp.eq.s32.totalorder %v3542_v58, 2 }
 0x4f8   : > { %v3759_v44 = vsel %vm3748_vm10, nan, %v3758_v40  ;;  %v3548_v39 = vxor.u32 2147483648, %v15839_v14  ;;  %v4066_v19 = vsel %vm4064_vm6, %v8918_v7, %v4065_v60  ;;  %v3546_v1 = vsel %vm3544_vm0, %v15839_v14, %v3545_v15 }
 0x4f9   : > { %v8445_v29 = vpack.c.bf16 %v3759_v44, %v3343_v42  ;;  %v3958_v55 = vand.u32 3, %v3957_v3  ;;  %v4070_v30 = vsel %vm4063_vm14, %v4066_v19, %v4069_v41  ;;  %v3961_v33 = vxor.u32 2147483648, %v12192_v0 }
 0x4fa   : > { %v3549_v27 = vsel %vm3547_vm2, %v3548_v39, %v15838_v38  ;;  %v3964_v32 = vxor.u32 2147483648, %v12181_v9  ;;  %v3655_v54 = vsel %vm3644_vm3, nan, %v3654_v28  ;;  %v4071_v6 = vsel %vm4060_vm15, nan, %v4070_v30 }
 0x4fb   : > { %8446 = vmatpush1.bf16.msra.mxu0 %v8445_v29  ;;  %vm3543_vm1 = vcmp.lt.s32.totalorder %v3542_v58, 2  ;;  %vm3960_vm13 = vcmp.eq.s32.totalorder %v3958_v55, 0  ;;  %v8451_v51 = vpack.c.bf16 %v4071_v6, %v3655_v54  ;;  %vm3963_vm5 = vcmp.eq.s32.totalorder %v3958_v55, 2 }
 0x4fc   : > { %v3550_v61 = vsel %vm3543_vm1, %v3546_v1, %v3549_v27  ;;  %v3962_v45 = vsel %vm3960_vm13, %v12181_v9, %v3961_v33  ;;  %vm3959_vm7 = vcmp.lt.s32.totalorder %v3958_v55, 2  ;;  %v3965_v2 = vsel %vm3963_vm5, %v3964_v32, %v12192_v0  ;;  %v8256_v9 = vld [vmem:[%s15351_s3 + $0x28] sm:$0xff]  ;;  %v8258_v0 = vld [vmem:[%s15351_s3 + $0x38] sm:$0xff] }
 0x4fd   : > { %8452 = vmatprep.subr.bf16.mxu1 %v8451_v51  ;;  %vm3540_vm3 = vweird.f32 %v15840_v22  ;;  %vm3956_vm15 = vweird.f32 %v11717_v49  ;;  %v3966_v63 = vsel %vm3959_vm7, %v3962_v45, %v3965_v2  ;;  %vm15841_vm4 = vcmask 261120   ;;  %v8257_v49 = vld [vmem:[%s15351_s3 + $0x30] sm:$0xff] }
 0x4fe   : > { %8263 = vmatmul.mubr.msk.f32.vlgmr.msra.gmra.mrb[16].mxu0 %vm15841_vm4, %v8255_v10  ;;  %v3551_v57 = vsel %vm3540_vm3, nan, %v3550_v61  ;;  %v3967_v31 = vsel %vm3956_vm15, nan, %v3966_v63  ;;  %v15842_v56 = vmov 0.0   ;;  %vm15843_vm10 = vmmov %vm15841_vm4 }
 0x4ff   : > { %4184 = vmatprep.mubr.f32.mxu0 %v15842_v56  ;;  %v8453_v20 = vpack.c.bf16 %v3967_v31, %v3551_v57  ;;  %vm15844_vm14 = vmmov %vm15841_vm4 }
 0x500   : > { %vm15845_vm6 = vmmov %vm15841_vm4 }
 0x501   : > { %8454 = vmatpush1.bf16.msra.mxu1 %v8453_v20  ;;  %vm15846_vm9 = vmmov %vm15841_vm4 }
 0x502   : > { %8264 = vmatmul.mubr.msk.f32.gmra.mrb[18].mxu0 %vm15843_vm10, %v8256_v9  ;;  %vm15847_vm11 = vmmov %vm15841_vm4 }
 0x503   : > { %4190 = vmatprep.mubr.f32.mxu0 %v15842_v56  ;;  %vm15848_vm12 = vmmov %vm15841_vm4 }
 0x504   : > { %8267 = vmatmul.mubr.msk.f32.vlgmr.msra.gmra.mrb[16].mxu1 %vm15844_vm14, %v8255_v10  ;;  %vm15849_vm8 = vmmov %vm15841_vm4 }
 0x505   : > { %4273 = vmatprep.mubr.f32.mxu1 %v15842_v56 }
 0x506   : > { %8265 = vmatmul.mubr.msk.f32.gmra.mrb[20].mxu0 %vm15845_vm6, %v8257_v49 }
 0x507   : > { %4196 = vmatprep.mubr.f32.mxu0 %v15842_v56 }
 0x508   : > { %8268 = vmatmul.mubr.msk.f32.gmra.mrb[18].mxu1 %vm15846_vm9, %v8256_v9 }
 0x509   : > { %4279 = vmatprep.mubr.f32.mxu1 %v15842_v56 }
 0x50a   : > { %8266 = vmatmul.mubr.msk.f32.gmra.mrb[22].mxu0 %vm15847_vm11, %v8258_v0 }
 0x50b   : > { %6062 = vmatprep.mubr.f32.mxu0 %v15842_v56 }
 0x50c   : > { %8269 = vmatmul.mubr.msk.f32.gmra.mrb[20].mxu1 %vm15848_vm12, %v8257_v49 }
 0x50d   : > { %4285 = vmatprep.mubr.f32.mxu1 %v15842_v56 }
 0x510   : > { %8270 = vmatmul.mubr.msk.f32.gmra.mrb[22].mxu1 %vm15849_vm8, %v8258_v0 }
 0x511   : > { %6151 = vmatprep.mubr.f32.mxu1 %v15842_v56 }
 0x5d1   : > { %v4180_v13 = vpop.f32.mrb[16].mxu0 }
 0x5d2   : > { %v12283_v53 = vadd.f32 %v4180_v13, %v12280_v50  ;;  %v4182_v36 = vpop.f32.mrb[17].mxu0 }
 0x5d3   : > { %v12286_v48 = vadd.f32 %v4182_v36, %v12280_v50 }
 0x5d4   : > { %15850 = vst [vmem:[#allocation18_spill] sm:$0xff] %v12283_v53  ;;  %v4292_v34 = vand.u32 2147483647, %v12283_v53  ;;  %v4295_v18 = vand.u32 2139095040, %v12283_v53 }
 0x5d5   : > { %15851 = vst [vmem:[#allocation20_spill] sm:$0xff] %v12286_v48  ;;  %v4399_v25 = vand.u32 2139095040, %v12286_v48  ;;  %v12291_v46 = vpop.f32.mrb[18].mxu0  ;;  %v15477_v58 = vand.u32 2147483647, %v12286_v48 }
 0x5d6   : > { %v4296_v17 = vshrl.u32 %v4295_v18, 23  ;;  %v12293_v3 = vpop.f32.mrb[19].mxu0  ;;  %v4299_v28 = vand.u32 8388607, %v4292_v34 }
 0x5d7   : > { %v4400_v47 = vshrl.u32 %v4399_v25, 23  ;;  %v4269_v26 = vpop.f32.mrb[16].mxu1  ;;  %v12315_v14 = vand.u32 8388607, %v15477_v58 }
 0x5d8   : > { %v8271_v35 = vadd.s32 4294967169, %v4296_v17  ;;  %v12298_v43 = vadd.f32 %v4269_v26, %v12280_v50  ;;  %v12300_v59 = vpop.f32.mrb[17].mxu1  ;;  %v4300_v7 = vor.u32 8388608, %v4299_v28 }
 0x5d9   : > { %v8275_v12 = vadd.s32 4294967169, %v4400_v47  ;;  %v12325_v51 = vpop.f32.mrb[20].mxu0 }
 0x5da   : > { %15852 = vst [vmem:[#allocation15_spill] sm:$0xff] %v12298_v43  ;;  %v4302_v24 = vadd.s32 1, %v8271_v35  ;;  %v4500_v38 = vand.u32 2147483647, %v12298_v43  ;;  %v4503_v15 = vand.u32 2139095040, %v12298_v43  ;;  %v12311_v44 = vshll.u32 %v4300_v7, 8 }
 0x5db   : > { %v4406_v11 = vadd.s32 1, %v8275_v12  ;;  %v12305_v8 = vpop.f32.mrb[18].mxu1 }
 0x5dc   : > { %vm4303_vm0 = vcmp.gt.s32.totalorder %v4302_v24, 0  ;;  %v4504_v62 = vshrl.u32 %v4503_v15, 23  ;;  %v4507_v60 = vand.u32 8388607, %v4500_v38  ;;  %v12309_v40 = vpop.f32.mrb[19].mxu1 }
 0x5dd   : > { %v4304_v37 = vsel %vm4303_vm0, %v4302_v24, 0  ;;  %vm4407_vm2 = vcmp.gt.s32.totalorder %v4406_v11, 0 }
 0x5de   : > { %v4306_v42 = vand.u32 31, %v4304_v37  ;;  %v4305_v41 = vshrl.u32 %v4304_v37, 5  ;;  %v8279_v19 = vadd.s32 4294967169, %v4504_v62  ;;  %v4508_v29 = vor.u32 8388608, %v4507_v60 }
 0x5df   : > { %v4408_v1 = vsel %vm4407_vm2, %v4406_v11, 0 }
 0x5e0   : > { %v4307_v39 = vsub.s32 32, %v4306_v42  ;;  %v4309_v55 = vshll.u32 %v15607_v4, %v4306_v42  ;;  %v4312_v30 = vshll.u32 %v15612_v5, %v4306_v42  ;;  %v4315_v27 = vshll.u32 %v15613_v21, %v4306_v42 }
 0x5e1   : > { %v4318_v33 = vshll.u32 %v15599_v52, %v4306_v42  ;;  %v4321_v10 = vshll.u32 %v15600_v23, %v4306_v42  ;;  %vm4324_vm1 = vcmp.lt.s32.totalorder %v4305_v41, 1  ;;  %v4510_v31 = vadd.s32 1, %v8279_v19 }
 0x5e2   : > { %v4310_v32 = vshrl.u32 %v15612_v5, %v4307_v39  ;;  %v4313_v54 = vshrl.u32 %v15613_v21, %v4307_v39  ;;  %v4316_v6 = vshrl.u32 %v15599_v52, %v4307_v39  ;;  %v4308_v61 = vshrl.u32 %v15607_v4, %v4307_v39 }
 0x5e3   : > { %v4319_v45 = vshrl.u32 %v15600_v23, %v4307_v39  ;;  %v4322_v2 = vshrl.u32 %v15601_v16, %v4307_v39  ;;  %vm4326_vm13 = vcmp.lt.s32.totalorder %v4305_v41, 3  ;;  %vm4327_vm5 = vcmp.lt.s32.totalorder %v4305_v41, 4 }
 0x5e4   : > { %v4311_v22 = vor.u32 %v4310_v32, %v4309_v55  ;;  %v4314_v63 = vor.u32 %v4313_v54, %v4312_v30  ;;  %v4317_v57 = vor.u32 %v4316_v6, %v4315_v27  ;;  %vm4511_vm7 = vcmp.gt.s32.totalorder %v4510_v31, 0 }
 0x5e5   : > { %v4320_v9 = vor.u32 %v4319_v45, %v4318_v33  ;;  %v4323_v20 = vor.u32 %v4322_v2, %v4321_v10  ;;  %vm4325_vm3 = vcmp.lt.s32.totalorder %v4305_v41, 2  ;;  %v4512_v35 = vsel %vm4511_vm7, %v4510_v31, 0 }
 0x5e6   : > { %v4328_v49 = vsel %vm4324_vm1, %v4308_v61, %v4311_v22  ;;  %v4329_v0 = vsel %vm4327_vm5, %v4317_v57, 2102212464  ;;  %v4332_v13 = vsel %vm4324_vm1, %v4311_v22, %v4314_v63  ;;  %v4336_v36 = vsel %vm4324_vm1, %v4314_v63, %v4317_v57 }
 0x5e7   : > { %v4330_v18 = vsel %vm4326_vm13, %v4314_v63, %v4329_v0  ;;  %v4333_v25 = vsel %vm4327_vm5, %v4320_v9, 920167782  ;;  %v4337_v17 = vsel %vm4327_vm5, %v4323_v20, 1326507024  ;;  %v12330_v7 = vshrl.u32 %v4512_v35, 5 }
 0x5e8   : > { %v4334_v28 = vsel %vm4326_vm13, %v4317_v57, %v4333_v25  ;;  %v4338_v47 = vsel %vm4326_vm13, %v4320_v9, %v4337_v17  ;;  %v4331_v26 = vsel %vm4325_vm3, %v4328_v49, %v4330_v18  ;;  %v4514_v60 = vand.u32 31, %v4512_v35 }
 0x5e9   : > { %v4335_v12 = vsel %vm4325_vm3, %v4332_v13, %v4334_v28  ;;  %v4339_v24 = vsel %vm4325_vm3, %v4336_v36, %v4338_v47  ;;  %v4404_v42 = vor.u32 8388608, %v12315_v14  ;;  %v4347_v41 = vmul.u32 %v12311_v44, %v4331_v26 }
 0x5ea   : > { %v12333_v15 = vmul.u32.u64.low %v12311_v44, %v4339_v24  ;;  %v12334_v11 = vmul.u32.u64.high %v12311_v44, %v4339_v24, %v12333_v15  ;;  %v12337_v37 = vmul.u32.u64.low %v12311_v44, %v4335_v12  ;;  %v12338_v62 = vmul.u32.u64.high %v12311_v44, %v4335_v12, %v12337_v37 }
 0x5eb   : > { %v12343_v39 = vshll.u32 %v4508_v29, 8  ;;  %v12345_v19 = vshrl.u32 %v4408_v1, 5  ;;  %v12349_v55 = vadd.f32 %v12300_v59, %v12280_v50  ;;  %v4515_v30 = vsub.s32 32, %v4514_v60  ;;  %v12391_v15 = vpop.f32.mrb[20].mxu1 }
 0x5ec   : > { %v4517_v27 = vshll.u32 %v15607_v4, %v4514_v60  ;;  %vm4532_vm15 = vcmp.lt.s32.totalorder %v12330_v7, 1  ;;  %v12353_v33 = vand.u32 31, %v4408_v1  ;;  %vm4349_vm4 = vc.u32 %v12334_v11, %v12337_v37 }
 0x5ed   : > { %v4350_v44 = vadd.s32 1, %v12338_v62  ;;  %v4520_v14 = vshll.u32 %v15612_v5, %v4514_v60  ;;  %v4523_v29 = vshll.u32 %v15613_v21, %v4514_v60  ;;  %v4518_v32 = vshrl.u32 %v15612_v5, %v4515_v30 }
 0x5ee   : > { %v4521_v50 = vshrl.u32 %v15613_v21, %v4515_v30  ;;  %v4524_v59 = vshrl.u32 %v15599_v52, %v4515_v30  ;;  %v4526_v54 = vshll.u32 %v15599_v52, %v4514_v60  ;;  %v4527_v6 = vshrl.u32 %v15600_v23, %v4515_v30 }
 0x5ef   : > { %v4351_v1 = vsel %vm4349_vm4, %v4350_v44, %v12338_v62  ;;  %v4529_v10 = vshll.u32 %v15600_v23, %v4514_v60  ;;  %v4530_v61 = vshrl.u32 %v15601_v16, %v4515_v30  ;;  %v4519_v2 = vor.u32 %v4518_v32, %v4517_v27 }
 0x5f0   : > { %v4352_v45 = vadd.s32 %v4351_v1, %v4347_v41  ;;  %v4522_v22 = vor.u32 %v4521_v50, %v4520_v14  ;;  %v4525_v63 = vor.u32 %v4524_v59, %v4523_v29  ;;  %v4528_v57 = vor.u32 %v4527_v6, %v4526_v54 }
 0x5f1   : > { %v4531_v31 = vor.u32 %v4530_v61, %v4529_v10  ;;  %vm4534_vm10 = vcmp.lt.s32.totalorder %v12330_v7, 3  ;;  %vm4535_vm14 = vcmp.lt.s32.totalorder %v12330_v7, 4  ;;  %v4516_v20 = vshrl.u32 %v15607_v4, %v4515_v30 }
 0x5f2   : > { %v4353_v9 = vadd.s32 536870912, %v4352_v45  ;;  %v4540_v49 = vsel %vm4532_vm15, %v4519_v2, %v4522_v22  ;;  %v4411_v0 = vsub.s32 32, %v12353_v33  ;;  %v4537_v13 = vsel %vm4535_vm14, %v4525_v63, 2102212464 }
 0x5f3   : > { %v4541_v36 = vsel %vm4535_vm14, %v4528_v57, 920167782  ;;  %v4544_v18 = vsel %vm4532_vm15, %v4522_v22, %v4525_v63  ;;  %v4545_v25 = vsel %vm4535_vm14, %v4531_v31, 1326507024  ;;  %vm4533_vm6 = vcmp.lt.s32.totalorder %v12330_v7, 2 }
 0x5f4   : > { %v12376_v17 = vshrl.u32 %v4353_v9, 30  ;;  %v4542_v28 = vsel %vm4534_vm10, %v4525_v63, %v4541_v36  ;;  %v4546_v47 = vsel %vm4534_vm10, %v4528_v57, %v4545_v25  ;;  %v4536_v35 = vsel %vm4532_vm15, %v4516_v20, %v4519_v2 }
 0x5f5   : > { %v4543_v26 = vsel %vm4533_vm6, %v4540_v49, %v4542_v28  ;;  %v4547_v12 = vsel %vm4533_vm6, %v4544_v18, %v4546_v47  ;;  %v12389_v24 = vshll.u32 %v4404_v42, 8  ;;  %v4538_v60 = vsel %vm4534_vm10, %v4522_v22, %v4537_v13 }
 0x5f6   : > { %v4355_v62 = vshll.u32 %v12376_v17, 30  ;;  %v12397_v41 = vmul.u32.u64.low %v12343_v39, %v4547_v12  ;;  %v12398_v30 = vmul.u32.u64.high %v12343_v39, %v4547_v12, %v12397_v41  ;;  %v4414_v14 = vshrl.u32 %v15612_v5, %v4411_v0 }
 0x5f7   : > { %v12401_v27 = vmul.u32.u64.low %v12343_v39, %v4543_v26  ;;  %v12402_v44 = vmul.u32.u64.high %v12343_v39, %v4543_v26, %v12401_v27  ;;  %v4607_v42 = vand.u32 2139095040, %v12349_v55  ;;  %v4413_v32 = vshll.u32 %v15607_v4, %v12353_v33 }
 0x5f8   : > { %v12407_v29 = vsub.s32 %v4352_v45, %v4355_v62  ;;  %v4417_v50 = vshrl.u32 %v15613_v21, %v4411_v0  ;;  %vm4428_vm9 = vcmp.lt.s32.totalorder %v12345_v19, 1  ;;  %v4539_v59 = vsel %vm4533_vm6, %v4536_v35, %v4538_v60 }
 0x5f9   : > { %v4416_v54 = vshll.u32 %v15612_v5, %v12353_v33  ;;  %v4419_v1 = vshll.u32 %v15613_v21, %v12353_v33  ;;  %v4420_v6 = vshrl.u32 %v15599_v52, %v4411_v0  ;;  %vm4557_vm11 = vc.u32 %v12398_v30, %v12401_v27 }
 0x5fa   : > { %v4358_v10 = vsub.s32 0, %v12407_v29  ;;  %v4415_v61 = vor.u32 %v4414_v14, %v4413_v32  ;;  %v4422_v45 = vshll.u32 %v15599_v52, %v12353_v33  ;;  %v4558_v7 = vadd.s32 1, %v12402_v44 }
 0x5fb   : > { %v4418_v2 = vor.u32 %v4417_v50, %v4416_v54  ;;  %v4421_v22 = vor.u32 %v4420_v6, %v4419_v1  ;;  %v4423_v63 = vshrl.u32 %v15600_v23, %v4411_v0  ;;  %v4555_v31 = vmul.u32 %v12343_v39, %v4539_v59 }
 0x5fc   : > { %v8272_v57 = vmin.u32 %v4358_v10, %v12407_v29  ;;  %v4425_v9 = vshll.u32 %v15600_v23, %v12353_v33  ;;  %v4426_v20 = vshrl.u32 %v15601_v16, %v4411_v0  ;;  %v4559_v49 = vsel %vm4557_vm11, %v4558_v7, %v12402_v44  ;;  %v12454_v10 = vpop.permute.xlu1 %4089 }
 0x5fd   : > { %v4412_v13 = vshrl.u32 %v15607_v4, %v4411_v0  ;;  %v4424_v36 = vor.u32 %v4423_v63, %v4422_v45  ;;  %vm4429_vm12 = vcmp.lt.s32.totalorder %v12345_v19, 2  ;;  %v4560_v25 = vadd.s32 %v4559_v49, %v4555_v31 }
 0x5fe   : > { %v4360_v18 = vclz %v8272_v57  ;;  %v4427_v28 = vor.u32 %v4426_v20, %v4425_v9  ;;  %vm4431_vm8 = vcmp.lt.s32.totalorder %v12345_v19, 4  ;;  %vm4430_vm0 = vcmp.lt.s32.totalorder %v12345_v19, 3 }
 0x5ff   : > { %v4433_v39 = vsel %vm4431_vm8, %v4421_v22, 2102212464  ;;  %v4436_v33 = vsel %vm4428_vm9, %v4415_v61, %v4418_v2  ;;  %v4437_v47 = vsel %vm4431_vm8, %v4424_v36, 920167782  ;;  %v4561_v26 = vadd.s32 536870912, %v4560_v25 }
 0x600   : > { %v8273_v35 = vadd.s32 4294967294, %v4360_v18  ;;  %v4438_v12 = vsel %vm4430_vm0, %v4421_v22, %v4437_v47  ;;  %v4440_v0 = vsel %vm4428_vm9, %v4418_v2, %v4421_v22  ;;  %v4432_v62 = vsel %vm4428_vm9, %v4412_v13, %v4415_v61 }
 0x601   : > { %v4439_v60 = vsel %vm4429_vm12, %v4436_v33, %v4438_v12  ;;  %v4441_v41 = vsel %vm4431_vm8, %v4427_v28, 1326507024  ;;  %v4608_v44 = vshrl.u32 %v4607_v42, 23  ;;  %v12445_v14 = vshrl.u32 %v4561_v26, 30  ;;  %v12482_v33 = vpop.f32.mrb[21].mxu0 }
 0x602   : > { %vm8274_vm2 = vcmp.lt.s32.totalorder %v8273_v35, 0  ;;  %v4434_v32 = vsel %vm4430_vm0, %v4418_v2, %v4433_v39  ;;  %v4442_v50 = vsel %vm4430_vm0, %v4424_v36, %v4441_v41  ;;  %v12463_v22 = vadd.f32 %v12291_v46, %v12454_v10 }
 0x603   : > { %v4363_v59 = vsel %vm8274_vm2, 0, %v8273_v35  ;;  %v4443_v54 = vsel %vm4429_vm12, %v4440_v0, %v4442_v50  ;;  %v12450_v1 = vmul.u32.u64.low %v12389_v24, %v4439_v60  ;;  %v12451_v6 = vmul.u32.u64.high %v12389_v24, %v4439_v60, %v12450_v1 }
 0x604   : > { %v4368_v61 = vsub.s32 4294967266, %v4363_v59  ;;  %v4563_v45 = vshll.u32 %v12445_v14, 30  ;;  %v12458_v42 = vmul.u32.u64.low %v12389_v24, %v4443_v54  ;;  %v12459_v7 = vmul.u32.u64.high %v12389_v24, %v4443_v54, %v12458_v42  ;;  %15853 = vst [vmem:[#allocation26_spill] sm:$0xff] %v12463_v22 }
 0x605   : > { %v8283_v2 = vadd.s32 4294967169, %v4608_v44  ;;  %v4435_v57 = vsel %vm4429_vm12, %v4432_v62, %v4434_v32  ;;  %v15474_v31 = vand.u32 2147483647, %v12349_v55  ;;  %v4454_v9 = vadd.s32 1, %v12451_v6 }
 0x606   : > { %v12465_v63 = vsub.s32 %v4560_v25, %v4563_v45  ;;  %v4364_v49 = vsub.s32 32, %v4363_v59  ;;  %v4369_v13 = vadd.s32 127, %v4368_v61  ;;  %v4451_v18 = vmul.u32 %v12389_v24, %v4435_v57 }
 0x607   : > { %v4614_v20 = vadd.s32 1, %v8283_v2  ;;  %vm4453_vm1 = vc.u32 %v12459_v7, %v12450_v1  ;;  %v4711_v46 = vand.u32 2139095040, %v12463_v22  ;;  %v4348_v19 = vadd.s32 %v12337_v37, %v12334_v11 }
 0x608   : > { %v4566_v36 = vsub.s32 0, %v12465_v63  ;;  %v4455_v28 = vsel %vm4453_vm1, %v4454_v9, %v12451_v6  ;;  %v4611_v39 = vand.u32 8388607, %v15474_v31  ;;  %v4370_v26 = vshll.u32 %v4369_v13, 23 }
 0x609   : > { %vm4615_vm13 = vcmp.gt.s32.totalorder %v4614_v20, 0  ;;  %v4456_v47 = vadd.s32 %v4455_v28, %v4451_v18  ;;  %v4366_v35 = vshrl.u32 %v4348_v19, %v4364_v49  ;;  %v4365_v62 = vshll.u32 %v12407_v29, %v4363_v59 }
 0x60a   : > { %v8280_v25 = vmin.u32 %v4566_v36, %v12465_v63  ;;  %v4616_v24 = vsel %vm4615_vm13, %v4614_v20, 0  ;;  %v4612_v11 = vor.u32 8388608, %v4611_v39  ;;  %v4712_v44 = vshrl.u32 %v4711_v46, 23 }
 0x60b   : > { %v4618_v0 = vand.u32 31, %v4616_v24  ;;  %v4457_v60 = vadd.s32 536870912, %v4456_v47  ;;  %v4556_v32 = vadd.s32 %v12401_v27, %v12398_v30  ;;  %v12489_v54 = vor.u32 %v4366_v35, %v4365_v62 }
 0x60c   : > { %v4568_v12 = vclz %v8280_v25  ;;  %v12491_v6 = vor.u32 4788187, %v4370_v26  ;;  %v12498_v30 = vshll.u32 %v4612_v11, 8  ;;  %v8287_v27 = vadd.s32 4294967169, %v4712_v44 }
 0x60d   : > { %v4619_v37 = vsub.s32 32, %v4618_v0  ;;  %v12487_v50 = vshrl.u32 %v4457_v60, 30  ;;  %v4621_v57 = vshll.u32 %v15607_v4, %v4618_v0  ;;  %v4617_v20 = vshrl.u32 %v4616_v24, 5 }
 0x60e   : > { %v8281_v41 = vadd.s32 4294967294, %v4568_v12  ;;  %v4624_v49 = vshll.u32 %v15612_v5, %v4618_v0  ;;  %v4627_v13 = vshll.u32 %v15613_v21, %v4618_v0  ;;  %v4630_v19 = vshll.u32 %v15599_v52, %v4618_v0 }
 0x60f   : > { %v4622_v61 = vshrl.u32 %v15612_v5, %v4619_v37  ;;  %v4459_v29 = vshll.u32 %v12487_v50, 30  ;;  %v4625_v59 = vshrl.u32 %v15613_v21, %v4619_v37  ;;  %v4628_v42 = vshrl.u32 %v15599_v52, %v4619_v37 }
 0x610   : > { %vm8282_vm5 = vcmp.lt.s32.totalorder %v8281_v41, 0  ;;  %v4631_v35 = vshrl.u32 %v15600_v23, %v4619_v37  ;;  %v4372_v26 = vand.u32 2147483647, %v12491_v6  ;;  %v4634_v24 = vshrl.u32 %v15601_v16, %v4619_v37 }
 0x611   : > { %v4571_v45 = vsel %vm8282_vm5, 0, %v8281_v41  ;;  %v12500_v9 = vsub.s32 %v4456_v47, %v4459_v29  ;;  %v4623_v46 = vor.u32 %v4622_v61, %v4621_v57  ;;  %v4626_v28 = vor.u32 %v4625_v59, %v4624_v49 }
 0x612   : > { %v4576_v2 = vsub.s32 4294967266, %v4571_v45  ;;  %v4572_v36 = vsub.s32 32, %v4571_v45  ;;  %v4629_v39 = vor.u32 %v4628_v42, %v4627_v13  ;;  %v4633_v47 = vshll.u32 %v15600_v23, %v4618_v0 }
 0x613   : > { %v4462_v25 = vsub.s32 0, %v12500_v9  ;;  %v4718_v12 = vadd.s32 1, %v8287_v27  ;;  %v4620_v41 = vshrl.u32 %v15607_v4, %v4619_v37  ;;  %v4632_v11 = vor.u32 %v4631_v35, %v4630_v19 }
 0x614   : > { %v4577_v18 = vadd.s32 127, %v4576_v2  ;;  %v4573_v44 = vshll.u32 %v12465_v63, %v4571_v45  ;;  %v4635_v61 = vor.u32 %v4634_v24, %v4633_v47  ;;  %vm4636_vm7 = vcmp.lt.s32.totalorder %v4617_v20, 1 }
 0x615   : > { %v8276_v60 = vmin.u32 %v4462_v25, %v12500_v9  ;;  %vm4639_vm3 = vcmp.lt.s32.totalorder %v4617_v20, 4  ;;  %v4574_v29 = vshrl.u32 %v4556_v32, %v4572_v36  ;;  %v4644_v6 = vsel %vm4636_vm7, %v4623_v46, %v4626_v28 }
 0x616   : > { %v4578_v62 = vshll.u32 %v4577_v18, 23  ;;  %v4641_v42 = vsel %vm4639_vm3, %v4629_v39, 2102212464  ;;  %vm4637_vm15 = vcmp.lt.s32.totalorder %v4617_v20, 2  ;;  %vm4638_vm4 = vcmp.lt.s32.totalorder %v4617_v20, 3 }
 0x617   : > { %v4464_v59 = vclz %v8276_v60  ;;  %v4645_v0 = vsel %vm4639_vm3, %v4632_v11, 920167782  ;;  %v4648_v2 = vsel %vm4636_vm7, %v4626_v28, %v4629_v39  ;;  %v4649_v13 = vsel %vm4639_vm3, %v4635_v61, 1326507024 }
 0x618   : > { %v4579_v57 = vor.u32 4788187, %v4578_v62  ;;  %v4646_v49 = vsel %vm4638_vm4, %v4629_v39, %v4645_v0  ;;  %v4640_v18 = vsel %vm4636_vm7, %v4620_v41, %v4623_v46  ;;  %v4642_v37 = vsel %vm4638_vm4, %v4626_v28, %v4641_v42 }
 0x619   : > { %v8277_v27 = vadd.s32 4294967294, %v4464_v59  ;;  %v4647_v19 = vsel %vm4637_vm15, %v4644_v6, %v4646_v49  ;;  %v4650_v63 = vsel %vm4638_vm4, %v4632_v11, %v4649_v13  ;;  %v15473_v39 = vand.u32 2147483647, %v12463_v22 }
 0x61a   : > { %v4651_v45 = vsel %vm4637_vm15, %v4648_v2, %v4650_v63  ;;  %v12516_v32 = vmul.u32.u64.low %v12498_v30, %v4647_v19  ;;  %v12517_v36 = vmul.u32.u64.high %v12498_v30, %v4647_v19, %v12516_v32  ;;  %v4374_v46 = vcvt.s32.f32 %v12489_v54 }
 0x61b   : > { %vm8278_vm10 = vcmp.lt.s32.totalorder %v8277_v27, 0  ;;  %v12521_v25 = vmul.u32.u64.low %v12498_v30, %v4651_v45  ;;  %v12522_v35 = vmul.u32.u64.high %v12498_v30, %v4651_v45, %v12521_v25  ;;  %v4575_v28 = vor.u32 %v4574_v29, %v4573_v44  ;;  %v12537_v44 = vpop.f32.mrb[21].mxu1 }
 0x61c   : > { %v4643_v47 = vsel %vm4637_vm15, %v4640_v18, %v4642_v37  ;;  %v12527_v24 = vsel %vm8278_vm10, 0, %v8277_v27  ;;  %vm4719_vm14 = vcmp.gt.s32.totalorder %v4718_v12, 0  ;;  %v12529_v62 = vmul.f32 %v4374_v46, %v4372_v26 }
 0x61d   : > { %v4580_v60 = vand.u32 2147483647, %v4579_v57  ;;  %v4662_v41 = vadd.s32 1, %v12517_v36  ;;  %v4659_v11 = vmul.u32 %v12498_v30, %v4643_v47  ;;  %vm4661_vm6 = vc.u32 %v12522_v35, %v12516_v32 }
 0x61e   : > { %v4715_v61 = vand.u32 8388607, %v15473_v39  ;;  %v4720_v54 = vsel %vm4719_vm14, %v4718_v12, 0  ;;  %v4582_v20 = vcvt.s32.f32 %v4575_v28  ;;  %v4472_v29 = vsub.s32 4294967266, %v12527_v24 }
 0x61f   : > { %v4663_v26 = vsel %vm4661_vm6, %v4662_v41, %v12517_v36  ;;  %v4378_v59 = vsub.s32 4, %v12376_v17  ;;  %v4452_v42 = vadd.s32 %v12450_v1, %v12459_v7  ;;  %v4722_v6 = vand.u32 31, %v4720_v54 }
 0x620   : > { %v4664_v30 = vadd.s32 %v4663_v26, %v4659_v11  ;;  %v4376_v0 = vxor.u32 2147483648, %v12529_v62  ;;  %v12545_v2 = vmul.f32 %v4582_v20, %v4580_v60  ;;  %v4468_v12 = vsub.s32 32, %v12527_v24 }
 0x621   : > { %v12550_v57 = vadd.f32 %v12305_v8, %v12454_v10  ;;  %v4469_v27 = vshll.u32 %v12500_v9, %v12527_v24  ;;  %v4716_v13 = vor.u32 8388608, %v4715_v61  ;;  %v4723_v18 = vsub.s32 32, %v4722_v6 }
 0x622   : > { %v4665_v49 = vadd.s32 536870912, %v4664_v30  ;;  %v4473_v37 = vadd.s32 127, %v4472_v29  ;;  %v4721_v1 = vshrl.u32 %v4720_v54, 5  ;;  %v4725_v7 = vshll.u32 %v15607_v4, %v4722_v6 }
 0x623   : > { %15854 = vst [vmem:[#allocation19_spill] sm:$0xff] %v12550_v57  ;;  %v4728_v19 = vshll.u32 %v15612_v5, %v4722_v6  ;;  %v4726_v45 = vshrl.u32 %v15612_v5, %v4723_v18  ;;  %v4729_v36 = vshrl.u32 %v15613_v21, %v4723_v18  ;;  %v4731_v8 = vshll.u32 %v15613_v21, %v4722_v6 }
 0x624   : > { %v12556_v63 = vshrl.u32 %v4665_v49, 30  ;;  %v4732_v25 = vshrl.u32 %v15599_v52, %v4723_v18  ;;  %v4734_v9 = vshll.u32 %v15599_v52, %v4722_v6  ;;  %v4735_v46 = vshrl.u32 %v15600_v23, %v4723_v18 }
 0x625   : > { %v4738_v28 = vshrl.u32 %v15601_v16, %v4723_v18  ;;  %v4727_v24 = vor.u32 %v4726_v45, %v4725_v7  ;;  %v4730_v60 = vor.u32 %v4729_v36, %v4728_v19  ;;  %v4737_v41 = vshll.u32 %v15600_v23, %v4722_v6 }
 0x626   : > { %15855 = vst [vmem:[#allocation21_spill] sm:$0xff] %v12556_v63  ;;  %v4667_v47 = vshll.u32 %v12556_v63, 30  ;;  %vm4294_vm9 = vcmp.lt.s32.totalorder %v12283_v53, 0  ;;  %v4470_v11 = vshrl.u32 %v4452_v42, %v4468_v12  ;;  %v4474_v61 = vshll.u32 %v4473_v37, 23 }
 0x627   : > { %v4733_v54 = vor.u32 %v4732_v25, %v4731_v8  ;;  %v4736_v20 = vor.u32 %v4735_v46, %v4734_v9  ;;  %v4739_v26 = vor.u32 %v4738_v28, %v4737_v41  ;;  %vm4740_vm11 = vcmp.lt.s32.totalorder %v4721_v1, 1 }
 0x628   : > { %v12568_v29 = vsub.s32 %v4664_v30, %v4667_v47  ;;  %v4756_v49 = vshll.u32 %v4716_v13, 8  ;;  %v4724_v39 = vshrl.u32 %v15607_v4, %v4723_v18  ;;  %vm4743_vm12 = vcmp.lt.s32.totalorder %v4721_v1, 4 }
 0x629   : > { %v4748_v31 = vsel %vm4740_vm11, %v4727_v24, %v4730_v60  ;;  %v4919_v7 = vand.u32 2139095040, %v12550_v57  ;;  %vm12575_vm8 = vcmp.le.f32.partialorder %v4292_v34, 0.7853982  ;;  %vm4742_vm0 = vcmp.lt.s32.totalorder %v4721_v1, 3 }
 0x62a   : > { %v4670_v42 = vsub.s32 0, %v12568_v29  ;;  %v4745_v30 = vsel %vm4743_vm12, %v4733_v54, 2102212464  ;;  %v4749_v12 = vsel %vm4743_vm12, %v4736_v20, 920167782  ;;  %vm4741_vm2 = vcmp.lt.s32.totalorder %v4721_v1, 2 }
 0x62b   : > { %v4475_v37 = vor.u32 4788187, %v4474_v61  ;;  %v4750_v13 = vsel %vm4742_vm0, %v4733_v54, %v4749_v12  ;;  %v4752_v18 = vsel %vm4740_vm11, %v4730_v60, %v4733_v54  ;;  %v4744_v45 = vsel %vm4740_vm11, %v4724_v39, %v4727_v24  ;;  %v12622_v12 = vpop.f32.mrb[22].mxu0 }
 0x62c   : > { %v8284_v19 = vmin.u32 %v4670_v42, %v12568_v29  ;;  %v4751_v36 = vsel %vm4741_vm2, %v4748_v31, %v4750_v13  ;;  %v4753_v34 = vsel %vm4743_vm12, %v4739_v26, 1326507024  ;;  %v4746_v8 = vsel %vm4742_vm0, %v4730_v60, %v4745_v30 }
 0x62d   : > { %v4754_v25 = vsel %vm4742_vm0, %v4736_v20, %v4753_v34  ;;  %v12584_v9 = vmul.u32.u64.low %v4756_v49, %v4751_v36  ;;  %v12585_v46 = vmul.u32.u64.high %v4756_v49, %v4751_v36, %v12584_v9  ;;  %v4920_v41 = vshrl.u32 %v4919_v7, 23 }
 0x62e   : > { %v4672_v28 = vclz %v8284_v19  ;;  %v4755_v47 = vsel %vm4741_vm2, %v4752_v18, %v4754_v25  ;;  %v12591_v61 = vadd.f32 %v12293_v3, %v12454_v10  ;;  %vm4502_vm1 = vcmp.lt.s32.totalorder %v12298_v43, 0 }
 0x62f   : > { %v4471_v39 = vor.u32 %v4470_v11, %v4469_v27  ;;  %v12594_v24 = vmul.u32.u64.low %v4756_v49, %v4755_v47  ;;  %v12595_v31 = vmul.u32.u64.high %v4756_v49, %v4755_v47, %v12594_v24  ;;  %v4379_v60 = vsel %vm4294_vm9, %v4378_v59, %v12376_v17 }
 0x630   : > { %v8285_v54 = vadd.s32 4294967294, %v4672_v28  ;;  %v4747_v20 = vsel %vm4741_vm2, %v4744_v45, %v4746_v8  ;;  %v8295_v26 = vadd.s32 4294967169, %v4920_v41  ;;  %v4377_v3 = vsel %vm4294_vm9, %v4376_v0, %v12529_v62 }
 0x631   : > { %v4584_v27 = vxor.u32 2147483648, %v12545_v2  ;;  %v4476_v11 = vand.u32 2147483647, %v4475_v37  ;;  %v4766_v7 = vadd.s32 1, %v12585_v46  ;;  %vm12612_vm13 = vcmp.le.f32.partialorder %v4500_v38, 0.7853982 }
 0x632   : > { %v15476_v17 = vand.u32 2147483647, %v12550_v57  ;;  %v4926_v59 = vadd.s32 1, %v8295_v26  ;;  %v4815_v1 = vand.u32 2139095040, %v12591_v61  ;;  %v4381_v30 = vsel %vm12575_vm8, 0, %v4379_v60 }
 0x633   : > { %v4478_v62 = vcvt.s32.f32 %v4471_v39  ;;  %v4763_v0 = vmul.u32 %v4756_v49, %v4747_v20  ;;  %vm4765_vm5 = vc.u32 %v12595_v31, %v12584_v9  ;;  %v4380_v38 = vsel %vm12575_vm8, %v12283_v53, %v4377_v3 }
 0x634   : > { %v4586_v37 = vsub.s32 4, %v12445_v14  ;;  %vm4398_vm7 = vcmp.lt.s32.totalorder %v12286_v48, 0  ;;  %vm8286_vm3 = vcmp.lt.s32.totalorder %v8285_v54, 0  ;;  %v4767_v13 = vsel %vm4765_vm5, %v4766_v7, %v12585_v46 }
 0x635   : > { %v4585_v49 = vsel %vm4502_vm1, %v4584_v27, %v12545_v2  ;;  %v4479_v18 = vmul.f32 %v4478_v62, %v4476_v11  ;;  %v4768_v19 = vadd.s32 %v4767_v13, %v4763_v0  ;;  %vm4927_vm15 = vcmp.gt.s32.totalorder %v4926_v59, 0 }
 0x636   : > { %v4923_v45 = vand.u32 8388607, %v15476_v17  ;;  %v4928_v36 = vsel %vm4927_vm15, %v4926_v59, 0  ;;  %v15475_v6 = vand.u32 2147483647, %v12591_v61  ;;  %v4816_v34 = vshrl.u32 %v4815_v1, 23 }
 0x637   : > { %8921 = vcosq.f32 %v4380_v38  ;;  %v12636_v8 = vsel %vm8286_vm3, 0, %v8285_v54  ;;  %v4769_v25 = vadd.s32 536870912, %v4768_v19  ;;  %v4930_v28 = vand.u32 31, %v4928_v36 }
 0x638   : > { %8923 = vsinq.f32 %v4380_v38  ;;  %v12638_v46 = vadd.s32 3, %v4381_v30  ;;  %v12643_v2 = vsel %vm4502_vm1, %v4586_v37, %v12445_v14  ;;  %v12648_v47 = vsel %vm12612_vm13, %v12298_v43, %v4585_v49 }
 0x639   : > { %v4480_v41 = vxor.u32 2147483648, %v4479_v18  ;;  %v4660_v39 = vadd.s32 %v12516_v32, %v12522_v35  ;;  %v12652_v24 = vshrl.u32 %v4769_v25, 30  ;;  %v4931_v60 = vsub.s32 32, %v4930_v28 }
 0x63a   : > { %15860 = vst [vmem:[#allocation16_spill] sm:$0xff] %v12638_v46  ;;  %v4680_v54 = vsub.s32 4294967266, %v12636_v8  ;;  %v4924_v20 = vor.u32 8388608, %v4923_v45  ;;  %v8291_v26 = vadd.s32 4294967169, %v4816_v34  ;;  %v12657_v14 = vand.u32 8388607, %v15475_v6 }
 0x63b   : > { %v4771_v3 = vshll.u32 %v12652_v24, 30  ;;  %v4933_v27 = vshll.u32 %v15607_v4, %v4930_v28  ;;  %v4934_v11 = vshrl.u32 %v15612_v5, %v4931_v60  ;;  %v4936_v7 = vshll.u32 %v15612_v5, %v4930_v28 }
 0x63c   : > { %v4937_v32 = vshrl.u32 %v15613_v21, %v4931_v60  ;;  %v4939_v35 = vshll.u32 %v15613_v21, %v4930_v28  ;;  %v4940_v59 = vshrl.u32 %v15599_v52, %v4931_v60  ;;  %v4943_v1 = vshrl.u32 %v15600_v23, %v4931_v60 }
 0x63d   : > { %v4481_v30 = vsel %vm4398_vm7, %v4480_v41, %v4479_v18  ;;  %v12669_v62 = vsub.s32 %v4768_v19, %v4771_v3  ;;  %v4929_v0 = vshrl.u32 %v4928_v36, 5  ;;  %v4942_v38 = vshll.u32 %v15599_v52, %v4930_v28 }
 0x63e   : > { %v4935_v37 = vor.u32 %v4934_v11, %v4933_v27  ;;  %v4938_v13 = vor.u32 %v4937_v32, %v4936_v7  ;;  %v4941_v49 = vor.u32 %v4940_v59, %v4939_v35  ;;  %v12672_v45 = vshll.u32 %v4924_v20, 8 }
 0x63f   : > { %v4774_v34 = vsub.s32 0, %v12669_v62  ;;  %v4944_v25 = vor.u32 %v4943_v1, %v4942_v38  ;;  %v4945_v6 = vshll.u32 %v15600_v23, %v4930_v28  ;;  %v4946_v17 = vshrl.u32 %v15601_v16, %v4931_v60  ;;  %v12699_v38 = vpop.f32.mrb[22].mxu1 }
 0x640   : > { %v4676_v58 = vsub.s32 32, %v12636_v8  ;;  %v4681_v18 = vadd.s32 127, %v4680_v54  ;;  %v4820_v19 = vor.u32 8388608, %v12657_v14  ;;  %v4822_v36 = vadd.s32 1, %v8291_v26 }
 0x641   : > { %v12679_v41 = vpop.eup %8921  ;;  %v15862_v3 = vand.u32 2147483647, %v12286_v48  ;;  %v15863_v20 = vmov 0  ;;  %v8288_v27 = vmin.u32 %v4774_v34, %v12669_v62  ;;  %v4947_v11 = vor.u32 %v4946_v17, %v4945_v6 }
 0x642   : > { %15861 = vst [vmem:[#allocation7_spill] sm:$0xff] %v12679_v41  ;;  %vm4948_vm10 = vcmp.lt.s32.totalorder %v4929_v0, 1  ;;  %vm4951_vm14 = vcmp.lt.s32.totalorder %v4929_v0, 4  ;;  %v12688_v28 = vpop.eup %8923  ;;  %vm4950_vm6 = vcmp.lt.s32.totalorder %v4929_v0, 3  ;;  %v4932_v32 = vshrl.u32 %v15607_v4, %v4931_v60 }
 0x643   : > { %vm12683_vm4 = vcmp.le.f32.partialorder %v15862_v3, 0.7853982  ;;  %15866 = vst [vmem:[#allocation9_spill] sm:$0xff] %v12688_v28  ;;  %v4953_v54 = vsel %vm4951_vm14, %v4941_v49, 2102212464  ;;  %v4956_v26 = vsel %vm4948_vm10, %v4935_v37, %v4938_v13  ;;  %v4776_v7 = vclz %v8288_v27 }
 0x644   : > { %v15864_v20 = vsel %vm12683_vm4, 4294967295, %v15863_v20  ;;  %v4957_v14 = vsel %vm4951_vm14, %v4944_v25, 920167782  ;;  %vm4949_vm9 = vcmp.lt.s32.totalorder %v4929_v0, 2  ;;  %v4677_v17 = vshll.u32 %v12568_v29, %v12636_v8 }
 0x645   : > { %15865 = vst [vmem:[#allocation33_spill] sm:$0xff] %v15864_v20  ;;  %v4958_v35 = vsel %vm4950_vm6, %v4941_v49, %v4957_v14  ;;  %v4678_v6 = vshrl.u32 %v4660_v39, %v4676_v58  ;;  %v4960_v1 = vsel %vm4948_vm10, %v4938_v13, %v4941_v49  ;;  %v8289_v34 = vadd.s32 4294967294, %v4776_v7 }
 0x646   : > { %v4959_v59 = vsel %vm4949_vm9, %v4956_v26, %v4958_v35  ;;  %v4952_v3 = vsel %vm4948_vm10, %v4932_v32, %v4935_v37  ;;  %v4954_v27 = vsel %vm4950_vm6, %v4938_v13, %v4953_v54  ;;  %v4961_v60 = vsel %vm4951_vm14, %v4947_v11, 1326507024 }
 0x647   : > { %v4962_v56 = vsel %vm4950_vm6, %v4944_v25, %v4961_v60  ;;  %v12706_v14 = vmul.u32.u64.low %v12672_v45, %v4959_v59  ;;  %v12707_v43 = vmul.u32.u64.high %v12672_v45, %v4959_v59, %v12706_v14  ;;  %vm4823_vm11 = vcmp.gt.s32.totalorder %v4822_v36, 0 }
 0x648   : > { %v4682_v58 = vshll.u32 %v4681_v18, 23  ;;  %vm8290_vm12 = vcmp.lt.s32.totalorder %v8289_v34, 0  ;;  %v4963_v29 = vsel %vm4949_vm9, %v4960_v1, %v4962_v56  ;;  %v4824_v8 = vsel %vm4823_vm11, %v4822_v36, 0 }
 0x649   : > { %v4679_v39 = vor.u32 %v4678_v6, %v4677_v17  ;;  %v12711_v49 = vsel %vm8290_vm12, 0, %v8289_v34  ;;  %v12714_v37 = vmul.u32.u64.low %v12672_v45, %v4963_v29  ;;  %v12715_v13 = vmul.u32.u64.high %v12672_v45, %v4963_v29, %v12714_v37 }
 0x64a   : > { %8925 = vcosq.f32 %v12648_v47  ;;  %v4784_v25 = vsub.s32 4294967266, %v12711_v49  ;;  %v4955_v11 = vsel %vm4949_vm9, %v4952_v3, %v4954_v27  ;;  %v4826_v54 = vand.u32 31, %v4824_v8 }
 0x64b   : > { %v12723_v18 = vsel %vm12683_vm4, %v12286_v48, %v4481_v30  ;;  %v4764_v56 = vadd.s32 %v12584_v9, %v12595_v31  ;;  %v4974_v36 = vadd.s32 1, %v12707_v43  ;;  %v12730_v26 = vadd.f32 %v12309_v40, %v12454_v10 }
 0x64c   : > { %v4683_v7 = vor.u32 4788187, %v4682_v58  ;;  %v4785_v32 = vadd.s32 127, %v4784_v25  ;;  %v4827_v35 = vsub.s32 32, %v4826_v54  ;;  %v12732_v0 = vshll.u32 %v4820_v19, 8 }
 0x64d   : > { %v4686_v17 = vcvt.s32.f32 %v4679_v39  ;;  %v4971_v6 = vmul.u32 %v12672_v45, %v4955_v11  ;;  %vm4973_vm8 = vc.u32 %v12715_v13, %v12706_v14  ;;  %v12737_v30 = vshrl.u32 %v4824_v8, 5 }
 0x64e   : > { %v4975_v9 = vsel %vm4973_vm8, %v4974_v36, %v12707_v43  ;;  %v4829_v31 = vshll.u32 %v15607_v4, %v4826_v54  ;;  %v4832_v40 = vshll.u32 %v15612_v5, %v4826_v54  ;;  %v4835_v10 = vshll.u32 %v15613_v21, %v4826_v54 }
 0x64f   : > { %v4976_v59 = vadd.s32 %v4975_v9, %v4971_v6  ;;  %v4830_v19 = vshrl.u32 %v15612_v5, %v4827_v35  ;;  %v4833_v1 = vshrl.u32 %v15613_v21, %v4827_v35  ;;  %v4836_v45 = vshrl.u32 %v15599_v52, %v4827_v35 }
 0x650   : > { %v4780_v34 = vsub.s32 32, %v12711_v49  ;;  %v4786_v3 = vshll.u32 %v4785_v32, 23  ;;  %v4838_v27 = vshll.u32 %v15599_v52, %v4826_v54  ;;  %v4839_v43 = vshrl.u32 %v15600_v23, %v4827_v35 }
 0x651   : > { %v4977_v60 = vadd.s32 536870912, %v4976_v59  ;;  %v4831_v58 = vor.u32 %v4830_v19, %v4829_v31  ;;  %v4834_v29 = vor.u32 %v4833_v1, %v4832_v40  ;;  %v4837_v8 = vor.u32 %v4836_v45, %v4835_v10 }
 0x652   : > { %v4684_v39 = vand.u32 2147483647, %v4683_v7  ;;  %v4840_v37 = vor.u32 %v4839_v43, %v4838_v27  ;;  %v4841_v25 = vshll.u32 %v15600_v23, %v4826_v54  ;;  %v4842_v11 = vshrl.u32 %v15601_v16, %v4827_v35 }
 0x653   : > { %v12751_v36 = vshrl.u32 %v4977_v60, 30  ;;  %vm4844_vm0 = vcmp.lt.s32.totalorder %v12737_v30, 1  ;;  %vm4847_vm2 = vcmp.lt.s32.totalorder %v12737_v30, 4  ;;  %v5023_v32 = vand.u32 2139095040, %v12730_v26 }
 0x654   : > { %v12756_v6 = vpop.eup %8925  ;;  %v4782_v9 = vshrl.u32 %v4764_v56, %v4780_v34  ;;  %v4843_v31 = vor.u32 %v4842_v11, %v4841_v25  ;;  %vm4846_vm1 = vcmp.lt.s32.totalorder %v12737_v30, 3  ;;  %v4853_v7 = vsel %vm4847_vm2, %v4840_v37, 920167782 }
 0x655   : > { %15867 = vst [vmem:[#allocation10_spill] sm:$0xff] %v12756_v6  ;;  %v4787_v54 = vor.u32 4788187, %v4786_v3  ;;  %v4979_v40 = vshll.u32 %v12751_v36, 30  ;;  %v4852_v10 = vsel %vm4844_vm0, %v4831_v58, %v4834_v29  ;;  %v4854_v19 = vsel %vm4846_vm1, %v4837_v8, %v4853_v7 }
 0x656   : > { %v4687_v1 = vmul.f32 %v4686_v17, %v4684_v39  ;;  %v4781_v45 = vshll.u32 %v12669_v62, %v12711_v49  ;;  %vm4845_vm5 = vcmp.lt.s32.totalorder %v12737_v30, 2  ;;  %v4856_v56 = vsel %vm4844_vm0, %v4834_v29, %v4837_v8 }
 0x657   : > { %vm15517_vm3 = vcmp.lt.s32.totalorder %v12349_v55, 0  ;;  %vm4710_vm15 = vcmp.lt.s32.totalorder %v12463_v22, 0  ;;  %v12773_v34 = vsub.s32 %v4976_v59, %v4979_v40  ;;  %v4828_v3 = vshrl.u32 %v15607_v4, %v4827_v35 }
 0x658   : > { %v4849_v27 = vsel %vm4847_vm2, %v4837_v8, 2102212464  ;;  %v4857_v17 = vsel %vm4847_vm2, %v4843_v31, 1326507024  ;;  %v4783_v62 = vor.u32 %v4782_v9, %v4781_v45  ;;  %v4855_v49 = vsel %vm4845_vm5, %v4852_v10, %v4854_v19 }
 0x659   : > { %v4858_v43 = vsel %vm4846_vm1, %v4840_v37, %v4857_v17  ;;  %v5024_v60 = vshrl.u32 %v5023_v32, 23  ;;  %v4788_v39 = vand.u32 2147483647, %v4787_v54  ;;  %v4982_v59 = vsub.s32 0, %v12773_v34 }
 0x65a   : > { %v4848_v35 = vsel %vm4844_vm0, %v4828_v3, %v4831_v58  ;;  %v4859_v8 = vsel %vm4845_vm5, %v4856_v56, %v4858_v43  ;;  %v4850_v25 = vsel %vm4846_vm1, %v4834_v29, %v4849_v27  ;;  %v15480_v58 = vand.u32 2147483647, %v12730_v26 }
 0x65b   : > { %v12792_v11 = vmul.u32.u64.low %v12732_v0, %v4859_v8  ;;  %v12793_v9 = vmul.u32.u64.high %v12732_v0, %v4859_v8, %v12792_v11  ;;  %v8299_v31 = vadd.s32 4294967169, %v5024_v60  ;;  %v8296_v37 = vmin.u32 %v4982_v59, %v12773_v34 }
 0x65c   : > { %v12797_v32 = vmul.u32.u64.low %v12732_v0, %v4855_v49  ;;  %v12798_v7 = vmul.u32.u64.high %v12732_v0, %v4855_v49, %v12797_v32  ;;  %v4688_v54 = vxor.u32 2147483648, %v4687_v1  ;;  %v4790_v40 = vcvt.s32.f32 %v4783_v62 }
 0x65d   : > { %v4794_v10 = vsub.s32 4, %v12652_v24  ;;  %v5030_v19 = vadd.s32 1, %v8299_v31  ;;  %8927 = vsinq.f32 %v12648_v47  ;;  %v4984_v45 = vclz %v8296_v37  ;;  %v12817_v47 = vpop.f32.mrb[23].mxu0 }
 0x65e   : > { %v4851_v56 = vsel %vm4845_vm5, %v4848_v35, %v4850_v25  ;;  %8929 = vcosq.f32 %v12723_v18  ;;  %v12810_v3 = vmul.f32 %v4790_v40, %v4788_v39  ;;  %vm4869_vm10 = vc.u32 %v12793_v9, %v12797_v32  ;;  %v12833_v25 = vpop.permute.xlu0 %4094 }
 0x65f   : > { %vm5031_vm14 = vcmp.gt.s32.totalorder %v5030_v19, 0  ;;  %v8297_v27 = vadd.s32 4294967294, %v4984_v45  ;;  %v4870_v17 = vadd.s32 1, %v12798_v7  ;;  %v5027_v62 = vand.u32 8388607, %v15480_v58 }
 0x660   : > { %v5032_v49 = vsel %vm5031_vm14, %v5030_v19, 0  ;;  %v12821_v30 = vsel %vm15517_vm3, %v4688_v54, %v4687_v1  ;;  %v12826_v43 = vsel %vm4710_vm15, %v4794_v10, %v12652_v24  ;;  %v4867_v60 = vmul.u32 %v12732_v0, %v4851_v56 }
 0x661   : > { %v5034_v39 = vand.u32 31, %v5032_v49  ;;  %v4972_v59 = vadd.s32 %v12706_v14, %v12715_v13  ;;  %vm8298_vm6 = vcmp.lt.s32.totalorder %v8297_v27, 0  ;;  %v4871_v8 = vsel %vm4869_vm10, %v4870_v17, %v12798_v7 }
 0x662   : > { %v4987_v11 = vsel %vm8298_vm6, 0, %v8297_v27  ;;  %v4872_v31 = vadd.s32 %v4871_v8, %v4867_v60  ;;  %v5028_v54 = vor.u32 8388608, %v5027_v62  ;;  %v12839_v40 = vadd.f32 %v12325_v51, %v12833_v25 }
 0x663   : > { %v5035_v37 = vsub.s32 32, %v5034_v39  ;;  %v4992_v24 = vsub.s32 4294967266, %v4987_v11  ;;  %v5037_v0 = vshll.u32 %v15607_v4, %v5034_v39  ;;  %v5040_v7 = vshll.u32 %v15612_v5, %v5034_v39 }
 0x664   : > { %15868 = vst [vmem:[#allocation32_spill] sm:$0xff] %v12839_v40  ;;  %v4873_v14 = vadd.s32 536870912, %v4872_v31  ;;  %v5033_v45 = vshrl.u32 %v5032_v49, 5  ;;  %v5043_v56 = vshll.u32 %v15613_v21, %v5034_v39  ;;  %v4988_v17 = vsub.s32 32, %v4987_v11 }
 0x665   : > { %v5038_v13 = vshrl.u32 %v15612_v5, %v5035_v37  ;;  %v5041_v10 = vshrl.u32 %v15613_v21, %v5035_v37  ;;  %v4993_v19 = vadd.s32 127, %v4992_v24  ;;  %v5044_v27 = vshrl.u32 %v15599_v52, %v5035_v37 }
 0x666   : > { %v12846_v62 = vshrl.u32 %v4873_v14, 30  ;;  %v5046_v1 = vshll.u32 %v15599_v52, %v5034_v39  ;;  %v5047_v35 = vshrl.u32 %v15600_v23, %v5035_v37  ;;  %v15872_v49 = vand.u32 2147483647, %v12349_v55 }
 0x667   : > { %v5039_v60 = vor.u32 %v5038_v13, %v5037_v0  ;;  %v5042_v8 = vor.u32 %v5041_v10, %v5040_v7  ;;  %v12848_v51 = vpop.eup %8927  ;;  %v4994_v58 = vshll.u32 %v4993_v19, 23  ;;  %v5045_v29 = vor.u32 %v5044_v27, %v5043_v56 }
 0x668   : > { %15869 = vst [vmem:[#allocation25_spill] sm:$0xff] %v12846_v62  ;;  %15870 = vst [vmem:[#allocation29_spill] sm:$0xff] %v12848_v51  ;;  %v12852_v6 = vpop.eup %8929  ;;  %vm12856_vm9 = vcmp.le.f32.partialorder %v15872_v49, 0.7853982  ;;  %v15875_v14 = vand.u32 2147483647, %v12463_v22  ;;  %v5049_v7 = vshll.u32 %v15600_v23, %v5034_v39  ;;  %v5050_v10 = vshrl.u32 %v15601_v16, %v5035_v37 }
 0x669   : > { %15871 = vst [vmem:[#allocation28_spill] sm:$0xff] %v12852_v6  ;;  %v4875_v13 = vshll.u32 %v12846_v62, 30  ;;  %v5068_v19 = vshll.u32 %v5028_v54, 8  ;;  %vm4918_vm12 = vcmp.lt.s32.totalorder %v12550_v57, 0  ;;  %v4989_v56 = vshll.u32 %v12773_v34, %v4987_v11 }
 0x66a   : > { %vm12862_vm11 = vcmp.le.f32.partialorder %v15875_v14, 0.7853982  ;;  %v5036_v27 = vshrl.u32 %v15607_v4, %v5035_v37  ;;  %v5048_v49 = vor.u32 %v5047_v35, %v5046_v1  ;;  %v5127_v51 = vand.u32 2139095040, %v12839_v40 }
 0x66b   : > { %v12873_v14 = vsub.s32 %v4872_v31, %v4875_v13  ;;  %v5051_v53 = vor.u32 %v5050_v10, %v5049_v7  ;;  %vm5052_vm8 = vcmp.lt.s32.totalorder %v5033_v45, 1  ;;  %vm5055_vm0 = vcmp.lt.s32.totalorder %v5033_v45, 4 }
 0x66c   : > { %v4990_v41 = vshrl.u32 %v4972_v59, %v4988_v17  ;;  %v4995_v28 = vor.u32 4788187, %v4994_v58  ;;  %v5057_v39 = vsel %vm5055_vm0, %v5045_v29, 2102212464  ;;  %v5060_v46 = vsel %vm5052_vm8, %v5039_v60, %v5042_v8 }
 0x66d   : > { %v4878_v54 = vsub.s32 0, %v12873_v14  ;;  %vm5054_vm2 = vcmp.lt.s32.totalorder %v5033_v45, 3  ;;  %v5061_v63 = vsel %vm5055_vm0, %v5048_v49, 920167782  ;;  %v5064_v62 = vsel %vm5052_vm8, %v5042_v8, %v5045_v29 }
 0x66e   : > { %v15878_v34 = vand.u32 2147483647, %v12550_v57  ;;  %vm5053_vm5 = vcmp.lt.s32.totalorder %v5033_v45, 2  ;;  %v5056_v1 = vsel %vm5052_vm8, %v5036_v27, %v5039_v60  ;;  %v5062_v11 = vsel %vm5054_vm2, %v5045_v29, %v5061_v63  ;;  %v12892_v63 = vpop.f32.mrb[23].mxu1 }
 0x66f   : > { %v5065_v31 = vsel %vm5055_vm0, %v5051_v53, 1326507024  ;;  %v8292_v59 = vmin.u32 %v4878_v54, %v12873_v14  ;;  %v5058_v58 = vsel %vm5054_vm2, %v5042_v8, %v5057_v39  ;;  %v5063_v37 = vsel %vm5053_vm5, %v5060_v46, %v5062_v11 }
 0x670   : > { %vm12878_vm1 = vcmp.le.f32.partialorder %v15878_v34, 0.7853982  ;;  %v5066_v17 = vsel %vm5054_vm2, %v5048_v49, %v5065_v31  ;;  %v4991_v13 = vor.u32 %v4990_v41, %v4989_v56  ;;  %v5128_v60 = vshrl.u32 %v5127_v51, 23 }
 0x671   : > { %v5067_v7 = vsel %vm5053_vm5, %v5064_v62, %v5066_v17  ;;  %v12885_v10 = vmul.u32.u64.low %v5068_v19, %v5063_v37  ;;  %v12886_v6 = vmul.u32.u64.high %v5068_v19, %v5063_v37, %v12885_v10  ;;  %v4880_v34 = vclz %v8292_v59 }
 0x672   : > { %v12889_v20 = vmul.u32.u64.low %v5068_v19, %v5067_v7  ;;  %v12890_v48 = vmul.u32.u64.high %v5068_v19, %v5067_v7, %v12889_v20  ;;  %8931 = vsinq.f32 %v12723_v18  ;;  %v4692_v53 = vsel %vm12856_vm9, %v12349_v55, %v12821_v30 }
 0x673   : > { %v4797_v46 = vsel %vm12862_vm11, 0, %v12826_v43  ;;  %v5059_v41 = vsel %vm5053_vm5, %v5056_v1, %v5058_v58  ;;  %v4996_v29 = vand.u32 2147483647, %v4995_v28  ;;  %v15881_v20 = vsub.s32 4, %v12751_v36 }
 0x674   : > { %v8293_v8 = vadd.s32 4294967294, %v4880_v34  ;;  %v8303_v18 = vadd.s32 4294967169, %v5128_v60  ;;  %v15882_v51 = vxor.u32 2147483648, %v12810_v3  ;;  %v5078_v56 = vadd.s32 1, %v12886_v6 }
 0x675   : > { %v5003_v62 = vsel %vm4918_vm12, %v15881_v20, %v12751_v36  ;;  %v15495_v43 = vand.u32 2147483647, %v12839_v40  ;;  %v12917_v28 = vadd.f32 %v12391_v15, %v12833_v25  ;;  %v4998_v45 = vcvt.s32.f32 %v4991_v13 }
 0x676   : > { %v4793_v30 = vsel %vm4710_vm15, %v15882_v51, %v12810_v3  ;;  %vm8294_vm10 = vcmp.lt.s32.totalorder %v8293_v8, 0  ;;  %v5075_v27 = vmul.u32 %v5068_v19, %v5059_v41  ;;  %vm5077_vm14 = vc.u32 %v12890_v48, %v12885_v10 }
 0x677   : > { %15883 = vst [vmem:[#allocation13_spill] sm:$0xff] %v12917_v28  ;;  %8933 = vcosq.f32 %v4692_v53  ;;  %v12921_v36 = vsel %vm8294_vm10, 0, %v8293_v8  ;;  %v5079_v49 = vsel %vm5077_vm14, %v5078_v56, %v12886_v6  ;;  %v5134_v3 = vadd.s32 1, %v8303_v18 }
 0x678   : > { %v12927_v39 = vsel %vm12862_vm11, %v12463_v22, %v4793_v30  ;;  %v12929_v54 = vmul.f32 %v4998_v45, %v4996_v29  ;;  %v5005_v15 = vsel %vm12878_vm1, 0, %v5003_v62  ;;  %v5080_v19 = vadd.s32 %v5079_v49, %v5075_v27 }
 0x679   : > { %v4888_v1 = vsub.s32 4294967266, %v12921_v36  ;;  %v5131_v11 = vand.u32 8388607, %v15495_v43  ;;  %vm5135_vm15 = vcmp.gt.s32.totalorder %v5134_v3, 0  ;;  %v5335_v6 = vand.u32 2139095040, %v12917_v28 }
 0x67a   : > { %v15884_v0 = vsel %vm12612_vm13, 0, %v12643_v2  ;;  %8935 = vsinq.f32 %v4692_v53  ;;  %v5081_v59 = vadd.s32 536870912, %v5080_v19  ;;  %v5136_v58 = vsel %vm5135_vm15, %v5134_v3, 0 }
 0x67b   : > { %v12941_v31 = vadd.s32 3, %v15884_v0  ;;  %8937 = vcosq.f32 %v12927_v39  ;;  %v12944_v37 = vadd.s32 3, %v4797_v46  ;;  %v12946_v17 = vadd.s32 3, %v5005_v15 }
 0x67c   : > { %v5138_v13 = vand.u32 31, %v5136_v58  ;;  %v4868_v34 = vadd.s32 %v12797_v32, %v12793_v9  ;;  %v12951_v42 = vshrl.u32 %v5081_v59, 30  ;;  %v12954_v60 = vpop.eup %8931  ;;  %v4889_v53 = vadd.s32 127, %v4888_v1 }
 0x67d   : > { %15885 = vst [vmem:[#allocation12_spill] sm:$0xff] %v12941_v31  ;;  %15886 = vst [vmem:[#allocation17_spill] sm:$0xff] %v12944_v37  ;;  %v5132_v41 = vor.u32 8388608, %v5131_v11  ;;  %v5336_v20 = vshrl.u32 %v5335_v6, 23  ;;  %v5137_v62 = vshrl.u32 %v5136_v58, 5  ;;  %v4884_v0 = vsub.s32 32, %v12921_v36 }
 0x67e   : > { %15887 = vst [vmem:[#allocation34_spill] sm:$0xff] %v12946_v17  ;;  %15888 = vst [vmem:[#allocation8_spill] sm:$0xff] %v12951_v42  ;;  %v5139_v29 = vsub.s32 32, %v5138_v13  ;;  %v5083_v46 = vshll.u32 %v12951_v42, 30  ;;  %v5141_v8 = vshll.u32 %v15607_v4, %v5138_v13  ;;  %v5144_v18 = vshll.u32 %v15612_v5, %v5138_v13 }
 0x67f   : > { %v5147_v32 = vshll.u32 %v15613_v21, %v5138_v13  ;;  %v5150_v45 = vshll.u32 %v15599_v52, %v5138_v13  ;;  %v5153_v49 = vshll.u32 %v15600_v23, %v5138_v13  ;;  %v4890_v43 = vshll.u32 %v4889_v53, 23 }
 0x680   : > { %v5142_v51 = vshrl.u32 %v15612_v5, %v5139_v29  ;;  %v5145_v9 = vshrl.u32 %v15613_v21, %v5139_v29  ;;  %v5148_v30 = vshrl.u32 %v15599_v52, %v5139_v29  ;;  %v12963_v56 = vsub.s32 %v5080_v19, %v5083_v46 }
 0x681   : > { %v5151_v27 = vshrl.u32 %v15600_v23, %v5139_v29  ;;  %v12968_v3 = vpop.eup %8933  ;;  %v5154_v6 = vshrl.u32 %v15601_v16, %v5139_v29  ;;  %v5172_v19 = vshll.u32 %v5132_v41, 8  ;;  %v4885_v46 = vshll.u32 %v12873_v14, %v12921_v36 }
 0x682   : > { %v5143_v15 = vor.u32 %v5142_v51, %v5141_v8  ;;  %v5146_v1 = vor.u32 %v5145_v9, %v5144_v18  ;;  %v5149_v11 = vor.u32 %v5148_v30, %v5147_v32  ;;  %v5086_v59 = vsub.s32 0, %v12963_v56 }
 0x683   : > { %v5152_v58 = vor.u32 %v5151_v27, %v5150_v45  ;;  %v5155_v2 = vor.u32 %v5154_v6, %v5153_v49  ;;  %v8311_v7 = vadd.s32 4294967169, %v5336_v20  ;;  %v5140_v18 = vshrl.u32 %v15607_v4, %v5139_v29 }
 0x684   : > { %v12975_v13 = vpop.eup %8935  ;;  %v8300_v8 = vmin.u32 %v5086_v59, %v12963_v56  ;;  %vm5156_vm13 = vcmp.lt.s32.totalorder %v5137_v62, 1  ;;  %vm5159_vm6 = vcmp.lt.s32.totalorder %v5137_v62, 4  ;;  %vm5158_vm11 = vcmp.lt.s32.totalorder %v5137_v62, 3 }
 0x685   : > { %v12979_v51 = vpop.eup %8937  ;;  %v5161_v9 = vsel %vm5159_vm6, %v5149_v11, 2102212464  ;;  %v5164_v32 = vsel %vm5156_vm13, %v5143_v15, %v5146_v1  ;;  %v5165_v41 = vsel %vm5159_vm6, %v5152_v58, 920167782  ;;  %vm5157_vm8 = vcmp.lt.s32.totalorder %v5137_v62, 2 }
 0x686   : > { %15889 = vst [vmem:[#allocation11_spill] sm:$0xff] %v12979_v51  ;;  %v5088_v30 = vclz %v8300_v8  ;;  %v5166_v14 = vsel %vm5158_vm11, %v5149_v11, %v5165_v41  ;;  %v5168_v36 = vsel %vm5156_vm13, %v5146_v1, %v5149_v11  ;;  %v4886_v53 = vshrl.u32 %v4868_v34, %v4884_v0 }
 0x687   : > { %v5160_v20 = vsel %vm5156_vm13, %v5140_v18, %v5143_v15  ;;  %v5167_v45 = vsel %vm5157_vm8, %v5164_v32, %v5166_v14  ;;  %v5169_v27 = vsel %vm5159_vm6, %v5155_v2, 1326507024  ;;  %v5162_v6 = vsel %vm5158_vm11, %v5146_v1, %v5161_v9 }
 0x688   : > { %v8301_v49 = vadd.s32 4294967294, %v5088_v30  ;;  %v5170_v29 = vsel %vm5158_vm11, %v5152_v58, %v5169_v27  ;;  %v5342_v59 = vadd.s32 1, %v8311_v7  ;;  %v4891_v17 = vor.u32 4788187, %v4890_v43  ;;  %v13005_v58 = vpop.permute.xlu1 %4099 }
 0x689   : > { %v5171_v31 = vsel %vm5157_vm8, %v5168_v36, %v5170_v29  ;;  %v12983_v51 = vmul.u32.u64.low %v5172_v19, %v5167_v45  ;;  %v12984_v22 = vmul.u32.u64.high %v5172_v19, %v5167_v45, %v12983_v51  ;;  %v4887_v34 = vor.u32 %v4886_v53, %v4885_v46 }
 0x68a   : > { %vm8302_vm0 = vcmp.lt.s32.totalorder %v8301_v49, 0  ;;  %v12987_v8 = vmul.u32.u64.low %v5172_v19, %v5171_v31  ;;  %v12988_v41 = vmul.u32.u64.high %v5172_v19, %v5171_v31, %v12987_v8  ;;  %vm5343_vm2 = vcmp.gt.s32.totalorder %v5342_v59, 0 }
 0x68b   : > { %v12990_v15 = vsel %vm8302_vm0, 0, %v8301_v49  ;;  %v5163_v2 = vsel %vm5157_vm8, %v5160_v20, %v5162_v6  ;;  %v5344_v1 = vsel %vm5343_vm2, %v5342_v59, 0  ;;  %8939 = vsinq.f32 %v12927_v39 }
 0x68c   : > { %v15890_v43 = vxor.u32 2147483648, %v12929_v54  ;;  %v15891_v11 = vand.u32 2147483647, %v12917_v28  ;;  %v13003_v31 = vadd.f32 %v12482_v33, %v12833_v25  ;;  %v4892_v62 = vand.u32 2147483647, %v4891_v17 }
 0x68d   : > { %v5182_v46 = vadd.s32 1, %v12984_v22  ;;  %v5346_v18 = vand.u32 31, %v5344_v1  ;;  %v13010_v39 = vadd.f32 %v12537_v44, %v12833_v25  ;;  %v5096_v9 = vsub.s32 4294967266, %v12990_v15 }
 0x68e   : > { %v5001_v7 = vsel %vm4918_vm12, %v15890_v43, %v12929_v54  ;;  %v5339_v0 = vand.u32 8388607, %v15891_v11  ;;  %v5179_v54 = vmul.u32 %v5172_v19, %v5163_v2  ;;  %vm5181_vm12 = vc.u32 %v12988_v41, %v12983_v51 }
 0x68f   : > { %v13017_v33 = vadd.f32 %v12622_v12, %v13005_v58  ;;  %v13022_v17 = vsel %vm12878_vm1, %v12550_v57, %v5001_v7  ;;  %v4894_v32 = vcvt.s32.f32 %v4887_v34  ;;  %v5183_v30 = vsel %vm5181_vm12, %v5182_v46, %v12984_v22 }
 0x690   : > { %v5347_v44 = vsub.s32 32, %v5346_v18  ;;  %v5076_v25 = vadd.s32 %v12885_v10, %v12890_v48  ;;  %v5184_v19 = vadd.s32 %v5183_v30, %v5179_v54  ;;  %v5340_v14 = vor.u32 8388608, %v5339_v0 }
 0x691   : > { %15892 = vst [vmem:[#allocation23_spill] sm:$0xff] %v13017_v33  ;;  %v4895_v53 = vmul.f32 %v4894_v32, %v4892_v62  ;;  %v5092_v45 = vsub.s32 32, %v12990_v15  ;;  %v5097_v27 = vadd.s32 127, %v5096_v9  ;;  %v5349_v22 = vshll.u32 %v15607_v4, %v5346_v18 }
 0x692   : > { %v5350_v12 = vshrl.u32 %v15612_v5, %v5347_v44  ;;  %v5353_v20 = vshrl.u32 %v15613_v21, %v5347_v44  ;;  %v5356_v35 = vshrl.u32 %v15599_v52, %v5347_v44  ;;  %v5185_v49 = vadd.s32 536870912, %v5184_v19 }
 0x693   : > { %v5352_v6 = vshll.u32 %v15612_v5, %v5346_v18  ;;  %v5355_v48 = vshll.u32 %v15613_v21, %v5346_v18  ;;  %v5358_v10 = vshll.u32 %v15599_v52, %v5346_v18  ;;  %v5359_v29 = vshrl.u32 %v15600_v23, %v5347_v44 }
 0x694   : > { %v13037_v59 = vshrl.u32 %v5185_v49, 30  ;;  %v5345_v8 = vshrl.u32 %v5344_v1, 5  ;;  %v5361_v34 = vshll.u32 %v15600_v23, %v5346_v18  ;;  %v5362_v2 = vshrl.u32 %v15601_v16, %v5347_v44 }
 0x695   : > { %v5351_v43 = vor.u32 %v5350_v12, %v5349_v22  ;;  %v5354_v7 = vor.u32 %v5353_v20, %v5352_v6  ;;  %v5357_v11 = vor.u32 %v5356_v35, %v5355_v48  ;;  %v5360_v0 = vor.u32 %v5359_v29, %v5358_v10  ;;  %v13041_v62 = vpop.eup %8939 }
 0x696   : > { %15893 = vst [vmem:[#allocation24_spill] sm:$0xff] %v13041_v62  ;;  %vm4814_vm1 = vcmp.lt.s32.totalorder %v12591_v61, 0  ;;  %v4896_v46 = vxor.u32 2147483648, %v4895_v53  ;;  %v5098_v9 = vshll.u32 %v5097_v27, 23  ;;  %v5187_v54 = vshll.u32 %v13037_v59, 30 }
 0x697   : > { %v5363_v32 = vor.u32 %v5362_v2, %v5361_v34  ;;  %v5093_v1 = vshll.u32 %v12963_v56, %v12990_v15  ;;  %v5094_v30 = vshrl.u32 %v5076_v25, %v5092_v45  ;;  %v5380_v18 = vshll.u32 %v5340_v14, 8 }
 0x698   : > { %v5231_v49 = vand.u32 2139095040, %v13003_v31  ;;  %v13048_v12 = vsub.s32 %v5184_v19, %v5187_v54  ;;  %v5348_v20 = vshrl.u32 %v15607_v4, %v5347_v44  ;;  %vm5364_vm5 = vcmp.lt.s32.totalorder %v5345_v8, 1 }
 0x699   : > { %vm5367_vm10 = vcmp.lt.s32.totalorder %v5345_v8, 4  ;;  %v15894_v35 = vand.u32 2147483647, %v12591_v61  ;;  %v5372_v22 = vsel %vm5364_vm5, %v5351_v43, %v5354_v7  ;;  %v5376_v56 = vsel %vm5364_vm5, %v5354_v7, %v5357_v11 }
 0x69a   : > { %v5373_v6 = vsel %vm5367_vm10, %v5360_v0, 920167782  ;;  %v5377_v15 = vsel %vm5367_vm10, %v5363_v32, 1326507024  ;;  %v5099_v25 = vor.u32 4788187, %v5098_v9  ;;  %v5095_v14 = vor.u32 %v5094_v30, %v5093_v1 }
 0x69b   : > { %vm13053_vm14 = vcmp.le.f32.partialorder %v15894_v35, 0.7853982  ;;  %vm5126_vm15 = vcmp.lt.s32.totalorder %v12839_v40, 0  ;;  %v5190_v19 = vsub.s32 0, %v13048_v12  ;;  %vm5366_vm13 = vcmp.lt.s32.totalorder %v5345_v8, 3 }
 0x69c   : > { %v5369_v44 = vsel %vm5367_vm10, %v5357_v11, 2102212464  ;;  %vm5365_vm6 = vcmp.lt.s32.totalorder %v5345_v8, 2  ;;  %v5374_v45 = vsel %vm5366_vm13, %v5357_v11, %v5373_v6  ;;  %v5378_v48 = vsel %vm5366_vm13, %v5360_v0, %v5377_v15 }
 0x69d   : > { %v8304_v10 = vmin.u32 %v5190_v19, %v13048_v12  ;;  %v5368_v29 = vsel %vm5364_vm5, %v5348_v20, %v5351_v43  ;;  %v5375_v34 = vsel %vm5365_vm6, %v5372_v22, %v5374_v45  ;;  %v5379_v2 = vsel %vm5365_vm6, %v5376_v56, %v5378_v48 }
 0x69e   : > { %v5370_v54 = vsel %vm5366_vm13, %v5354_v7, %v5369_v44  ;;  %v13065_v9 = vmul.u32.u64.low %v5380_v18, %v5379_v2  ;;  %v13066_v32 = vmul.u32.u64.high %v5380_v18, %v5379_v2, %v13065_v9  ;;  %v5232_v35 = vshrl.u32 %v5231_v49, 23 }
 0x69f   : > { %v5100_v36 = vand.u32 2147483647, %v5099_v25  ;;  %v15897_v57 = vand.u32 2147483647, %v12839_v40  ;;  %v5192_v11 = vclz %v8304_v10  ;;  %8941 = vcosq.f32 %v13022_v17 }
 0x6a0   : > { %v13074_v0 = vmul.u32.u64.low %v5380_v18, %v5375_v34  ;;  %v13075_v30 = vmul.u32.u64.high %v5380_v18, %v5375_v34, %v13074_v0  ;;  %v4897_v43 = vsel %vm4814_vm1, %v4896_v46, %v4895_v53  ;;  %v5210_v7 = vsub.s32 4, %v13037_v59 }
 0x6a1   : > { %vm13070_vm11 = vcmp.le.f32.partialorder %v15897_v57, 0.7853982  ;;  %v8307_v49 = vadd.s32 4294967169, %v5232_v35  ;;  %v5102_v20 = vcvt.s32.f32 %v5095_v14  ;;  %v8305_v22 = vadd.s32 4294967294, %v5192_v11 }
 0x6a2   : > { %v5371_v57 = vsel %vm5365_vm6, %v5368_v29, %v5370_v54  ;;  %v15900_v6 = vand.u32 2147483647, %v13003_v31  ;;  %8943 = vsinq.f32 %v13022_v17  ;;  %vm5389_vm8 = vc.u32 %v13066_v32, %v13074_v0 }
 0x6a3   : > { %v5238_v15 = vadd.s32 1, %v8307_v49  ;;  %v5439_v25 = vand.u32 2139095040, %v13010_v39  ;;  %v4900_v53 = vsel %vm13053_vm14, %v12591_v61, %v4897_v43  ;;  %v13092_v46 = vmul.f32 %v5102_v20, %v5100_v36 }
 0x6a4   : > { %v5235_v56 = vand.u32 8388607, %v15900_v6  ;;  %vm8306_vm0 = vcmp.lt.s32.totalorder %v8305_v22, 0  ;;  %v5390_v8 = vadd.s32 1, %v13075_v30  ;;  %v13098_v17 = vsel %vm5126_vm15, %v5210_v7, %v13037_v59 }
 0x6a5   : > { %v5195_v19 = vsel %vm8306_vm0, 0, %v8305_v22  ;;  %v5387_v44 = vmul.u32 %v5380_v18, %v5371_v57  ;;  %vm5239_vm2 = vcmp.gt.s32.totalorder %v5238_v15, 0  ;;  %v15500_v10 = vand.u32 2147483647, %v13010_v39 }
 0x6a6   : > { %v5200_v14 = vsub.s32 4294967266, %v5195_v19  ;;  %v5391_v45 = vsel %vm5389_vm8, %v5390_v8, %v13075_v30  ;;  %v5236_v48 = vor.u32 8388608, %v5235_v56  ;;  %8945 = vcosq.f32 %v4900_v53 }
 0x6a7   : > { %v5392_v36 = vadd.s32 %v5391_v45, %v5387_v44  ;;  %v5240_v29 = vsel %vm5239_vm2, %v5238_v15, 0  ;;  %v5440_v34 = vshrl.u32 %v5439_v25, 23  ;;  %8947 = vsinq.f32 %v4900_v53 }
 0x6a8   : > { %v5196_v2 = vsub.s32 32, %v5195_v19  ;;  %v5201_v54 = vadd.s32 127, %v5200_v14  ;;  %v5242_v9 = vand.u32 31, %v5240_v29  ;;  %v5180_v59 = vadd.s32 %v12983_v51, %v12988_v41 }
 0x6a9   : > { %v5393_v11 = vadd.s32 536870912, %v5392_v36  ;;  %v13108_v7 = vshll.u32 %v5236_v48, 8  ;;  %v13112_v49 = vand.u32 8388607, %v15500_v10  ;;  %v13114_v20 = vpop.eup %8941  ;;  %v5197_v22 = vshll.u32 %v13048_v12, %v5195_v19 }
 0x6aa   : > { %v5202_v30 = vshll.u32 %v5201_v54, 23  ;;  %v5243_v43 = vsub.s32 32, %v5242_v9  ;;  %15901 = vst [vmem:[#allocation31_spill] sm:$0xff] %v13114_v20  ;;  %v8315_v51 = vadd.s32 4294967169, %v5440_v34  ;;  %v5543_v41 = vand.u32 2139095040, %v13017_v33 }
 0x6ab   : > { %v13117_v57 = vshrl.u32 %v5393_v11, 30  ;;  %v5198_v6 = vshrl.u32 %v5180_v59, %v5196_v2  ;;  %v5245_v56 = vshll.u32 %v15607_v4, %v5242_v9  ;;  %v5248_v25 = vshll.u32 %v15612_v5, %v5242_v9 }
 0x6ac   : > { %v5246_v15 = vshrl.u32 %v15612_v5, %v5243_v43  ;;  %v13123_v53 = vpop.eup %8943  ;;  %v5249_v44 = vshrl.u32 %v15613_v21, %v5243_v43  ;;  %v5251_v12 = vshll.u32 %v15613_v21, %v5242_v9  ;;  %v5252_v19 = vshrl.u32 %v15599_v52, %v5243_v43 }
 0x6ad   : > { %15902 = vst [vmem:[#allocation43_spill] sm:$0xff] %v13123_v53  ;;  %v5395_v8 = vshll.u32 %v13117_v57, 30  ;;  %v5203_v14 = vor.u32 4788187, %v5202_v30  ;;  %v5241_v45 = vshrl.u32 %v5240_v29, 5  ;;  %v5254_v48 = vshll.u32 %v15599_v52, %v5242_v9 }
 0x6ae   : > { %v5255_v34 = vshrl.u32 %v15600_v23, %v5243_v43  ;;  %v5247_v54 = vor.u32 %v5246_v15, %v5245_v56  ;;  %v5250_v59 = vor.u32 %v5249_v44, %v5248_v25  ;;  %v5253_v11 = vor.u32 %v5252_v19, %v5251_v12 }
 0x6af   : > { %v13131_v2 = vsub.s32 %v5392_v36, %v5395_v8  ;;  %v5199_v10 = vor.u32 %v5198_v6, %v5197_v22  ;;  %v5257_v35 = vshll.u32 %v15600_v23, %v5242_v9  ;;  %v5258_v20 = vshrl.u32 %v15601_v16, %v5243_v43 }
 0x6b0   : > { %v5256_v18 = vor.u32 %v5255_v34, %v5254_v48  ;;  %v13135_v53 = vpop.eup %8945  ;;  %v5244_v29 = vshrl.u32 %v15607_v4, %v5243_v43  ;;  %v5444_v62 = vor.u32 8388608, %v13112_v49  ;;  %v5446_v37 = vadd.s32 1, %v8315_v51 }
 0x6b1   : > { %v5398_v30 = vsub.s32 0, %v13131_v2  ;;  %v13140_v36 = vpop.eup %8947  ;;  %v5204_v56 = vand.u32 2147483647, %v5203_v14  ;;  %v5259_v15 = vor.u32 %v5258_v20, %v5257_v35  ;;  %vm5260_vm12 = vcmp.lt.s32.totalorder %v5241_v45, 1 }
 0x6b2   : > { %vm5263_vm5 = vcmp.lt.s32.totalorder %v5241_v45, 4  ;;  %vm5262_vm10 = vcmp.lt.s32.totalorder %v5241_v45, 3  ;;  %v5268_v6 = vsel %vm5260_vm12, %v5247_v54, %v5250_v59  ;;  %v5206_v25 = vcvt.s32.f32 %v5199_v10 }
 0x6b3   : > { %v8312_v22 = vmin.u32 %v5398_v30, %v13131_v2  ;;  %v5265_v9 = vsel %vm5263_vm5, %v5253_v11, 2102212464  ;;  %v5264_v8 = vsel %vm5260_vm12, %v5244_v29, %v5247_v54  ;;  %v5269_v12 = vsel %vm5263_vm5, %v5256_v18, 920167782 }
 0x6b4   : > { %v5266_v44 = vsel %vm5262_vm10, %v5250_v59, %v5265_v9  ;;  %vm5261_vm13 = vcmp.lt.s32.totalorder %v5241_v45, 2  ;;  %v5270_v49 = vsel %vm5262_vm10, %v5253_v11, %v5269_v12  ;;  %v5272_v51 = vsel %vm5260_vm12, %v5250_v59, %v5253_v11 }
 0x6b5   : > { %v5400_v43 = vclz %v8312_v22  ;;  %v13145_v19 = vmul.f32 %v5206_v25, %v5204_v56  ;;  %v5271_v35 = vsel %vm5261_vm13, %v5268_v6, %v5270_v49  ;;  %v5273_v20 = vsel %vm5263_vm5, %v5259_v15, 1326507024 }
 0x6b6   : > { %v5544_v14 = vshrl.u32 %v5543_v41, 23  ;;  %v5267_v34 = vsel %vm5261_vm13, %v5264_v8, %v5266_v44  ;;  %v5274_v30 = vsel %vm5262_vm10, %v5256_v18, %v5273_v20  ;;  %vm5447_vm6 = vcmp.gt.s32.totalorder %v5446_v37, 0 }
 0x6b7   : > { %v8313_v48 = vadd.s32 4294967294, %v5400_v43  ;;  %v5275_v10 = vsel %vm5261_vm13, %v5272_v51, %v5274_v30  ;;  %v13149_v54 = vmul.u32.u64.low %v13108_v7, %v5271_v35  ;;  %v13150_v29 = vmul.u32.u64.high %v13108_v7, %v5271_v35, %v13149_v54 }
 0x6b8   : > { %v5448_v22 = vsel %vm5447_vm6, %v5446_v37, 0  ;;  %v13154_v59 = vmul.u32.u64.low %v13108_v7, %v5275_v10  ;;  %v13155_v11 = vmul.u32.u64.high %v13108_v7, %v5275_v10, %v13154_v59  ;;  %v15504_v56 = vand.u32 2147483647, %v13017_v33 }
 0x6b9   : > { %vm8314_vm8 = vcmp.lt.s32.totalorder %v8313_v48, 0  ;;  %v5388_v41 = vadd.s32 %v13074_v0, %v13066_v32  ;;  %v5450_v18 = vand.u32 31, %v5448_v22  ;;  %v13160_v15 = vshll.u32 %v5444_v62, 8 }
 0x6ba   : > { %v5403_v45 = vsel %vm8314_vm8, 0, %v8313_v48  ;;  %v5208_v9 = vxor.u32 2147483648, %v13145_v19  ;;  %v5283_v37 = vmul.u32 %v13108_v7, %v5267_v34  ;;  %v5286_v8 = vadd.s32 1, %v13150_v29 }
 0x6bb   : > { %v5404_v6 = vsub.s32 32, %v5403_v45  ;;  %v5408_v25 = vsub.s32 4294967266, %v5403_v45  ;;  %v13165_v44 = vshrl.u32 %v5448_v22, 5  ;;  %v5451_v12 = vsub.s32 32, %v5450_v18 }
 0x6bc   : > { %v8319_v43 = vadd.s32 4294967169, %v5544_v14  ;;  %vm5285_vm0 = vc.u32 %v13155_v11, %v13149_v54  ;;  %v5453_v32 = vshll.u32 %v15607_v4, %v5450_v18  ;;  %v13172_v62 = vand.u32 8388607, %v15504_v56 }
 0x6bd   : > { %v5409_v49 = vadd.s32 127, %v5408_v25  ;;  %v5287_v0 = vsel %vm5285_vm0, %v5286_v8, %v13150_v29  ;;  %v5454_v7 = vshrl.u32 %v15612_v5, %v5451_v12  ;;  %v5456_v51 = vshll.u32 %v15612_v5, %v5450_v18 }
 0x6be   : > { %v5457_v35 = vshrl.u32 %v15613_v21, %v5451_v12  ;;  %v5405_v20 = vshll.u32 %v13131_v2, %v5403_v45  ;;  %v5406_v14 = vshrl.u32 %v5388_v41, %v5404_v6  ;;  %v5288_v34 = vadd.s32 %v5287_v0, %v5283_v37 }
 0x6bf   : > { %v5410_v48 = vshll.u32 %v5409_v49, 23  ;;  %vm15515_vm2 = vcmp.lt.s32.totalorder %v12730_v26, 0  ;;  %v5455_v30 = vor.u32 %v5454_v7, %v5453_v32  ;;  %v5459_v22 = vshll.u32 %v15613_v21, %v5450_v18 }
 0x6c0   : > { %v5458_v10 = vor.u32 %v5457_v35, %v5456_v51  ;;  %v5460_v59 = vshrl.u32 %v15599_v52, %v5451_v12  ;;  %v5289_v29 = vadd.s32 536870912, %v5288_v34  ;;  %v5462_v25 = vshll.u32 %v15599_v52, %v5450_v18 }
 0x6c1   : > { %v5463_v8 = vshrl.u32 %v15600_v23, %v5451_v12  ;;  %vm5468_vm12 = vcmp.lt.s32.totalorder %v13165_v44, 1  ;;  %v5411_v56 = vor.u32 4788187, %v5410_v48  ;;  %v5465_v41 = vshll.u32 %v15600_v23, %v5450_v18 }
 0x6c2   : > { %v5461_v2 = vor.u32 %v5460_v59, %v5459_v22  ;;  %v5466_v45 = vshrl.u32 %v15601_v16, %v5451_v12  ;;  %v15903_v6 = vand.u32 2147483647, %v12730_v26  ;;  %v5407_v49 = vor.u32 %v5406_v14, %v5405_v20 }
 0x6c3   : > { %v13193_v32 = vshrl.u32 %v5289_v29, 30  ;;  %v5452_v0 = vshrl.u32 %v15607_v4, %v5451_v12  ;;  %v5464_v7 = vor.u32 %v5463_v8, %v5462_v25  ;;  %vm5469_vm10 = vcmp.lt.s32.totalorder %v13165_v44, 2 }
 0x6c4   : > { %vm13189_vm5 = vcmp.le.f32.partialorder %v15903_v6, 0.7853982  ;;  %v5467_v51 = vor.u32 %v5466_v45, %v5465_v41  ;;  %vm5471_vm13 = vcmp.lt.s32.totalorder %v13165_v44, 4  ;;  %v5476_v18 = vsel %vm5468_vm12, %v5455_v30, %v5458_v10 }
 0x6c5   : > { %15906 = vst [vmem:[#allocation22_spill] sm:$0xff] %v13193_v32  ;;  %v5291_v35 = vshll.u32 %v13193_v32, 30  ;;  %vm5470_vm6 = vcmp.lt.s32.totalorder %v13165_v44, 3  ;;  %v5473_v48 = vsel %vm5471_vm13, %v5461_v2, 2102212464  ;;  %v5480_v12 = vsel %vm5468_vm12, %v5458_v10, %v5461_v2 }
 0x6c6   : > { %v5477_v22 = vsel %vm5471_vm13, %v5464_v7, 920167782  ;;  %v5412_v20 = vand.u32 2147483647, %v5411_v56  ;;  %v5481_v59 = vsel %vm5471_vm13, %v5467_v51, 1326507024  ;;  %v5414_v29 = vcvt.s32.f32 %v5407_v49 }
 0x6c7   : > { %v5478_v14 = vsel %vm5470_vm6, %v5461_v2, %v5477_v22  ;;  %v13204_v25 = vsub.s32 %v5288_v34, %v5291_v35  ;;  %v5472_v8 = vsel %vm5468_vm12, %v5452_v0, %v5455_v30  ;;  %v5474_v45 = vsel %vm5470_vm6, %v5458_v10, %v5473_v48 }
 0x6c8   : > { %v5479_v41 = vsel %vm5469_vm10, %v5476_v18, %v5478_v14  ;;  %v5482_v6 = vsel %vm5470_vm6, %v5464_v7, %v5481_v59  ;;  %v15907_v56 = vxor.u32 2147483648, %v13092_v46  ;;  %v5209_v30 = vsel %vm5126_vm15, %v5208_v9, %v13145_v19 }
 0x6c9   : > { %v13211_v32 = vmul.u32.u64.low %v13160_v15, %v5479_v41  ;;  %v13212_v42 = vmul.u32.u64.high %v13160_v15, %v5479_v41, %v13211_v32  ;;  %v5294_v2 = vsub.s32 0, %v13204_v25  ;;  %v5483_v10 = vsel %vm5469_vm10, %v5480_v12, %v5482_v6 }
 0x6ca   : > { %v5105_v34 = vsel %vm15515_vm2, %v15907_v56, %v13092_v46  ;;  %v13226_v49 = vmul.f32 %v5414_v29, %v5412_v20  ;;  %v13229_v0 = vmul.u32.u64.low %v13160_v15, %v5483_v10  ;;  %v13230_v7 = vmul.u32.u64.high %v13160_v15, %v5483_v10, %v13229_v0 }
 0x6cb   : > { %v5550_v51 = vadd.s32 1, %v8319_v43  ;;  %v15908_v46 = vsel %vm13070_vm11, 0, %v13098_v17  ;;  %v8308_v19 = vmin.u32 %v5294_v2, %v13204_v25  ;;  %v5475_v9 = vsel %vm5469_vm10, %v5472_v8, %v5474_v45 }
 0x6cc   : > { %v13236_v18 = vadd.s32 3, %v15908_v46  ;;  %v5548_v35 = vor.u32 8388608, %v13172_v62  ;;  %v13245_v48 = vsel %vm13189_vm5, %v12730_v26, %v5105_v34  ;;  %v5494_v22 = vadd.s32 1, %v13212_v42 }
 0x6cd   : > { %vm5551_vm15 = vcmp.gt.s32.totalorder %v5550_v51, 0  ;;  %v13252_v17 = vsel %vm13070_vm11, %v12839_v40, %v5209_v30  ;;  %v5284_v44 = vadd.s32 %v13149_v54, %v13155_v11  ;;  %v5296_v20 = vclz %v8308_v19 }
 0x6ce   : > { %15909 = vst [vmem:[#allocation42_spill] sm:$0xff] %v13236_v18  ;;  %v5552_v62 = vsel %vm5551_vm15, %v5550_v51, 0  ;;  %v5491_v12 = vmul.u32 %v13160_v15, %v5475_v9  ;;  %vm5493_vm8 = vc.u32 %v13230_v7, %v13211_v32  ;;  %v13261_v41 = vshll.u32 %v5548_v35, 8 }
 0x6cf   : > { %v5554_v59 = vand.u32 31, %v5552_v62  ;;  %v8309_v29 = vadd.s32 4294967294, %v5296_v20  ;;  %v5495_v8 = vsel %vm5493_vm8, %v5494_v22, %v13212_v42  ;;  %v13265_v1 = vadd.f32 %v12699_v38, %v13005_v58 }
 0x6d0   : > { %v5496_v54 = vadd.s32 %v5495_v8, %v5491_v12  ;;  %v13267_v11 = vshrl.u32 %v5552_v62, 5  ;;  %vm5334_vm0 = vcmp.lt.s32.totalorder %v12917_v28, 0  ;;  %vm15514_vm8 = vcmp.lt.s32.totalorder %v13003_v31, 0 }
 0x6d1   : > { %v5555_v45 = vsub.s32 32, %v5554_v59  ;;  %v5557_v6 = vshll.u32 %v15607_v4, %v5554_v59  ;;  %vm8310_vm11 = vcmp.lt.s32.totalorder %v8309_v29, 0  ;;  %v5560_v15 = vshll.u32 %v15612_v5, %v5554_v59 }
 0x6d2   : > { %v5563_v56 = vshll.u32 %v15613_v21, %v5554_v59  ;;  %v5566_v34 = vshll.u32 %v15599_v52, %v5554_v59  ;;  %v5299_v42 = vsel %vm8310_vm11, 0, %v8309_v29  ;;  %v5497_v30 = vadd.s32 536870912, %v5496_v54 }
 0x6d3   : > { %v5558_v2 = vshrl.u32 %v15612_v5, %v5555_v45  ;;  %v5569_v38 = vshll.u32 %v15600_v23, %v5554_v59  ;;  %v5300_v10 = vsub.s32 32, %v5299_v42  ;;  %v5301_v0 = vshll.u32 %v13204_v25, %v5299_v42 }
 0x6d4   : > { %v5304_v51 = vsub.s32 4294967266, %v5299_v42  ;;  %v5561_v46 = vshrl.u32 %v15613_v21, %v5555_v45  ;;  %v13277_v19 = vshrl.u32 %v5497_v30, 30  ;;  %v5564_v35 = vshrl.u32 %v15599_v52, %v5555_v45 }
 0x6d5   : > { %v5559_v9 = vor.u32 %v5558_v2, %v5557_v6  ;;  %v5567_v22 = vshrl.u32 %v15600_v23, %v5555_v45  ;;  %v5302_v20 = vshrl.u32 %v5284_v44, %v5300_v10  ;;  %v5570_v29 = vshrl.u32 %v15601_v16, %v5555_v45 }
 0x6d6   : > { %v5305_v62 = vadd.s32 127, %v5304_v51  ;;  %v5562_v12 = vor.u32 %v5561_v46, %v5560_v15  ;;  %v5499_v59 = vshll.u32 %v13277_v19, 30  ;;  %v5565_v25 = vor.u32 %v5564_v35, %v5563_v56 }
 0x6d7   : > { %v5568_v8 = vor.u32 %v5567_v22, %v5566_v34  ;;  %v5751_v42 = vand.u32 2139095040, %v13265_v1  ;;  %v5303_v30 = vor.u32 %v5302_v20, %v5301_v0  ;;  %v5556_v6 = vshrl.u32 %v15607_v4, %v5555_v45 }
 0x6d8   : > { %v5306_v43 = vshll.u32 %v5305_v62, 23  ;;  %v5571_v2 = vor.u32 %v5570_v29, %v5569_v38  ;;  %v13286_v14 = vsub.s32 %v5496_v54, %v5499_v59  ;;  %vm5572_vm12 = vcmp.lt.s32.totalorder %v13267_v11, 1 }
 0x6d9   : > { %vm5573_vm10 = vcmp.lt.s32.totalorder %v13267_v11, 2  ;;  %vm5575_vm13 = vcmp.lt.s32.totalorder %v13267_v11, 4  ;;  %v15910_v44 = vand.u32 2147483647, %v12917_v28  ;;  %vm5574_vm15 = vcmp.lt.s32.totalorder %v13267_v11, 3 }
 0x6da   : > { %v5307_v56 = vor.u32 4788187, %v5306_v43  ;;  %v5577_v34 = vsel %vm5575_vm13, %v5565_v25, 2102212464  ;;  %v5580_v45 = vsel %vm5572_vm12, %v5559_v9, %v5562_v12  ;;  %v5502_v54 = vsub.s32 0, %v13286_v14 }
 0x6db   : > { %vm13293_vm6 = vcmp.le.f32.partialorder %v15910_v44, 0.7853982  ;;  %v5576_v38 = vsel %vm5572_vm12, %v5556_v6, %v5559_v9  ;;  %v5581_v10 = vsel %vm5575_vm13, %v5568_v8, 920167782  ;;  %v5584_v0 = vsel %vm5572_vm12, %v5562_v12, %v5565_v25 }
 0x6dc   : > { %v5308_v51 = vand.u32 2147483647, %v5307_v56  ;;  %v5310_v46 = vcvt.s32.f32 %v5303_v30  ;;  %v5582_v35 = vsel %vm5574_vm15, %v5565_v25, %v5581_v10  ;;  %v5585_v22 = vsel %vm5575_vm13, %v5571_v2, 1326507024 }
 0x6dd   : > { %v8316_v20 = vmin.u32 %v5502_v54, %v13286_v14  ;;  %v5578_v62 = vsel %vm5574_vm15, %v5562_v12, %v5577_v34  ;;  %v5583_v43 = vsel %vm5573_vm10, %v5580_v45, %v5582_v35  ;;  %v5586_v29 = vsel %vm5574_vm15, %v5568_v8, %v5585_v22 }
 0x6de   : > { %v15913_v59 = vand.u32 2147483647, %v13003_v31  ;;  %v5311_v9 = vmul.f32 %v5310_v46, %v5308_v51  ;;  %v5587_v6 = vsel %vm5573_vm10, %v5584_v0, %v5586_v29  ;;  %v5752_v8 = vshrl.u32 %v5751_v42, 23 }
 0x6df   : > { %v13312_v25 = vmul.u32.u64.low %v13261_v41, %v5583_v43  ;;  %v13313_v30 = vmul.u32.u64.high %v13261_v41, %v5583_v43, %v13312_v25  ;;  %v5504_v2 = vclz %v8316_v20  ;;  %8949 = vcosq.f32 %v13245_v48 }
 0x6e0   : > { %vm13305_vm11 = vcmp.le.f32.partialorder %v15913_v59, 0.7853982  ;;  %v13316_v12 = vmul.u32.u64.low %v13261_v41, %v5587_v6  ;;  %v13317_v56 = vmul.u32.u64.high %v13261_v41, %v5587_v6, %v13316_v12  ;;  %v15916_v34 = vxor.u32 2147483648, %v13226_v49 }
 0x6e1   : > { %v5312_v54 = vxor.u32 2147483648, %v5311_v9  ;;  %v5579_v10 = vsel %vm5573_vm10, %v5576_v38, %v5578_v62  ;;  %8951 = vsinq.f32 %v13245_v48  ;;  %v8317_v0 = vadd.s32 4294967294, %v5504_v2 }
 0x6e2   : > { %v5417_v45 = vsel %vm5334_vm0, %v15916_v34, %v13226_v49  ;;  %v15509_v51 = vand.u32 2147483647, %v13265_v1  ;;  %v8327_v46 = vadd.s32 4294967169, %v5752_v8  ;;  %8953 = vcosq.f32 %v13252_v17 }
 0x6e3   : > { %v15917_v42 = vsub.s32 4, %v13117_v57  ;;  %v5598_v49 = vadd.s32 1, %v13313_v30  ;;  %v13338_v11 = vadd.f32 %v12817_v47, %v13005_v58  ;;  %v5420_v48 = vsel %vm13293_vm6, %v12917_v28, %v5417_v45 }
 0x6e4   : > { %vm8318_vm12 = vcmp.lt.s32.totalorder %v8317_v0, 0  ;;  %v5595_v38 = vmul.u32 %v13261_v41, %v5579_v10  ;;  %vm5597_vm10 = vc.u32 %v13317_v56, %v13312_v25  ;;  %v5313_v22 = vsel %vm15514_vm8, %v5312_v54, %v5311_v9 }
 0x6e5   : > { %v5419_v35 = vsel %vm5334_vm0, %v15917_v42, %v13117_v57  ;;  %v5507_v20 = vsel %vm8318_vm12, 0, %v8317_v0  ;;  %v5599_v57 = vsel %vm5597_vm10, %v5598_v49, %v13313_v30  ;;  %v5758_v62 = vadd.s32 1, %v8327_v46 }
 0x6e6   : > { %8955 = vsinq.f32 %v13252_v17  ;;  %v5421_v47 = vsel %vm13293_vm6, 0, %v5419_v35  ;;  %v5512_v43 = vsub.s32 4294967266, %v5507_v20  ;;  %v5755_v29 = vand.u32 8388607, %v15509_v51 }
 0x6e7   : > { %8957 = vcosq.f32 %v5420_v48  ;;  %v5600_v41 = vadd.s32 %v5599_v57, %v5595_v38  ;;  %vm5759_vm0 = vcmp.gt.s32.totalorder %v5758_v62, 0  ;;  %v5647_v59 = vand.u32 2139095040, %v13338_v11 }
 0x6e8   : > { %v13357_v9 = vsel %vm13305_vm11, %v13003_v31, %v5313_v22  ;;  %v5508_v6 = vsub.s32 32, %v5507_v20  ;;  %v5513_v30 = vadd.s32 127, %v5512_v43  ;;  %v5760_v17 = vsel %vm5759_vm0, %v5758_v62, 0 }
 0x6e9   : > { %8959 = vsinq.f32 %v5420_v48  ;;  %v13359_v15 = vadd.s32 3, %v5421_v47  ;;  %v5601_v2 = vadd.s32 536870912, %v5600_v41  ;;  %v5762_v12 = vand.u32 31, %v5760_v17  ;;  %v13368_v10 = vpop.eup %8949 }
 0x6ea   : > { %v5492_v8 = vadd.s32 %v13211_v32, %v13230_v7  ;;  %v5756_v34 = vor.u32 8388608, %v5755_v29  ;;  %v13366_v54 = vadd.f32 %v12892_v63, %v13005_v58  ;;  %8961 = vcosq.f32 %v13357_v9 }
 0x6eb   : > { %15918 = vst [vmem:[#allocation30_spill] sm:$0xff] %v13359_v15  ;;  %v13372_v0 = vadd.s32 %v13312_v25, %v13317_v56  ;;  %v13374_v46 = vshrl.u32 %v5601_v2, 30  ;;  %v5763_v42 = vsub.s32 32, %v5762_v12  ;;  %v13376_v35 = vpop.eup %8951  ;;  %v5509_v32 = vshll.u32 %v13286_v14, %v5507_v20 }
 0x6ec   : > { %v5510_v7 = vshrl.u32 %v5492_v8, %v5508_v6  ;;  %v5514_v49 = vshll.u32 %v5513_v30, 23  ;;  %v5648_v48 = vshrl.u32 %v5647_v59, 23  ;;  %v13379_v38 = vpop.eup %8953  ;;  %v5765_v58 = vshll.u32 %v15607_v4, %v5762_v12 }
 0x6ed   : > { %15919 = vst [vmem:[#allocation39_spill] sm:$0xff] %v13379_v38  ;;  %v5603_v63 = vshll.u32 %v13374_v46, 30  ;;  %v5766_v22 = vshrl.u32 %v15612_v5, %v5763_v42  ;;  %v5768_v25 = vshll.u32 %v15612_v5, %v5762_v12  ;;  %v5769_v56 = vshrl.u32 %v15613_v21, %v5763_v42 }
 0x6ee   : > { %v5771_v57 = vshll.u32 %v15613_v21, %v5762_v12  ;;  %v5772_v62 = vshrl.u32 %v15599_v52, %v5763_v42  ;;  %v5775_v14 = vshrl.u32 %v15600_v23, %v5763_v42  ;;  %v5761_v47 = vshrl.u32 %v5760_v17, 5 }
 0x6ef   : > { %v13389_v20 = vsub.s32 %v5600_v41, %v5603_v63  ;;  %v5774_v43 = vshll.u32 %v15599_v52, %v5762_v12  ;;  %v13392_v29 = vshll.u32 %v5756_v34, 8  ;;  %v5515_v6 = vor.u32 4788187, %v5514_v49 }
 0x6f0   : > { %v13394_v59 = vpop.eup %8955  ;;  %vm5542_vm13 = vcmp.lt.s32.totalorder %v13017_v33, 0  ;;  %v5767_v30 = vor.u32 %v5766_v22, %v5765_v58  ;;  %v5770_v2 = vor.u32 %v5769_v56, %v5768_v25  ;;  %v5773_v8 = vor.u32 %v5772_v62, %v5771_v57 }
 0x6f1   : > { %15920 = vst [vmem:[#allocation41_spill] sm:$0xff] %v13394_v59  ;;  %v13397_v51 = vpop.eup %8957  ;;  %v5606_v45 = vsub.s32 0, %v13389_v20  ;;  %v5776_v28 = vor.u32 %v5775_v14, %v5774_v43  ;;  %v5777_v41 = vshll.u32 %v15600_v23, %v5762_v12  ;;  %v5778_v17 = vshrl.u32 %v15601_v16, %v5763_v42 }
 0x6f2   : > { %15921 = vst [vmem:[#allocation36_spill] sm:$0xff] %v13397_v51  ;;  %v5511_v63 = vor.u32 %v5510_v7, %v5509_v32  ;;  %v5626_v34 = vsub.s32 4, %v13374_v46  ;;  %v5764_v15 = vshrl.u32 %v15607_v4, %v5763_v42  ;;  %v8323_v49 = vadd.s32 4294967169, %v5648_v48 }
 0x6f3   : > { %v13404_v38 = vpop.eup %8959  ;;  %v8320_v58 = vmin.u32 %v5606_v45, %v13389_v20  ;;  %v5779_v22 = vor.u32 %v5778_v17, %v5777_v41  ;;  %vm5780_vm6 = vcmp.lt.s32.totalorder %v5761_v47, 1  ;;  %vm5783_vm15 = vcmp.lt.s32.totalorder %v5761_v47, 4 }
 0x6f4   : > { %15922 = vst [vmem:[#allocation38_spill] sm:$0xff] %v13404_v38  ;;  %vm5782_vm12 = vcmp.lt.s32.totalorder %v5761_v47, 3  ;;  %v5785_v25 = vsel %vm5783_vm15, %v5773_v8, 2102212464  ;;  %v5788_v12 = vsel %vm5780_vm6, %v5767_v30, %v5770_v2  ;;  %v5789_v56 = vsel %vm5783_vm15, %v5776_v28, 920167782  ;;  %v13410_v32 = vpop.eup %8961 }
 0x6f5   : > { %v5516_v7 = vand.u32 2147483647, %v5515_v6  ;;  %v15923_v42 = vand.u32 2147483647, %v13017_v33  ;;  %v15924_v48 = vmov 0  ;;  %v5608_v45 = vclz %v8320_v58 }
 0x6f6   : > { %vm5781_vm0 = vcmp.lt.s32.totalorder %v5761_v47, 2  ;;  %v5790_v57 = vsel %vm5782_vm12, %v5773_v8, %v5789_v56  ;;  %v5518_v62 = vcvt.s32.f32 %v5511_v63  ;;  %v5792_v43 = vsel %vm5780_vm6, %v5770_v2, %v5773_v8 }
 0x6f7   : > { %vm13414_vm10 = vcmp.le.f32.partialorder %v15923_v42, 0.7853982  ;;  %v5791_v14 = vsel %vm5781_vm0, %v5788_v12, %v5790_v57  ;;  %v15927_v41 = vand.u32 2147483647, %v13338_v11  ;;  %v8321_v6 = vadd.s32 4294967294, %v5608_v45 }
 0x6f8   : > { %v15925_v48 = vsel %vm13414_vm10, 4294967295, %v15924_v48  ;;  %v5784_v51 = vsel %vm5780_vm6, %v5764_v15, %v5767_v30  ;;  %v5786_v42 = vsel %vm5782_vm12, %v5770_v2, %v5785_v25  ;;  %v5793_v38 = vsel %vm5783_vm15, %v5779_v22, 1326507024 }
 0x6f9   : > { %15926 = vst [vmem:[#allocation35_spill] sm:$0xff] %v15925_v48  ;;  %v13423_v17 = vand.u32 8388607, %v15927_v41  ;;  %v5794_v58 = vsel %vm5782_vm12, %v5776_v28, %v5793_v38  ;;  %v13430_v56 = vmul.u32.u64.low %v13392_v29, %v5791_v14  ;;  %v13431_v63 = vmul.u32.u64.high %v13392_v29, %v5791_v14, %v13430_v56 }
 0x6fa   : > { %v5654_v12 = vadd.s32 1, %v8323_v49  ;;  %v5519_v8 = vmul.f32 %v5518_v62, %v5516_v7  ;;  %vm8322_vm8 = vcmp.lt.s32.totalorder %v8321_v6, 0  ;;  %v13437_v45 = vsel %vm5542_vm13, %v5626_v34, %v13374_v46 }
 0x6fb   : > { %15928 = vst [vmem:[#allocation14_spill] sm:$0xff] %v13437_v45  ;;  %v5795_v15 = vsel %vm5781_vm0, %v5792_v43, %v5794_v58  ;;  %v5611_v30 = vsel %vm8322_vm8, 0, %v8321_v6  ;;  %vm15516_vm15 = vcmp.lt.s32.totalorder %v13010_v39, 0  ;;  %v5787_v49 = vsel %vm5781_vm0, %v5784_v51, %v5786_v42 }
 0x6fc   : > { %v13441_v2 = vmul.u32.u64.low %v13392_v29, %v5795_v15  ;;  %v13442_v22 = vmul.u32.u64.high %v13392_v29, %v5795_v15, %v13441_v2  ;;  %vm5655_vm6 = vcmp.gt.s32.totalorder %v5654_v12, 0  ;;  %v5612_v28 = vsub.s32 32, %v5611_v30 }
 0x6fd   : > { %v5616_v38 = vsub.s32 4294967266, %v5611_v30  ;;  %v5656_v25 = vsel %vm5655_vm6, %v5654_v12, 0  ;;  %8963 = vsinq.f32 %v13357_v9  ;;  %v5806_v46 = vadd.s32 1, %v13431_v63 }
 0x6fe   : > { %v5652_v34 = vor.u32 8388608, %v13423_v17  ;;  %v5658_v7 = vand.u32 31, %v5656_v25  ;;  %v5613_v57 = vshll.u32 %v13389_v20, %v5611_v30  ;;  %v5614_v62 = vshrl.u32 %v13372_v0, %v5612_v28 }
 0x6ff   : > { %v5617_v14 = vadd.s32 127, %v5616_v38  ;;  %v5803_v51 = vmul.u32 %v13392_v29, %v5787_v49  ;;  %vm5805_vm8 = vc.u32 %v13442_v22, %v13430_v56  ;;  %v5520_v41 = vxor.u32 2147483648, %v5519_v8 }
 0x700   : > { %v5659_v9 = vsub.s32 32, %v5658_v7  ;;  %v5615_v17 = vor.u32 %v5614_v62, %v5613_v57  ;;  %v5807_v20 = vsel %vm5805_vm8, %v5806_v46, %v13431_v63  ;;  %v5661_v0 = vshll.u32 %v15607_v4, %v5658_v7 }
 0x701   : > { %v5618_v6 = vshll.u32 %v5617_v14, 23  ;;  %v5808_v42 = vadd.s32 %v5807_v20, %v5803_v51  ;;  %v15929_v15 = vand.u32 2147483647, %v13010_v39  ;;  %v5657_v2 = vshrl.u32 %v5656_v25, 5 }
 0x702   : > { %v5662_v58 = vshrl.u32 %v15612_v5, %v5659_v9  ;;  %v5665_v12 = vshrl.u32 %v15613_v21, %v5659_v9  ;;  %v5664_v28 = vshll.u32 %v15612_v5, %v5658_v7  ;;  %v5668_v38 = vshrl.u32 %v15599_v52, %v5659_v9 }
 0x703   : > { %vm13464_vm12 = vcmp.le.f32.partialorder %v15929_v15, 0.7853982  ;;  %v5619_v30 = vor.u32 4788187, %v5618_v6  ;;  %v5622_v63 = vcvt.s32.f32 %v5615_v17  ;;  %v5809_v49 = vadd.s32 536870912, %v5808_v42 }
 0x704   : > { %v5663_v46 = vor.u32 %v5662_v58, %v5661_v0  ;;  %v5667_v57 = vshll.u32 %v15613_v21, %v5658_v7  ;;  %v5666_v14 = vor.u32 %v5665_v12, %v5664_v28  ;;  %v5670_v51 = vshll.u32 %v15599_v52, %v5658_v7 }
 0x705   : > { %v5620_v62 = vand.u32 2147483647, %v5619_v30  ;;  %v5671_v20 = vshrl.u32 %v15600_v23, %v5659_v9  ;;  %v5521_v15 = vsel %vm15516_vm15, %v5520_v41, %v5519_v8  ;;  %vm5750_vm0 = vcmp.lt.s32.totalorder %v13265_v1, 0 }
 0x706   : > { %v5810_v25 = vshrl.u32 %v5809_v49, 30  ;;  %v5669_v6 = vor.u32 %v5668_v38, %v5667_v57  ;;  %v5674_v47 = vshrl.u32 %v15601_v16, %v5659_v9  ;;  %v5660_v0 = vshrl.u32 %v15607_v4, %v5659_v9 }
 0x707   : > { %v5623_v17 = vmul.f32 %v5622_v63, %v5620_v62  ;;  %v5672_v58 = vor.u32 %v5671_v20, %v5670_v51  ;;  %v5673_v30 = vshll.u32 %v15600_v23, %v5658_v7  ;;  %v13479_v12 = vpop.eup %8963  ;;  %vm5676_vm6 = vcmp.lt.s32.totalorder %v5657_v2, 1 }
 0x708   : > { %v5811_v28 = vshll.u32 %v5810_v25, 30  ;;  %vm5677_vm8 = vcmp.lt.s32.totalorder %v5657_v2, 2  ;;  %vm5679_vm2 = vcmp.lt.s32.totalorder %v5657_v2, 4  ;;  %vm5678_vm15 = vcmp.lt.s32.totalorder %v5657_v2, 3 }
 0x709   : > { %v5675_v43 = vor.u32 %v5674_v47, %v5673_v30  ;;  %v5684_v8 = vsel %vm5676_vm6, %v5663_v46, %v5666_v14  ;;  %v5685_v41 = vsel %vm5679_vm2, %v5672_v58, 920167782  ;;  %v5624_v38 = vxor.u32 2147483648, %v5623_v17 }
 0x70a   : > { %v15932_v63 = vand.u32 2147483647, %v13265_v1  ;;  %v13489_v7 = vsub.s32 %v5808_v42, %v5811_v28  ;;  %v5681_v49 = vsel %vm5679_vm2, %v5669_v6, 2102212464  ;;  %v5686_v57 = vsel %vm5678_vm15, %v5669_v6, %v5685_v41 }
 0x70b   : > { %v5834_v62 = vsub.s32 4, %v5810_v25  ;;  %v5687_v47 = vsel %vm5677_vm8, %v5684_v8, %v5686_v57  ;;  %v5692_v51 = vshll.u32 %v5652_v34, 8  ;;  %v5855_v20 = vand.u32 2139095040, %v13366_v54 }
 0x70c   : > { %vm13485_vm3 = vcmp.le.f32.partialorder %v15932_v63, 0.7853982  ;;  %v5524_v30 = vsel %vm13464_vm12, %v13010_v39, %v5521_v15  ;;  %v5814_v63 = vsub.s32 0, %v13489_v7  ;;  %v5680_v40 = vsel %vm5676_vm6, %v5660_v0, %v5663_v46 }
 0x70d   : > { %v5688_v42 = vsel %vm5676_vm6, %v5666_v14, %v5669_v6  ;;  %v5682_v28 = vsel %vm5678_vm15, %v5666_v14, %v5681_v49  ;;  %v5689_v41 = vsel %vm5679_vm2, %v5675_v43, 1326507024  ;;  %v5625_v34 = vsel %vm5542_vm13, %v5624_v38, %v5623_v17 }
 0x70e   : > { %v13503_v45 = vmul.u32.u64.low %v5692_v51, %v5687_v47  ;;  %v13504_v59 = vmul.u32.u64.high %v5692_v51, %v5687_v47, %v13503_v45  ;;  %v8328_v8 = vmin.u32 %v5814_v63, %v13489_v7  ;;  %v5690_v15 = vsel %vm5678_vm15, %v5672_v58, %v5689_v41 }
 0x70f   : > { %v15935_v57 = vand.u32 2147483647, %v13366_v54  ;;  %v13514_v46 = vsel %vm5750_vm0, %v5834_v62, %v5810_v25  ;;  %v5691_v14 = vsel %vm5677_vm8, %v5688_v42, %v5690_v15  ;;  %v5856_v43 = vshrl.u32 %v5855_v20, 23  ;;  %v15937_v62 = vld [vmem:[#allocation20_spill] sm:$0xff] }
 0x710   : > { %15936 = vst [vmem:[#allocation40_spill] sm:$0xff] %v13514_v46  ;;  %v4482_v6 = vsub.s32 4, %v12487_v50  ;;  %v5816_v0 = vclz %v8328_v8  ;;  %v5683_v49 = vsel %vm5677_vm8, %v5680_v40, %v5682_v28  ;;  %v13525_v58 = vsel %vm13414_vm10, %v13017_v33, %v5625_v34 }
 0x711   : > { %v5859_v18 = vand.u32 8388607, %v15935_v57  ;;  %v13519_v17 = vmul.u32.u64.low %v5692_v51, %v5691_v14  ;;  %v13520_v38 = vmul.u32.u64.high %v5692_v51, %v5691_v14, %v13519_v17  ;;  %v5702_v47 = vadd.s32 1, %v13504_v59 }
 0x712   : > { %v8331_v25 = vadd.s32 4294967169, %v5856_v43  ;;  %v4483_v20 = vsel %vm4398_vm7, %v4482_v6, %v12487_v50  ;;  %8965 = vcosq.f32 %v5524_v30  ;;  %v8329_v63 = vadd.s32 4294967294, %v5816_v0  ;;  %v15939_v6 = vld [vmem:[#allocation28_spill] sm:$0xff]  ;;  %v15940_v17 = vld [vmem:[#allocation25_spill] sm:$0xff] }
 0x713   : > { %v5860_v42 = vor.u32 8388608, %v5859_v18  ;;  %v4485_v40 = vsel %vm12683_vm4, 0, %v4483_v20  ;;  %8967 = vsinq.f32 %v5524_v30  ;;  %v5804_v28 = vadd.s32 %v13430_v56, %v13442_v22 }
 0x714   : > { %v5862_v34 = vadd.s32 1, %v8331_v25  ;;  %8969 = vcosq.f32 %v13525_v58  ;;  %vm8330_vm2 = vcmp.lt.s32.totalorder %v8329_v63, 0  ;;  %v5699_v8 = vmul.u32 %v5692_v51, %v5683_v49 }
 0x715   : > { %vm5701_vm7 = vc.u32 %v13520_v38, %v13503_v45  ;;  %v5819_v50 = vsel %vm8330_vm2, 0, %v8329_v63  ;;  %v4489_v15 = vadd.s32 3, %v4485_v40  ;;  %v13541_v56 = vshll.u32 %v5860_v42, 8 }
 0x716   : > { %v5703_v18 = vsel %vm5701_vm7, %v5702_v47, %v13504_v59  ;;  %vm5863_vm13 = vcmp.gt.s32.totalorder %v5862_v34, 0  ;;  %v5820_v30 = vsub.s32 32, %v5819_v50  ;;  %v5824_v57 = vsub.s32 4294967266, %v5819_v50 }
 0x717   : > { %v5704_v14 = vadd.s32 %v5703_v18, %v5699_v8  ;;  %v5864_v22 = vsel %vm5863_vm13, %v5862_v34, 0  ;;  %v4898_v25 = vsub.s32 4, %v15940_v17  ;;  %v5821_v51 = vshll.u32 %v13489_v7, %v5819_v50 }
 0x718   : > { %v5822_v49 = vshrl.u32 %v5804_v28, %v5820_v30  ;;  %v5825_v20 = vadd.s32 127, %v5824_v57  ;;  %v13548_v59 = vadd.s32 %v13503_v45, %v13520_v38  ;;  %v5866_v47 = vand.u32 31, %v5864_v22 }
 0x719   : > { %v5705_v63 = vadd.s32 536870912, %v5704_v14  ;;  %v13550_v2 = vand.u32 3, %v4489_v15  ;;  %v5865_v18 = vshrl.u32 %v5864_v22, 5  ;;  %v4701_v24 = vxor.u32 2147483648, %v12975_v13 }
 0x71a   : > { %v5823_v40 = vor.u32 %v5822_v49, %v5821_v51  ;;  %v5826_v34 = vshll.u32 %v5825_v20, 23  ;;  %v5867_v41 = vsub.s32 32, %v5866_v47  ;;  %v5869_v0 = vshll.u32 %v15607_v4, %v5866_v47 }
 0x71b   : > { %v13553_v8 = vshrl.u32 %v5705_v63, 30  ;;  %v5872_v7 = vshll.u32 %v15612_v5, %v5866_v47  ;;  %v5875_v28 = vshll.u32 %v15613_v21, %v5866_v47  ;;  %v5878_v30 = vshll.u32 %v15599_v52, %v5866_v47 }
 0x71c   : > { %v13558_v50 = vpop.eup %8965  ;;  %v5827_v45 = vor.u32 4788187, %v5826_v34  ;;  %v5830_v38 = vcvt.s32.f32 %v5823_v40  ;;  %v5868_v51 = vshrl.u32 %v15607_v4, %v5867_v41  ;;  %v5870_v22 = vshrl.u32 %v15612_v5, %v5867_v41 }
 0x71d   : > { %15941 = vst [vmem:[#allocation37_spill] sm:$0xff] %v13558_v50  ;;  %v5707_v15 = vshll.u32 %v13553_v8, 30  ;;  %v13562_v57 = vpop.eup %8967  ;;  %v5873_v49 = vshrl.u32 %v15613_v21, %v5867_v41  ;;  %v5876_v20 = vshrl.u32 %v15599_v52, %v5867_v41  ;;  %v5879_v40 = vshrl.u32 %v15600_v23, %v5867_v41 }
 0x71e   : > { %v13568_v63 = vpop.eup %8969  ;;  %v5828_v42 = vand.u32 2147483647, %v5827_v45  ;;  %v5881_v34 = vshll.u32 %v15600_v23, %v5866_v47  ;;  %v5871_v33 = vor.u32 %v5870_v22, %v5869_v0  ;;  %v5882_v4 = vshrl.u32 %v15601_v16, %v5867_v41 }
 0x71f   : > { %v13570_v43 = vsub.s32 %v5704_v14, %v5707_v15  ;;  %v5874_v46 = vor.u32 %v5873_v49, %v5872_v7  ;;  %v5877_v48 = vor.u32 %v5876_v20, %v5875_v28  ;;  %v5880_v21 = vor.u32 %v5879_v40, %v5878_v30 }
 0x720   : > { %v5831_v50 = vmul.f32 %v5830_v38, %v5828_v42  ;;  %vm5884_vm4 = vcmp.lt.s32.totalorder %v5865_v18, 1  ;;  %v5883_v52 = vor.u32 %v5882_v4, %v5881_v34  ;;  %vm5886_vm15 = vcmp.lt.s32.totalorder %v5865_v18, 3 }
 0x721   : > { %v5710_v5 = vsub.s32 0, %v13570_v43  ;;  %vm5887_vm6 = vcmp.lt.s32.totalorder %v5865_v18, 4  ;;  %v5888_v45 = vsel %vm5884_vm4, %v5868_v51, %v5871_v33  ;;  %vm4491_vm8 = vcmp.lt.s32.totalorder %v13550_v2, 2 }
 0x722   : > { %v5832_v14 = vxor.u32 2147483648, %v5831_v50  ;;  %v5889_v47 = vsel %vm5887_vm6, %v5877_v48, 2102212464  ;;  %v5892_v0 = vsel %vm5884_vm4, %v5871_v33, %v5874_v46  ;;  %v5893_v28 = vsel %vm5887_vm6, %v5880_v21, 920167782 }
 0x723   : > { %v8324_v15 = vmin.u32 %v5710_v5, %v13570_v43  ;;  %v5890_v7 = vsel %vm5886_vm15, %v5874_v46, %v5889_v47  ;;  %v5896_v41 = vsel %vm5884_vm4, %v5874_v46, %v5877_v48  ;;  %v5897_v42 = vsel %vm5887_vm6, %v5883_v52, 1326507024 }
 0x724   : > { %vm5885_vm2 = vcmp.lt.s32.totalorder %v5865_v18, 2  ;;  %v5894_v30 = vsel %vm5886_vm15, %v5877_v48, %v5893_v28  ;;  %vm4492_vm7 = vcmp.eq.s32.totalorder %v13550_v2, 0  ;;  %v5898_v51 = vsel %vm5886_vm15, %v5880_v21, %v5897_v42 }
 0x725   : > { %v5712_v38 = vclz %v8324_v15  ;;  %v5895_v4 = vsel %vm5885_vm2, %v5892_v0, %v5894_v30  ;;  %vm4495_vm13 = vcmp.eq.s32.totalorder %v13550_v2, 2  ;;  %v4899_v5 = vsel %vm4814_vm1, %v4898_v25, %v15940_v17  ;;  %v15944_v15 = vld [vmem:[#allocation21_spill] sm:$0xff] }
 0x726   : > { %v5891_v22 = vsel %vm5885_vm2, %v5888_v45, %v5890_v7  ;;  %v5899_v49 = vsel %vm5885_vm2, %v5896_v41, %v5898_v51  ;;  %v15942_v52 = vxor.u32 2147483648, %v12954_v60  ;;  %v5833_v48 = vsel %vm5750_vm0, %v5832_v14, %v5831_v50 }
 0x727   : > { %v8325_v33 = vadd.s32 4294967294, %v5712_v38  ;;  %v13592_v20 = vmul.u32.u64.low %v13541_v56, %v5899_v49  ;;  %v13593_v18 = vmul.u32.u64.high %v13541_v56, %v5899_v49, %v13592_v20  ;;  %vm4488_vm4 = vweird.f32 %v15937_v62 }
 0x728   : > { %v4494_v46 = vsel %vm4492_vm7, %v15939_v6, %v15942_v52  ;;  %v15943_v21 = vxor.u32 2147483648, %v15939_v6  ;;  %v13600_v25 = vmul.u32.u64.low %v13541_v56, %v5895_v4  ;;  %v13601_v40 = vmul.u32.u64.high %v13541_v56, %v5895_v4, %v13600_v25 }
 0x729   : > { %vm8326_vm1 = vcmp.lt.s32.totalorder %v8325_v33, 0  ;;  %v4901_v34 = vsel %vm13053_vm14, 0, %v4899_v5  ;;  %vm4904_vm0 = vweird.f32 %v12591_v61  ;;  %v5907_v45 = vmul.u32 %v13541_v56, %v5891_v22 }
 0x72a   : > { %v4497_v17 = vsel %vm4495_vm13, %v15943_v21, %v12954_v60  ;;  %v5715_v50 = vsel %vm8326_vm1, 0, %v8325_v33  ;;  %v4905_v14 = vadd.s32 3, %v4901_v34  ;;  %v4690_v47 = vsub.s32 4, %v15944_v15 }
 0x72b   : > { %v5716_v0 = vsub.s32 32, %v5715_v50  ;;  %v5720_v7 = vsub.s32 4294967266, %v5715_v50  ;;  %v4498_v60 = vsel %vm4491_vm8, %v4494_v46, %v4497_v17  ;;  %v4912_v6 = vxor.u32 2147483648, %v13135_v53 }
 0x72c   : > { %v5717_v28 = vshll.u32 %v13570_v43, %v5715_v50  ;;  %vm5909_vm15 = vc.u32 %v13593_v18, %v13600_v25  ;;  %v4906_v27 = vand.u32 3, %v4905_v14  ;;  %vm15945_vm14 = vcmp.lt.s32.totalorder %v12349_v55, 0 }
 0x72d   : > { %v4691_v41 = vsel %vm15945_vm14, %v4690_v47, %v15944_v15  ;;  %v5718_v56 = vshrl.u32 %v13548_v59, %v5716_v0  ;;  %v5721_v42 = vadd.s32 127, %v5720_v7  ;;  %v5910_v38 = vadd.s32 1, %v13601_v40  ;;  %v15950_v47 = vld [vmem:[#allocation8_spill] sm:$0xff] }
 0x72e   : > { %v4693_v2 = vsel %vm12856_vm9, 0, %v4691_v41  ;;  %vm4907_vm6 = vcmp.lt.s32.totalorder %v4906_v27, 2  ;;  %vm4908_vm8 = vcmp.eq.s32.totalorder %v4906_v27, 0  ;;  %vm4911_vm2 = vcmp.eq.s32.totalorder %v4906_v27, 2  ;;  %v15953_v41 = vld [vmem:[#allocation9_spill] sm:$0xff] }
 0x72f   : > { %v4697_v30 = vadd.s32 3, %v4693_v2  ;;  %v5719_v43 = vor.u32 %v5718_v56, %v5717_v28  ;;  %v5722_v4 = vshll.u32 %v5721_v42, 23  ;;  %v5911_v51 = vsel %vm5909_vm15, %v5910_v38, %v13601_v40  ;;  %v15952_v28 = vld [vmem:[#allocation16_spill] sm:$0xff]  ;;  %v15954_v38 = vld [vmem:[#allocation7_spill] sm:$0xff] }
 0x730   : > { %v15946_v5 = vxor.u32 2147483648, %v13140_v36  ;;  %vm5646_vm7 = vcmp.lt.s32.totalorder %v13338_v11, 0  ;;  %v5912_v59 = vadd.s32 %v5911_v51, %v5907_v45  ;;  %v4913_v22 = vsel %vm4911_vm2, %v4912_v6, %v13140_v36 }
 0x731   : > { %v4698_v49 = vand.u32 3, %v4697_v30  ;;  %v15947_v52 = vand.u32 2147483647, %v13338_v11  ;;  %v5723_v20 = vor.u32 4788187, %v5722_v4  ;;  %v4499_v21 = vsel %vm4488_vm4, nan, %v4498_v60 }
 0x732   : > { %v4910_v33 = vsel %vm4908_vm8, %v13135_v53, %v15946_v5  ;;  %v4704_v17 = vxor.u32 2147483648, %v12968_v3  ;;  %v5726_v40 = vcvt.s32.f32 %v5719_v43  ;;  %v5913_v34 = vadd.s32 536870912, %v5912_v59 }
 0x733   : > { %vm13629_vm9 = vcmp.le.f32.partialorder %v15947_v52, 0.7853982  ;;  %v4914_v53 = vsel %vm4907_vm6, %v4910_v33, %v4913_v22  ;;  %vm4700_vm13 = vcmp.eq.s32.totalorder %v4698_v49, 0  ;;  %v5724_v50 = vand.u32 2147483647, %v5723_v20  ;;  %v15955_v33 = vld [vmem:[#allocation18_spill] sm:$0xff] }
 0x734   : > { %v4915_v36 = vsel %vm4904_vm0, nan, %v4914_v53  ;;  %v4702_v14 = vsel %vm4700_vm13, %v12968_v3, %v4701_v24  ;;  %vm4703_vm1 = vcmp.eq.s32.totalorder %v4698_v49, 2  ;;  %8971 = vsinq.f32 %v13525_v58  ;;  %v15957_v24 = vld [vmem:[#allocation24_spill] sm:$0xff] }
 0x735   : > { %v8455_v45 = vpack.c.bf16 %v4915_v36, %v4499_v21  ;;  %v13641_v15 = vshrl.u32 %v5913_v34, 30  ;;  %v4705_v62 = vsel %vm4703_vm1, %v4704_v17, %v12975_v13  ;;  %v5106_v0 = vsub.s32 4, %v15950_v47  ;;  %v15958_v21 = vld [vmem:[#allocation26_spill] sm:$0xff] }
 0x736   : > { %v13648_v7 = vsel %vm13485_vm3, %v13265_v1, %v5833_v48  ;;  %v5727_v61 = vmul.f32 %v5726_v40, %v5724_v50  ;;  %vm4696_vm4 = vweird.f32 %v12349_v55  ;;  %vm4699_vm0 = vcmp.lt.s32.totalorder %v4698_v49, 2  ;;  %v15956_v49 = vld [vmem:[#allocation17_spill] sm:$0xff] }
 0x737   : > { %8456 = vmatprep.subr.bf16.mxu0 %v8455_v45  ;;  %v13652_v3 = vadd.s32 %v13600_v25, %v13593_v18  ;;  %v5915_v58 = vshll.u32 %v13641_v15, 30  ;;  %v4706_v60 = vsel %vm4699_vm0, %v4702_v14, %v4705_v62  ;;  %vm15951_vm15 = vcmp.lt.s32.totalorder %v12730_v26, 0  ;;  %v15959_v45 = vld [vmem:[#allocation11_spill] sm:$0xff] }
 0x738   : > { %v5107_v13 = vsel %vm15951_vm15, %v5106_v0, %v15950_v47  ;;  %v5728_v6 = vxor.u32 2147483648, %v5727_v61  ;;  %vm5112_vm14 = vweird.f32 %v12730_v26  ;;  %v4386_v27 = vand.u32 3, %v15952_v28 }
 0x739   : > { %v5109_v48 = vsel %vm13189_vm5, 0, %v5107_v13  ;;  %v4389_v56 = vxor.u32 2147483648, %v15953_v41  ;;  %v13663_v42 = vsub.s32 %v5912_v59, %v5915_v58  ;;  %v5117_v25 = vxor.u32 2147483648, %v13376_v35  ;;  %v15961_v13 = vld [vmem:[#allocation29_spill] sm:$0xff] }
 0x73a   : > { %v5113_v18 = vadd.s32 3, %v5109_v48  ;;  %v4392_v2 = vxor.u32 2147483648, %v15954_v38  ;;  %v5729_v30 = vsel %vm5646_vm7, %v5728_v6, %v5727_v61  ;;  %v4707_v37 = vsel %vm4696_vm4, nan, %v4706_v60  ;;  %v15962_v6 = vld [vmem:[#allocation10_spill] sm:$0xff] }
 0x73b   : > { %v5120_v43 = vxor.u32 2147483648, %v13368_v10  ;;  %vm4388_vm5 = vcmp.eq.s32.totalorder %v4386_v27, 0  ;;  %v5732_v4 = vsel %vm13629_vm9, %v13338_v11, %v5729_v30  ;;  %v5918_v51 = vsub.s32 0, %v13663_v42  ;;  %v15963_v30 = vld [vmem:[#allocation34_spill] sm:$0xff] }
 0x73c   : > { %v5114_v5 = vand.u32 3, %v5113_v18  ;;  %vm4384_vm6 = vweird.f32 %v15955_v33  ;;  %vm4391_vm8 = vcmp.eq.s32.totalorder %v4386_v27, 2  ;;  %v4390_v59 = vsel %vm4388_vm5, %v15954_v38, %v4389_v56 }
 0x73d   : > { %v4393_v22 = vsel %vm4391_vm8, %v4392_v2, %v15953_v41  ;;  %v4802_v55 = vand.u32 3, %v15956_v49  ;;  %v4805_v52 = vxor.u32 2147483648, %v15957_v24  ;;  %v8332_v20 = vmin.u32 %v5918_v51, %v13663_v42 }
 0x73e   : > { %vm5116_vm2 = vcmp.eq.s32.totalorder %v5114_v5, 0  ;;  %vm4387_vm13 = vcmp.lt.s32.totalorder %v4386_v27, 2  ;;  %vm4800_vm1 = vweird.f32 %v15958_v21  ;;  %8973 = vsinq.f32 %v5732_v4  ;;  %v13684_v17 = vpop.eup %8971 }
 0x73f   : > { %vm5115_vm4 = vcmp.lt.s32.totalorder %v5114_v5, 2  ;;  %v5118_v53 = vsel %vm5116_vm2, %v13368_v10, %v5117_v25  ;;  %vm5119_vm0 = vcmp.eq.s32.totalorder %v5114_v5, 2  ;;  %v5920_v40 = vclz %v8332_v20  ;;  %v15960_v10 = vld [vmem:[#allocation12_spill] sm:$0xff] }
 0x740   : > { %v5121_v34 = vsel %vm5119_vm0, %v5120_v43, %v13376_v35  ;;  %v4394_v36 = vsel %vm4387_vm13, %v4390_v59, %v4393_v22  ;;  %vm4804_vm15 = vcmp.eq.s32.totalorder %v4802_v55, 0  ;;  %vm4803_vm5 = vcmp.lt.s32.totalorder %v4802_v55, 2  ;;  %v15964_v43 = vld [vmem:[#allocation43_spill] sm:$0xff] }
 0x741   : > { %v5122_v50 = vsel %vm5115_vm4, %v5118_v53, %v5121_v34  ;;  %v4806_v14 = vsel %vm4804_vm15, %v15959_v45, %v4805_v52  ;;  %v4808_v62 = vxor.u32 2147483648, %v15959_v45  ;;  %v8333_v47 = vadd.s32 4294967294, %v5920_v40  ;;  %v15965_v59 = vld [vmem:[#allocation31_spill] sm:$0xff]  ;;  %v15968_v40 = vld [vmem:[#allocation22_spill] sm:$0xff] }
 0x742   : > { %v5123_v0 = vsel %vm5112_vm14, nan, %v5122_v50  ;;  %vm4807_vm8 = vcmp.eq.s32.totalorder %v4802_v55, 2  ;;  %v4594_v61 = vand.u32 3, %v15960_v10  ;;  %v4597_v35 = vxor.u32 2147483648, %v15961_v13 }
 0x743   : > { %v8463_v58 = vpack.c.bf16 %v5123_v0, %v4707_v37  ;;  %v4809_v60 = vsel %vm4807_vm8, %v4808_v62, %v15957_v24  ;;  %v4600_v48 = vxor.u32 2147483648, %v15962_v6  ;;  %8975 = vcosq.f32 %v5732_v4 }
 0x744   : > { %vm8334_vm2 = vcmp.lt.s32.totalorder %v8333_v47, 0  ;;  %v4810_v28 = vsel %vm4803_vm5, %v4806_v14, %v4809_v60  ;;  %vm4596_vm13 = vcmp.eq.s32.totalorder %v4594_v61, 0  ;;  %v4395_v26 = vsel %vm4384_vm6, nan, %v4394_v36 }
 0x745   : > { %v5923_v27 = vsel %vm8334_vm2, 0, %v8333_v47  ;;  %8464 = vmatprep.subr.bf16.mxu1 %v8463_v58  ;;  %v4811_v41 = vsel %vm4800_vm1, nan, %v4810_v28  ;;  %v4598_v56 = vsel %vm4596_vm13, %v15962_v6, %v4597_v35  ;;  %vm4599_vm14 = vcmp.eq.s32.totalorder %v4594_v61, 2 }
 0x746   : > { %v5924_v18 = vsub.s32 32, %v5923_v27  ;;  %v5928_v25 = vsub.s32 4294967266, %v5923_v27  ;;  %v8457_v38 = vpack.c.bf16 %v4811_v41, %v4395_v26  ;;  %vm4595_vm4 = vcmp.lt.s32.totalorder %v4594_v61, 2 }
 0x747   : > { %v4601_v2 = vsel %vm4599_vm14, %v4600_v48, %v15961_v13  ;;  %v5010_v37 = vand.u32 3, %v15963_v30  ;;  %v5013_v4 = vxor.u32 2147483648, %v15964_v43  ;;  %v5925_v51 = vshll.u32 %v13663_v42, %v5923_v27  ;;  %v15966_v42 = vld [vmem:[#allocation15_spill] sm:$0xff] }
 0x748   : > { %v5926_v5 = vshrl.u32 %v13652_v3, %v5924_v18  ;;  %v5929_v33 = vadd.s32 127, %v5928_v25  ;;  %8458 = vmatpush1.bf16.msra.mxu0 %v8457_v38  ;;  %v5016_v22 = vxor.u32 2147483648, %v15965_v59  ;;  %v13706_v49 = vpop.eup %8973  ;;  %v4602_v55 = vsel %vm4595_vm4, %v4598_v56, %v4601_v2  ;;  %v15967_v3 = vld [vmem:[#allocation19_spill] sm:$0xff] }
 0x749   : > { %vm5011_vm6 = vcmp.lt.s32.totalorder %v5010_v37, 2  ;;  %vm5012_vm1 = vcmp.eq.s32.totalorder %v5010_v37, 0  ;;  %vm5015_vm0 = vcmp.eq.s32.totalorder %v5010_v37, 2  ;;  %vm5854_vm15 = vcmp.lt.s32.totalorder %v13366_v54, 0 }
 0x74a   : > { %v5927_v24 = vor.u32 %v5926_v5, %v5925_v51  ;;  %v5930_v52 = vshll.u32 %v5929_v33, 23  ;;  %v5014_v20 = vsel %vm5012_vm1, %v15965_v59, %v5013_v4  ;;  %v5017_v21 = vsel %vm5015_vm0, %v5016_v22, %v15964_v43  ;;  %v15974_v5 = vld [vmem:[#allocation37_spill] sm:$0xff] }
 0x74b   : > { %vm4592_vm5 = vweird.f32 %v15966_v42  ;;  %vm5008_vm8 = vweird.f32 %v15967_v3  ;;  %v5018_v53 = vsel %vm5011_vm6, %v5014_v20, %v5017_v21  ;;  %v5314_v34 = vsub.s32 4, %v15968_v40  ;;  %v15975_v21 = vld [vmem:[#allocation42_spill] sm:$0xff]  ;;  %v15976_v3 = vld [vmem:[#allocation41_spill] sm:$0xff] }
 0x74c   : > { %8977 = vcosq.f32 %v13648_v7  ;;  %v15969_v36 = vand.u32 2147483647, %v13366_v54  ;;  %v5931_v45 = vor.u32 4788187, %v5930_v52  ;;  %v4603_v14 = vsel %vm4592_vm5, nan, %v4602_v55 }
 0x74d   : > { %v5019_v62 = vsel %vm5008_vm8, nan, %v5018_v53  ;;  %8979 = vsinq.f32 %v13648_v7  ;;  %vm15972_vm13 = vcmp.lt.s32.totalorder %v13003_v31, 0  ;;  %v5730_v10 = vsub.s32 4, %v13553_v8  ;;  %v8976_v61 = vpop.eup %8975 }
 0x74e   : > { %vm13717_vm2 = vcmp.le.f32.partialorder %v15969_v36, 0.7853982  ;;  %v8465_v47 = vpack.c.bf16 %v5019_v62, %v4603_v14  ;;  %v5315_v0 = vsel %vm15972_vm13, %v5314_v34, %v15968_v40  ;;  %v5932_v58 = vand.u32 2147483647, %v5931_v45  ;;  %v15978_v34 = vld [vmem:[#allocation14_spill] sm:$0xff] }
 0x74f   : > { %v5934_v60 = vcvt.s32.f32 %v5927_v24  ;;  %v5317_v13 = vsel %vm13305_vm11, 0, %v5315_v0  ;;  %v5325_v35 = vxor.u32 2147483648, %v13479_v12  ;;  %v5328_v48 = vxor.u32 2147483648, %v13410_v32  ;;  %v8336_v40 = vld [vmem:[%s15351_s3 + $0x48] sm:$0xff] }
 0x750   : > { %8466 = vmatpush1.bf16.msra.mxu1 %v8465_v47  ;;  %v5321_v6 = vadd.s32 3, %v5317_v13  ;;  %v5731_v7 = vsel %vm5646_vm7, %v5730_v10, %v13553_v8  ;;  %v5522_v28 = vsub.s32 4, %v13277_v19  ;;  %vm5320_vm14 = vweird.f32 %v13003_v31 }
 0x751   : > { %v5935_v27 = vmul.f32 %v5934_v60, %v5932_v58  ;;  %v5733_v26 = vsel %vm13629_vm9, 0, %v5731_v7  ;;  %vm5736_vm11 = vweird.f32 %v13338_v11  ;;  %v5741_v44 = vxor.u32 2147483648, %v13706_v49  ;;  %v15982_v58 = vld [vmem:[#allocation32_spill] sm:$0xff]  ;;  %v15983_v60 = vld [vmem:[#allocation39_spill] sm:$0xff] }
 0x752   : > { %v5322_v41 = vand.u32 3, %v5321_v6  ;;  %v5737_v56 = vadd.s32 3, %v5733_v26  ;;  %v5744_v18 = vxor.u32 2147483648, %v8976_v61  ;;  %vm15973_vm4 = vcmp.lt.s32.totalorder %v13010_v39, 0  ;;  %v15984_v7 = vld [vmem:[#allocation23_spill] sm:$0xff] }
 0x753   : > { %v5523_v25 = vsel %vm15973_vm4, %v5522_v28, %v13277_v19  ;;  %v5936_v8 = vxor.u32 2147483648, %v5935_v27  ;;  %v5533_v2 = vxor.u32 2147483648, %v13562_v57  ;;  %v5938_v46 = vsub.s32 4, %v13641_v15 }
 0x754   : > { %v5525_v38 = vsel %vm13464_vm12, 0, %v5523_v25  ;;  %vm5323_vm7 = vcmp.lt.s32.totalorder %v5322_v41, 2  ;;  %vm5324_vm9 = vcmp.eq.s32.totalorder %v5322_v41, 0  ;;  %vm5327_vm6 = vcmp.eq.s32.totalorder %v5322_v41, 2  ;;  %v15985_v25 = vld [vmem:[#allocation30_spill] sm:$0xff] }
 0x755   : > { %v5738_v30 = vand.u32 3, %v5737_v56  ;;  %v5937_v37 = vsel %vm5854_vm15, %v5936_v8, %v5935_v27  ;;  %v5326_v43 = vsel %vm5324_vm9, %v13410_v32, %v5325_v35  ;;  %v5329_v4 = vsel %vm5327_vm6, %v5328_v48, %v13479_v12 }
 0x756   : > { %v5529_v19 = vadd.s32 3, %v5525_v38  ;;  %v5940_v29 = vsel %vm13717_vm2, %v13366_v54, %v5937_v37  ;;  %v5330_v51 = vsel %vm5323_vm7, %v5326_v43, %v5329_v4  ;;  %v5536_v33 = vxor.u32 2147483648, %v15974_v5  ;;  %v13754_v59 = vpop.eup %8977  ;;  %v15986_v38 = vld [vmem:[#allocation38_spill] sm:$0xff]  ;;  %v15987_v43 = vld [vmem:[#allocation36_spill] sm:$0xff] }
 0x757   : > { %vm5740_vm12 = vcmp.eq.s32.totalorder %v5738_v30, 0  ;;  %8981 = vcosq.f32 %v5940_v29  ;;  %vm5739_vm1 = vcmp.lt.s32.totalorder %v5738_v30, 2  ;;  %vm5743_vm0 = vcmp.eq.s32.totalorder %v5738_v30, 2  ;;  %v13756_v55 = vpop.eup %8979 }
 0x758   : > { %v5742_v22 = vsel %vm5740_vm12, %v8976_v61, %v5741_v44  ;;  %8983 = vsinq.f32 %v5940_v29  ;;  %v5745_v32 = vsel %vm5743_vm0, %v5744_v18, %v13706_v49  ;;  %v5530_v12 = vand.u32 3, %v5529_v19  ;;  %v15980_v49 = vld [vmem:[#allocation40_spill] sm:$0xff] }
 0x759   : > { %v5939_v24 = vsel %vm5854_vm15, %v5938_v46, %v13641_v15  ;;  %v5746_v52 = vsel %vm5739_vm1, %v5742_v22, %v5745_v32  ;;  %v5218_v42 = vand.u32 3, %v15975_v21  ;;  %v5221_v53 = vxor.u32 2147483648, %v15976_v3 }
 0x75a   : > { %v5941_v20 = vsel %vm13717_vm2, 0, %v5939_v24  ;;  %v15979_v36 = vsel %vm13414_vm10, 0, %v15978_v34  ;;  %v15981_v14 = vsel %vm13485_vm3, 0, %v15980_v49  ;;  %v5331_v15 = vsel %vm5320_vm14, nan, %v5330_v51 }
 0x75b   : > { %v5633_v45 = vadd.s32 3, %v15979_v36  ;;  %v5841_v62 = vadd.s32 3, %v15981_v14  ;;  %v5747_v50 = vsel %vm5736_vm11, nan, %v5746_v52  ;;  %vm5532_vm15 = vcmp.eq.s32.totalorder %v5530_v12, 0 }
 0x75c   : > { %v8459_v47 = vpack.c.bf16 %v5747_v50, %v5331_v15  ;;  %vm5535_vm5 = vcmp.eq.s32.totalorder %v5530_v12, 2  ;;  %v5945_v0 = vadd.s32 3, %v5941_v20  ;;  %v5534_v10 = vsel %vm5532_vm15, %v15974_v5, %v5533_v2 }
 0x75d   : > { %v5537_v61 = vsel %vm5535_vm5, %v5536_v33, %v13562_v57  ;;  %vm5216_vm10 = vweird.f32 %v15982_v58  ;;  %vm5220_vm8 = vcmp.eq.s32.totalorder %v5218_v42, 0  ;;  %vm5531_vm3 = vcmp.lt.s32.totalorder %v5530_v12, 2  ;;  %v8335_v12 = vld [vmem:[%s15351_s3 + $0x40] sm:$0xff] }
 0x75e   : > { %8460 = vmatprep.subr.bf16.mxu0 %v8459_v47  ;;  %v5946_v9 = vand.u32 3, %v5945_v0  ;;  %v5222_v31 = vsel %vm5220_vm8, %v15983_v60, %v5221_v53  ;;  %v5224_v13 = vxor.u32 2147483648, %v15983_v60  ;;  %vm5528_vm2 = vweird.f32 %v13010_v39  ;;  %v15989_v53 = vld [vmem:[#allocation13_spill] sm:$0xff] }
 0x75f   : > { %vm5944_vm13 = vweird.f32 %v13366_v54  ;;  %vm5223_vm14 = vcmp.eq.s32.totalorder %v5218_v42, 2  ;;  %v5634_v11 = vand.u32 3, %v5633_v45  ;;  %v5637_v35 = vxor.u32 2147483648, %v13684_v17  ;;  %v13839_v45 = vpop.permute.xlu0 %5968 }
 0x760   : > { %v5640_v57 = vxor.u32 2147483648, %v13568_v63  ;;  %v5538_v6 = vsel %vm5531_vm3, %v5534_v10, %v5537_v61  ;;  %vm5219_vm11 = vcmp.lt.s32.totalorder %v5218_v42, 2  ;;  %v5225_v48 = vsel %vm5223_vm14, %v5224_v13, %v15976_v3 }
 0x761   : > { %vm5632_vm4 = vweird.f32 %v15984_v7  ;;  %vm5947_vm7 = vcmp.lt.s32.totalorder %v5946_v9, 2  ;;  %v5226_v28 = vsel %vm5219_vm11, %v5222_v31, %v5225_v48  ;;  %vm5636_vm9 = vcmp.eq.s32.totalorder %v5634_v11, 0  ;;  %v8982_v27 = vpop.eup %8981 }
 0x762   : > { %vm5639_vm6 = vcmp.eq.s32.totalorder %v5634_v11, 2  ;;  %vm5951_vm12 = vcmp.eq.s32.totalorder %v5946_v9, 2  ;;  %vm5635_vm1 = vcmp.lt.s32.totalorder %v5634_v11, 2  ;;  %v5638_v26 = vsel %vm5636_vm9, %v13568_v63, %v5637_v35  ;;  %v8984_v41 = vpop.eup %8983 }
 0x763   : > { %v5641_v44 = vsel %vm5639_vm6, %v5640_v57, %v13684_v17  ;;  %v5952_v56 = vxor.u32 2147483648, %v8982_v27  ;;  %v5426_v8 = vand.u32 3, %v15985_v25  ;;  %v5429_v2 = vxor.u32 2147483648, %v15986_v38 }
 0x764   : > { %v5642_v18 = vsel %vm5635_vm1, %v5638_v26, %v5641_v44  ;;  %v5949_v46 = vxor.u32 2147483648, %v8984_v41  ;;  %v5227_v30 = vsel %vm5216_vm10, nan, %v5226_v28  ;;  %v5432_v4 = vxor.u32 2147483648, %v15987_v43 }
 0x765   : > { %v5643_v37 = vsel %vm5632_vm4, nan, %v5642_v18  ;;  %vm5948_vm0 = vcmp.eq.s32.totalorder %v5946_v9, 0  ;;  %v5953_v63 = vsel %vm5951_vm12, %v5952_v56, %v8984_v41  ;;  %vm5428_vm15 = vcmp.eq.s32.totalorder %v5426_v8, 0 }
 0x766   : > { %v8461_v19 = vpack.c.bf16 %v5643_v37, %v5227_v30  ;;  %v5950_v17 = vsel %vm5948_vm0, %v8982_v27, %v5949_v46  ;;  %v5430_v29 = vsel %vm5428_vm15, %v15987_v43, %v5429_v2  ;;  %vm5431_vm5 = vcmp.eq.s32.totalorder %v5426_v8, 2 }
 0x767   : > { %v5842_v51 = vand.u32 3, %v5841_v62  ;;  %v5954_v5 = vsel %vm5947_vm7, %v5950_v17, %v5953_v63  ;;  %v5433_v33 = vsel %vm5431_vm5, %v5432_v4, %v15986_v38  ;;  %v5845_v22 = vxor.u32 2147483648, %v13756_v55 }
 0x768   : > { %8462 = vmatpush1.bf16.msra.mxu0 %v8461_v19  ;;  %v5848_v32 = vxor.u32 2147483648, %v13754_v59  ;;  %v5539_v24 = vsel %vm5528_vm2, nan, %v5538_v6  ;;  %v5955_v52 = vsel %vm5944_vm13, nan, %v5954_v5  ;;  %vm5427_vm10 = vcmp.lt.s32.totalorder %v5426_v8, 2 }
 0x769   : > { %vm5844_vm8 = vcmp.eq.s32.totalorder %v5842_v51, 0  ;;  %v8467_v20 = vpack.c.bf16 %v5955_v52, %v5539_v24  ;;  %v5434_v21 = vsel %vm5427_vm10, %v5430_v29, %v5433_v33  ;;  %vm5847_vm3 = vcmp.eq.s32.totalorder %v5842_v51, 2 }
 0x76a   : > { %v5846_v42 = vsel %vm5844_vm8, %v13754_v59, %v5845_v22  ;;  %vm5843_vm14 = vcmp.lt.s32.totalorder %v5842_v51, 2  ;;  %v5849_v3 = vsel %vm5847_vm3, %v5848_v32, %v13756_v55  ;;  %vm15988_vm11 = vcmask 261120   ;;  %v8337_v55 = vld [vmem:[%s15351_s3 + $0x50] sm:$0xff] }
 0x76b   : > { %8343 = vmatmul.mubr.msk.f32.vlgmr.msra.gmra.mrb[24].mxu0 %vm15988_vm11, %v8335_v12  ;;  %8468 = vmatprep.subr.bf16.mxu1 %v8467_v20  ;;  %vm5424_vm4 = vweird.f32 %v15989_v53  ;;  %vm5840_vm2 = vweird.f32 %v13265_v1  ;;  %v5850_v39 = vsel %vm5843_vm14, %v5846_v42, %v5849_v3  ;;  %v15990_v54 = vmov 0.0   ;;  %vm15991_vm13 = vmmov %vm15988_vm11  ;;  %v8338_v1 = vld [vmem:[%s15351_s3 + $0x58] sm:$0xff] }
 0x76c   : > { %6068 = vmatprep.mubr.f32.mxu0 %v15990_v54  ;;  %v5435_v34 = vsel %vm5424_vm4, nan, %v5434_v21  ;;  %v5851_v59 = vsel %vm5840_vm2, nan, %v5850_v39  ;;  %vm15992_vm7 = vmmov %vm15988_vm11  ;;  %v16000_v4 = vmov 683565275   ;;  %v16001_v19 = vmov 2475754826  }
 0x76d   : > { %v8469_v36 = vpack.c.bf16 %v5851_v59, %v5435_v34  ;;  %vm15993_vm9 = vmmov %vm15992_vm7  ;;  %v16002_v29 = vmov 2131351028   ;;  %v16003_v5 = vmov 2102212464  }
 0x76e   : > { %vm15994_vm6 = vmmov %vm15992_vm7 }
 0x76f   : > { %8344 = vmatmul.mubr.msk.f32.gmra.mrb[26].mxu0 %vm15991_vm13, %v8336_v40  ;;  %8470 = vmatpush1.bf16.msra.mxu1 %v8469_v36  ;;  %vm15995_vm12 = vmmov %vm15994_vm6 }
 0x770   : > { %6074 = vmatprep.mubr.f32.mxu0 %v15990_v54  ;;  %vm15996_vm1 = vmmov %vm15994_vm6 }
 0x771   : > { %vm15997_vm0 = vmmov %vm15996_vm1 }
 0x772   : > { %8347 = vmatmul.mubr.msk.f32.vlgmr.msra.gmra.mrb[24].mxu1 %vm15992_vm7, %v8335_v12 }
 0x773   : > { %8345 = vmatmul.mubr.msk.f32.gmra.mrb[28].mxu0 %vm15993_vm9, %v8337_v55  ;;  %6157 = vmatprep.mubr.f32.mxu1 %v15990_v54 }
 0x774   : > { %6080 = vmatprep.mubr.f32.mxu0 %v15990_v54 }
 0x776   : > { %8348 = vmatmul.mubr.msk.f32.gmra.mrb[26].mxu1 %vm15994_vm6, %v8336_v40 }
 0x777   : > { %8346 = vmatmul.mubr.msk.f32.gmra.mrb[30].mxu0 %vm15995_vm12, %v8338_v1  ;;  %6163 = vmatprep.mubr.f32.mxu1 %v15990_v54 }
 0x778   : > { %7918 = vmatprep.mubr.f32.mxu0 %v15990_v54 }
 0x77a   : > { %8349 = vmatmul.mubr.msk.f32.gmra.mrb[28].mxu1 %vm15996_vm1, %v8337_v55 }
 0x77b   : > { %6169 = vmatprep.mubr.f32.mxu1 %v15990_v54 }
 0x77e   : > { %8350 = vmatmul.mubr.msk.f32.gmra.mrb[30].mxu1 %vm15997_vm0, %v8338_v1 }
 0x77f   : > { %7989 = vmatprep.mubr.f32.mxu1 %v15990_v54 }
 0x83e   : > { %v6064_v49 = vpop.f32.mrb[24].mxu0 }
 0x83f   : > { %v13842_v14 = vadd.f32 %v6064_v49, %v13839_v45  ;;  %v6066_v62 = vpop.f32.mrb[25].mxu0 }
 0x840   : > { %v13845_v15 = vadd.f32 %v6066_v62, %v13839_v45 }
 0x841   : > { %15998 = vst [vmem:[#allocation27_spill] sm:$0xff] %v13842_v14  ;;  %v6176_v50 = vand.u32 2147483647, %v13842_v14  ;;  %v6179_v47 = vand.u32 2139095040, %v13842_v14 }
 0x842   : > { %v6283_v0 = vand.u32 2139095040, %v13845_v15  ;;  %v13850_v10 = vpop.f32.mrb[26].mxu0  ;;  %v6280_v60 = vand.u32 2147483647, %v13845_v15 }
 0x843   : > { %v6180_v61 = vshrl.u32 %v6179_v47, 23  ;;  %v13852_v58 = vpop.f32.mrb[27].mxu0  ;;  %v6183_v9 = vand.u32 8388607, %v6176_v50 }
 0x844   : > { %v6284_v31 = vshrl.u32 %v6283_v0, 23  ;;  %v6287_v28 = vand.u32 8388607, %v6280_v60 }
 0x845   : > { %v8351_v13 = vadd.s32 4294967169, %v6180_v61  ;;  %v6153_v11 = vpop.f32.mrb[24].mxu1  ;;  %v6184_v7 = vor.u32 8388608, %v6183_v9 }
 0x846   : > { %v8355_v35 = vadd.s32 4294967169, %v6284_v31  ;;  %v13858_v6 = vadd.f32 %v6153_v11, %v13839_v45  ;;  %v13860_v48 = vpop.f32.mrb[25].mxu1  ;;  %v6288_v2 = vor.u32 8388608, %v6287_v28  ;;  %v13885_v42 = vpop.f32.mrb[28].mxu0 }
 0x847   : > { %v6186_v57 = vadd.s32 1, %v8351_v13  ;;  %v13870_v38 = vshll.u32 %v6184_v7, 8 }
 0x848   : > { %15999 = vst [vmem:[#allocation20_spill] sm:$0xff] %v13858_v6  ;;  %v6290_v27 = vadd.s32 1, %v8355_v35  ;;  %v6384_v26 = vand.u32 2147483647, %v13858_v6  ;;  %v6387_v44 = vand.u32 2139095040, %v13858_v6 }
 0x849   : > { %vm6187_vm15 = vcmp.gt.s32.totalorder %v6186_v57, 0  ;;  %v13866_v56 = vpop.f32.mrb[26].mxu1 }
 0x84a   : > { %v6188_v41 = vsel %vm6187_vm15, %v6186_v57, 0  ;;  %vm6291_vm5 = vcmp.gt.s32.totalorder %v6290_v27, 0  ;;  %v13868_v25 = vpop.f32.mrb[27].mxu1  ;;  %v6388_v30 = vshrl.u32 %v6387_v44, 23  ;;  %v6391_v37 = vand.u32 8388607, %v6384_v26  ;;  %v13896_v44 = vpop.permute.xlu1 %5973 }
 0x84b   : > { %v6190_v18 = vand.u32 31, %v6188_v41  ;;  %v6189_v8 = vshrl.u32 %v6188_v41, 5  ;;  %v6292_v43 = vsel %vm6291_vm5, %v6290_v27, 0 }
 0x84c   : > { %v8359_v54 = vadd.s32 4294967169, %v6388_v30  ;;  %v6392_v31 = vor.u32 8388608, %v6391_v37  ;;  %v13904_v30 = vadd.f32 %v13860_v48, %v13839_v45  ;;  %v13908_v37 = vadd.f32 %v13850_v10, %v13896_v44 }
 0x84d   : > { %v6191_v46 = vsub.s32 32, %v6190_v18  ;;  %v6193_v63 = vshll.u32 %v16000_v4, %v6190_v18  ;;  %v6196_v17 = vshll.u32 %v16001_v19, %v6190_v18  ;;  %v6199_v51 = vshll.u32 %v16002_v29, %v6190_v18 }
 0x84e   : > { %v6202_v33 = vshll.u32 %v16003_v5, %v6190_v18  ;;  %v6205_v24 = vshll.u32 %v15600_v23, %v6190_v18  ;;  %vm6208_vm10 = vcmp.lt.s32.totalorder %v6189_v8, 1  ;;  %vm6210_vm8 = vcmp.lt.s32.totalorder %v6189_v8, 3  ;;  %16004 = vst [vmem:[#allocation33_spill] sm:$0xff] %v13904_v30  ;;  %16005 = vst [vmem:[#allocation28_spill] sm:$0xff] %v13908_v37 }
 0x84f   : > { %v6194_v22 = vshrl.u32 %v16001_v19, %v6191_v46  ;;  %v6197_v32 = vshrl.u32 %v16002_v29, %v6191_v46  ;;  %v6200_v12 = vshrl.u32 %v16003_v5, %v6191_v46  ;;  %v6192_v52 = vshrl.u32 %v16000_v4, %v6191_v46 }
 0x850   : > { %v6203_v20 = vshrl.u32 %v15600_v23, %v6191_v46  ;;  %v6206_v21 = vshrl.u32 %v15601_v16, %v6191_v46  ;;  %vm6211_vm3 = vcmp.lt.s32.totalorder %v6189_v8, 4  ;;  %v6394_v0 = vadd.s32 1, %v8359_v54 }
 0x851   : > { %v6195_v3 = vor.u32 %v6194_v22, %v6193_v63  ;;  %v6198_v53 = vor.u32 %v6197_v32, %v6196_v17  ;;  %v6201_v39 = vor.u32 %v6200_v12, %v6199_v51  ;;  %vm6209_vm14 = vcmp.lt.s32.totalorder %v6189_v8, 2 }
 0x852   : > { %v6204_v40 = vor.u32 %v6203_v20, %v6202_v33  ;;  %v6207_v34 = vor.u32 %v6206_v21, %v6205_v24  ;;  %vm6395_vm11 = vcmp.gt.s32.totalorder %v6394_v0, 0  ;;  %v13898_v18 = vand.u32 31, %v6292_v43 }
 0x853   : > { %v6212_v59 = vsel %vm6208_vm10, %v6192_v52, %v6195_v3  ;;  %v6213_v36 = vsel %vm6211_vm3, %v6201_v39, 2102212464  ;;  %v6216_v55 = vsel %vm6208_vm10, %v6195_v3, %v6198_v53  ;;  %v6220_v1 = vsel %vm6208_vm10, %v6198_v53, %v6201_v39 }
 0x854   : > { %v6214_v49 = vsel %vm6210_vm8, %v6198_v53, %v6213_v36  ;;  %v6217_v62 = vsel %vm6211_vm3, %v6204_v40, 920167782  ;;  %v6221_v47 = vsel %vm6211_vm3, %v6207_v34, 1326507024  ;;  %v6396_v41 = vsel %vm6395_vm11, %v6394_v0, 0 }
 0x855   : > { %v6218_v61 = vsel %vm6210_vm8, %v6201_v39, %v6217_v62  ;;  %v6222_v9 = vsel %vm6210_vm8, %v6204_v40, %v6221_v47  ;;  %v6215_v13 = vsel %vm6209_vm14, %v6212_v59, %v6214_v49  ;;  %v6398_v8 = vand.u32 31, %v6396_v41 }
 0x856   : > { %v6219_v11 = vsel %vm6209_vm14, %v6216_v55, %v6218_v61  ;;  %v6223_v35 = vsel %vm6209_vm14, %v6220_v1, %v6222_v9  ;;  %v13900_v46 = vshll.u32 %v6288_v2, 8  ;;  %v6231_v63 = vmul.u32 %v13870_v38, %v6215_v13  ;;  %v13933_v55 = vpop.f32.mrb[28].mxu1 }
 0x857   : > { %v13888_v57 = vmul.u32.u64.low %v13870_v38, %v6223_v35  ;;  %v13889_v7 = vmul.u32.u64.high %v13870_v38, %v6223_v35, %v13888_v57  ;;  %v13892_v28 = vmul.u32.u64.low %v13870_v38, %v6219_v11  ;;  %v13893_v27 = vmul.u32.u64.high %v13870_v38, %v6219_v11, %v13892_v28 }
 0x858   : > { %v6397_v17 = vshrl.u32 %v6396_v41, 5  ;;  %v13911_v51 = vshll.u32 %v6392_v31, 8  ;;  %v13913_v33 = vshrl.u32 %v6292_v43, 5  ;;  %v6399_v22 = vsub.s32 32, %v6398_v8 }
 0x859   : > { %vm6233_vm4 = vc.u32 %v13889_v7, %v13892_v28  ;;  %v6234_v2 = vadd.s32 1, %v13893_v27  ;;  %v13919_v45 = vsub.s32 32, %v13898_v18  ;;  %v6401_v48 = vshll.u32 %v16000_v4, %v6398_v8 }
 0x85a   : > { %v6404_v10 = vshll.u32 %v16001_v19, %v6398_v8  ;;  %v6407_v38 = vshll.u32 %v16002_v29, %v6398_v8  ;;  %v6410_v32 = vshll.u32 %v16003_v5, %v6398_v8  ;;  %v6400_v12 = vshrl.u32 %v16000_v4, %v6399_v22 }
 0x85b   : > { %v6235_v43 = vsel %vm6233_vm4, %v6234_v2, %v13893_v27  ;;  %v6402_v24 = vshrl.u32 %v16001_v19, %v6399_v22  ;;  %v6405_v52 = vshrl.u32 %v16002_v29, %v6399_v22  ;;  %v6408_v21 = vshrl.u32 %v16003_v5, %v6399_v22 }
 0x85c   : > { %v6236_v20 = vadd.s32 %v6235_v43, %v6231_v63  ;;  %v6411_v3 = vshrl.u32 %v15600_v23, %v6399_v22  ;;  %v6413_v53 = vshll.u32 %v15600_v23, %v6398_v8  ;;  %v6414_v40 = vshrl.u32 %v15601_v16, %v6399_v22 }
 0x85d   : > { %v6403_v39 = vor.u32 %v6402_v24, %v6401_v48  ;;  %v6406_v54 = vor.u32 %v6405_v52, %v6404_v10  ;;  %vm6416_vm2 = vcmp.lt.s32.totalorder %v6397_v17, 1  ;;  %v6409_v59 = vor.u32 %v6408_v21, %v6407_v38 }
 0x85e   : > { %v6237_v34 = vadd.s32 536870912, %v6236_v20  ;;  %v6412_v36 = vor.u32 %v6411_v3, %v6410_v32  ;;  %vm6417_vm13 = vcmp.lt.s32.totalorder %v6397_v17, 2  ;;  %v6415_v1 = vor.u32 %v6414_v40, %v6413_v53 }
 0x85f   : > { %vm6418_vm7 = vcmp.lt.s32.totalorder %v6397_v17, 3  ;;  %vm6419_vm9 = vcmp.lt.s32.totalorder %v6397_v17, 4  ;;  %v6420_v49 = vsel %vm6416_vm2, %v6400_v12, %v6403_v39  ;;  %v6424_v0 = vsel %vm6416_vm2, %v6403_v39, %v6406_v54 }
 0x860   : > { %v13936_v62 = vshrl.u32 %v6237_v34, 30  ;;  %v6421_v47 = vsel %vm6419_vm9, %v6409_v59, 2102212464  ;;  %v6425_v61 = vsel %vm6419_vm9, %v6412_v36, 920167782  ;;  %v6428_v13 = vsel %vm6416_vm2, %v6406_v54, %v6409_v59 }
 0x861   : > { %v6422_v9 = vsel %vm6418_vm7, %v6406_v54, %v6421_v47  ;;  %v6426_v31 = vsel %vm6418_vm7, %v6409_v59, %v6425_v61  ;;  %v6429_v11 = vsel %vm6419_vm9, %v6415_v1, 1326507024  ;;  %v15533_v27 = vand.u32 2147483647, %v13904_v30 }
 0x862   : > { %v6239_v35 = vshll.u32 %v13936_v62, 30  ;;  %v6427_v57 = vsel %vm6417_vm13, %v6424_v0, %v6426_v31  ;;  %v6491_v41 = vand.u32 2139095040, %v13904_v30  ;;  %v6430_v8 = vsel %vm6418_vm7, %v6412_v36, %v6429_v11 }
 0x863   : > { %v13945_v63 = vmul.u32.u64.low %v13911_v51, %v6427_v57  ;;  %v13946_v2 = vmul.u32.u64.high %v13911_v51, %v6427_v57, %v13945_v63  ;;  %vm6312_vm6 = vcmp.lt.s32.totalorder %v13913_v33, 1  ;;  %v6423_v48 = vsel %vm6417_vm13, %v6420_v49, %v6422_v9 }
 0x864   : > { %v13950_v22 = vsub.s32 %v6236_v20, %v6239_v35  ;;  %v6431_v10 = vsel %vm6417_vm13, %v6428_v13, %v6430_v8  ;;  %v6297_v38 = vshll.u32 %v16000_v4, %v13898_v18  ;;  %v6298_v12 = vshrl.u32 %v16001_v19, %v13919_v45 }
 0x865   : > { %v13957_v32 = vmul.u32.u64.low %v13911_v51, %v6431_v10  ;;  %v13958_v43 = vmul.u32.u64.high %v13911_v51, %v6431_v10, %v13957_v32  ;;  %v6300_v24 = vshll.u32 %v16001_v19, %v13898_v18  ;;  %v6301_v20 = vshrl.u32 %v16002_v29, %v13919_v45 }
 0x866   : > { %v6242_v52 = vsub.s32 0, %v13950_v22  ;;  %v6303_v17 = vshll.u32 %v16002_v29, %v13898_v18  ;;  %v6304_v21 = vshrl.u32 %v16003_v5, %v13919_v45  ;;  %v6439_v3 = vmul.u32 %v13911_v51, %v6423_v48 }
 0x867   : > { %v6442_v53 = vadd.s32 1, %v13946_v2  ;;  %v6306_v39 = vshll.u32 %v16003_v5, %v13898_v18  ;;  %v6307_v54 = vshrl.u32 %v15600_v23, %v13919_v45  ;;  %v6299_v34 = vor.u32 %v6298_v12, %v6297_v38 }
 0x868   : > { %v8352_v40 = vmin.u32 %v6242_v52, %v13950_v22  ;;  %v6302_v59 = vor.u32 %v6301_v20, %v6300_v24  ;;  %v6305_v36 = vor.u32 %v6304_v21, %v6303_v17  ;;  %vm6441_vm12 = vc.u32 %v13958_v43, %v13945_v63 }
 0x869   : > { %v6308_v1 = vor.u32 %v6307_v54, %v6306_v39  ;;  %v6309_v51 = vshll.u32 %v15600_v23, %v13898_v18  ;;  %v6310_v49 = vshrl.u32 %v15601_v16, %v13919_v45  ;;  %v6443_v0 = vsel %vm6441_vm12, %v6442_v53, %v13946_v2 }
 0x86a   : > { %v6244_v47 = vclz %v8352_v40  ;;  %vm6313_vm1 = vcmp.lt.s32.totalorder %v13913_v33, 2  ;;  %vm6314_vm0 = vcmp.lt.s32.totalorder %v13913_v33, 3  ;;  %v6232_v61 = vadd.s32 %v13892_v28, %v13889_v7 }
 0x86b   : > { %v6444_v9 = vadd.s32 %v6443_v0, %v6439_v3  ;;  %v6311_v31 = vor.u32 %v6310_v49, %v6309_v51  ;;  %vm6315_vm15 = vcmp.lt.s32.totalorder %v13913_v33, 4  ;;  %v6320_v18 = vsel %vm6312_vm6, %v6299_v34, %v6302_v59 }
 0x86c   : > { %v8353_v13 = vadd.s32 4294967294, %v6244_v47  ;;  %v6321_v11 = vsel %vm6315_vm15, %v6308_v1, 920167782  ;;  %v6324_v35 = vsel %vm6312_vm6, %v6302_v59, %v6305_v36  ;;  %v6296_v8 = vshrl.u32 %v16000_v4, %v13919_v45 }
 0x86d   : > { %v6445_v57 = vadd.s32 536870912, %v6444_v9  ;;  %v6322_v2 = vsel %vm6314_vm0, %v6305_v36, %v6321_v11  ;;  %v6325_v7 = vsel %vm6315_vm15, %v6311_v31, 1326507024  ;;  %v6317_v28 = vsel %vm6315_vm15, %v6305_v36, 2102212464 }
 0x86e   : > { %vm8354_vm5 = vcmp.lt.s32.totalorder %v8353_v13, 0  ;;  %v6326_v48 = vsel %vm6314_vm0, %v6308_v1, %v6325_v7  ;;  %v6492_v10 = vshrl.u32 %v6491_v41, 23  ;;  %v6323_v12 = vsel %vm6313_vm1, %v6320_v18, %v6322_v2 }
 0x86f   : > { %v6247_v38 = vsel %vm8354_vm5, 0, %v8353_v13  ;;  %v14000_v32 = vshrl.u32 %v6445_v57, 30  ;;  %v6327_v24 = vsel %vm6313_vm1, %v6324_v35, %v6326_v48  ;;  %v6316_v20 = vsel %vm6312_vm6, %v6296_v8, %v6299_v34  ;;  %v14035_v57 = vpop.f32.mrb[29].mxu0 }
 0x870   : > { %v6248_v45 = vsub.s32 32, %v6247_v38  ;;  %v6252_v52 = vsub.s32 4294967266, %v6247_v38  ;;  %v8363_v17 = vadd.s32 4294967169, %v6492_v10  ;;  %v6318_v41 = vsel %vm6314_vm0, %v6302_v59, %v6317_v28 }
 0x871   : > { %v6447_v21 = vshll.u32 %v14000_v32, 30  ;;  %v14012_v3 = vmul.u32.u64.low %v13900_v46, %v6327_v24  ;;  %v14013_v53 = vmul.u32.u64.high %v13900_v46, %v6327_v24, %v14012_v3  ;;  %v6595_v36 = vand.u32 2139095040, %v13908_v37 }
 0x872   : > { %v6253_v39 = vadd.s32 127, %v6252_v52  ;;  %v14016_v54 = vmul.u32.u64.low %v13900_v46, %v6323_v12  ;;  %v14017_v40 = vmul.u32.u64.high %v13900_v46, %v6323_v12, %v14016_v54  ;;  %v6250_v1 = vshrl.u32 %v6232_v61, %v6248_v45 }
 0x873   : > { %v14021_v34 = vsub.s32 %v6444_v9, %v6447_v21  ;;  %v6498_v51 = vadd.s32 1, %v8363_v17  ;;  %v6319_v59 = vsel %vm6313_vm1, %v6316_v20, %v6318_v41  ;;  %v6495_v47 = vand.u32 8388607, %v15533_v27 }
 0x874   : > { %v6254_v49 = vshll.u32 %v6253_v39, 23  ;;  %v6249_v0 = vshll.u32 %v13950_v22, %v6247_v38  ;;  %vm6337_vm10 = vc.u32 %v14013_v53, %v14016_v54  ;;  %v6338_v13 = vadd.s32 1, %v14017_v40 }
 0x875   : > { %v6450_v31 = vsub.s32 0, %v14021_v34  ;;  %vm6499_vm8 = vcmp.gt.s32.totalorder %v6498_v51, 0  ;;  %v6592_v61 = vand.u32 2147483647, %v13908_v37  ;;  %v6596_v9 = vshrl.u32 %v6595_v36, 23 }
 0x876   : > { %v6251_v18 = vor.u32 %v6250_v1, %v6249_v0  ;;  %v6335_v11 = vmul.u32 %v13900_v46, %v6319_v59  ;;  %v6500_v35 = vsel %vm6499_vm8, %v6498_v51, 0  ;;  %v6255_v22 = vor.u32 4788187, %v6254_v49 }
 0x877   : > { %v8360_v33 = vmin.u32 %v6450_v31, %v14021_v34  ;;  %v6339_v8 = vsel %vm6337_vm10, %v6338_v13, %v14017_v40  ;;  %v6496_v2 = vor.u32 8388608, %v6495_v47  ;;  %v6502_v7 = vand.u32 31, %v6500_v35 }
 0x878   : > { %v6340_v48 = vadd.s32 %v6339_v8, %v6335_v11  ;;  %v6440_v10 = vadd.s32 %v13945_v63, %v13958_v43  ;;  %v6258_v12 = vcvt.s32.f32 %v6251_v18  ;;  %v8367_v52 = vadd.s32 4294967169, %v6596_v9 }
 0x879   : > { %v6452_v28 = vclz %v8360_v33  ;;  %v6503_v38 = vsub.s32 32, %v6502_v7  ;;  %v6256_v20 = vand.u32 2147483647, %v6255_v22  ;;  %v14041_v17 = vshll.u32 %v6496_v2, 8 }
 0x87a   : > { %v6341_v45 = vadd.s32 536870912, %v6340_v48  ;;  %v14045_v21 = vand.u32 8388607, %v6592_v61  ;;  %v6501_v39 = vshrl.u32 %v6500_v35, 5  ;;  %v6505_v40 = vshll.u32 %v16000_v4, %v6502_v7 }
 0x87b   : > { %v8361_v24 = vadd.s32 4294967294, %v6452_v28  ;;  %v6506_v46 = vshrl.u32 %v16001_v19, %v6503_v38  ;;  %v6509_v3 = vshrl.u32 %v16002_v29, %v6503_v38  ;;  %v6512_v63 = vshrl.u32 %v16003_v5, %v6503_v38 }
 0x87c   : > { %v14047_v41 = vshrl.u32 %v6341_v45, 30  ;;  %v6515_v36 = vshrl.u32 %v15600_v23, %v6503_v38  ;;  %v6508_v49 = vshll.u32 %v16001_v19, %v6502_v7  ;;  %v6511_v59 = vshll.u32 %v16002_v29, %v6502_v7 }
 0x87d   : > { %vm8362_vm3 = vcmp.lt.s32.totalorder %v8361_v24, 0  ;;  %v6507_v0 = vor.u32 %v6506_v46, %v6505_v40  ;;  %v6514_v31 = vshll.u32 %v16003_v5, %v6502_v7  ;;  %v6602_v13 = vadd.s32 1, %v8367_v52 }
 0x87e   : > { %v6455_v43 = vsel %vm8362_vm3, 0, %v8361_v24  ;;  %v6343_v47 = vshll.u32 %v14047_v41, 30  ;;  %v6510_v33 = vor.u32 %v6509_v3, %v6508_v49  ;;  %v6513_v11 = vor.u32 %v6512_v63, %v6511_v59 }
 0x87f   : > { %v6456_v1 = vsub.s32 32, %v6455_v43  ;;  %v6460_v51 = vsub.s32 4294967266, %v6455_v43  ;;  %v6516_v22 = vor.u32 %v6515_v36, %v6514_v31  ;;  %v6517_v8 = vshll.u32 %v15600_v23, %v6502_v7 }
 0x880   : > { %v14057_v35 = vsub.s32 %v6340_v48, %v6343_v47  ;;  %v6518_v2 = vshrl.u32 %v15601_v16, %v6503_v38  ;;  %v6259_v28 = vmul.f32 %v6258_v12, %v6256_v20  ;;  %v6457_v24 = vshll.u32 %v14021_v34, %v6455_v43 }
 0x881   : > { %v6458_v9 = vshrl.u32 %v6440_v10, %v6456_v1  ;;  %v6461_v18 = vadd.s32 127, %v6460_v51  ;;  %v6504_v46 = vshrl.u32 %v16000_v4, %v6503_v38  ;;  %vm6520_vm14 = vcmp.lt.s32.totalorder %v6501_v39, 1 }
 0x882   : > { %v6346_v40 = vsub.s32 0, %v14057_v35  ;;  %v6519_v52 = vor.u32 %v6518_v2, %v6517_v8  ;;  %vm6521_vm11 = vcmp.lt.s32.totalorder %v6501_v39, 2  ;;  %vm6522_vm4 = vcmp.lt.s32.totalorder %v6501_v39, 3 }
 0x883   : > { %v6462_v45 = vshll.u32 %v6461_v18, 23  ;;  %v6459_v10 = vor.u32 %v6458_v9, %v6457_v24  ;;  %vm6523_vm2 = vcmp.lt.s32.totalorder %v6501_v39, 4  ;;  %v6528_v48 = vsel %vm6520_vm14, %v6507_v0, %v6510_v33 }
 0x884   : > { %v8356_v3 = vmin.u32 %v6346_v40, %v14057_v35  ;;  %v6525_v7 = vsel %vm6523_vm2, %v6513_v11, 2102212464  ;;  %v6529_v63 = vsel %vm6523_vm2, %v6516_v22, 920167782  ;;  %v6532_v36 = vsel %vm6520_vm14, %v6510_v33, %v6513_v11 }
 0x885   : > { %v6463_v12 = vor.u32 4788187, %v6462_v45  ;;  %v6524_v20 = vsel %vm6520_vm14, %v6504_v46, %v6507_v0  ;;  %v6530_v34 = vsel %vm6522_vm4, %v6513_v11, %v6529_v63  ;;  %v6533_v43 = vsel %vm6523_vm2, %v6519_v52, 1326507024 }
 0x886   : > { %v6348_v1 = vclz %v8356_v3  ;;  %v6531_v38 = vsel %vm6521_vm11, %v6528_v48, %v6530_v34  ;;  %v6534_v51 = vsel %vm6522_vm4, %v6516_v22, %v6533_v43  ;;  %vm6603_vm13 = vcmp.gt.s32.totalorder %v6602_v13, 0 }
 0x887   : > { %v6526_v49 = vsel %vm6522_vm4, %v6510_v33, %v6525_v7  ;;  %v6535_v59 = vsel %vm6521_vm11, %v6532_v36, %v6534_v51  ;;  %v14068_v47 = vmul.u32.u64.low %v14041_v17, %v6531_v38  ;;  %v14069_v31 = vmul.u32.u64.high %v14041_v17, %v6531_v38, %v14068_v47  ;;  %v14077_v33 = vpop.f32.mrb[29].mxu1 }
 0x888   : > { %v8357_v9 = vadd.s32 4294967294, %v6348_v1  ;;  %v14073_v18 = vmul.u32.u64.low %v14041_v17, %v6535_v59  ;;  %v14074_v8 = vmul.u32.u64.high %v14041_v17, %v6535_v59, %v14073_v18  ;;  %v6604_v0 = vsel %vm6603_vm13, %v6602_v13, 0 }
 0x889   : > { %v6606_v11 = vand.u32 31, %v6604_v0  ;;  %v6260_v2 = vxor.u32 2147483648, %v6259_v28  ;;  %v6464_v24 = vand.u32 2147483647, %v6463_v12  ;;  %v6527_v22 = vsel %vm6521_vm11, %v6524_v20, %v6526_v49 }
 0x88a   : > { %vm8358_vm7 = vcmp.lt.s32.totalorder %v8357_v9, 0  ;;  %v6546_v46 = vadd.s32 1, %v14069_v31  ;;  %v6600_v40 = vor.u32 8388608, %v14045_v21  ;;  %vm6178_vm9 = vcmp.lt.s32.totalorder %v13842_v14, 0 }
 0x88b   : > { %v6351_v45 = vsel %vm8358_vm7, 0, %v8357_v9  ;;  %v6607_v52 = vsub.s32 32, %v6606_v11  ;;  %v6466_v48 = vcvt.s32.f32 %v6459_v10  ;;  %v14084_v13 = vadd.f32 %v13852_v58, %v13896_v44 }
 0x88c   : > { %v6356_v3 = vsub.s32 4294967266, %v6351_v45  ;;  %v6262_v7 = vsub.s32 4, %v13936_v62  ;;  %v6336_v39 = vadd.s32 %v14016_v54, %v14013_v53  ;;  %v6543_v63 = vmul.u32 %v14041_v17, %v6527_v22 }
 0x88d   : > { %vm6545_vm6 = vc.u32 %v14074_v8, %v14068_v47  ;;  %v14094_v21 = vsel %vm6178_vm9, %v6260_v2, %v6259_v28  ;;  %v14096_v10 = vmul.f32 %v6466_v48, %v6464_v24  ;;  %v6605_v20 = vshrl.u32 %v6604_v0, 5 }
 0x88e   : > { %v6357_v36 = vadd.s32 127, %v6356_v3  ;;  %v6547_v58 = vsel %vm6545_vm6, %v6546_v46, %v14069_v31  ;;  %v6610_v34 = vshrl.u32 %v16001_v19, %v6607_v52  ;;  %v14100_v43 = vshll.u32 %v6600_v40, 8 }
 0x88f   : > { %v6548_v12 = vadd.s32 %v6547_v58, %v6543_v63  ;;  %v6352_v53 = vsub.s32 32, %v6351_v45  ;;  %v6609_v54 = vshll.u32 %v16000_v4, %v6606_v11  ;;  %v6612_v17 = vshll.u32 %v16001_v19, %v6606_v11 }
 0x890   : > { %v6613_v1 = vshrl.u32 %v16002_v29, %v6607_v52  ;;  %v6358_v28 = vshll.u32 %v6357_v36, 23  ;;  %v6615_v51 = vshll.u32 %v16002_v29, %v6606_v11  ;;  %v6616_v49 = vshrl.u32 %v16003_v5, %v6607_v52 }
 0x891   : > { %v6549_v38 = vadd.s32 536870912, %v6548_v12  ;;  %v6611_v59 = vor.u32 %v6610_v34, %v6609_v54  ;;  %v6618_v9 = vshll.u32 %v16003_v5, %v6606_v11  ;;  %v6619_v18 = vshrl.u32 %v15600_v23, %v6607_v52 }
 0x892   : > { %v6614_v31 = vor.u32 %v6613_v1, %v6612_v17  ;;  %v6617_v2 = vor.u32 %v6616_v49, %v6615_v51  ;;  %v6621_v24 = vshll.u32 %v15600_v23, %v6606_v11  ;;  %v6622_v22 = vshrl.u32 %v15601_v16, %v6607_v52 }
 0x893   : > { %v14109_v0 = vshrl.u32 %v6549_v38, 30  ;;  %v6353_v46 = vshll.u32 %v14057_v35, %v6351_v45  ;;  %v6608_v40 = vshrl.u32 %v16000_v4, %v6607_v52  ;;  %v6620_v48 = vor.u32 %v6619_v18, %v6618_v9 }
 0x894   : > { %v14117_v3 = vadd.f32 %v13866_v56, %v13896_v44  ;;  %vm14121_vm12 = vcmp.le.f32.partialorder %v6176_v50, 0.7853982  ;;  %v6623_v11 = vor.u32 %v6622_v22, %v6621_v24  ;;  %vm6624_vm1 = vcmp.lt.s32.totalorder %v6605_v20, 1 }
 0x895   : > { %16006 = vst [vmem:[#allocation25_spill] sm:$0xff] %v14109_v0  ;;  %v6551_v36 = vshll.u32 %v14109_v0, 30  ;;  %vm6627_vm0 = vcmp.lt.s32.totalorder %v6605_v20, 4  ;;  %v6354_v58 = vshrl.u32 %v6336_v39, %v6352_v53  ;;  %v6359_v35 = vor.u32 4788187, %v6358_v28 }
 0x896   : > { %16007 = vst [vmem:[#allocation21_spill] sm:$0xff] %v14117_v3  ;;  %v6629_v45 = vsel %vm6627_vm0, %v6617_v2, 2102212464  ;;  %v6632_v52 = vsel %vm6624_vm1, %v6611_v59, %v6614_v31  ;;  %vm6626_vm15 = vcmp.lt.s32.totalorder %v6605_v20, 3  ;;  %v6633_v56 = vsel %vm6627_vm0, %v6620_v48, 920167782 }
 0x897   : > { %v14126_v34 = vsub.s32 %v6548_v12, %v6551_v36  ;;  %v6636_v54 = vsel %vm6624_vm1, %v6614_v31, %v6617_v2  ;;  %vm6625_vm5 = vcmp.lt.s32.totalorder %v6605_v20, 2  ;;  %v6628_v17 = vsel %vm6624_vm1, %v6608_v40, %v6611_v59 }
 0x898   : > { %v6634_v50 = vsel %vm6626_vm15, %v6617_v2, %v6633_v56  ;;  %v6637_v1 = vsel %vm6627_vm0, %v6623_v11, 1326507024  ;;  %v6630_v51 = vsel %vm6626_vm15, %v6614_v31, %v6629_v45  ;;  %v6355_v18 = vor.u32 %v6354_v58, %v6353_v46 }
 0x899   : > { %v6554_v38 = vsub.s32 0, %v14126_v34  ;;  %v6635_v49 = vsel %vm6625_vm5, %v6632_v52, %v6634_v50  ;;  %v6638_v9 = vsel %vm6626_vm15, %v6620_v48, %v6637_v1  ;;  %v6468_v12 = vxor.u32 2147483648, %v14096_v10 }
 0x89a   : > { %v6639_v24 = vsel %vm6625_vm5, %v6636_v54, %v6638_v9  ;;  %v14130_v39 = vmul.u32.u64.low %v14100_v43, %v6635_v49  ;;  %v14131_v53 = vmul.u32.u64.high %v14100_v43, %v6635_v49, %v14130_v39  ;;  %v6360_v2 = vand.u32 2147483647, %v6359_v35 }
 0x89b   : > { %v8364_v28 = vmin.u32 %v6554_v38, %v14126_v34  ;;  %v14137_v20 = vmul.u32.u64.low %v14100_v43, %v6639_v24  ;;  %v14138_v59 = vmul.u32.u64.high %v14100_v43, %v6639_v24, %v14137_v20  ;;  %v6631_v22 = vsel %vm6625_vm5, %v6628_v17, %v6630_v51 }
 0x89c   : > { %v6803_v31 = vand.u32 2139095040, %v14117_v3  ;;  %v15531_v46 = vand.u32 2147483647, %v14084_v13  ;;  %v6263_v40 = vsel %vm6178_vm9, %v6262_v7, %v13936_v62  ;;  %vm6386_vm10 = vcmp.lt.s32.totalorder %v13858_v6, 0 }
 0x89d   : > { %v6470_v48 = vsub.s32 4, %v14000_v32  ;;  %v6556_v36 = vclz %v8364_v28  ;;  %v6264_v11 = vsel %vm14121_vm12, %v13842_v14, %v14094_v21  ;;  %v6362_v58 = vcvt.s32.f32 %v6355_v18  ;;  %v14183_v18 = vpop.f32.mrb[30].mxu0 }
 0x89e   : > { %v6650_v35 = vadd.s32 1, %v14131_v53  ;;  %v6804_v45 = vshrl.u32 %v6803_v31, 23  ;;  %v6469_v52 = vsel %vm6386_vm10, %v6468_v12, %v14096_v10  ;;  %v6647_v62 = vmul.u32 %v14100_v43, %v6631_v22 }
 0x89f   : > { %v8365_v56 = vadd.s32 4294967294, %v6556_v36  ;;  %vm6649_vm8 = vc.u32 %v14138_v59, %v14130_v39  ;;  %v6363_v7 = vmul.f32 %v6362_v58, %v6360_v2  ;;  %v15532_v17 = vand.u32 2147483647, %v14117_v3 }
 0x8a0   : > { %v6651_v54 = vsel %vm6649_vm8, %v6650_v35, %v14131_v53  ;;  %v8375_v21 = vadd.s32 4294967169, %v6804_v45  ;;  %v6699_v1 = vand.u32 2139095040, %v14084_v13  ;;  %v6265_v38 = vsel %vm14121_vm12, 0, %v6263_v40 }
 0x8a1   : > { %vm8366_vm3 = vcmp.lt.s32.totalorder %v8365_v56, 0  ;;  %v6652_v50 = vadd.s32 %v6651_v54, %v6647_v62  ;;  %vm14167_vm14 = vcmp.le.f32.partialorder %v6384_v26, 0.7853982  ;;  %8985 = vcosq.f32 %v6264_v11 }
 0x8a2   : > { %v14171_v43 = vsel %vm8366_vm3, 0, %v8365_v56  ;;  %v6810_v51 = vadd.s32 1, %v8375_v21  ;;  %v14176_v49 = vsel %vm6386_vm10, %v6470_v48, %v14000_v32  ;;  %v14181_v63 = vsel %vm14167_vm14, %v13858_v6, %v6469_v52 }
 0x8a3   : > { %v6653_v9 = vadd.s32 536870912, %v6652_v50  ;;  %v6364_v26 = vxor.u32 2147483648, %v6363_v7  ;;  %v6807_v24 = vand.u32 8388607, %v15532_v17  ;;  %v14189_v53 = vand.u32 8388607, %v15531_v46 }
 0x8a4   : > { %vm6811_vm11 = vcmp.gt.s32.totalorder %v6810_v51, 0  ;;  %v6564_v32 = vsub.s32 4294967266, %v14171_v43  ;;  %v6700_v20 = vshrl.u32 %v6699_v1, 23  ;;  %8987 = vsinq.f32 %v6264_v11 }
 0x8a5   : > { %v14192_v12 = vshrl.u32 %v6653_v9, 30  ;;  %v6812_v28 = vsel %vm6811_vm11, %v6810_v51, 0  ;;  %v14194_v2 = vadd.s32 3, %v6265_v38  ;;  %vm6282_vm4 = vcmp.lt.s32.totalorder %v13845_v15, 0 }
 0x8a6   : > { %v6814_v22 = vand.u32 31, %v6812_v28  ;;  %v6473_v31 = vsel %vm14167_vm14, 0, %v14176_v49  ;;  %8989 = vcosq.f32 %v14181_v63  ;;  %v6544_v40 = vadd.s32 %v14068_v47, %v14074_v8 }
 0x8a7   : > { %16012 = vst [vmem:[#allocation8_spill] sm:$0xff] %v14194_v2  ;;  %v6655_v48 = vshll.u32 %v14192_v12, 30  ;;  %v14206_v36 = vsel %vm6282_vm4, %v6364_v26, %v6363_v7  ;;  %v6808_v11 = vor.u32 8388608, %v6807_v24  ;;  %v6560_v45 = vsub.s32 32, %v14171_v43 }
 0x8a8   : > { %v6815_v58 = vsub.s32 32, %v6814_v22  ;;  %v6565_v52 = vadd.s32 127, %v6564_v32  ;;  %v8371_v62 = vadd.s32 4294967169, %v6700_v20  ;;  %v6817_v54 = vshll.u32 %v16000_v4, %v6814_v22 }
 0x8a9   : > { %v14210_v56 = vsub.s32 %v6652_v50, %v6655_v48  ;;  %v6820_v8 = vshll.u32 %v16001_v19, %v6814_v22  ;;  %v6813_v1 = vshrl.u32 %v6812_v28, 5  ;;  %v6823_v38 = vshll.u32 %v16002_v29, %v6814_v22 }
 0x8aa   : > { %v6818_v47 = vshrl.u32 %v16001_v19, %v6815_v58  ;;  %v6821_v21 = vshrl.u32 %v16002_v29, %v6815_v58  ;;  %v6824_v51 = vshrl.u32 %v16003_v5, %v6815_v58  ;;  %v6826_v50 = vshll.u32 %v16003_v5, %v6814_v22 }
 0x8ab   : > { %v6658_v7 = vsub.s32 0, %v14210_v56  ;;  %v6827_v24 = vshrl.u32 %v15600_v23, %v6815_v58  ;;  %v14221_v32 = vpop.eup %8985  ;;  %v6566_v20 = vshll.u32 %v6565_v52, 23  ;;  %v14224_v46 = vshll.u32 %v6808_v11, 8 }
 0x8ac   : > { %v6819_v9 = vor.u32 %v6818_v47, %v6817_v54  ;;  %v6822_v26 = vor.u32 %v6821_v21, %v6820_v8  ;;  %16013 = vst [vmem:[#allocation16_spill] sm:$0xff] %v14221_v32  ;;  %v14228_v28 = vadd.f32 %v13868_v25, %v13896_v44  ;;  %v6825_v17 = vor.u32 %v6824_v51, %v6823_v38 }
 0x8ad   : > { %v8368_v48 = vmin.u32 %v6658_v7, %v14210_v56  ;;  %v6828_v27 = vor.u32 %v6827_v24, %v6826_v50  ;;  %v6829_v54 = vshll.u32 %v15600_v23, %v6814_v22  ;;  %v6830_v47 = vshrl.u32 %v15601_v16, %v6815_v58 }
 0x8ae   : > { %v6561_v8 = vshll.u32 %v14126_v34, %v14171_v43  ;;  %vm6594_vm2 = vcmp.lt.s32.totalorder %v13908_v37, 0  ;;  %vm6832_vm13 = vcmp.lt.s32.totalorder %v6813_v1, 1  ;;  %v6706_v21 = vadd.s32 1, %v8371_v62  ;;  %v14235_v11 = vpop.eup %8987 }
 0x8af   : > { %v6660_v52 = vclz %v8368_v48  ;;  %16014 = vst [vmem:[#allocation9_spill] sm:$0xff] %v14235_v11  ;;  %vm14239_vm7 = vcmp.le.f32.partialorder %v6280_v60, 0.7853982  ;;  %v6562_v44 = vshrl.u32 %v6544_v40, %v6560_v45  ;;  %v6831_v22 = vor.u32 %v6830_v47, %v6829_v54  ;;  %v14256_v48 = vpop.f32.mrb[30].mxu1 }
 0x8b0   : > { %vm6835_vm9 = vcmp.lt.s32.totalorder %v6813_v1, 4  ;;  %v6840_v7 = vsel %vm6832_vm13, %v6819_v9, %v6822_v26  ;;  %v14244_v38 = vpop.eup %8989  ;;  %v6567_v34 = vor.u32 4788187, %v6566_v20  ;;  %vm6834_vm6 = vcmp.lt.s32.totalorder %v6813_v1, 3  ;;  %v14417_v11 = vpop.f32.mrb[31].mxu1 }
 0x8b1   : > { %16017 = vst [vmem:[#allocation7_spill] sm:$0xff] %v14244_v38  ;;  %v8369_v43 = vadd.s32 4294967294, %v6660_v52  ;;  %v6841_v51 = vsel %vm6835_vm9, %v6828_v27, 920167782  ;;  %vm14248_vm12 = vcmp.le.f32.partialorder %v6592_v61, 0.7853982  ;;  %v6844_v45 = vsel %vm6832_vm13, %v6822_v26, %v6825_v17 }
 0x8b2   : > { %vm6833_vm1 = vcmp.lt.s32.totalorder %v6813_v1, 2  ;;  %v6837_v60 = vsel %vm6835_vm9, %v6825_v17, 2102212464  ;;  %v6842_v40 = vsel %vm6834_vm6, %v6825_v17, %v6841_v51  ;;  %v6816_v50 = vshrl.u32 %v16000_v4, %v6815_v58 }
 0x8b3   : > { %vm8370_vm0 = vcmp.lt.s32.totalorder %v8369_v43, 0  ;;  %v6843_v24 = vsel %vm6833_vm1, %v6840_v7, %v6842_v40  ;;  %v6845_v20 = vsel %vm6835_vm9, %v6831_v22, 1326507024  ;;  %v6563_v54 = vor.u32 %v6562_v44, %v6561_v8 }
 0x8b4   : > { %v6678_v61 = vsub.s32 4, %v14192_v12  ;;  %v6846_v47 = vsel %vm6834_vm6, %v6828_v27, %v6845_v20  ;;  %vm6707_vm15 = vcmp.gt.s32.totalorder %v6706_v21, 0  ;;  %v14260_v52 = vsel %vm8370_vm0, 0, %v8369_v43 }
 0x8b5   : > { %v6836_v51 = vsel %vm6832_vm13, %v6816_v50, %v6819_v9  ;;  %v6838_v17 = vsel %vm6834_vm6, %v6822_v26, %v6837_v60  ;;  %v6847_v35 = vsel %vm6833_vm1, %v6844_v45, %v6846_v47  ;;  %8991 = vsinq.f32 %v14181_v63 }
 0x8b6   : > { %v14266_v58 = vmul.u32.u64.low %v14224_v46, %v6847_v35  ;;  %v14267_v7 = vmul.u32.u64.high %v14224_v46, %v6847_v35, %v14266_v58  ;;  %v14270_v22 = vmul.u32.u64.low %v14224_v46, %v6843_v24  ;;  %v14271_v8 = vmul.u32.u64.high %v14224_v46, %v6843_v24, %v14270_v22 }
 0x8b7   : > { %v14279_v27 = vadd.s32 3, %v6473_v31  ;;  %v6568_v9 = vand.u32 2147483647, %v6567_v34  ;;  %v6708_v26 = vsel %vm6707_vm15, %v6706_v21, 0  ;;  %v6668_v44 = vsub.s32 4294967266, %v14260_v52 }
 0x8b8   : > { %v14285_v35 = vsel %vm6594_vm2, %v6678_v61, %v14192_v12  ;;  %v6839_v43 = vsel %vm6833_vm1, %v6836_v51, %v6838_v17  ;;  %v6710_v60 = vand.u32 31, %v6708_v26  ;;  %v14292_v10 = vsel %vm14239_vm7, %v13845_v15, %v14206_v36 }
 0x8b9   : > { %16020 = vst [vmem:[#allocation18_spill] sm:$0xff] %v14279_v27  ;;  %v6570_v49 = vcvt.s32.f32 %v6563_v54  ;;  %v6648_v63 = vadd.s32 %v14130_v39, %v14138_v59  ;;  %v16021_v31 = vor.u32 8388608, %v14189_v53  ;;  %vm6857_vm5 = vc.u32 %v14267_v7, %v14270_v22 }
 0x8ba   : > { %v6858_v12 = vadd.s32 1, %v14271_v8  ;;  %v6711_v1 = vsub.s32 32, %v6710_v60  ;;  %v6664_v36 = vsub.s32 32, %v14260_v52  ;;  %v6681_v39 = vsel %vm14248_vm12, 0, %v14285_v35 }
 0x8bb   : > { %v14298_v21 = vshll.u32 %v16021_v31, 8  ;;  %v14304_v40 = vmul.f32 %v6570_v49, %v6568_v9  ;;  %v6855_v59 = vmul.u32 %v14224_v46, %v6839_v43  ;;  %v6669_v53 = vadd.s32 127, %v6668_v44 }
 0x8bc   : > { %v6859_v45 = vsel %vm6857_vm5, %v6858_v12, %v14271_v8  ;;  %v6714_v50 = vshrl.u32 %v16001_v19, %v6711_v1  ;;  %v6717_v24 = vshrl.u32 %v16002_v29, %v6711_v1  ;;  %v6713_v54 = vshll.u32 %v16000_v4, %v6710_v60 }
 0x8bd   : > { %v6860_v20 = vadd.s32 %v6859_v45, %v6855_v59  ;;  %v6716_v61 = vshll.u32 %v16001_v19, %v6710_v60  ;;  %v6720_v47 = vshrl.u32 %v16003_v5, %v6711_v1  ;;  %v6709_v51 = vshrl.u32 %v6708_v26, 5  ;;  %v14325_v26 = vpop.permute.xlu0 %5978 }
 0x8be   : > { %v6719_v17 = vshll.u32 %v16002_v29, %v6710_v60  ;;  %v6722_v58 = vshll.u32 %v16003_v5, %v6710_v60  ;;  %v6723_v46 = vshrl.u32 %v15600_v23, %v6711_v1  ;;  %v6715_v8 = vor.u32 %v6714_v50, %v6713_v54 }
 0x8bf   : > { %v6861_v9 = vadd.s32 536870912, %v6860_v20  ;;  %v6718_v44 = vor.u32 %v6717_v24, %v6716_v61  ;;  %v6907_v35 = vand.u32 2139095040, %v14228_v28  ;;  %v6725_v31 = vshll.u32 %v15600_v23, %v6710_v60  ;;  %v14323_v59 = vpop.eup %8991 }
 0x8c0   : > { %v6721_v43 = vor.u32 %v6720_v47, %v6719_v17  ;;  %v6724_v49 = vor.u32 %v6723_v46, %v6722_v58  ;;  %v6726_v12 = vshrl.u32 %v15601_v16, %v6711_v1  ;;  %16022 = vst [vmem:[#allocation17_spill] sm:$0xff] %v14323_v59  ;;  %v6572_v45 = vxor.u32 2147483648, %v14304_v40 }
 0x8c1   : > { %v6665_v34 = vshll.u32 %v14210_v56, %v14260_v52  ;;  %v6666_v6 = vshrl.u32 %v6648_v63, %v6664_v36  ;;  %v14330_v50 = vshrl.u32 %v6861_v9, 30  ;;  %vm15575_vm10 = vcmp.lt.s32.totalorder %v13904_v30, 0 }
 0x8c2   : > { %v6670_v24 = vshll.u32 %v6669_v53, 23  ;;  %v6727_v54 = vor.u32 %v6726_v12, %v6725_v31  ;;  %vm6728_vm8 = vcmp.lt.s32.totalorder %v6709_v51, 1  ;;  %v14335_v60 = vadd.f32 %v13885_v42, %v14325_v26 }
 0x8c3   : > { %v6863_v61 = vshll.u32 %v14330_v50, 30  ;;  %vm6731_vm3 = vcmp.lt.s32.totalorder %v6709_v51, 4  ;;  %v6736_v47 = vsel %vm6728_vm8, %v6715_v8, %v6718_v44  ;;  %v6908_v17 = vshrl.u32 %v6907_v35, 23 }
 0x8c4   : > { %16023 = vst [vmem:[#allocation24_spill] sm:$0xff] %v14335_v60  ;;  %v6712_v56 = vshrl.u32 %v16000_v4, %v6711_v1  ;;  %vm6730_vm14 = vcmp.lt.s32.totalorder %v6709_v51, 3  ;;  %v6733_v52 = vsel %vm6731_vm3, %v6721_v43, 2102212464  ;;  %v6737_v63 = vsel %vm6731_vm3, %v6724_v49, 920167782 }
 0x8c5   : > { %v14340_v36 = vsub.s32 %v6860_v20, %v6863_v61  ;;  %vm6729_vm11 = vcmp.lt.s32.totalorder %v6709_v51, 2  ;;  %v6738_v53 = vsel %vm6730_vm14, %v6721_v43, %v6737_v63  ;;  %v6740_v58 = vsel %vm6728_vm8, %v6718_v44, %v6721_v43 }
 0x8c6   : > { %v6667_v46 = vor.u32 %v6666_v6, %v6665_v34  ;;  %v6671_v42 = vor.u32 4788187, %v6670_v24  ;;  %v6739_v9 = vsel %vm6729_vm11, %v6736_v47, %v6738_v53  ;;  %v6741_v31 = vsel %vm6731_vm3, %v6727_v54, 1326507024  ;;  %v14358_v24 = vpop.f32.mrb[31].mxu0 }
 0x8c7   : > { %v6866_v12 = vsub.s32 0, %v14340_v36  ;;  %v6732_v35 = vsel %vm6728_vm8, %v6712_v56, %v6715_v8  ;;  %v6734_v38 = vsel %vm6730_vm14, %v6718_v44, %v6733_v52  ;;  %v6742_v1 = vsel %vm6730_vm14, %v6724_v49, %v6741_v31 }
 0x8c8   : > { %v6743_v59 = vsel %vm6729_vm11, %v6740_v58, %v6742_v1  ;;  %v14348_v20 = vmul.u32.u64.low %v14298_v21, %v6739_v9  ;;  %v14349_v61 = vmul.u32.u64.high %v14298_v21, %v6739_v9, %v14348_v20  ;;  %v8379_v63 = vadd.s32 4294967169, %v6908_v17 }
 0x8c9   : > { %8993 = vcosq.f32 %v14292_v10  ;;  %v8376_v6 = vmin.u32 %v6866_v12, %v14340_v36  ;;  %v14355_v34 = vmul.u32.u64.low %v14298_v21, %v6743_v59  ;;  %v14356_v43 = vmul.u32.u64.high %v14298_v21, %v6743_v59, %v14355_v34 }
 0x8ca   : > { %8995 = vsinq.f32 %v14292_v10  ;;  %v14361_v8 = vadd.s32 3, %v6681_v39  ;;  %v6735_v44 = vsel %vm6729_vm11, %v6732_v35, %v6734_v38  ;;  %v6914_v49 = vadd.s32 1, %v8379_v63 }
 0x8cb   : > { %v14367_v54 = vsel %vm15575_vm10, %v6572_v45, %v14304_v40  ;;  %v6672_v47 = vand.u32 2147483647, %v6671_v42  ;;  %v6868_v17 = vclz %v8376_v6  ;;  %v16025_v56 = vand.u32 2147483647, %v14228_v28 }
 0x8cc   : > { %16024 = vst [vmem:[#allocation26_spill] sm:$0xff] %v14361_v8  ;;  %v6674_v52 = vcvt.s32.f32 %v6667_v46  ;;  %v6754_v53 = vadd.s32 1, %v14349_v61  ;;  %vm6915_vm13 = vcmp.gt.s32.totalorder %v6914_v49, 0  ;;  %v7011_v10 = vand.u32 2139095040, %v14335_v60 }
 0x8cd   : > { %v6911_v59 = vand.u32 8388607, %v16025_v56  ;;  %v8377_v39 = vadd.s32 4294967294, %v6868_v17  ;;  %v6751_v38 = vmul.u32 %v14298_v21, %v6735_v44  ;;  %vm6753_vm9 = vc.u32 %v14356_v43, %v14348_v20 }
 0x8ce   : > { %v6916_v51 = vsel %vm6915_vm13, %v6914_v49, 0  ;;  %v6856_v40 = vadd.s32 %v14270_v22, %v14267_v7  ;;  %v6755_v45 = vsel %vm6753_vm9, %v6754_v53, %v14349_v61  ;;  %v14381_v46 = vadd.f32 %v13933_v55, %v14325_v26 }
 0x8cf   : > { %v6918_v58 = vand.u32 31, %v6916_v51  ;;  %v14383_v42 = vmul.f32 %v6674_v52, %v6672_v47  ;;  %vm8378_vm6 = vcmp.lt.s32.totalorder %v8377_v39, 0  ;;  %v6756_v9 = vadd.s32 %v6755_v45, %v6751_v38 }
 0x8d0   : > { %16026 = vst [vmem:[#allocation11_spill] sm:$0xff] %v14381_v46  ;;  %v6912_v31 = vor.u32 8388608, %v6911_v59  ;;  %v6871_v21 = vsel %vm8378_vm6, 0, %v8377_v39  ;;  %v7012_v1 = vshrl.u32 %v7011_v10, 23  ;;  %v6917_v22 = vshrl.u32 %v6916_v51, 5 }
 0x8d1   : > { %v6919_v12 = vsub.s32 32, %v6918_v58  ;;  %v6872_v63 = vsub.s32 32, %v6871_v21  ;;  %v6876_v6 = vsub.s32 4294967266, %v6871_v21  ;;  %v6757_v7 = vadd.s32 536870912, %v6756_v9 }
 0x8d2   : > { %v6921_v61 = vshll.u32 %v16000_v4, %v6918_v58  ;;  %v6924_v55 = vshll.u32 %v16001_v19, %v6918_v58  ;;  %v6927_v56 = vshll.u32 %v16002_v29, %v6918_v58  ;;  %v6930_v39 = vshll.u32 %v16003_v5, %v6918_v58 }
 0x8d3   : > { %v6922_v34 = vshrl.u32 %v16001_v19, %v6919_v12  ;;  %v6925_v44 = vshrl.u32 %v16002_v29, %v6919_v12  ;;  %v14390_v49 = vpop.eup %8993  ;;  %v6877_v47 = vadd.s32 127, %v6876_v6  ;;  %v14392_v17 = vshrl.u32 %v6757_v7, 30 }
 0x8d4   : > { %v6928_v59 = vshrl.u32 %v16003_v5, %v6919_v12  ;;  %v14396_v52 = vpop.eup %8995  ;;  %v6874_v53 = vshrl.u32 %v6856_v40, %v6872_v63  ;;  %v6931_v38 = vshrl.u32 %v15600_v23, %v6919_v12  ;;  %v6933_v7 = vshll.u32 %v15600_v23, %v6918_v58 }
 0x8d5   : > { %v6923_v10 = vor.u32 %v6922_v34, %v6921_v61  ;;  %v6878_v51 = vshll.u32 %v6877_v47, 23  ;;  %v6759_v45 = vshll.u32 %v14392_v17, 30  ;;  %v6926_v35 = vor.u32 %v6925_v44, %v6924_v55 }
 0x8d6   : > { %v6929_v27 = vor.u32 %v6928_v59, %v6927_v56  ;;  %v6932_v6 = vor.u32 %v6931_v38, %v6930_v39  ;;  %v6934_v8 = vshrl.u32 %v15601_v16, %v6919_v12  ;;  %v14403_v32 = vshll.u32 %v6912_v31, 8 }
 0x8d7   : > { %v16027_v14 = vand.u32 2147483647, %v13904_v30  ;;  %v16028_v40 = vmov 0  ;;  %v6873_v63 = vshll.u32 %v14340_v36, %v6871_v21  ;;  %v14412_v61 = vsub.s32 %v6756_v9, %v6759_v45 }
 0x8d8   : > { %v6920_v34 = vshrl.u32 %v16000_v4, %v6919_v12  ;;  %v8383_v55 = vadd.s32 4294967169, %v7012_v1  ;;  %v6879_v44 = vor.u32 4788187, %v6878_v51  ;;  %v6935_v47 = vor.u32 %v6934_v8, %v6933_v7 }
 0x8d9   : > { %vm14407_vm1 = vcmp.le.f32.partialorder %v16027_v14, 0.7853982  ;;  %vm6936_vm0 = vcmp.lt.s32.totalorder %v6917_v22, 1  ;;  %vm6939_vm15 = vcmp.lt.s32.totalorder %v6917_v22, 4  ;;  %v6875_v58 = vor.u32 %v6874_v53, %v6873_v63 }
 0x8da   : > { %v16029_v40 = vsel %vm14407_vm1, 4294967295, %v16028_v40  ;;  %v6762_v31 = vsub.s32 0, %v14412_v61  ;;  %v6941_v56 = vsel %vm6939_vm15, %v6929_v27, 2102212464  ;;  %v6944_v59 = vsel %vm6936_vm0, %v6923_v10, %v6926_v35 }
 0x8db   : > { %16030 = vst [vmem:[#allocation12_spill] sm:$0xff] %v16029_v40  ;;  %vm6938_vm5 = vcmp.lt.s32.totalorder %v6917_v22, 3  ;;  %v6945_v14 = vsel %vm6939_vm15, %v6932_v6, 920167782  ;;  %v6948_v39 = vsel %vm6936_vm0, %v6926_v35, %v6929_v27  ;;  %v6949_v38 = vsel %vm6939_vm15, %v6935_v47, 1326507024 }
 0x8dc   : > { %v8372_v36 = vmin.u32 %v6762_v31, %v14412_v61  ;;  %vm6937_vm8 = vcmp.lt.s32.totalorder %v6917_v22, 2  ;;  %v6940_v9 = vsel %vm6936_vm0, %v6920_v34, %v6923_v10  ;;  %v6946_v21 = vsel %vm6938_vm5, %v6929_v27, %v6945_v14 }
 0x8dd   : > { %v6880_v12 = vand.u32 2147483647, %v6879_v44  ;;  %v6942_v1 = vsel %vm6938_vm5, %v6926_v35, %v6941_v56  ;;  %v6947_v51 = vsel %vm6937_vm8, %v6944_v59, %v6946_v21  ;;  %v6950_v8 = vsel %vm6938_vm5, %v6932_v6, %v6949_v38 }
 0x8de   : > { %v6882_v45 = vcvt.s32.f32 %v6875_v58  ;;  %v6764_v7 = vclz %v8372_v36  ;;  %v6951_v53 = vsel %vm6937_vm8, %v6948_v39, %v6950_v8  ;;  %v7018_v63 = vadd.s32 1, %v8383_v55 }
 0x8df   : > { %v14420_v2 = vmul.u32.u64.low %v14403_v32, %v6951_v53  ;;  %v14421_v0 = vmul.u32.u64.high %v14403_v32, %v6951_v53, %v14420_v2  ;;  %v14424_v47 = vmul.u32.u64.low %v14403_v32, %v6947_v51  ;;  %v14425_v31 = vmul.u32.u64.high %v14403_v32, %v6947_v51, %v14424_v47 }
 0x8e0   : > { %v8373_v27 = vadd.s32 4294967294, %v6764_v7  ;;  %v6943_v22 = vsel %vm6937_vm8, %v6940_v9, %v6942_v1  ;;  %v16031_v35 = vand.u32 2147483647, %v14335_v60  ;;  %vm7019_vm3 = vcmp.gt.s32.totalorder %v7018_v63, 0 }
 0x8e1   : > { %v14434_v6 = vsel %vm14407_vm1, %v13904_v30, %v14367_v54  ;;  %v14437_v2 = vmul.f32 %v6882_v45, %v6880_v12  ;;  %v7020_v55 = vsel %vm7019_vm3, %v7018_v63, 0  ;;  %v6752_v59 = vadd.s32 %v14348_v20, %v14356_v43 }
 0x8e2   : > { %v7015_v10 = vand.u32 8388607, %v16031_v35  ;;  %vm8374_vm14 = vcmp.lt.s32.totalorder %v8373_v27, 0  ;;  %v7022_v58 = vand.u32 31, %v7020_v55  ;;  %v6959_v39 = vmul.u32 %v14403_v32, %v6943_v22 }
 0x8e3   : > { %v6767_v14 = vsel %vm8374_vm14, 0, %v8373_v27  ;;  %vm6961_vm11 = vc.u32 %v14421_v0, %v14424_v47  ;;  %v6962_v36 = vadd.s32 1, %v14425_v31  ;;  %v6884_v21 = vxor.u32 2147483648, %v14437_v2 }
 0x8e4   : > { %v6768_v54 = vsub.s32 32, %v6767_v14  ;;  %v6772_v38 = vsub.s32 4294967266, %v6767_v14  ;;  %v7016_v9 = vor.u32 8388608, %v7015_v10  ;;  %v7021_v12 = vshrl.u32 %v7020_v55, 5 }
 0x8e5   : > { %v7023_v1 = vsub.s32 32, %v7022_v58  ;;  %v7025_v51 = vshll.u32 %v16000_v4, %v7022_v58  ;;  %v6963_v20 = vsel %vm6961_vm11, %v6962_v36, %v14425_v31  ;;  %v7028_v43 = vshll.u32 %v16001_v19, %v7022_v58 }
 0x8e6   : > { %v6773_v8 = vadd.s32 127, %v6772_v38  ;;  %v7031_v32 = vshll.u32 %v16002_v29, %v7022_v58  ;;  %v6770_v45 = vshrl.u32 %v6752_v59, %v6768_v54  ;;  %v6964_v7 = vadd.s32 %v6963_v20, %v6959_v39 }
 0x8e7   : > { %v7026_v53 = vshrl.u32 %v16001_v19, %v7023_v1  ;;  %v7029_v63 = vshrl.u32 %v16002_v29, %v7023_v1  ;;  %v7032_v22 = vshrl.u32 %v16003_v5, %v7023_v1  ;;  %v7034_v35 = vshll.u32 %v16003_v5, %v7022_v58 }
 0x8e8   : > { %v6774_v27 = vshll.u32 %v6773_v8, 23  ;;  %v7035_v10 = vshrl.u32 %v15600_v23, %v7023_v1  ;;  %v6965_v55 = vadd.s32 536870912, %v6964_v7  ;;  %v14457_v36 = vshll.u32 %v7016_v9, 8 }
 0x8e9   : > { %v7027_v38 = vor.u32 %v7026_v53, %v7025_v51  ;;  %v7030_v31 = vor.u32 %v7029_v63, %v7028_v43  ;;  %v6769_v56 = vshll.u32 %v14412_v61, %v6767_v14  ;;  %v7033_v59 = vor.u32 %v7032_v22, %v7031_v32 }
 0x8ea   : > { %v7036_v39 = vor.u32 %v7035_v10, %v7034_v35  ;;  %v7219_v54 = vand.u32 2139095040, %v14381_v46  ;;  %vm6802_vm13 = vcmp.lt.s32.totalorder %v14117_v3, 0  ;;  %v6775_v8 = vor.u32 4788187, %v6774_v27 }
 0x8eb   : > { %v14462_v20 = vshrl.u32 %v6965_v55, 30  ;;  %v7037_v44 = vshll.u32 %v15600_v23, %v7022_v58  ;;  %v7038_v34 = vshrl.u32 %v15601_v16, %v7023_v1  ;;  %v6771_v40 = vor.u32 %v6770_v45, %v6769_v56 }
 0x8ec   : > { %v7024_v51 = vshrl.u32 %v16000_v4, %v7023_v1  ;;  %vm7040_vm9 = vcmp.lt.s32.totalorder %v7021_v12, 1  ;;  %vm7043_vm6 = vcmp.lt.s32.totalorder %v7021_v12, 4  ;;  %v16033_v32 = vand.u32 2147483647, %v14117_v3 }
 0x8ed   : > { %16032 = vst [vmem:[#allocation29_spill] sm:$0xff] %v14462_v20  ;;  %v6967_v61 = vshll.u32 %v14462_v20, 30  ;;  %v7039_v14 = vor.u32 %v7038_v34, %v7037_v44  ;;  %v7045_v9 = vsel %vm7043_vm6, %v7033_v59, 2102212464  ;;  %v7048_v43 = vsel %vm7040_vm9, %v7027_v38, %v7030_v31 }
 0x8ee   : > { %vm14470_vm0 = vcmp.le.f32.partialorder %v16033_v32, 0.7853982  ;;  %vm7041_vm15 = vcmp.lt.s32.totalorder %v7021_v12, 2  ;;  %vm7042_vm5 = vcmp.lt.s32.totalorder %v7021_v12, 3  ;;  %v7049_v58 = vsel %vm7043_vm6, %v7036_v39, 920167782 }
 0x8ef   : > { %v7052_v63 = vsel %vm7040_vm9, %v7030_v31, %v7033_v59  ;;  %v6776_v56 = vand.u32 2147483647, %v6775_v8  ;;  %v14474_v45 = vsub.s32 %v6964_v7, %v6967_v61  ;;  %v7050_v1 = vsel %vm7042_vm5, %v7033_v59, %v7049_v58 }
 0x8f0   : > { %v7053_v27 = vsel %vm7043_vm6, %v7039_v14, 1326507024  ;;  %v7044_v22 = vsel %vm7040_vm9, %v7024_v51, %v7027_v38  ;;  %v7046_v35 = vsel %vm7042_vm5, %v7030_v31, %v7045_v9  ;;  %v7051_v34 = vsel %vm7041_vm15, %v7048_v43, %v7050_v1 }
 0x8f1   : > { %v7054_v44 = vsel %vm7042_vm5, %v7036_v39, %v7053_v27  ;;  %v6970_v10 = vsub.s32 0, %v14474_v45  ;;  %v14480_v32 = vmul.u32.u64.low %v14457_v36, %v7051_v34  ;;  %v14481_v20 = vmul.u32.u64.high %v14457_v36, %v7051_v34, %v14480_v32 }
 0x8f2   : > { %v7055_v55 = vsel %vm7041_vm15, %v7052_v63, %v7054_v44  ;;  %v6778_v30 = vcvt.s32.f32 %v6771_v40  ;;  %v7220_v59 = vshrl.u32 %v7219_v54, 23  ;;  %8997 = vcosq.f32 %v14434_v6 }
 0x8f3   : > { %v14485_v7 = vmul.u32.u64.low %v14457_v36, %v7055_v55  ;;  %v14486_v8 = vmul.u32.u64.high %v14457_v36, %v7055_v55, %v14485_v7  ;;  %v16036_v38 = vxor.u32 2147483648, %v14383_v42  ;;  %v8380_v39 = vmin.u32 %v6970_v10, %v14474_v45 }
 0x8f4   : > { %v7047_v51 = vsel %vm7041_vm15, %v7044_v22, %v7046_v35  ;;  %v6885_v40 = vsel %vm6802_vm13, %v6884_v21, %v14437_v2  ;;  %v16037_v61 = vsub.s32 4, %v14330_v50  ;;  %vm6698_vm8 = vcmp.lt.s32.totalorder %v14084_v13, 0 }
 0x8f5   : > { %v6677_v31 = vsel %vm6594_vm2, %v16036_v38, %v14383_v42  ;;  %v6779_v14 = vmul.f32 %v6778_v30, %v6776_v56  ;;  %v8391_v9 = vadd.s32 4294967169, %v7220_v59  ;;  %v6972_v43 = vclz %v8380_v39 }
 0x8f6   : > { %v6887_v54 = vsel %vm6802_vm13, %v16037_v61, %v14330_v50  ;;  %v7066_v42 = vadd.s32 1, %v14481_v20  ;;  %v16038_v12 = vand.u32 2147483647, %v14381_v46  ;;  %v14510_v63 = vadd.f32 %v14035_v57, %v14325_v26 }
 0x8f7   : > { %8999 = vsinq.f32 %v14434_v6  ;;  %v7063_v2 = vmul.u32 %v14457_v36, %v7047_v51  ;;  %vm7065_vm2 = vc.u32 %v14486_v8, %v14480_v32  ;;  %v7226_v50 = vadd.s32 1, %v8391_v9 }
 0x8f8   : > { %v7223_v58 = vand.u32 8388607, %v16038_v12  ;;  %v6680_v30 = vsel %vm14248_vm12, %v13908_v37, %v6677_v31  ;;  %v6889_v21 = vsel %vm14470_vm0, 0, %v6887_v54  ;;  %v8381_v56 = vadd.s32 4294967294, %v6972_v43 }
 0x8f9   : > { %v7067_v1 = vsel %vm7065_vm2, %v7066_v42, %v14481_v20  ;;  %v14525_v57 = vsel %vm14470_vm0, %v14117_v3, %v6885_v40  ;;  %v6780_v6 = vxor.u32 2147483648, %v6779_v14  ;;  %vm7227_vm3 = vcmp.gt.s32.totalorder %v7226_v50, 0 }
 0x8fa   : > { %v7068_v36 = vadd.s32 %v7067_v1, %v7063_v2  ;;  %vm8382_vm14 = vcmp.lt.s32.totalorder %v8381_v56, 0  ;;  %v7224_v27 = vor.u32 8388608, %v7223_v58  ;;  %v7228_v22 = vsel %vm7227_vm3, %v7226_v50, 0 }
 0x8fb   : > { %v7115_v62 = vand.u32 2139095040, %v14510_v63  ;;  %9001 = vcosq.f32 %v6680_v30  ;;  %v6975_v35 = vsel %vm8382_vm14, 0, %v8381_v56  ;;  %v7230_v44 = vand.u32 31, %v7228_v22 }
 0x8fc   : > { %v7069_v34 = vadd.s32 536870912, %v7068_v36  ;;  %9003 = vsinq.f32 %v6680_v30  ;;  %v14528_v10 = vadd.s32 3, %v6889_v21  ;;  %v6976_v20 = vsub.s32 32, %v6975_v35  ;;  %v14535_v38 = vpop.eup %8997 }
 0x8fd   : > { %v6980_v55 = vsub.s32 4294967266, %v6975_v35  ;;  %9005 = vcosq.f32 %v14525_v57  ;;  %v6960_v53 = vadd.s32 %v14424_v47, %v14421_v0  ;;  %v7231_v59 = vsub.s32 32, %v7230_v44 }
 0x8fe   : > { %16039 = vst [vmem:[#allocation10_spill] sm:$0xff] %v14528_v10  ;;  %v14533_v7 = vshrl.u32 %v7069_v34, 30  ;;  %v14539_v31 = vsel %vm6698_vm8, %v6780_v6, %v6779_v14  ;;  %v14541_v51 = vshll.u32 %v7224_v27, 8  ;;  %v7116_v40 = vshrl.u32 %v7115_v62, 23 }
 0x8ff   : > { %v6981_v39 = vadd.s32 127, %v6980_v55  ;;  %v7233_v54 = vshll.u32 %v16000_v4, %v7230_v44  ;;  %v7234_v9 = vshrl.u32 %v16001_v19, %v7231_v59  ;;  %v7236_v0 = vshll.u32 %v16001_v19, %v7230_v44 }
 0x900   : > { %v7071_v61 = vshll.u32 %v14533_v7, 30  ;;  %v6978_v47 = vshrl.u32 %v6960_v53, %v6976_v20  ;;  %v7237_v42 = vshrl.u32 %v16002_v29, %v7231_v59  ;;  %v7240_v12 = vshrl.u32 %v16003_v5, %v7231_v59 }
 0x901   : > { %v6982_v43 = vshll.u32 %v6981_v39, 23  ;;  %v14549_v14 = vpop.eup %8999  ;;  %v7239_v2 = vshll.u32 %v16002_v29, %v7230_v44  ;;  %v7242_v50 = vshll.u32 %v16003_v5, %v7230_v44  ;;  %v7243_v30 = vshrl.u32 %v15600_v23, %v7231_v59 }
 0x902   : > { %v14551_v58 = vsub.s32 %v7068_v36, %v7071_v61  ;;  %v6977_v21 = vshll.u32 %v14474_v45, %v6975_v35  ;;  %v7229_v1 = vshrl.u32 %v7228_v22, 5  ;;  %v7235_v6 = vor.u32 %v7234_v9, %v7233_v54 }
 0x903   : > { %v6983_v56 = vor.u32 4788187, %v6982_v43  ;;  %vm7010_vm12 = vcmp.lt.s32.totalorder %v14335_v60, 0  ;;  %v7238_v62 = vor.u32 %v7237_v42, %v7236_v0  ;;  %v7241_v34 = vor.u32 %v7240_v12, %v7239_v2 }
 0x904   : > { %v7074_v27 = vsub.s32 0, %v14551_v58  ;;  %v7244_v20 = vor.u32 %v7243_v30, %v7242_v50  ;;  %v6979_v36 = vor.u32 %v6978_v47, %v6977_v21  ;;  %v7245_v55 = vshll.u32 %v15600_v23, %v7230_v44 }
 0x905   : > { %v7246_v53 = vshrl.u32 %v15601_v16, %v7231_v59  ;;  %v8387_v39 = vadd.s32 4294967169, %v7116_v40  ;;  %v14561_v61 = vpop.eup %9001  ;;  %v16041_v45 = vand.u32 2147483647, %v14084_v13  ;;  %v6984_v35 = vand.u32 2147483647, %v6983_v56 }
 0x906   : > { %16040 = vst [vmem:[#allocation34_spill] sm:$0xff] %v14561_v61  ;;  %v8384_v54 = vmin.u32 %v7074_v27, %v14551_v58  ;;  %v7094_v9 = vsub.s32 4, %v14533_v7  ;;  %v7232_v0 = vshrl.u32 %v16000_v4, %v7231_v59  ;;  %v14572_v47 = vpop.eup %9003  ;;  %vm7248_vm13 = vcmp.lt.s32.totalorder %v7229_v1, 1 }
 0x907   : > { %vm14565_vm11 = vcmp.le.f32.partialorder %v16041_v45, 0.7853982  ;;  %16044 = vst [vmem:[#allocation43_spill] sm:$0xff] %v14572_v47  ;;  %v7247_v44 = vor.u32 %v7246_v53, %v7245_v55  ;;  %vm7250_vm9 = vcmp.lt.s32.totalorder %v7229_v1, 3  ;;  %vm7251_vm6 = vcmp.lt.s32.totalorder %v7229_v1, 4  ;;  %v14574_v40 = vpop.eup %9005 }
 0x908   : > { %16045 = vst [vmem:[#allocation31_spill] sm:$0xff] %v14574_v40  ;;  %v7076_v43 = vclz %v8384_v54  ;;  %v7253_v42 = vsel %vm7251_vm6, %v7241_v34, 2102212464  ;;  %v7256_v12 = vsel %vm7248_vm13, %v7235_v6, %v7238_v62  ;;  %v7257_v2 = vsel %vm7251_vm6, %v7244_v20, 920167782 }
 0x909   : > { %v6986_v50 = vcvt.s32.f32 %v6979_v36  ;;  %vm7249_vm0 = vcmp.lt.s32.totalorder %v7229_v1, 2  ;;  %v7258_v30 = vsel %vm7250_vm9, %v7241_v34, %v7257_v2  ;;  %v7260_v21 = vsel %vm7248_vm13, %v7238_v62, %v7241_v34 }
 0x90a   : > { %v8385_v56 = vadd.s32 4294967294, %v7076_v43  ;;  %v7252_v27 = vsel %vm7248_vm13, %v7232_v0, %v7235_v6  ;;  %v7259_v59 = vsel %vm7249_vm0, %v7256_v12, %v7258_v30  ;;  %v7261_v45 = vsel %vm7251_vm6, %v7247_v44, 1326507024 }
 0x90b   : > { %vm15573_vm15 = vcmp.lt.s32.totalorder %v14228_v28, 0  ;;  %v7254_v55 = vsel %vm7250_vm9, %v7238_v62, %v7253_v42  ;;  %v7262_v53 = vsel %vm7250_vm9, %v7244_v20, %v7261_v45  ;;  %v6987_v36 = vmul.f32 %v6986_v50, %v6984_v35 }
 0x90c   : > { %v14582_v54 = vmul.u32.u64.low %v14541_v51, %v7259_v59  ;;  %v14583_v3 = vmul.u32.u64.high %v14541_v51, %v7259_v59, %v14582_v54  ;;  %vm8386_vm5 = vcmp.lt.s32.totalorder %v8385_v56, 0  ;;  %v7263_v34 = vsel %vm7249_vm0, %v7260_v21, %v7262_v53 }
 0x90d   : > { %v15550_v6 = vand.u32 2147483647, %v14510_v63  ;;  %v7079_v0 = vsel %vm8386_vm5, 0, %v8385_v56  ;;  %v7095_v44 = vsel %vm7010_vm12, %v7094_v9, %v14533_v7  ;;  %9007 = vsinq.f32 %v14525_v57 }
 0x90e   : > { %v14592_v62 = vmul.u32.u64.low %v14541_v51, %v7263_v34  ;;  %v14593_v43 = vmul.u32.u64.high %v14541_v51, %v7263_v34, %v14592_v62  ;;  %v16046_v20 = vand.u32 2147483647, %v14335_v60  ;;  %v7084_v42 = vsub.s32 4294967266, %v7079_v0 }
 0x90f   : > { %v7255_v12 = vsel %vm7249_vm0, %v7252_v27, %v7254_v55  ;;  %v6784_v7 = vsel %vm14565_vm11, %v14084_v13, %v14539_v31  ;;  %v7274_v9 = vadd.s32 1, %v14583_v3  ;;  %v7122_v2 = vadd.s32 1, %v8387_v39  ;;  %v14619_v31 = vpop.permute.xlu1 %5983 }
 0x910   : > { %vm14598_vm2 = vcmp.le.f32.partialorder %v16046_v20, 0.7853982  ;;  %v14610_v57 = vadd.f32 %v14077_v33, %v14325_v26  ;;  %v6988_v50 = vxor.u32 2147483648, %v6987_v36  ;;  %v7085_v30 = vadd.s32 127, %v7084_v42  ;;  %v16099_v26 = vld [vmem:[#allocation16_spill] sm:$0xff] }
 0x911   : > { %v7097_v21 = vsel %vm14598_vm2, 0, %v7095_v44  ;;  %v7119_v1 = vand.u32 8388607, %v15550_v6  ;;  %v7080_v56 = vsub.s32 32, %v7079_v0  ;;  %v7271_v27 = vmul.u32 %v14541_v51, %v7255_v12 }
 0x912   : > { %vm7273_vm3 = vc.u32 %v14593_v43, %v14582_v54  ;;  %vm7123_vm14 = vcmp.gt.s32.totalorder %v7122_v2, 0  ;;  %9009 = vcosq.f32 %v6784_v7  ;;  %v16049_v33 = vand.u32 2147483647, %v14228_v28 }
 0x913   : > { %v7086_v39 = vshll.u32 %v7085_v30, 23  ;;  %v7275_v59 = vsel %vm7273_vm3, %v7274_v9, %v14583_v3  ;;  %v7124_v45 = vsel %vm7123_vm14, %v7122_v2, 0  ;;  %v7064_v51 = vadd.s32 %v14480_v32, %v14486_v8 }
 0x914   : > { %vm14623_vm13 = vcmp.le.f32.partialorder %v16049_v33, 0.7853982  ;;  %v7276_v55 = vadd.s32 %v7275_v59, %v7271_v27  ;;  %v7126_v53 = vand.u32 31, %v7124_v45  ;;  %v14632_v34 = vadd.f32 %v14183_v18, %v14619_v31 }
 0x915   : > { %9011 = vsinq.f32 %v6784_v7  ;;  %v6989_v44 = vsel %vm15573_vm15, %v6988_v50, %v6987_v36  ;;  %v14636_v62 = vadd.s32 3, %v7097_v21  ;;  %v7082_v42 = vshrl.u32 %v7064_v51, %v7080_v56 }
 0x916   : > { %v7277_v3 = vadd.s32 536870912, %v7276_v55  ;;  %v7120_v12 = vor.u32 8388608, %v7119_v1  ;;  %v7127_v9 = vsub.s32 32, %v7126_v53  ;;  %v7081_v32 = vshll.u32 %v14551_v58, %v7079_v0 }
 0x917   : > { %16052 = vst [vmem:[#allocation15_spill] sm:$0xff] %v14636_v62  ;;  %v7087_v8 = vor.u32 4788187, %v7086_v39  ;;  %v7129_v2 = vshll.u32 %v16000_v4, %v7126_v53  ;;  %v7323_v18 = vand.u32 2139095040, %v14610_v57  ;;  %v7132_v36 = vshll.u32 %v16001_v19, %v7126_v53  ;;  %v14647_v21 = vpop.eup %9007 }
 0x918   : > { %v14642_v30 = vshrl.u32 %v7277_v3, 30  ;;  %v7130_v7 = vshrl.u32 %v16001_v19, %v7127_v9  ;;  %v7133_v50 = vshrl.u32 %v16002_v29, %v7127_v9  ;;  %16053 = vst [vmem:[#allocation19_spill] sm:$0xff] %v14647_v21  ;;  %v7136_v1 = vshrl.u32 %v16003_v5, %v7127_v9 }
 0x919   : > { %v7138_v56 = vshll.u32 %v16003_v5, %v7126_v53  ;;  %v7139_v58 = vshrl.u32 %v15600_v23, %v7127_v9  ;;  %v7142_v0 = vshrl.u32 %v15601_v16, %v7127_v9  ;;  %v7083_v27 = vor.u32 %v7082_v42, %v7081_v32 }
 0x91a   : > { %v7279_v33 = vshll.u32 %v14642_v30, 30  ;;  %v7125_v39 = vshrl.u32 %v7124_v45, 5  ;;  %v7135_v59 = vshll.u32 %v16002_v29, %v7126_v53  ;;  %v7131_v51 = vor.u32 %v7130_v7, %v7129_v2 }
 0x91b   : > { %v7134_v3 = vor.u32 %v7133_v50, %v7132_v36  ;;  %v7140_v6 = vor.u32 %v7139_v58, %v7138_v56  ;;  %v7141_v20 = vshll.u32 %v15600_v23, %v7126_v53  ;;  %v6992_v62 = vsel %vm14623_vm13, %v14228_v28, %v6989_v44 }
 0x91c   : > { %v14659_v40 = vsub.s32 %v7276_v55, %v7279_v33  ;;  %v7137_v21 = vor.u32 %v7136_v1, %v7135_v59  ;;  %v14661_v10 = vshll.u32 %v7120_v12, 8  ;;  %v14663_v42 = vpop.eup %9009  ;;  %v7088_v32 = vand.u32 2147483647, %v7087_v8 }
 0x91d   : > { %v7143_v45 = vor.u32 %v7142_v0, %v7141_v20  ;;  %v7324_v61 = vshrl.u32 %v7323_v18, 23  ;;  %v16054_v2 = vand.u32 2147483647, %v14610_v57  ;;  %v7090_v36 = vcvt.s32.f32 %v7083_v27 }
 0x91e   : > { %v7282_v53 = vsub.s32 0, %v14659_v40  ;;  %vm7144_vm9 = vcmp.lt.s32.totalorder %v7125_v39, 1  ;;  %vm7147_vm6 = vcmp.lt.s32.totalorder %v7125_v39, 4  ;;  %v7128_v55 = vshrl.u32 %v16000_v4, %v7127_v9 }
 0x91f   : > { %v7327_v7 = vand.u32 8388607, %v16054_v2  ;;  %v14668_v50 = vpop.eup %9011  ;;  %vm7146_vm0 = vcmp.lt.s32.totalorder %v7125_v39, 3  ;;  %v7152_v44 = vsel %vm7144_vm9, %v7131_v51, %v7134_v3  ;;  %v7153_v12 = vsel %vm7147_vm6, %v7140_v6, 920167782 }
 0x920   : > { %vm7218_vm5 = vcmp.lt.s32.totalorder %v14381_v46, 0  ;;  %v8392_v20 = vmin.u32 %v7282_v53, %v14659_v40  ;;  %vm7145_vm3 = vcmp.lt.s32.totalorder %v7125_v39, 2  ;;  %v7149_v8 = vsel %vm7147_vm6, %v7137_v21, 2102212464 }
 0x921   : > { %v7154_v18 = vsel %vm7146_vm0, %v7137_v21, %v7153_v12  ;;  %v7091_v1 = vmul.f32 %v7090_v36, %v7088_v32  ;;  %v7156_v58 = vsel %vm7144_vm9, %v7134_v3, %v7137_v21  ;;  %v7157_v0 = vsel %vm7147_vm6, %v7143_v45, 1326507024 }
 0x922   : > { %v7155_v56 = vsel %vm7145_vm3, %v7152_v44, %v7154_v18  ;;  %v7284_v27 = vclz %v8392_v20  ;;  %v7158_v9 = vsel %vm7146_vm0, %v7140_v6, %v7157_v0  ;;  %v7148_v2 = vsel %vm7144_vm9, %v7128_v55, %v7131_v51 }
 0x923   : > { %v14679_v33 = vmul.u32.u64.low %v14661_v10, %v7155_v56  ;;  %v14680_v59 = vmul.u32.u64.high %v14661_v10, %v7155_v56, %v14679_v33  ;;  %v7150_v53 = vsel %vm7146_vm0, %v7134_v3, %v7149_v8  ;;  %v7159_v12 = vsel %vm7145_vm3, %v7156_v58, %v7158_v9 }
 0x924   : > { %v8395_v32 = vadd.s32 4294967169, %v7324_v61  ;;  %9013 = vcosq.f32 %v6992_v62  ;;  %v8393_v36 = vadd.s32 4294967294, %v7284_v27  ;;  %v7302_v6 = vsub.s32 4, %v14642_v30 }
 0x925   : > { %v14687_v21 = vmul.u32.u64.low %v14661_v10, %v7159_v12  ;;  %v14688_v45 = vmul.u32.u64.high %v14661_v10, %v7159_v12, %v14687_v21  ;;  %9015 = vsinq.f32 %v6992_v62  ;;  %v7427_v20 = vand.u32 2139095040, %v14632_v34 }
 0x926   : > { %v7330_v44 = vadd.s32 1, %v8395_v32  ;;  %v7272_v51 = vadd.s32 %v14582_v54, %v14593_v43  ;;  %vm8394_vm14 = vcmp.lt.s32.totalorder %v8393_v36, 0  ;;  %v7151_v3 = vsel %vm7145_vm3, %v7148_v2, %v7150_v53 }
 0x927   : > { %v7170_v61 = vadd.s32 1, %v14680_v59  ;;  %v7092_v55 = vxor.u32 2147483648, %v7091_v1  ;;  %v7287_v8 = vsel %vm8394_vm14, 0, %v8393_v36  ;;  %v7328_v18 = vor.u32 8388608, %v7327_v7 }
 0x928   : > { %vm7331_vm9 = vcmp.gt.s32.totalorder %v7330_v44, 0  ;;  %v7288_v56 = vsub.s32 32, %v7287_v8  ;;  %v7292_v58 = vsub.s32 4294967266, %v7287_v8  ;;  %v15554_v62 = vand.u32 2147483647, %v14632_v34 }
 0x929   : > { %v7428_v0 = vshrl.u32 %v7427_v20, 23  ;;  %v14700_v27 = vsel %vm7218_vm5, %v7302_v6, %v14642_v30  ;;  %v7167_v54 = vmul.u32 %v14661_v10, %v7151_v3  ;;  %vm7169_vm6 = vc.u32 %v14688_v45, %v14679_v33 }
 0x92a   : > { %v7332_v43 = vsel %vm7331_vm9, %v7330_v44, 0  ;;  %v7290_v39 = vshrl.u32 %v7272_v51, %v7288_v56  ;;  %v7293_v9 = vadd.s32 127, %v7292_v58  ;;  %v7171_v7 = vsel %vm7169_vm6, %v7170_v61, %v14680_v59 }
 0x92b   : > { %v14706_v2 = vshrl.u32 %v7332_v43, 5  ;;  %v7093_v53 = vsel %vm7010_vm12, %v7092_v55, %v7091_v1  ;;  %v7289_v12 = vshll.u32 %v14659_v40, %v7287_v8  ;;  %v7172_v32 = vadd.s32 %v7171_v7, %v7167_v54 }
 0x92c   : > { %v7334_v30 = vand.u32 31, %v7332_v43  ;;  %v7294_v36 = vshll.u32 %v7293_v9, 23  ;;  %v14711_v21 = vshll.u32 %v7328_v18, 8  ;;  %v8399_v10 = vadd.s32 4294967169, %v7428_v0 }
 0x92d   : > { %v14715_v6 = vand.u32 8388607, %v15554_v62  ;;  %v7291_v44 = vor.u32 %v7290_v39, %v7289_v12  ;;  %v7173_v20 = vadd.s32 536870912, %v7172_v32  ;;  %vm7352_vm0 = vcmp.lt.s32.totalorder %v14706_v2, 1 }
 0x92e   : > { %v7335_v59 = vsub.s32 32, %v7334_v30  ;;  %v14718_v51 = vpop.eup %9013  ;;  %v7295_v1 = vor.u32 4788187, %v7294_v36  ;;  %v7337_v40 = vshll.u32 %v16000_v4, %v7334_v30  ;;  %v7340_v3 = vshll.u32 %v16001_v19, %v7334_v30 }
 0x92f   : > { %16055 = vst [vmem:[#allocation22_spill] sm:$0xff] %v14718_v51  ;;  %v7343_v61 = vshll.u32 %v16002_v29, %v7334_v30  ;;  %v14723_v55 = vpop.eup %9015  ;;  %v14725_v8 = vshrl.u32 %v7173_v20, 30  ;;  %v7346_v58 = vshll.u32 %v16003_v5, %v7334_v30  ;;  %v7349_v39 = vshll.u32 %v15600_v23, %v7334_v30 }
 0x930   : > { %16056 = vst [vmem:[#allocation37_spill] sm:$0xff] %v14723_v55  ;;  %v7338_v18 = vshrl.u32 %v16001_v19, %v7335_v59  ;;  %v7341_v56 = vshrl.u32 %v16002_v29, %v7335_v59  ;;  %v7296_v0 = vand.u32 2147483647, %v7295_v1  ;;  %v7344_v54 = vshrl.u32 %v16003_v5, %v7335_v59 }
 0x931   : > { %16057 = vst [vmem:[#allocation42_spill] sm:$0xff] %v14725_v8  ;;  %v7347_v43 = vshrl.u32 %v15600_v23, %v7335_v59  ;;  %v16058_v9 = vand.u32 2147483647, %v14381_v46  ;;  %v7175_v12 = vshll.u32 %v14725_v8, 30  ;;  %v7350_v62 = vshrl.u32 %v15601_v16, %v7335_v59 }
 0x932   : > { %v7339_v36 = vor.u32 %v7338_v18, %v7337_v40  ;;  %v7342_v20 = vor.u32 %v7341_v56, %v7340_v3  ;;  %v7298_v37 = vcvt.s32.f32 %v7291_v44  ;;  %v7345_v1 = vor.u32 %v7344_v54, %v7343_v61 }
 0x933   : > { %vm14735_vm12 = vcmp.le.f32.partialorder %v16058_v9, 0.7853982  ;;  %v7348_v47 = vor.u32 %v7347_v43, %v7346_v58  ;;  %vm7353_vm3 = vcmp.lt.s32.totalorder %v14706_v2, 2  ;;  %v14742_v51 = vsub.s32 %v7172_v32, %v7175_v12 }
 0x934   : > { %v7336_v30 = vshrl.u32 %v16000_v4, %v7335_v59  ;;  %v7351_v55 = vor.u32 %v7350_v62, %v7349_v39  ;;  %vm7355_vm14 = vcmp.lt.s32.totalorder %v14706_v2, 4  ;;  %vm7354_vm9 = vcmp.lt.s32.totalorder %v14706_v2, 3 }
 0x935   : > { %v7357_v9 = vsel %vm7355_vm14, %v7345_v1, 2102212464  ;;  %v7360_v40 = vsel %vm7352_vm0, %v7339_v36, %v7342_v20  ;;  %v7361_v3 = vsel %vm7355_vm14, %v7348_v47, 920167782  ;;  %v7299_v18 = vmul.f32 %v7298_v37, %v7296_v0 }
 0x936   : > { %v7178_v44 = vsub.s32 0, %v14742_v51  ;;  %v7362_v61 = vsel %vm7354_vm9, %v7345_v1, %v7361_v3  ;;  %v7364_v32 = vsel %vm7352_vm0, %v7342_v20, %v7345_v1  ;;  %v7365_v62 = vsel %vm7355_vm14, %v7351_v55, 1326507024 }
 0x937   : > { %v7363_v59 = vsel %vm7353_vm3, %v7360_v40, %v7362_v61  ;;  %v7434_v56 = vadd.s32 1, %v8399_v10  ;;  %v14756_v58 = vadd.f32 %v14256_v48, %v14619_v31  ;;  %v7356_v37 = vsel %vm7352_vm0, %v7336_v30, %v7339_v36 }
 0x938   : > { %v8388_v54 = vmin.u32 %v7178_v44, %v14742_v51  ;;  %v7358_v0 = vsel %vm7354_vm9, %v7342_v20, %v7357_v9  ;;  %v7366_v43 = vsel %vm7354_vm9, %v7348_v47, %v7365_v62  ;;  %v7432_v10 = vor.u32 8388608, %v14715_v6 }
 0x939   : > { %v7367_v39 = vsel %vm7353_vm3, %v7364_v32, %v7366_v43  ;;  %v14764_v12 = vmul.u32.u64.low %v14711_v21, %v7363_v59  ;;  %v14765_v1 = vmul.u32.u64.high %v14711_v21, %v7363_v59, %v14764_v12  ;;  %v7300_v55 = vxor.u32 2147483648, %v7299_v18 }
 0x93a   : > { %v7180_v48 = vclz %v8388_v54  ;;  %v14770_v40 = vmul.u32.u64.low %v14711_v21, %v7367_v39  ;;  %v14771_v3 = vmul.u32.u64.high %v14711_v21, %v7367_v39, %v14770_v40  ;;  %v14776_v47 = vsel %vm14598_vm2, %v14335_v60, %v7093_v53 }
 0x93b   : > { %v7359_v20 = vsel %vm7353_vm3, %v7356_v37, %v7358_v0  ;;  %vm7435_vm6 = vcmp.gt.s32.totalorder %v7434_v56, 0  ;;  %v7168_v6 = vadd.s32 %v14679_v33, %v14688_v45  ;;  %v14787_v44 = vadd.f32 %v14358_v24, %v14619_v31 }
 0x93c   : > { %v8389_v30 = vadd.s32 4294967294, %v7180_v48  ;;  %v7436_v9 = vsel %vm7435_vm6, %v7434_v56, 0  ;;  %v7378_v35 = vadd.s32 1, %v14765_v1  ;;  %v14790_v61 = vshll.u32 %v7432_v10, 8 }
 0x93d   : > { %v7438_v53 = vand.u32 31, %v7436_v9  ;;  %v15564_v32 = vand.u32 2147483647, %v14756_v58  ;;  %v14795_v2 = vsel %vm7218_vm5, %v7300_v55, %v7299_v18  ;;  %v7375_v33 = vmul.u32 %v14711_v21, %v7359_v20 }
 0x93e   : > { %vm8390_vm2 = vcmp.lt.s32.totalorder %v8389_v30, 0  ;;  %vm7377_vm0 = vc.u32 %v14771_v3, %v14764_v12  ;;  %v7635_v62 = vand.u32 2139095040, %v14756_v58  ;;  %v7437_v0 = vshrl.u32 %v7436_v9, 5 }
 0x93f   : > { %v7183_v45 = vsel %vm8390_vm2, 0, %v8389_v30  ;;  %v7379_v24 = vsel %vm7377_vm0, %v7378_v35, %v14765_v1  ;;  %v7439_v59 = vsub.s32 32, %v7438_v53  ;;  %v7441_v18 = vshll.u32 %v16000_v4, %v7438_v53 }
 0x940   : > { %v7184_v56 = vsub.s32 32, %v7183_v45  ;;  %v7188_v54 = vsub.s32 4294967266, %v7183_v45  ;;  %v7380_v37 = vadd.s32 %v7379_v24, %v7375_v33  ;;  %v7185_v43 = vshll.u32 %v14742_v51, %v7183_v45 }
 0x941   : > { %v7442_v39 = vshrl.u32 %v16001_v19, %v7439_v59  ;;  %v7445_v21 = vshrl.u32 %v16002_v29, %v7439_v59  ;;  %v7444_v1 = vshll.u32 %v16001_v19, %v7438_v53  ;;  %v7447_v20 = vshll.u32 %v16002_v29, %v7438_v53 }
 0x942   : > { %v7186_v10 = vshrl.u32 %v7168_v6, %v7184_v56  ;;  %v7189_v55 = vadd.s32 127, %v7188_v54  ;;  %v7381_v48 = vadd.s32 536870912, %v7380_v37  ;;  %v7448_v30 = vshrl.u32 %v16003_v5, %v7439_v59 }
 0x943   : > { %v7443_v40 = vor.u32 %v7442_v39, %v7441_v18  ;;  %v7450_v9 = vshll.u32 %v16003_v5, %v7438_v53  ;;  %v7451_v45 = vshrl.u32 %v15600_v23, %v7439_v59  ;;  %v7446_v24 = vor.u32 %v7445_v21, %v7444_v1 }
 0x944   : > { %v7187_v35 = vor.u32 %v7186_v10, %v7185_v43  ;;  %v7190_v51 = vshll.u32 %v7189_v55, 23  ;;  %v14810_v33 = vshrl.u32 %v7381_v48, 30  ;;  %v7449_v36 = vor.u32 %v7448_v30, %v7447_v20 }
 0x945   : > { %v7453_v6 = vshll.u32 %v15600_v23, %v7438_v53  ;;  %v7454_v56 = vshrl.u32 %v15601_v16, %v7439_v59  ;;  %v7452_v39 = vor.u32 %v7451_v45, %v7450_v9  ;;  %v7639_v60 = vand.u32 8388607, %v15564_v32 }
 0x946   : > { %16061 = vst [vmem:[#allocation41_spill] sm:$0xff] %v14810_v33  ;;  %v7191_v54 = vor.u32 4788187, %v7190_v51  ;;  %v7383_v18 = vshll.u32 %v14810_v33, 30  ;;  %v7440_v43 = vshrl.u32 %v16000_v4, %v7439_v59  ;;  %vm7456_vm5 = vcmp.lt.s32.totalorder %v7437_v0, 1 }
 0x947   : > { %v7455_v10 = vor.u32 %v7454_v56, %v7453_v6  ;;  %v7636_v55 = vshrl.u32 %v7635_v62, 23  ;;  %v7194_v8 = vcvt.s32.f32 %v7187_v35  ;;  %vm7459_vm3 = vcmp.lt.s32.totalorder %v7437_v0, 4 }
 0x948   : > { %v7192_v48 = vand.u32 2147483647, %v7191_v54  ;;  %v14819_v21 = vsub.s32 %v7380_v37, %v7383_v18  ;;  %vm7458_vm14 = vcmp.lt.s32.totalorder %v7437_v0, 3  ;;  %v7461_v53 = vsel %vm7459_vm3, %v7449_v36, 2102212464 }
 0x949   : > { %v7464_v1 = vsel %vm7456_vm5, %v7443_v40, %v7446_v24  ;;  %v7465_v20 = vsel %vm7459_vm3, %v7452_v39, 920167782  ;;  %vm7457_vm9 = vcmp.lt.s32.totalorder %v7437_v0, 2  ;;  %v7468_v51 = vsel %vm7456_vm5, %v7446_v24, %v7449_v36 }
 0x94a   : > { %v7386_v30 = vsub.s32 0, %v14819_v21  ;;  %v7466_v9 = vsel %vm7458_vm14, %v7449_v36, %v7465_v20  ;;  %vm15570_vm6 = vcmp.lt.s32.totalorder %v14510_v63, 0  ;;  %v7460_v59 = vsel %vm7456_vm5, %v7440_v43, %v7443_v40 }
 0x94b   : > { %v7467_v62 = vsel %vm7457_vm9, %v7464_v1, %v7466_v9  ;;  %v7469_v45 = vsel %vm7459_vm3, %v7455_v10, 1326507024  ;;  %v8407_v35 = vadd.s32 4294967169, %v7636_v55  ;;  %v7195_v37 = vmul.f32 %v7194_v8, %v7192_v48 }
 0x94c   : > { %v8396_v6 = vmin.u32 %v7386_v30, %v14819_v21  ;;  %v7462_v56 = vsel %vm7458_vm14, %v7446_v24, %v7461_v53  ;;  %v7470_v54 = vsel %vm7458_vm14, %v7452_v39, %v7469_v45  ;;  %v14838_v40 = vsel %vm14735_vm12, %v14381_v46, %v14795_v2 }
 0x94d   : > { %v7471_v18 = vsel %vm7457_vm9, %v7468_v51, %v7470_v54  ;;  %v14830_v32 = vmul.u32.u64.low %v14790_v61, %v7467_v62  ;;  %v14831_v20 = vmul.u32.u64.high %v14790_v61, %v7467_v62, %v14830_v32  ;;  %v7642_v36 = vadd.s32 1, %v8407_v35  ;;  %v16117_v51 = vld [vmem:[#allocation41_spill] sm:$0xff] }
 0x94e   : > { %v7388_v8 = vclz %v8396_v6  ;;  %v14841_v43 = vmul.u32.u64.low %v14790_v61, %v7471_v18  ;;  %v14842_v24 = vmul.u32.u64.high %v14790_v61, %v7471_v18, %v14841_v43  ;;  %9017 = vcosq.f32 %v14776_v47 }
 0x94f   : > { %v7463_v39 = vsel %vm7457_vm9, %v7460_v59, %v7462_v56  ;;  %v7640_v10 = vor.u32 8388608, %v7639_v60  ;;  %vm7643_vm2 = vcmp.gt.s32.totalorder %v7642_v36, 0  ;;  %9019 = vsinq.f32 %v14776_v47 }
 0x950   : > { %v7196_v55 = vxor.u32 2147483648, %v7195_v37  ;;  %v8397_v48 = vadd.s32 4294967294, %v7388_v8  ;;  %v7644_v53 = vsel %vm7643_vm2, %v7642_v36, 0  ;;  %9021 = vcosq.f32 %v14838_v40 }
 0x951   : > { %v7482_v2 = vadd.s32 1, %v14831_v20  ;;  %v7646_v1 = vand.u32 31, %v7644_v53  ;;  %v16062_v9 = vand.u32 2147483647, %v14510_v63  ;;  %v7376_v60 = vadd.s32 %v14764_v12, %v14771_v3 }
 0x952   : > { %vm8398_vm5 = vcmp.lt.s32.totalorder %v8397_v48, 0  ;;  %v7479_v47 = vmul.u32 %v14790_v61, %v7463_v39  ;;  %vm7481_vm3 = vc.u32 %v14842_v24, %v14830_v32  ;;  %v14862_v45 = vshll.u32 %v7640_v10, 8 }
 0x953   : > { %vm14852_vm0 = vcmp.le.f32.partialorder %v16062_v9, 0.7853982  ;;  %v7391_v0 = vsel %vm8398_vm5, 0, %v8397_v48  ;;  %v7483_v59 = vsel %vm7481_vm3, %v7482_v2, %v14831_v20  ;;  %v7647_v62 = vsub.s32 32, %v7646_v1 }
 0x954   : > { %v7197_v35 = vsel %vm15570_vm6, %v7196_v55, %v7195_v37  ;;  %v7392_v6 = vsub.s32 32, %v7391_v0  ;;  %v7396_v56 = vsub.s32 4294967266, %v7391_v0  ;;  %v7484_v54 = vadd.s32 %v7483_v59, %v7479_v47 }
 0x955   : > { %v7393_v12 = vshll.u32 %v14819_v21, %v7391_v0  ;;  %v14867_v3 = vshrl.u32 %v7644_v53, 5  ;;  %v7650_v61 = vshrl.u32 %v16001_v19, %v7647_v62  ;;  %v7531_v18 = vand.u32 2139095040, %v14787_v44 }
 0x956   : > { %v7394_v36 = vshrl.u32 %v7376_v60, %v7392_v6  ;;  %v7397_v8 = vadd.s32 127, %v7396_v56  ;;  %v7485_v20 = vadd.s32 536870912, %v7484_v54  ;;  %v7653_v43 = vshrl.u32 %v16002_v29, %v7647_v62 }
 0x957   : > { %v7649_v39 = vshll.u32 %v16000_v4, %v7646_v1  ;;  %v7652_v37 = vshll.u32 %v16001_v19, %v7646_v1  ;;  %v7655_v10 = vshll.u32 %v16002_v29, %v7646_v1  ;;  %v7656_v55 = vshrl.u32 %v16003_v5, %v7647_v62 }
 0x958   : > { %v7395_v21 = vor.u32 %v7394_v36, %v7393_v12  ;;  %v7398_v48 = vshll.u32 %v7397_v8, 23  ;;  %v14876_v53 = vshrl.u32 %v7485_v20, 30  ;;  %v7659_v2 = vshrl.u32 %v15600_v23, %v7647_v62  ;;  %v14879_v9 = vpop.eup %9017 }
 0x959   : > { %16065 = vst [vmem:[#allocation35_spill] sm:$0xff] %v14879_v9  ;;  %vm15572_vm14 = vcmp.lt.s32.totalorder %v14610_v57, 0  ;;  %v7651_v60 = vor.u32 %v7650_v61, %v7649_v39  ;;  %v7658_v47 = vshll.u32 %v16003_v5, %v7646_v1  ;;  %v7661_v0 = vshll.u32 %v15600_v23, %v7646_v1  ;;  %v14885_v6 = vpop.eup %9019 }
 0x95a   : > { %v7662_v59 = vshrl.u32 %v15601_v16, %v7647_v62  ;;  %16066 = vst [vmem:[#allocation14_spill] sm:$0xff] %v14885_v6  ;;  %v7399_v56 = vor.u32 4788187, %v7398_v48  ;;  %v7487_v12 = vshll.u32 %v14876_v53, 30  ;;  %v7654_v36 = vor.u32 %v7653_v43, %v7652_v37  ;;  %v14888_v20 = vpop.eup %9021 }
 0x95b   : > { %v7657_v8 = vor.u32 %v7656_v55, %v7655_v10  ;;  %16067 = vst [vmem:[#allocation40_spill] sm:$0xff] %v14888_v20  ;;  %v7200_v30 = vsel %vm14852_vm0, %v14510_v63, %v7197_v35  ;;  %v7660_v61 = vor.u32 %v7659_v2, %v7658_v47  ;;  %v7532_v46 = vshrl.u32 %v7531_v18, 23 }
 0x95c   : > { %v7663_v39 = vor.u32 %v7662_v59, %v7661_v0  ;;  %v16068_v1 = vand.u32 2147483647, %v14610_v57  ;;  %v16069_v9 = vmov 0  ;;  %v7400_v48 = vand.u32 2147483647, %v7399_v56 }
 0x95d   : > { %v7402_v6 = vcvt.s32.f32 %v7395_v21  ;;  %v14899_v33 = vsub.s32 %v7484_v54, %v7487_v12  ;;  %v7648_v43 = vshrl.u32 %v16000_v4, %v7647_v62  ;;  %vm7664_vm2 = vcmp.lt.s32.totalorder %v14867_v3, 1 }
 0x95e   : > { %vm14895_vm9 = vcmp.le.f32.partialorder %v16068_v1, 0.7853982  ;;  %vm7665_vm5 = vcmp.lt.s32.totalorder %v14867_v3, 2  ;;  %vm7666_vm3 = vcmp.lt.s32.totalorder %v14867_v3, 3  ;;  %vm7667_vm6 = vcmp.lt.s32.totalorder %v14867_v3, 4 }
 0x95f   : > { %v16070_v9 = vsel %vm14895_vm9, 4294967295, %v16069_v9  ;;  %v7403_v35 = vmul.f32 %v7402_v6, %v7400_v48  ;;  %v7490_v18 = vsub.s32 0, %v14899_v33  ;;  %v7669_v37 = vsel %vm7667_vm6, %v7657_v8, 2102212464 }
 0x960   : > { %16071 = vst [vmem:[#allocation32_spill] sm:$0xff] %v16070_v9  ;;  %v7672_v10 = vsel %vm7664_vm2, %v7651_v60, %v7654_v36  ;;  %v7668_v55 = vsel %vm7664_vm2, %v7648_v43, %v7651_v60  ;;  %v7673_v2 = vsel %vm7667_vm6, %v7660_v61, 920167782  ;;  %v7676_v21 = vsel %vm7664_vm2, %v7654_v36, %v7657_v8 }
 0x961   : > { %v7677_v54 = vsel %vm7667_vm6, %v7663_v39, 1326507024  ;;  %v7404_v47 = vxor.u32 2147483648, %v7403_v35  ;;  %v8400_v62 = vmin.u32 %v7490_v18, %v14899_v33  ;;  %v7674_v0 = vsel %vm7666_vm3, %v7657_v8, %v7673_v2 }
 0x962   : > { %v7678_v59 = vsel %vm7666_vm3, %v7660_v61, %v7677_v54  ;;  %v7670_v56 = vsel %vm7666_vm3, %v7654_v36, %v7669_v37  ;;  %v7675_v12 = vsel %vm7665_vm5, %v7672_v10, %v7674_v0  ;;  %v8403_v1 = vadd.s32 4294967169, %v7532_v46 }
 0x963   : > { %v7679_v6 = vsel %vm7665_vm5, %v7676_v21, %v7678_v59  ;;  %v7405_v48 = vsel %vm15572_vm14, %v7404_v47, %v7403_v35  ;;  %v7492_v60 = vclz %v8400_v62  ;;  %9023 = vsinq.f32 %v14838_v40 }
 0x964   : > { %v14915_v43 = vmul.u32.u64.low %v14862_v45, %v7679_v6  ;;  %v14916_v39 = vmul.u32.u64.high %v14862_v45, %v7679_v6, %v14915_v43  ;;  %v16072_v36 = vsel %vm14735_vm12, 0, %v14700_v27  ;;  %9025 = vcosq.f32 %v7200_v30 }
 0x965   : > { %v14923_v8 = vadd.s32 3, %v16072_v36  ;;  %v14926_v61 = vmul.u32.u64.low %v14862_v45, %v7675_v12  ;;  %v14927_v18 = vmul.u32.u64.high %v14862_v45, %v7675_v12, %v14926_v61  ;;  %v8401_v46 = vadd.s32 4294967294, %v7492_v60 }
 0x966   : > { %v7510_v35 = vsub.s32 4, %v14876_v53  ;;  %v7538_v37 = vadd.s32 1, %v8403_v1  ;;  %9027 = vsinq.f32 %v7200_v30  ;;  %v14934_v40 = vsel %vm14895_vm9, %v14610_v57, %v7405_v48 }
 0x967   : > { %16073 = vst [vmem:[#allocation39_spill] sm:$0xff] %v14923_v8  ;;  %vm7426_vm12 = vcmp.lt.s32.totalorder %v14632_v34, 0  ;;  %v7671_v27 = vsel %vm7665_vm5, %v7668_v55, %v7670_v56  ;;  %vm8402_vm6 = vcmp.lt.s32.totalorder %v8401_v46, 0  ;;  %vm7689_vm2 = vc.u32 %v14916_v39, %v14926_v61 }
 0x968   : > { %v16074_v7 = vand.u32 2147483647, %v14787_v44  ;;  %vm7539_vm3 = vcmp.gt.s32.totalorder %v7538_v37, 0  ;;  %v7480_v30 = vadd.s32 %v14830_v32, %v14842_v24  ;;  %v7495_v2 = vsel %vm8402_vm6, 0, %v8401_v46 }
 0x969   : > { %v7690_v21 = vadd.s32 1, %v14927_v18  ;;  %v7540_v54 = vsel %vm7539_vm3, %v7538_v37, 0  ;;  %v7496_v47 = vsub.s32 32, %v7495_v2  ;;  %v7500_v62 = vsub.s32 4294967266, %v7495_v2 }
 0x96a   : > { %v7535_v10 = vand.u32 8388607, %v16074_v7  ;;  %v14949_v3 = vsel %vm7426_vm12, %v7510_v35, %v14876_v53  ;;  %v7687_v55 = vmul.u32 %v14862_v45, %v7671_v27  ;;  %9029 = vcosq.f32 %v14934_v40 }
 0x96b   : > { %v7691_v0 = vsel %vm7689_vm2, %v7690_v21, %v14927_v18  ;;  %v7542_v59 = vand.u32 31, %v7540_v54  ;;  %v14956_v32 = vadd.f32 %v14417_v11, %v14619_v31  ;;  %v7498_v24 = vshrl.u32 %v7480_v30, %v7496_v47 }
 0x96c   : > { %v7501_v56 = vadd.s32 127, %v7500_v62  ;;  %v7692_v12 = vadd.s32 %v7691_v0, %v7687_v55  ;;  %v7536_v6 = vor.u32 8388608, %v7535_v10  ;;  %v7497_v1 = vshll.u32 %v14899_v33, %v7495_v2  ;;  %v16123_v62 = vld [vmem:[#allocation35_spill] sm:$0xff] }
 0x96d   : > { %v7541_v48 = vshrl.u32 %v7540_v54, 5  ;;  %v7543_v53 = vsub.s32 32, %v7542_v59  ;;  %v7545_v36 = vshll.u32 %v16000_v4, %v7542_v59  ;;  %v7551_v18 = vshll.u32 %v16002_v29, %v7542_v59  ;;  %v14962_v46 = vpop.eup %9023 }
 0x96e   : > { %v7502_v45 = vshll.u32 %v7501_v56, 23  ;;  %v7693_v43 = vadd.s32 536870912, %v7692_v12  ;;  %16075 = vst [vmem:[#allocation23_spill] sm:$0xff] %v14962_v46  ;;  %v7499_v11 = vor.u32 %v7498_v24, %v7497_v1  ;;  %v14967_v33 = vpop.eup %9025  ;;  %vm7634_vm5 = vcmp.lt.s32.totalorder %v14756_v58, 0 }
 0x96f   : > { %v7546_v31 = vshrl.u32 %v16001_v19, %v7543_v53  ;;  %v7549_v35 = vshrl.u32 %v16002_v29, %v7543_v53  ;;  %v7552_v37 = vshrl.u32 %v16003_v5, %v7543_v53  ;;  %v7548_v10 = vshll.u32 %v16001_v19, %v7542_v59 }
 0x970   : > { %v7503_v27 = vor.u32 4788187, %v7502_v45  ;;  %v7694_v7 = vshrl.u32 %v7693_v43, 30  ;;  %v7555_v30 = vshrl.u32 %v15600_v23, %v7543_v53  ;;  %v14972_v2 = vpop.eup %9027  ;;  %v7554_v54 = vshll.u32 %v16003_v5, %v7542_v59 }
 0x971   : > { %v7553_v21 = vor.u32 %v7552_v37, %v7551_v18  ;;  %v14975_v47 = vshll.u32 %v7536_v6, 8  ;;  %v16076_v55 = vand.u32 2147483647, %v14632_v34  ;;  %v7547_v1 = vor.u32 %v7546_v31, %v7545_v36 }
 0x972   : > { %v7504_v24 = vand.u32 2147483647, %v7503_v27  ;;  %v7695_v56 = vshll.u32 %v7694_v7, 30  ;;  %v7550_v45 = vor.u32 %v7549_v35, %v7548_v10  ;;  %v7506_v43 = vcvt.s32.f32 %v7499_v11 }
 0x973   : > { %vm14980_vm6 = vcmp.le.f32.partialorder %v16076_v55, 0.7853982  ;;  %v7556_v60 = vor.u32 %v7555_v30, %v7554_v54  ;;  %v7557_v18 = vshll.u32 %v15600_v23, %v7542_v59  ;;  %v7558_v37 = vshrl.u32 %v15601_v16, %v7543_v53 }
 0x974   : > { %v16079_v6 = vand.u32 2147483647, %v14756_v58  ;;  %v14992_v55 = vsub.s32 %v7692_v12, %v7695_v56  ;;  %v7544_v20 = vshrl.u32 %v16000_v4, %v7543_v53  ;;  %vm7560_vm3 = vcmp.lt.s32.totalorder %v7541_v48, 1  ;;  %v14995_v36 = vpop.eup %9029 }
 0x975   : > { %vm7563_vm14 = vcmp.lt.s32.totalorder %v7541_v48, 4  ;;  %16082 = vst [vmem:[#allocation30_spill] sm:$0xff] %v14995_v36  ;;  %v7507_v11 = vmul.f32 %v7506_v43, %v7504_v24  ;;  %v7718_v31 = vsub.s32 4, %v7694_v7  ;;  %v7559_v35 = vor.u32 %v7558_v37, %v7557_v18 }
 0x976   : > { %vm14988_vm2 = vcmp.le.f32.partialorder %v16079_v6, 0.7853982  ;;  %v7565_v59 = vsel %vm7563_vm14, %v7553_v21, 2102212464  ;;  %v7698_v27 = vsub.s32 0, %v14992_v55  ;;  %vm7562_vm15 = vcmp.lt.s32.totalorder %v7541_v48, 3 }
 0x977   : > { %v7564_v10 = vsel %vm7560_vm3, %v7544_v20, %v7547_v1  ;;  %v7568_v30 = vsel %vm7560_vm3, %v7547_v1, %v7550_v45  ;;  %v7566_v54 = vsel %vm7562_vm15, %v7550_v45, %v7565_v59  ;;  %v7569_v6 = vsel %vm7563_vm14, %v7556_v60, 920167782 }
 0x978   : > { %v7572_v46 = vsel %vm7560_vm3, %v7550_v45, %v7553_v21  ;;  %v7573_v12 = vsel %vm7563_vm14, %v7559_v35, 1326507024  ;;  %v8408_v56 = vmin.u32 %v7698_v27, %v14992_v55  ;;  %vm7561_vm10 = vcmp.lt.s32.totalorder %v7541_v48, 2 }
 0x979   : > { %v7570_v53 = vsel %vm7562_vm15, %v7553_v21, %v7569_v6  ;;  %v7574_v8 = vsel %vm7562_vm15, %v7556_v60, %v7573_v12  ;;  %v7508_v9 = vxor.u32 2147483648, %v7507_v11  ;;  %v15001_v24 = vsel %vm7634_vm5, %v7718_v31, %v7694_v7 }
 0x97a   : > { %v7571_v43 = vsel %vm7561_vm10, %v7568_v30, %v7570_v53  ;;  %v7575_v18 = vsel %vm7561_vm10, %v7572_v46, %v7574_v8  ;;  %v7700_v37 = vclz %v8408_v56  ;;  %v7567_v36 = vsel %vm7561_vm10, %v7564_v10, %v7566_v54 }
 0x97b   : > { %v15004_v20 = vmul.u32.u64.low %v14975_v47, %v7575_v18  ;;  %v15005_v1 = vmul.u32.u64.high %v14975_v47, %v7575_v18, %v15004_v20  ;;  %9031 = vsinq.f32 %v14934_v40  ;;  %v7513_v48 = vsel %vm14980_vm6, 0, %v14949_v3 }
 0x97c   : > { %v15012_v60 = vmul.u32.u64.low %v14975_v47, %v7571_v43  ;;  %v15013_v21 = vmul.u32.u64.high %v14975_v47, %v7571_v43, %v15012_v60  ;;  %v7688_v7 = vadd.s32 %v14926_v61, %v14916_v39  ;;  %v8409_v8 = vadd.s32 4294967294, %v7700_v37 }
 0x97d   : > { %v7739_v46 = vand.u32 2139095040, %v14956_v32  ;;  %v16083_v45 = vsub.s32 4, %v14047_v41  ;;  %v7509_v31 = vsel %vm7426_vm12, %v7508_v9, %v7507_v11  ;;  %v7721_v35 = vsel %vm14988_vm2, 0, %v15001_v24 }
 0x97e   : > { %v7583_v59 = vmul.u32 %v14975_v47, %v7567_v36  ;;  %vm8410_vm10 = vcmp.lt.s32.totalorder %v8409_v8, 0  ;;  %vm7585_vm15 = vc.u32 %v15005_v1, %v15012_v60  ;;  %v16084_v27 = vand.u32 2147483647, %v14956_v32 }
 0x97f   : > { %v6367_v40 = vsel %vm6282_vm4, %v16083_v45, %v14047_v41  ;;  %v7740_v61 = vshrl.u32 %v7739_v46, 23  ;;  %v7703_v41 = vsel %vm8410_vm10, 0, %v8409_v8  ;;  %v7586_v30 = vadd.s32 1, %v15013_v21 }
 0x980   : > { %v6369_v39 = vsel %vm14239_vm7, 0, %v6367_v40  ;;  %v7743_v10 = vand.u32 8388607, %v16084_v27  ;;  %v6782_v11 = vsub.s32 4, %v14392_v17  ;;  %v7704_v54 = vsub.s32 32, %v7703_v41 }
 0x981   : > { %v6373_v9 = vadd.s32 3, %v6369_v39  ;;  %v7708_v6 = vsub.s32 4294967266, %v7703_v41  ;;  %v8411_v12 = vadd.s32 4294967169, %v7740_v61  ;;  %v6377_v47 = vxor.u32 2147483648, %v14396_v52 }
 0x982   : > { %v7705_v25 = vshll.u32 %v14992_v55, %v7703_v41  ;;  %v7587_v36 = vsel %vm7585_vm15, %v7586_v30, %v15013_v21  ;;  %v6380_v53 = vxor.u32 2147483648, %v14390_v49  ;;  %v7706_v43 = vshrl.u32 %v7688_v7, %v7704_v54 }
 0x983   : > { %v6374_v56 = vand.u32 3, %v6373_v9  ;;  %v7709_v18 = vadd.s32 127, %v7708_v6  ;;  %v7588_v37 = vadd.s32 %v7587_v36, %v7583_v59  ;;  %v7746_v20 = vadd.s32 1, %v8411_v12 }
 0x984   : > { %v7744_v8 = vor.u32 8388608, %v7743_v10  ;;  %v6783_v46 = vsel %vm6698_vm8, %v6782_v11, %v14392_v17  ;;  %v7707_v45 = vor.u32 %v7706_v43, %v7705_v25  ;;  %v15048_v21 = vsel %vm14980_vm6, %v14632_v34, %v7509_v31 }
 0x985   : > { %vm6376_vm4 = vcmp.eq.s32.totalorder %v6374_v56, 0  ;;  %vm6379_vm7 = vcmp.eq.s32.totalorder %v6374_v56, 2  ;;  %v7710_v40 = vshll.u32 %v7709_v18, 23  ;;  %v7589_v39 = vadd.s32 536870912, %v7588_v37  ;;  %v15043_v55 = vpop.eup %9031 }
 0x986   : > { %vm7747_vm14 = vcmp.gt.s32.totalorder %v7746_v20, 0  ;;  %v6378_v59 = vsel %vm6376_vm4, %v14390_v49, %v6377_v47  ;;  %v6381_v61 = vsel %vm6379_vm7, %v6380_v53, %v14396_v52  ;;  %v15053_v10 = vadd.s32 %v15012_v60, %v15005_v1 }
 0x987   : > { %v7748_v7 = vsel %vm7747_vm14, %v7746_v20, 0  ;;  %v7711_v27 = vor.u32 4788187, %v7710_v40  ;;  %v15055_v17 = vshrl.u32 %v7589_v39, 30  ;;  %v6785_v41 = vsel %vm14565_vm11, 0, %v6783_v46 }
 0x988   : > { %v7714_v30 = vcvt.s32.f32 %v7707_v45  ;;  %v7750_v9 = vand.u32 31, %v7748_v7  ;;  %v15059_v11 = vshll.u32 %v7744_v8, 8  ;;  %vm6375_vm8 = vcmp.lt.s32.totalorder %v6374_v56, 2 }
 0x989   : > { %v7712_v31 = vand.u32 2147483647, %v7711_v27  ;;  %v7591_v54 = vshll.u32 %v15055_v17, 30  ;;  %v7749_v49 = vshrl.u32 %v7748_v7, 5  ;;  %v15062_v6 = vsel %vm6375_vm8, %v6378_v59, %v6381_v61 }
 0x98a   : > { %v7751_v52 = vsub.s32 32, %v7750_v9  ;;  %v7753_v1 = vshll.u32 %v16000_v4, %v7750_v9  ;;  %v6789_v60 = vadd.s32 3, %v6785_v41  ;;  %v6793_v12 = vxor.u32 2147483648, %v14668_v50 }
 0x98b   : > { %v7715_v47 = vmul.f32 %v7714_v30, %v7712_v31  ;;  %v15066_v22 = vsub.s32 %v7588_v37, %v7591_v54  ;;  %v7756_v25 = vshll.u32 %v16001_v19, %v7750_v9  ;;  %v7759_v36 = vshll.u32 %v16002_v29, %v7750_v9 }
 0x98c   : > { %v7754_v56 = vshrl.u32 %v16001_v19, %v7751_v52  ;;  %v7757_v53 = vshrl.u32 %v16002_v29, %v7751_v52  ;;  %v7760_v43 = vshrl.u32 %v16003_v5, %v7751_v52  ;;  %v7762_v18 = vshll.u32 %v16003_v5, %v7750_v9 }
 0x98d   : > { %v7594_v20 = vsub.s32 0, %v15066_v22  ;;  %v7763_v8 = vshrl.u32 %v15600_v23, %v7751_v52  ;;  %v7765_v46 = vshll.u32 %v15600_v23, %v7750_v9  ;;  %v7766_v37 = vshrl.u32 %v15601_v16, %v7751_v52 }
 0x98e   : > { %v7752_v45 = vshrl.u32 %v16000_v4, %v7751_v52  ;;  %v7755_v40 = vor.u32 %v7754_v56, %v7753_v1  ;;  %v7758_v39 = vor.u32 %v7757_v53, %v7756_v25  ;;  %v7761_v7 = vor.u32 %v7760_v43, %v7759_v36 }
 0x98f   : > { %v8404_v19 = vmin.u32 %v7594_v20, %v15066_v22  ;;  %v7764_v29 = vor.u32 %v7763_v8, %v7762_v18  ;;  %v7767_v59 = vor.u32 %v7766_v37, %v7765_v46  ;;  %vm7768_vm11 = vcmp.lt.s32.totalorder %v7749_v49, 1 }
 0x990   : > { %v7716_v61 = vxor.u32 2147483648, %v7715_v47  ;;  %vm7771_vm12 = vcmp.lt.s32.totalorder %v7749_v49, 4  ;;  %v7772_v5 = vsel %vm7768_vm11, %v7752_v45, %v7755_v40  ;;  %v7776_v27 = vsel %vm7768_vm11, %v7755_v40, %v7758_v39 }
 0x991   : > { %v7596_v41 = vclz %v8404_v19  ;;  %vm7770_vm3 = vcmp.lt.s32.totalorder %v7749_v49, 3  ;;  %v7773_v23 = vsel %vm7771_vm12, %v7761_v7, 2102212464  ;;  %v7777_v16 = vsel %vm7771_vm12, %v7764_v29, 920167782 }
 0x992   : > { %vm6372_vm10 = vweird.f32 %v13845_v15  ;;  %vm7769_vm15 = vcmp.lt.s32.totalorder %v7749_v49, 2  ;;  %v7774_v4 = vsel %vm7770_vm3, %v7758_v39, %v7773_v23  ;;  %v7778_v30 = vsel %vm7770_vm3, %v7761_v7, %v7777_v16 }
 0x993   : > { %v7780_v9 = vsel %vm7768_vm11, %v7758_v39, %v7761_v7  ;;  %vm6788_vm4 = vweird.f32 %v14084_v13  ;;  %v8405_v31 = vadd.s32 4294967294, %v7596_v41  ;;  %v7775_v54 = vsel %vm7769_vm15, %v7772_v5, %v7774_v4  ;;  %v16085_v7 = vld [vmem:[#allocation25_spill] sm:$0xff] }
 0x994   : > { %v7779_v52 = vsel %vm7769_vm15, %v7776_v27, %v7778_v30  ;;  %v7781_v1 = vsel %vm7771_vm12, %v7767_v59, 1326507024  ;;  %v7717_v25 = vsel %vm7634_vm5, %v7716_v61, %v7715_v47  ;;  %v7791_v18 = vmul.u32 %v15059_v11, %v7775_v54  ;;  %v16086_v5 = vld [vmem:[#allocation33_spill] sm:$0xff] }
 0x995   : > { %v7782_v36 = vsel %vm7770_vm3, %v7764_v29, %v7781_v1  ;;  %v15088_v56 = vmul.u32.u64.low %v15059_v11, %v7779_v52  ;;  %v15089_v53 = vmul.u32.u64.high %v15059_v11, %v7779_v52, %v15088_v56  ;;  %vm8406_vm7 = vcmp.lt.s32.totalorder %v8405_v31, 0 }
 0x996   : > { %v7783_v43 = vsel %vm7769_vm15, %v7780_v9, %v7782_v36  ;;  %v6790_v20 = vand.u32 3, %v6789_v60  ;;  %v7599_v8 = vsel %vm8406_vm7, 0, %v8405_v31  ;;  %v6796_v49 = vxor.u32 2147483648, %v14663_v42 }
 0x997   : > { %v15093_v46 = vmul.u32.u64.low %v15059_v11, %v7783_v43  ;;  %v15094_v37 = vmul.u32.u64.high %v15059_v11, %v7783_v43, %v15093_v46  ;;  %v7600_v45 = vsub.s32 32, %v7599_v8  ;;  %v7601_v47 = vshll.u32 %v15066_v22, %v7599_v8 }
 0x998   : > { %v7604_v40 = vsub.s32 4294967266, %v7599_v8  ;;  %vm6791_vm5 = vcmp.lt.s32.totalorder %v6790_v20, 2  ;;  %v7794_v39 = vadd.s32 1, %v15089_v53  ;;  %vm6792_vm14 = vcmp.eq.s32.totalorder %v6790_v20, 0  ;;  %v16094_v8 = vld [vmem:[#allocation8_spill] sm:$0xff] }
 0x999   : > { %vm6795_vm8 = vcmp.eq.s32.totalorder %v6790_v20, 2  ;;  %v6574_v19 = vsub.s32 4, %v16085_v7  ;;  %v7602_v60 = vshrl.u32 %v15053_v10, %v7600_v45  ;;  %v6794_v59 = vsel %vm6792_vm14, %v14663_v42, %v6793_v12 }
 0x99a   : > { %v7605_v29 = vadd.s32 127, %v7604_v40  ;;  %v6797_v11 = vsel %vm6795_vm8, %v6796_v49, %v14668_v50  ;;  %vm7793_vm11 = vc.u32 %v15094_v37, %v15088_v56  ;;  %v6383_v22 = vsel %vm6372_vm10, nan, %v15062_v6 }
 0x99b   : > { %v6798_v61 = vsel %vm6791_vm5, %v6794_v59, %v6797_v11  ;;  %vm16087_vm12 = vcmp.lt.s32.totalorder %v16086_v5, 0  ;;  %v7603_v41 = vor.u32 %v7602_v60, %v7601_v47  ;;  %v7795_v10 = vsel %vm7793_vm11, %v7794_v39, %v15089_v53  ;;  %v16095_v60 = vld [vmem:[#allocation37_spill] sm:$0xff]  ;;  %v16096_v59 = vld [vmem:[#allocation22_spill] sm:$0xff] }
 0x99c   : > { %v6575_v27 = vsel %vm16087_vm12, %v6574_v19, %v16085_v7  ;;  %v7606_v23 = vshll.u32 %v7605_v29, 23  ;;  %v6799_v42 = vsel %vm6788_vm4, nan, %v6798_v61  ;;  %9033 = vcosq.f32 %v15048_v21 }
 0x99d   : > { %vm7530_vm3 = vcmp.lt.s32.totalorder %v14787_v44, 0  ;;  %v7796_v50 = vadd.s32 %v7795_v10, %v7791_v18  ;;  %v8471_v12 = vpack.c.bf16 %v6799_v42, %v6383_v22  ;;  %v6577_v6 = vsel %vm14407_vm1, 0, %v6575_v27  ;;  %v16097_v22 = vld [vmem:[#allocation9_spill] sm:$0xff]  ;;  %v16098_v27 = vld [vmem:[#allocation27_spill] sm:$0xff] }
 0x99e   : > { %9035 = vsinq.f32 %v15048_v21  ;;  %v15121_v16 = vsel %vm14988_vm2, %v14756_v58, %v7717_v25  ;;  %v7607_v4 = vor.u32 4788187, %v7606_v23  ;;  %v6581_v30 = vadd.s32 3, %v6577_v6  ;;  %v16092_v21 = vld [vmem:[#allocation29_spill] sm:$0xff] }
 0x99f   : > { %v16089_v13 = vand.u32 2147483647, %v14787_v44  ;;  %v7797_v31 = vadd.s32 536870912, %v7796_v50  ;;  %8472 = vmatprep.subr.bf16.mxu0 %v8471_v12  ;;  %v6585_v54 = vxor.u32 2147483648, %v14549_v14  ;;  %v6588_v52 = vxor.u32 2147483648, %v14535_v38 }
 0x9a0   : > { %v6990_v1 = vsub.s32 4, %v16092_v21  ;;  %v7608_v36 = vand.u32 2147483647, %v7607_v4  ;;  %v7610_v53 = vcvt.s32.f32 %v7603_v41  ;;  %v15133_v25 = vadd.s32 %v15088_v56, %v15094_v37 }
 0x9a1   : > { %vm15125_vm10 = vcmp.le.f32.partialorder %v16089_v13, 0.7853982  ;;  %v6582_v43 = vand.u32 3, %v6581_v30  ;;  %v15135_v18 = vshrl.u32 %v7797_v31, 30  ;;  %vm6580_vm1 = vweird.f32 %v16086_v5  ;;  %v16100_v31 = vld [vmem:[#allocation26_spill] sm:$0xff] }
 0x9a2   : > { %vm16093_vm15 = vcmp.lt.s32.totalorder %v14228_v28, 0  ;;  %v6270_v46 = vand.u32 3, %v16094_v8  ;;  %v7611_v49 = vmul.f32 %v7610_v53, %v7608_v36  ;;  %vm6996_vm14 = vweird.f32 %v14228_v28  ;;  %v16102_v53 = vld [vmem:[#allocation28_spill] sm:$0xff]  ;;  %v16104_v28 = vld [vmem:[#allocation18_spill] sm:$0xff] }
 0x9a3   : > { %v6991_v20 = vsel %vm16093_vm15, %v6990_v1, %v16092_v21  ;;  %vm6583_vm4 = vcmp.lt.s32.totalorder %v6582_v43, 2  ;;  %vm6584_vm7 = vcmp.eq.s32.totalorder %v6582_v43, 0  ;;  %vm6587_vm5 = vcmp.eq.s32.totalorder %v6582_v43, 2  ;;  %v16103_v43 = vld [vmem:[#allocation34_spill] sm:$0xff] }
 0x9a4   : > { %v7799_v45 = vshll.u32 %v15135_v18, 30  ;;  %v6586_v56 = vsel %vm6584_vm7, %v14535_v38, %v6585_v54  ;;  %v6589_v37 = vsel %vm6587_vm5, %v6588_v52, %v14549_v14  ;;  %v6993_v47 = vsel %vm14623_vm13, 0, %v6991_v20  ;;  %v16101_v52 = vld [vmem:[#allocation43_spill] sm:$0xff] }
 0x9a5   : > { %v7612_v40 = vxor.u32 2147483648, %v7611_v49  ;;  %v6590_v39 = vsel %vm6583_vm4, %v6586_v56, %v6589_v37  ;;  %v6997_v7 = vadd.s32 3, %v6993_v47  ;;  %v7001_v29 = vxor.u32 2147483648, %v16095_v60 }
 0x9a6   : > { %v15148_v19 = vsub.s32 %v7796_v50, %v7799_v45  ;;  %v7004_v11 = vxor.u32 2147483648, %v16096_v59  ;;  %v6273_v61 = vxor.u32 2147483648, %v16097_v22  ;;  %vm6268_vm8 = vweird.f32 %v16098_v27  ;;  %v15157_v23 = vpop.eup %9033 }
 0x9a7   : > { %v7613_v38 = vsel %vm7530_vm3, %v7612_v40, %v7611_v49  ;;  %v6998_v14 = vand.u32 3, %v6997_v7  ;;  %vm6271_vm13 = vcmp.lt.s32.totalorder %v6270_v46, 2  ;;  %v6276_v41 = vxor.u32 2147483648, %v16099_v26  ;;  %v16105_v40 = vld [vmem:[#allocation17_spill] sm:$0xff] }
 0x9a8   : > { %v7802_v10 = vsub.s32 0, %v15148_v19  ;;  %v6591_v42 = vsel %vm6580_vm1, nan, %v6590_v39  ;;  %vm6272_vm11 = vcmp.eq.s32.totalorder %v6270_v46, 0  ;;  %vm6275_vm12 = vcmp.eq.s32.totalorder %v6270_v46, 2  ;;  %v15162_v50 = vpop.eup %9035 }
 0x9a9   : > { %v7616_v12 = vsel %vm15125_vm10, %v14787_v44, %v7613_v38  ;;  %vm7000_vm15 = vcmp.eq.s32.totalorder %v6998_v14, 0  ;;  %vm7003_vm4 = vcmp.eq.s32.totalorder %v6998_v14, 2  ;;  %v6274_v15 = vsel %vm6272_vm11, %v16099_v26, %v6273_v61  ;;  %v16108_v61 = vld [vmem:[#allocation10_spill] sm:$0xff] }
 0x9aa   : > { %v8412_v6 = vmin.u32 %v7802_v10, %v15148_v19  ;;  %vm6999_vm7 = vcmp.lt.s32.totalorder %v6998_v14, 2  ;;  %v7002_v4 = vsel %vm7000_vm15, %v16096_v59, %v7001_v29  ;;  %v7005_v5 = vsel %vm7003_vm4, %v7004_v11, %v16095_v60  ;;  %v16106_v60 = vld [vmem:[#allocation7_spill] sm:$0xff] }
 0x9ab   : > { %v7006_v30 = vsel %vm6999_vm7, %v7002_v4, %v7005_v5  ;;  %v6277_v13 = vsel %vm6275_vm12, %v6276_v41, %v16097_v22  ;;  %v6686_v54 = vand.u32 3, %v16100_v31  ;;  %v6689_v21 = vxor.u32 2147483648, %v16101_v52  ;;  %v16107_v22 = vld [vmem:[#allocation20_spill] sm:$0xff]  ;;  %v16111_v31 = vld [vmem:[#allocation42_spill] sm:$0xff] }
 0x9ac   : > { %v7804_v1 = vclz %v8412_v6  ;;  %v7007_v36 = vsel %vm6996_vm14, nan, %v7006_v30  ;;  %vm6684_vm1 = vweird.f32 %v16102_v53  ;;  %v6692_v20 = vxor.u32 2147483648, %v16103_v43  ;;  %v16109_v6 = vld [vmem:[#allocation19_spill] sm:$0xff] }
 0x9ad   : > { %9037 = vcosq.f32 %v7616_v12  ;;  %v8479_v8 = vpack.c.bf16 %v7007_v36, %v6591_v42  ;;  %v6278_v49 = vsel %vm6271_vm13, %v6274_v15, %v6277_v13  ;;  %vm6688_vm5 = vcmp.eq.s32.totalorder %v6686_v54, 0  ;;  %v16110_v30 = vld [vmem:[#allocation31_spill] sm:$0xff] }
 0x9ae   : > { %9039 = vsinq.f32 %v7616_v12  ;;  %v8413_v45 = vadd.s32 4294967294, %v7804_v1  ;;  %v6690_v56 = vsel %vm6688_vm5, %v16103_v43, %v6689_v21  ;;  %vm6691_vm11 = vcmp.eq.s32.totalorder %v6686_v54, 2 }
 0x9af   : > { %8480 = vmatprep.subr.bf16.mxu1 %v8479_v8  ;;  %vm6687_vm12 = vcmp.lt.s32.totalorder %v6686_v54, 2  ;;  %v6693_v37 = vsel %vm6691_vm11, %v6692_v20, %v16101_v52  ;;  %v6478_v47 = vand.u32 3, %v16104_v28  ;;  %v6481_v39 = vxor.u32 2147483648, %v16105_v40 }
 0x9b0   : > { %vm8414_vm14 = vcmp.lt.s32.totalorder %v8413_v45, 0  ;;  %v6279_v7 = vsel %vm6268_vm8, nan, %v6278_v49  ;;  %v6694_v46 = vsel %vm6687_vm12, %v6690_v56, %v6693_v37  ;;  %v6484_v29 = vxor.u32 2147483648, %v16106_v60 }
 0x9b1   : > { %v7807_v59 = vsel %vm8414_vm14, 0, %v8413_v45  ;;  %v6695_v11 = vsel %vm6684_vm1, nan, %v6694_v46  ;;  %vm6476_vm13 = vweird.f32 %v16107_v22  ;;  %v6894_v38 = vand.u32 3, %v16108_v61 }
 0x9b2   : > { %v7808_v14 = vsub.s32 32, %v7807_v59  ;;  %v7812_v26 = vsub.s32 4294967266, %v7807_v59  ;;  %v8473_v41 = vpack.c.bf16 %v6695_v11, %v6279_v7  ;;  %vm6480_vm15 = vcmp.eq.s32.totalorder %v6478_v47, 0 }
 0x9b3   : > { %v7809_v10 = vshll.u32 %v15148_v19, %v7807_v59  ;;  %vm6479_vm4 = vcmp.lt.s32.totalorder %v6478_v47, 2  ;;  %v6482_v27 = vsel %vm6480_vm15, %v16106_v60, %v6481_v39  ;;  %vm6483_vm8 = vcmp.eq.s32.totalorder %v6478_v47, 2 }
 0x9b4   : > { %v7810_v42 = vshrl.u32 %v15133_v25, %v7808_v14  ;;  %v7813_v12 = vadd.s32 127, %v7812_v26  ;;  %8474 = vmatpush1.bf16.msra.mxu0 %v8473_v41  ;;  %v6485_v15 = vsel %vm6483_vm8, %v6484_v29, %v16105_v40  ;;  %v6897_v4 = vxor.u32 2147483648, %v16109_v6  ;;  %v16112_v25 = vld [vmem:[#allocation21_spill] sm:$0xff] }
 0x9b5   : > { %v6486_v5 = vsel %vm6479_vm4, %v6482_v27, %v6485_v15  ;;  %vm6896_vm7 = vcmp.eq.s32.totalorder %v6894_v38, 0  ;;  %v6900_v13 = vxor.u32 2147483648, %v16110_v30  ;;  %v7198_v54 = vsub.s32 4, %v16111_v31 }
 0x9b6   : > { %v7811_v52 = vor.u32 %v7810_v42, %v7809_v10  ;;  %v7814_v19 = vshll.u32 %v7813_v12, 23  ;;  %v6898_v21 = vsel %vm6896_vm7, %v16110_v30, %v6897_v4  ;;  %vm6899_vm1 = vcmp.eq.s32.totalorder %v6894_v38, 2 }
 0x9b7   : > { %v9038_v1 = vpop.eup %9037  ;;  %vm7738_vm5 = vcmp.lt.s32.totalorder %v14956_v32, 0  ;;  %vm6892_vm11 = vweird.f32 %v16112_v25  ;;  %vm6895_vm12 = vcmp.lt.s32.totalorder %v6894_v38, 2  ;;  %v6901_v36 = vsel %vm6899_vm1, %v6900_v13, %v16109_v6 }
 0x9b8   : > { %vm16113_vm14 = vcmp.lt.s32.totalorder %v14510_v63, 0  ;;  %v9040_v43 = vpop.eup %9039  ;;  %v16114_v20 = vand.u32 2147483647, %v14956_v32  ;;  %v7815_v49 = vor.u32 4788187, %v7814_v19  ;;  %v6487_v45 = vsel %vm6476_vm13, nan, %v6486_v5 }
 0x9b9   : > { %v7199_v53 = vsel %vm16113_vm14, %v7198_v54, %v16111_v31  ;;  %v6902_v56 = vsel %vm6895_vm12, %v6898_v21, %v6901_v36  ;;  %v7209_v40 = vxor.u32 2147483648, %v14972_v2  ;;  %v7614_v39 = vsub.s32 4, %v15055_v17  ;;  %v16120_v19 = vld [vmem:[#allocation30_spill] sm:$0xff] }
 0x9ba   : > { %vm15206_vm15 = vcmp.le.f32.partialorder %v16114_v20, 0.7853982  ;;  %v7201_v37 = vsel %vm14852_vm0, 0, %v7199_v53  ;;  %v6903_v28 = vsel %vm6892_vm11, nan, %v6902_v56  ;;  %v7816_v7 = vand.u32 2147483647, %v7815_v49 }
 0x9bb   : > { %v7205_v47 = vadd.s32 3, %v7201_v37  ;;  %v7818_v46 = vcvt.s32.f32 %v7811_v52  ;;  %v8481_v60 = vpack.c.bf16 %v6903_v28, %v6487_v45  ;;  %v7212_v29 = vxor.u32 2147483648, %v14967_v33  ;;  %v16124_v28 = vld [vmem:[#allocation24_spill] sm:$0xff] }
 0x9bc   : > { %vm7204_vm4 = vweird.f32 %v14510_v63  ;;  %v7615_v11 = vsel %vm7530_vm3, %v7614_v39, %v15055_v17  ;;  %v7406_v22 = vsub.s32 4, %v16117_v51  ;;  %vm7620_vm0 = vweird.f32 %v14787_v44 }
 0x9bd   : > { %v7206_v59 = vand.u32 3, %v7205_v47  ;;  %v7819_v61 = vmul.f32 %v7818_v46, %v7816_v7  ;;  %8482 = vmatpush1.bf16.msra.mxu1 %v8481_v60  ;;  %v7617_v38 = vsel %vm15125_vm10, 0, %v7615_v11  ;;  %v7625_v14 = vxor.u32 2147483648, %v9040_v43  ;;  %v16125_v46 = vld [vmem:[#allocation39_spill] sm:$0xff] }
 0x9be   : > { %v7621_v26 = vadd.s32 3, %v7617_v38  ;;  %v7628_v41 = vxor.u32 2147483648, %v9038_v1  ;;  %vm16118_vm3 = vcmp.lt.s32.totalorder %v14610_v57, 0  ;;  %v7417_v6 = vxor.u32 2147483648, %v15043_v55  ;;  %v16126_v11 = vld [vmem:[#allocation23_spill] sm:$0xff] }
 0x9bf   : > { %vm7208_vm13 = vcmp.eq.s32.totalorder %v7206_v59, 0  ;;  %vm7211_vm8 = vcmp.eq.s32.totalorder %v7206_v59, 2  ;;  %v7820_v10 = vxor.u32 2147483648, %v7819_v61  ;;  %v7407_v17 = vsel %vm16118_vm3, %v7406_v22, %v16117_v51  ;;  %v16127_v22 = vld [vmem:[#allocation40_spill] sm:$0xff] }
 0x9c0   : > { %v7210_v27 = vsel %vm7208_vm13, %v14967_v33, %v7209_v40  ;;  %v7213_v42 = vsel %vm7211_vm8, %v7212_v29, %v14972_v2  ;;  %vm7207_vm7 = vcmp.lt.s32.totalorder %v7206_v59, 2  ;;  %v7622_v12 = vand.u32 3, %v7621_v26 }
 0x9c1   : > { %v7409_v15 = vsel %vm14895_vm9, 0, %v7407_v17  ;;  %v7821_v4 = vsel %vm7738_vm5, %v7820_v10, %v7819_v61  ;;  %v7214_v5 = vsel %vm7207_vm7, %v7210_v27, %v7213_v42  ;;  %v7822_v33 = vsub.s32 4, %v15135_v18 }
 0x9c2   : > { %v7413_v30 = vadd.s32 3, %v7409_v15  ;;  %v7824_v2 = vsel %vm15206_vm15, %v14956_v32, %v7821_v4  ;;  %vm7623_vm10 = vcmp.lt.s32.totalorder %v7622_v12, 2  ;;  %vm7624_vm1 = vcmp.eq.s32.totalorder %v7622_v12, 0 }
 0x9c3   : > { %vm7627_vm11 = vcmp.eq.s32.totalorder %v7622_v12, 2  ;;  %9041 = vcosq.f32 %v7824_v2  ;;  %v7626_v13 = vsel %vm7624_vm1, %v9038_v1, %v7625_v14  ;;  %v7420_v21 = vxor.u32 2147483648, %v16120_v19 }
 0x9c4   : > { %v7629_v31 = vsel %vm7627_vm11, %v7628_v41, %v9040_v43  ;;  %v7414_v54 = vand.u32 3, %v7413_v30  ;;  %9043 = vsinq.f32 %v7824_v2  ;;  %v7823_v25 = vsel %vm7738_vm5, %v7822_v33, %v15135_v18 }
 0x9c5   : > { %v7630_v52 = vsel %vm7623_vm10, %v7626_v13, %v7629_v31  ;;  %v7517_v36 = vadd.s32 3, %v7513_v48  ;;  %9045 = vsinq.f32 %v15121_v16  ;;  %v7215_v1 = vsel %vm7204_vm4, nan, %v7214_v5  ;;  %v16121_v48 = vld [vmem:[#allocation15_spill] sm:$0xff]  ;;  %v7840_v13 = vld [vmem:[%s15353_s5] sm:$0x1] }
 0x9c6   : > { %v7631_v53 = vsel %vm7620_vm0, nan, %v7630_v52  ;;  %9047 = vcosq.f32 %v15121_v16  ;;  %v7725_v18 = vadd.s32 3, %v7721_v35  ;;  %v7825_v3 = vsel %vm15206_vm15, 0, %v7823_v25  ;;  %v16122_v16 = vld [vmem:[#allocation14_spill] sm:$0xff]  ;;  %v7845_v25 = vpop.permute.xlu0 %7844 }
 0x9c7   : > { %v8475_v43 = vpack.c.bf16 %v7631_v53, %v7215_v1  ;;  %vm7416_vm9 = vcmp.eq.s32.totalorder %v7414_v54, 0  ;;  %vm7419_vm6 = vcmp.eq.s32.totalorder %v7414_v54, 2  ;;  %v7829_v0 = vadd.s32 3, %v7825_v3 }
 0x9c8   : > { %v7102_v63 = vand.u32 3, %v16121_v48  ;;  %v7418_v44 = vsel %vm7416_vm9, %v16120_v19, %v7417_v6  ;;  %v7421_v20 = vsel %vm7419_vm6, %v7420_v21, %v15043_v55  ;;  %v7105_v49 = vxor.u32 2147483648, %v16122_v16 }
 0x9c9   : > { %8476 = vmatprep.subr.bf16.mxu0 %v8475_v43  ;;  %v7108_v45 = vxor.u32 2147483648, %v16123_v62  ;;  %vm7415_vm2 = vcmp.lt.s32.totalorder %v7414_v54, 2  ;;  %v7830_v24 = vand.u32 3, %v7829_v0  ;;  %vm7412_vm14 = vweird.f32 %v14610_v57  ;;  %v16128_v57 = vld [vmem:[#allocation11_spill] sm:$0xff] }
 0x9ca   : > { %vm7104_vm5 = vcmp.eq.s32.totalorder %v7102_v63, 0  ;;  %vm7107_vm12 = vcmp.eq.s32.totalorder %v7102_v63, 2  ;;  %vm7828_vm15 = vweird.f32 %v14956_v32  ;;  %v7518_v56 = vand.u32 3, %v7517_v36  ;;  %v16131_v36 = vld [vmem:[#allocation6_spill] sm:$0xff] }
 0x9cb   : > { %v7106_v35 = vsel %vm7104_vm5, %v16123_v62, %v7105_v49  ;;  %v7109_v8 = vsel %vm7107_vm12, %v7108_v45, %v16122_v16  ;;  %v7521_v37 = vxor.u32 2147483648, %v15162_v50  ;;  %v7422_v55 = vsel %vm7415_vm2, %v7418_v44, %v7421_v20 }
 0x9cc   : > { %vm7100_vm4 = vweird.f32 %v16124_v28  ;;  %vm7103_vm0 = vcmp.lt.s32.totalorder %v7102_v63, 2  ;;  %vm7516_vm13 = vweird.f32 %v14632_v34  ;;  %vm7831_vm8 = vcmp.lt.s32.totalorder %v7830_v24, 2 }
 0x9cd   : > { %vm7832_vm3 = vcmp.eq.s32.totalorder %v7830_v24, 0  ;;  %vm7835_vm7 = vcmp.eq.s32.totalorder %v7830_v24, 2  ;;  %vm7520_vm10 = vcmp.eq.s32.totalorder %v7518_v56, 0  ;;  %v9042_v47 = vpop.eup %9041  ;;  %v7110_v40 = vsel %vm7103_vm0, %v7106_v35, %v7109_v8 }
 0x9ce   : > { %v7522_v39 = vsel %vm7520_vm10, %v15157_v23, %v7521_v37  ;;  %v7524_v7 = vxor.u32 2147483648, %v15157_v23  ;;  %v7310_v60 = vand.u32 3, %v16125_v46  ;;  %v9044_v29 = vpop.eup %9043  ;;  %v7836_v59 = vxor.u32 2147483648, %v9042_v47 }
 0x9cf   : > { %vm7523_vm1 = vcmp.eq.s32.totalorder %v7518_v56, 2  ;;  %v7313_v51 = vxor.u32 2147483648, %v16126_v11  ;;  %v7316_v61 = vxor.u32 2147483648, %v16127_v22  ;;  %v9046_v38 = vpop.eup %9045  ;;  %v7833_v14 = vxor.u32 2147483648, %v9044_v29 }
 0x9d0   : > { %vm7519_vm11 = vcmp.lt.s32.totalorder %v7518_v56, 2  ;;  %v7525_v26 = vsel %vm7523_vm1, %v7524_v7, %v15162_v50  ;;  %vm7312_vm9 = vcmp.eq.s32.totalorder %v7310_v60, 0  ;;  %v9048_v41 = vpop.eup %9047  ;;  %v7837_v10 = vsel %vm7835_vm7, %v7836_v59, %v9044_v29 }
 0x9d1   : > { %v7111_v23 = vsel %vm7100_vm4, nan, %v7110_v40  ;;  %v7526_v27 = vsel %vm7519_vm11, %v7522_v39, %v7525_v26  ;;  %v7314_v42 = vsel %vm7312_vm9, %v16127_v22, %v7313_v51  ;;  %v7834_v17 = vsel %vm7832_vm3, %v9042_v47, %v7833_v14 }
 0x9d2   : > { %v7527_v12 = vsel %vm7516_vm13, nan, %v7526_v27  ;;  %vm7315_vm6 = vcmp.eq.s32.totalorder %v7310_v60, 2  ;;  %v7726_v9 = vand.u32 3, %v7725_v18  ;;  %v7838_v15 = vsel %vm7831_vm8, %v7834_v17, %v7837_v10 }
 0x9d3   : > { %v8477_v50 = vpack.c.bf16 %v7527_v12, %v7111_v23  ;;  %v7317_v6 = vsel %vm7315_vm6, %v7316_v61, %v16126_v11  ;;  %v7729_v4 = vxor.u32 2147483648, %v9046_v38  ;;  %v7423_v5 = vsel %vm7412_vm14, nan, %v7422_v55 }
 0x9d4   : > { %v7839_v30 = vsel %vm7828_vm15, nan, %v7838_v15  ;;  %vm7728_vm2 = vcmp.eq.s32.totalorder %v7726_v9, 0  ;;  %vm7311_vm5 = vcmp.lt.s32.totalorder %v7310_v60, 2  ;;  %v7732_v2 = vxor.u32 2147483648, %v9048_v41 }
 0x9d5   : > { %v8483_v33 = vpack.c.bf16 %v7839_v30, %v7423_v5  ;;  %8478 = vmatpush1.bf16.msra.mxu0 %v8477_v50  ;;  %v7730_v34 = vsel %vm7728_vm2, %v9048_v41, %v7729_v4  ;;  %v7318_v31 = vsel %vm7311_vm5, %v7314_v42, %v7317_v6  ;;  %vm7731_vm12 = vcmp.eq.s32.totalorder %v7726_v9, 2 }
 0x9d6   : > { %vm7727_vm4 = vcmp.lt.s32.totalorder %v7726_v9, 2  ;;  %v7733_v54 = vsel %vm7731_vm12, %v7732_v2, %v9046_v38  ;;  %vm7308_vm14 = vweird.f32 %v16128_v57  ;;  %vm7724_vm0 = vweird.f32 %v14756_v58 }
 0x9d7   : > { %8484 = vmatprep.subr.bf16.mxu1 %v8483_v33  ;;  %v7734_v32 = vsel %vm7727_vm4, %v7730_v34, %v7733_v54  ;;  %vm16129_vm15 = vcmask 261120   ;;  %v7319_v52 = vsel %vm7308_vm14, nan, %v7318_v31  ;;  %v16132_v1 = vsub.s32 0, %v16131_v36 }
 0x9d8   : > { %8415 = vmatmul.mubr.msk.f32.vlgmr.msra.gmra.mrb[32].mxu0 %vm16129_vm15, %v7840_v13  ;;  %v7735_v19 = vsel %vm7724_vm0, nan, %v7734_v32  ;;  %vm16130_vm13 = vmmov %vm16129_vm15  ;;  %v9121_v18 = vmov 1966171168   ;;  %v16133_v37 = vlaneseq }
 0x9d9   : > { %v8485_v21 = vpack.c.bf16 %v7735_v19, %v7319_v52  ;;  %v7850_v53 = vrot.slane %v7845_v25, %v16132_v1  ;;  %v8003_v43 = vunpack.c.l.s4 %v9121_v18 }
 0x9da   : > { %vm8027_vm8 = vcmp.lt.s32.totalorder %v16133_v37, 512 }
 0x9db   : > { %8486 = vmatpush1.bf16.msra.mxu1 %v8485_v21  ;;  %v8004_v63 = vunpack.c.0.s8 %v8003_v43 }
 0x9dd   : > { %v8007_v16 = vsub.s32 %v8004_v63, %v16131_v36 }
 0x9de   : > { %8416 = vmatmul.mubr.msk.f32.vlgmr.msra.gmra.mrb[32].mxu1 %vm16130_vm13, %v7840_v13 }
 0xaab   : > { %v7920_v3 = vpop.f32.mrb[32].mxu0 }
 0xaac   : > { %v7921_v0 = vadd.f32 %v7920_v3, %v7850_v53  ;;  %v7922_v58 = vpop.f32.mrb[33].mxu0 }
 0xaad   : > { %v7923_v48 = vadd.f32 %v7922_v58, %v7850_v53 }
 0xaaf   : > { %v8000_v44 = vcombine.low %v7921_v0, %v7923_v48 }
 0xab1   : > { %v7991_v20 = vpop.f32.mrb[32].mxu1  ;;  %v8008_v24 = vrot.slane %v8000_v44, %v8007_v16 }
 0xab2   : > { %v7992_v49 = vadd.f32 %v7991_v20, %v7850_v53  ;;  %v7993_v62 = vpop.f32.mrb[33].mxu1 }
 0xab3   : > { %v7994_v45 = vadd.f32 %v7993_v62, %v7850_v53 }
 0xab5   : > { %v8001_v35 = vcombine.low %v7992_v49, %v7994_v45 }
 0xab7   : > { %v8015_v8 = vrot.slane %v8001_v35, %v8007_v16 }
 0xab9   : > { %v8016_v56 = vcombine.low %v8008_v24, %v8015_v8 }
 0xabb   : > { %v8023_v55 = vrot.slane %v8016_v56, %v8007_v16 }
 0xabd   : > { %8029 = vst.msk [vmem:[%s272_s9] sm:$0xf] %vm8027_vm8, %v8023_v55 }
 0xabe   : > { %9062 = shalt.err (!%p9059_p3)
}
 0xabf   : > { %s9063_s21 = scalar_lea.hbm %s15306_s16, 64  ;;  %s9067_s24 = scalar_lea.hbm %s15355_s7, 128 }
 0xac0   : > { %p9064_p4 = scmp.ne.s32.totalorder %s15306_s16, %s9063_s21  ;;  %p9068_p9 = scmp.lt.u32.totalorder %s15306_s16, %s15355_s7 }
 0xac1   : > { %p9069_p10 = scmp.lt.u32.totalorder %s9067_s24, %s9063_s21  ;;  %p9071_p12 = scmp.lt.u32.totalorder %s9063_s21, %s15306_s16 }
 0xac2   : > { %p9065_p7 = pnand %p9064_p4, %p9204_p5 }
 0xac3   : > { %p9070_p11 = por %p9069_p10, %p9068_p9 }
 0xac4   : > { %p9066_p8 = pneg %p9065_p7 }
 0xac5   : > { %p9072_p13 = por %p9071_p12, %p9070_p11 }
 0xac7   : > { %p9073_p0 = pnand %p9072_p13, %p9066_p8 }
 0xac9   : > { %9076 = shalt.err (!%p9073_p0)
}
 0xaca   : > { %8743 = dma.vmem_to_hbm [thread:$0]  (%p9204_p5), %s15308_s10, 64, %s15306_s16, %s8031_s17  }
 0xacb PF: > { %p8749_p1 = scmp.ge.s32.totalorder %s9111_s29, 2  ;;  %s8057_s9 = sand.u32 1, %s9099_s26  }
 0xacc   : > { %s8058_s14 = scalar_lea.sflag [#allocation4], %s8057_s9 }
 0xacd   : > { %p8746_p2 = pnand %p8749_p1, %p9208_p6 }
 0xacf   : > { %9094 = dma.done.wait (!%p8746_p2), %s8058_s14, 64  }
 0xad0   : > { %9096 = vsyncadd (!%p8746_p2), %s8058_s14, 4294967232  ;;  %p19_p3 = scmp.ge.s32.totalorder %s9191_s8, 4   ;;  %s16134_s26 = smov %s9103_s27 }
 0xad1   : > { %s16135_s27 = smov %s9107_s28  ;;  %s16136_s28 = smov %s9202_s11 }
 0xad2   : > { %s16137_s29 = smov %s9191_s8  ;;  %21 = sbr.rel (!%p19_p3) target bundleno = 6 (0x6), region = 87 }
 0xad9   :  { %8063 = vsyncpa [#allocation4], 1 }
 0xada   :  { %8065 = vsyncpa [#allocation4 + $0x1], 1 }

</bundles_post_ra>
